<compile_context>
chip_gen: v6e
topology: v6e:2x2x1
jax: 0.10.0
libtpu: 0.0.40
codegen_flags: <defaults>
</compile_context>

<pallas_src>
import math
import numpy as np
import jax
import jax.numpy as jnp
from jax import lax
from jax.experimental import pallas as pl
from jax.experimental.pallas import tpu as pltpu

EPS = 1e-5  # torch BatchNorm1d default


# ----------------------------- Pallas kernel ------------------------------ #
def evo_block_kernel(x_ref, m1_ref, b1_ref, p1_ref, bc1_ref, g1_ref, be1_ref,
                     md_ref, bd_ref, p2_ref, bc2_ref, g2_ref, be2_ref,
                     mm_ref, bm_ref, o_ref):
    f32 = jnp.float32
    bf16 = jnp.bfloat16
    hp = lax.Precision.HIGHEST
    x = x_ref[...]                                          # (B, ch*N) f32

    def batchnorm(h, p_ref, bc_ref, g_ref, be_ref):
        # Training-mode BatchNorm1d over (batch, length) for this group's
        # channels.  Two-pass (center, then variance of the centered values)
        # so there is no E[h^2]-E[h]^2 cancellation; the thin f32 pool
        # (entries 1/(B*len)) and 0/1 broadcast matrices are exact and the
        # tiny stat dots run at HIGHEST precision.
        p = p_ref[...]                                      # (K, Gc) f32
        bc = bc_ref[...]                                    # (Gc, K) 0/1 f32
        s = jnp.sum(h, axis=0, keepdims=True)               # (1, K)
        mu = jnp.dot(s, p, precision=hp, preferred_element_type=f32)   # (1, Gc)
        mu_f = jnp.dot(mu, bc, precision=hp, preferred_element_type=f32)
        d = h - mu_f
        q = jnp.sum(d * d, axis=0, keepdims=True)           # (1, K)
        var = jnp.dot(q, p, precision=hp, preferred_element_type=f32)  # (1, Gc)
        scale = g_ref[...] * lax.rsqrt(var + EPS)           # (1, Gc)
        scale_f = jnp.dot(scale, bc, precision=hp, preferred_element_type=f32)
        shift_f = jnp.dot(be_ref[...], bc, precision=hp, preferred_element_type=f32)
        return d * scale_f + shift_f

    # conv1_1 / conv1_2 (grouped, circular pad, stride 2) + bias + ReLU for
    # this group, channel-concatenated the way torch.cat(...).reshape(...) does.
    h1 = jnp.dot(x.astype(bf16), m1_ref[...], preferred_element_type=f32)
    h1 = jnp.maximum(h1 + b1_ref[...], 0.0)                 # (B, Gc*L)
    h1 = batchnorm(h1, p1_ref, bc1_ref, g1_ref, be1_ref)

    # ConvTranspose1d (k=10, stride 2, pad 4) + bias + ReLU
    h2 = jnp.dot(h1.astype(bf16), md_ref[...], preferred_element_type=f32)
    h2 = jnp.maximum(h2 + bd_ref[...], 0.0)                 # (B, Gc*N)
    h2 = batchnorm(h2, p2_ref, bc2_ref, g2_ref, be2_ref)

    # mix conv (k=3, zero pad 1) + bias + residual
    out = jnp.dot(h2.astype(bf16), mm_ref[...], preferred_element_type=f32)
    o_ref[...] = out + bm_ref[...] + x


# ------------------------ parameters (deterministic) ----------------------- #
def make_params(key, factor, ch, rep):
    c1o = math.floor(8 * factor)
    C = ch * rep
    Ccat = 2 * c1o * rep
    ks = jax.random.split(key, 12)

    def rn(k, shape, scale):
        return scale * jax.random.normal(k, shape, dtype=jnp.float32)

    return dict(
        w1_1=rn(ks[0], (c1o * rep, ch, 7), 0.1),
        b1_1=rn(ks[1], (c1o * rep,), 0.05),
        w1_2=rn(ks[2], (c1o * rep, ch, 7), 0.1),
        b1_2=rn(ks[3], (c1o * rep,), 0.05),
        g1=1.0 + rn(ks[4], (Ccat,), 0.1),
        be1=rn(ks[5], (Ccat,), 0.05),
        wd=rn(ks[6], (Ccat, Ccat // rep, 10), 0.1),
        bd=rn(ks[7], (Ccat,), 0.05),
        g4=1.0 + rn(ks[8], (Ccat,), 0.1),
        be4=rn(ks[9], (Ccat,), 0.05),
        wm=rn(ks[10], (C, Ccat // rep, 3), 0.1),
        bm=rn(ks[11], (C,), 0.05),
    )


# ----------- build per-group matmul operands from the conv weights --------- #
def build_operands(params, B, N, factor, ch, rep):
    c1o = math.floor(8 * factor)
    C = ch * rep
    Ccat = 2 * c1o * rep
    L = N // 2
    Gc = Ccat // rep          # concat channels per group
    chg = C // rep            # mix output channels per group (= ch)

    w1_1 = np.asarray(params["w1_1"]); w1_2 = np.asarray(params["w1_2"])
    b1_1 = np.asarray(params["b1_1"]); b1_2 = np.asarray(params["b1_2"])
    wd = np.asarray(params["wd"]); bd = np.asarray(params["bd"])
    wm = np.asarray(params["wm"]); bm = np.asarray(params["bm"])
    g1 = np.asarray(params["g1"]); be1 = np.asarray(params["be1"])
    g4 = np.asarray(params["g4"]); be4 = np.asarray(params["be4"])

    # conv1_1 (circular pad 3) and conv1_2 (circular pad 6, dilation 2),
    # stride 2, per-group block of the block-diagonal lowering.
    M1 = np.zeros((rep, ch * N, Gc * L), dtype=np.float32)
    b1cat = np.zeros((rep, 1, Gc * L), dtype=np.float32)
    for g in range(rep):
        for oc in range(c1o):
            oc_g = g * c1o + oc
            cc1 = oc
            cc2 = c1o + oc
            b1cat[g, 0, cc1 * L:(cc1 + 1) * L] = b1_1[oc_g]
            b1cat[g, 0, cc2 * L:(cc2 + 1) * L] = b1_2[oc_g]
            for ic in range(ch):
                for l in range(L):
                    for k in range(7):
                        n1 = (2 * l + k - 3) % N
                        M1[g, ic * N + n1, cc1 * L + l] += w1_1[oc_g, ic, k]
                        n2 = (2 * l + 2 * k - 6) % N
                        M1[g, ic * N + n2, cc2 * L + l] += w1_2[oc_g, ic, k]

    # ConvTranspose1d(k=10, stride=2, padding=4), per-group block.
    Md = np.zeros((rep, Gc * L, Gc * N), dtype=np.float32)
    bd_full = np.zeros((rep, 1, Gc * N), dtype=np.float32)
    for g in range(rep):
        for ocl in range(Gc):
            bd_full[g, 0, ocl * N:(ocl + 1) * N] = bd[g * Gc + ocl]
            for icl in range(Gc):
                ic = g * Gc + icl
                for l in range(L):
                    for k in range(10):
                        j = 2 * l + k - 4
                        if 0 <= j < N:
                            Md[g, icl * L + l, ocl * N + j] += wd[ic, ocl, k]

    # mix conv (k=3, zero pad 1), per-group block.
    Mm = np.zeros((rep, Gc * N, chg * N), dtype=np.float32)
    bm_full = np.zeros((rep, 1, chg * N), dtype=np.float32)
    for g in range(rep):
        for ocl in range(chg):
            oc = g * chg + ocl
            bm_full[g, 0, ocl * N:(ocl + 1) * N] = bm[oc]
            for icl in range(Gc):
                for n in range(N):
                    for k in range(3):
                        m = n + k - 1
                        if 0 <= m < N:
                            Mm[g, icl * N + m, ocl * N + n] += wm[oc, icl, k]

    # Thin per-group BN pool (stats) and 0/1 broadcast matrices.  Identical
    # for every group -> stored once, in f32 (exact; no in-kernel up-cast).
    P1 = np.zeros((Gc * L, Gc), dtype=np.float32)
    Bc1 = np.zeros((Gc, Gc * L), dtype=np.float32)
    for c in range(Gc):
        P1[c * L:(c + 1) * L, c] = 1.0 / (B * L)
        Bc1[c, c * L:(c + 1) * L] = 1.0
    P2 = np.zeros((Gc * N, Gc), dtype=np.float32)
    Bc2 = np.zeros((Gc, Gc * N), dtype=np.float32)
    for c in range(Gc):
        P2[c * N:(c + 1) * N, c] = 1.0 / (B * N)
        Bc2[c, c * N:(c + 1) * N] = 1.0

    def f(v):
        return jnp.asarray(v, dtype=jnp.float32)

    def w16(v):
        # bf16 storage for the streamed conv matrices (each entry is exactly
        # one bf16-rounded weight, so the cast is exact).
        return jnp.asarray(v, dtype=jnp.bfloat16)

    return dict(
        M1=w16(M1), b1=f(b1cat), P1=f(P1), Bc1=f(Bc1),
        g1=f(g1.reshape(rep, 1, Gc)), be1=f(be1.reshape(rep, 1, Gc)),
        Md=w16(Md), bd=f(bd_full), P2=f(P2), Bc2=f(Bc2),
        g2=f(g4.reshape(rep, 1, Gc)), be2=f(be4.reshape(rep, 1, Gc)),
        Mm=w16(Mm), bm=f(bm_full),
    )


# ------------------------------- wrapper ----------------------------------- #
def evo_block_forward(x, ops):
    B, C, N = x.shape
    rep = ops["M1"].shape[0]
    ch = C // rep
    L = N // 2
    GcL = ops["M1"].shape[2]
    Gc = GcL // L
    GcN = Gc * N
    chN = ch * N
    assert N % 2 == 0 and N >= 12, "need even N >= 12 (circular pad 6)"
    assert chN % 128 == 0, "per-group (channel*length) lane width must be 128-aligned"

    x_flat = x.reshape(B, C * N).astype(jnp.float32)

    def stk(tail):
        # rep-stacked per-group operand; leading dim squeezed inside the kernel.
        return pl.BlockSpec((None,) + tail, lambda g: (g, 0, 0))

    def shared(arr):
        # group-invariant operand (BN pool/broadcast); same block every step.
        return pl.BlockSpec(arr.shape, lambda g: (0, 0))

    in_specs = [
        pl.BlockSpec((B, chN), lambda g: (0, g)),          # x (this group's chans)
        stk((chN, GcL)),                                    # M1
        stk((1, GcL)),                                      # b1
        shared(ops["P1"]), shared(ops["Bc1"]),              # BN1 pool / broadcast
        stk((1, Gc)), stk((1, Gc)),                         # gamma1 / beta1
        stk((GcL, GcN)),                                    # Md
        stk((1, GcN)),                                      # bd
        shared(ops["P2"]), shared(ops["Bc2"]),              # BN2 pool / broadcast
        stk((1, Gc)), stk((1, Gc)),                         # gamma2 / beta2
        stk((GcN, chN)),                                    # Mm
        stk((1, chN)),                                      # bm
    ]
    out_spec = pl.BlockSpec((B, chN), lambda g: (0, g))

    out_flat = pl.pallas_call(
        evo_block_kernel,
        out_shape=jax.ShapeDtypeStruct((B, C * N), jnp.float32),
        grid=(rep,),
        in_specs=in_specs,
        out_specs=out_spec,
        compiler_params=pltpu.CompilerParams(
            # Group axis is independent work: megacore-shardable on v7x,
            # harmless on v5e/v6e; BlockSpec double-buffers the next group's
            # weight blocks behind the current group's compute.
            dimension_semantics=("parallel",),
            # 32 MiB is load-bearing on v5e (16 MiB default scoped VMEM) and
            # stays safely below v7x's 64 MiB physical VMEM.
            vmem_limit_bytes=32 * 1024 * 1024),
    )(x_flat, ops["M1"], ops["b1"], ops["P1"], ops["Bc1"], ops["g1"],
      ops["be1"], ops["Md"], ops["bd"], ops["P2"], ops["Bc2"], ops["g2"],
      ops["be2"], ops["Mm"], ops["bm"])
    return out_flat.reshape(B, C, N)


# --------------------- pure-JAX reference (for checking) ------------------- #
def torch_reference(x, params, factor, ch, rep):
    hp = jax.lax.Precision.HIGHEST
    B, C, N = x.shape
    c1o = math.floor(8 * factor)
    Ccat = 2 * c1o * rep
    Gc = Ccat // rep
    dn = ("NCH", "OIH", "NCH")

    xp = jnp.concatenate([x[..., -3:], x, x[..., :3]], axis=-1)
    o1 = lax.conv_general_dilated(xp, params["w1_1"], window_strides=(2,),
                                  padding=[(0, 0)], dimension_numbers=dn,
                                  feature_group_count=rep, precision=hp)
    o1 = jax.nn.relu(o1 + params["b1_1"][None, :, None])

    xp2 = jnp.concatenate([x[..., -6:], x, x[..., :6]], axis=-1)
    o2 = lax.conv_general_dilated(xp2, params["w1_2"], window_strides=(2,),
                                  padding=[(0, 0)], rhs_dilation=(2,),
                                  dimension_numbers=dn,
                                  feature_group_count=rep, precision=hp)
    o2 = jax.nn.relu(o2 + params["b1_2"][None, :, None])

    L = o1.shape[-1]
    h = jnp.concatenate([o1.reshape(B, rep, c1o, L),
                         o2.reshape(B, rep, c1o, L)], axis=2).reshape(B, Ccat, L)

    def bn(z, gamma, beta):
        mu = jnp.mean(z, axis=(0, 2), keepdims=True)
        var = jnp.mean((z - mu) ** 2, axis=(0, 2), keepdims=True)
        return (z - mu) * jax.lax.rsqrt(var + EPS) * gamma[None, :, None] \
            + beta[None, :, None]

    h = bn(h, params["g1"], params["be1"])

    # ConvTranspose1d(k=10, s=2, p=4, groups=rep) as lhs-dilated conv
    wd = params["wd"].reshape(rep, Gc, Gc, 10)       # [g, ic_local, oc_local, k]
    wd_eq = jnp.flip(jnp.transpose(wd, (0, 2, 1, 3)), axis=-1).reshape(Ccat, Gc, 10)
    h2 = lax.conv_general_dilated(h, wd_eq, window_strides=(1,),
                                  padding=[(5, 5)], lhs_dilation=(2,),
                                  dimension_numbers=dn,
                                  feature_group_count=rep, precision=hp)
    h2 = jax.nn.relu(h2 + params["bd"][None, :, None])
    h2 = bn(h2, params["g4"], params["be4"])

    out = lax.conv_general_dilated(h2, params["wm"], window_strides=(1,),
                                   padding=[(1, 1)], dimension_numbers=dn,
                                   feature_group_count=rep, precision=hp)
    return out + params["bm"][None, :, None] + x


# ---------------------------------- main ----------------------------------- #
if __name__ == "__main__":
    factor, ch, rep = 1, 4, 2           # conv1_out_ch = 8, concat channels = 32
    B, N = 2, 32
    C = ch * rep

    key = jax.random.PRNGKey(0)
    kx, kp = jax.random.split(key)
    x = jax.random.normal(kx, (B, C, N), dtype=jnp.float32)

    params = make_params(kp, factor, ch, rep)
    # Only the conv weights are stored in bf16 by the kernel (inside the
    # streamed matrices); round exactly those for the reference so both sides
    # use identical weights and the check isolates lowering / MXU error.
    # Biases and BN gamma/beta stay f32 on both sides.
    for name in ("w1_1", "w1_2", "wd", "wm"):
        params[name] = params[name].astype(jnp.bfloat16).astype(jnp.float32)

    ops = build_operands(params, B, N, factor, ch, rep)
    out = jax.block_until_ready(evo_block_forward(x, ops))

    ref = np.asarray(torch_reference(x, params, factor, ch, rep))
    got = np.asarray(out)
    err = float(np.max(np.abs(got - ref)))
    if not np.allclose(got, ref, rtol=2e-2, atol=2e-2):
        raise AssertionError(f"Pallas Evo_Block mismatch, max abs err = {err}")
    print("KERNEL_OK")
</pallas_src>

<mosaic_0001>
module attributes {stable_mosaic.version = 11 : i64} {
  func.func @evo_block_kernel(%arg0: i32, %arg1: memref<2x128xf32, #tpu.memory_space<vmem>>, %arg2: memref<1x128x256xbf16, #tpu.memory_space<vmem>>, %arg3: memref<1x1x256xf32, #tpu.memory_space<vmem>>, %arg4: memref<256x16xf32, #tpu.memory_space<vmem>>, %arg5: memref<16x256xf32, #tpu.memory_space<vmem>>, %arg6: memref<1x1x16xf32, #tpu.memory_space<vmem>>, %arg7: memref<1x1x16xf32, #tpu.memory_space<vmem>>, %arg8: memref<1x256x512xbf16, #tpu.memory_space<vmem>>, %arg9: memref<1x1x512xf32, #tpu.memory_space<vmem>>, %arg10: memref<512x16xf32, #tpu.memory_space<vmem>>, %arg11: memref<16x512xf32, #tpu.memory_space<vmem>>, %arg12: memref<1x1x16xf32, #tpu.memory_space<vmem>>, %arg13: memref<1x1x16xf32, #tpu.memory_space<vmem>>, %arg14: memref<1x512x128xbf16, #tpu.memory_space<vmem>>, %arg15: memref<1x1x128xf32, #tpu.memory_space<vmem>>, %arg16: memref<2x128xf32, #tpu.memory_space<vmem>>) attributes {dimension_semantics = [#tpu.dimension_semantics<parallel>], iteration_bounds = array<i64: 2>, scalar_prefetch = 0 : i64, scratch_operands = 0 : i64, tpu.core_type = #tpu.core_type<tc>, window_params = [{transform_indices = @transform_0, window_bounds = array<i64: 2, 128>}, {transform_indices = @transform_1, window_bounds = array<i64: 1, 128, 256>}, {transform_indices = @transform_2, window_bounds = array<i64: 1, 1, 256>}, {pipeline_mode = #tpu.pipeline_mode<synchronous>, transform_indices = @transform_3, window_bounds = array<i64: 256, 16>}, {pipeline_mode = #tpu.pipeline_mode<synchronous>, transform_indices = @transform_4, window_bounds = array<i64: 16, 256>}, {transform_indices = @transform_5, window_bounds = array<i64: 1, 1, 16>}, {transform_indices = @transform_6, window_bounds = array<i64: 1, 1, 16>}, {transform_indices = @transform_7, window_bounds = array<i64: 1, 256, 512>}, {transform_indices = @transform_8, window_bounds = array<i64: 1, 1, 512>}, {pipeline_mode = #tpu.pipeline_mode<synchronous>, transform_indices = @transform_9, window_bounds = array<i64: 512, 16>}, {pipeline_mode = #tpu.pipeline_mode<synchronous>, transform_indices = @transform_10, window_bounds = array<i64: 16, 512>}, {transform_indices = @transform_11, window_bounds = array<i64: 1, 1, 16>}, {transform_indices = @transform_12, window_bounds = array<i64: 1, 1, 16>}, {transform_indices = @transform_13, window_bounds = array<i64: 1, 512, 128>}, {transform_indices = @transform_14, window_bounds = array<i64: 1, 1, 128>}, {transform_indices = @transform_15, window_bounds = array<i64: 2, 128>}]} {
    %c0 = arith.constant 0 : index
    %c0_0 = arith.constant 0 : index
    %0 = vector.load %arg1[%c0, %c0_0] : memref<2x128xf32, #tpu.memory_space<vmem>>, vector<2x128xf32>
    %1 = arith.truncf %0 : vector<2x128xf32> to vector<2x128xbf16>
    %c0_1 = arith.constant 0 : index
    %c0_2 = arith.constant 0 : index
    %c0_3 = arith.constant 0 : index
    %2 = vector.load %arg2[%c0_1, %c0_2, %c0_3] : memref<1x128x256xbf16, #tpu.memory_space<vmem>>, vector<1x128x256xbf16>
    %3 = vector.shape_cast %2 : vector<1x128x256xbf16> to vector<128x256xbf16>
    %cst = arith.constant dense<0.000000e+00> : vector<2x256xf32>
    %4 = tpu.matmul %1, %3, %cst {dimension_numbers = #tpu.dot_dimension_numbers<[1], [0], [0], [1], [0, 0, 1, 1], [], []>} : vector<2x128xbf16>, vector<128x256xbf16>, vector<2x256xf32> -> vector<2x256xf32>
    %c0_4 = arith.constant 0 : index
    %c0_5 = arith.constant 0 : index
    %c0_6 = arith.constant 0 : index
    %5 = vector.load %arg3[%c0_4, %c0_5, %c0_6] : memref<1x1x256xf32, #tpu.memory_space<vmem>>, vector<1x1x256xf32>
    %6 = vector.shape_cast %5 : vector<1x1x256xf32> to vector<1x256xf32>
    %7 = vector.broadcast %6 : vector<1x256xf32> to vector<2x256xf32>
    %8 = arith.addf %4, %7 : vector<2x256xf32>
    %cst_7 = arith.constant 0.000000e+00 : f32
    %9 = vector.broadcast %cst_7 : f32 to vector<2x256xf32>
    %10 = arith.maximumf %8, %9 : vector<2x256xf32>
    %c0_8 = arith.constant 0 : index
    %c0_9 = arith.constant 0 : index
    %11 = vector.load %arg4[%c0_8, %c0_9] : memref<256x16xf32, #tpu.memory_space<vmem>>, vector<256x16xf32>
    %c0_10 = arith.constant 0 : index
    %c0_11 = arith.constant 0 : index
    %12 = vector.load %arg5[%c0_10, %c0_11] : memref<16x256xf32, #tpu.memory_space<vmem>>, vector<16x256xf32>
    %cst_12 = arith.constant dense<0.000000e+00> : vector<256xf32>
    %13 = vector.multi_reduction <add>, %10, %cst_12 [0] : vector<2x256xf32> to vector<256xf32>
    %14 = vector.shape_cast %13 : vector<256xf32> to vector<1x256xf32>
    %cst_13 = arith.constant dense<0.000000e+00> : vector<1x16xf32>
    %15 = tpu.matmul %14, %11, %cst_13 {dimension_numbers = #tpu.dot_dimension_numbers<[1], [0], [0], [1], [0, 0, 1, 1], [], []>, precision = #tpu.contract_precision<fp32>} : vector<1x256xf32>, vector<256x16xf32>, vector<1x16xf32> -> vector<1x16xf32>
    %cst_14 = arith.constant dense<0.000000e+00> : vector<1x256xf32>
    %16 = tpu.matmul %15, %12, %cst_14 {dimension_numbers = #tpu.dot_dimension_numbers<[1], [0], [0], [1], [0, 0, 1, 1], [], []>, precision = #tpu.contract_precision<fp32>} : vector<1x16xf32>, vector<16x256xf32>, vector<1x256xf32> -> vector<1x256xf32>
    %17 = vector.broadcast %16 : vector<1x256xf32> to vector<2x256xf32>
    %18 = arith.subf %10, %17 : vector<2x256xf32>
    %19 = arith.mulf %18, %18 : vector<2x256xf32>
    %cst_15 = arith.constant dense<0.000000e+00> : vector<256xf32>
    %20 = vector.multi_reduction <add>, %19, %cst_15 [0] : vector<2x256xf32> to vector<256xf32>
    %21 = vector.shape_cast %20 : vector<256xf32> to vector<1x256xf32>
    %cst_16 = arith.constant dense<0.000000e+00> : vector<1x16xf32>
    %22 = tpu.matmul %21, %11, %cst_16 {dimension_numbers = #tpu.dot_dimension_numbers<[1], [0], [0], [1], [0, 0, 1, 1], [], []>, precision = #tpu.contract_precision<fp32>} : vector<1x256xf32>, vector<256x16xf32>, vector<1x16xf32> -> vector<1x16xf32>
    %c0_17 = arith.constant 0 : index
    %c0_18 = arith.constant 0 : index
    %c0_19 = arith.constant 0 : index
    %23 = vector.load %arg6[%c0_17, %c0_18, %c0_19] : memref<1x1x16xf32, #tpu.memory_space<vmem>>, vector<1x1x16xf32>
    %24 = vector.shape_cast %23 : vector<1x1x16xf32> to vector<1x16xf32>
    %cst_20 = arith.constant 9.99999974E-6 : f32
    %25 = vector.broadcast %cst_20 : f32 to vector<1x16xf32>
    %26 = arith.addf %22, %25 : vector<1x16xf32>
    %27 = math.rsqrt %26 : vector<1x16xf32>
    %28 = arith.mulf %24, %27 : vector<1x16xf32>
    %cst_21 = arith.constant dense<0.000000e+00> : vector<1x256xf32>
    %29 = tpu.matmul %28, %12, %cst_21 {dimension_numbers = #tpu.dot_dimension_numbers<[1], [0], [0], [1], [0, 0, 1, 1], [], []>, precision = #tpu.contract_precision<fp32>} : vector<1x16xf32>, vector<16x256xf32>, vector<1x256xf32> -> vector<1x256xf32>
    %c0_22 = arith.constant 0 : index
    %c0_23 = arith.constant 0 : index
    %c0_24 = arith.constant 0 : index
    %30 = vector.load %arg7[%c0_22, %c0_23, %c0_24] : memref<1x1x16xf32, #tpu.memory_space<vmem>>, vector<1x1x16xf32>
    %31 = vector.shape_cast %30 : vector<1x1x16xf32> to vector<1x16xf32>
    %cst_25 = arith.constant dense<0.000000e+00> : vector<1x256xf32>
    %32 = tpu.matmul %31, %12, %cst_25 {dimension_numbers = #tpu.dot_dimension_numbers<[1], [0], [0], [1], [0, 0, 1, 1], [], []>, precision = #tpu.contract_precision<fp32>} : vector<1x16xf32>, vector<16x256xf32>, vector<1x256xf32> -> vector<1x256xf32>
    %33 = vector.broadcast %29 : vector<1x256xf32> to vector<2x256xf32>
    %34 = arith.mulf %18, %33 : vector<2x256xf32>
    %35 = vector.broadcast %32 : vector<1x256xf32> to vector<2x256xf32>
    %36 = arith.addf %34, %35 : vector<2x256xf32>
    %37 = arith.truncf %36 : vector<2x256xf32> to vector<2x256xbf16>
    %c0_26 = arith.constant 0 : index
    %c0_27 = arith.constant 0 : index
    %c0_28 = arith.constant 0 : index
    %38 = vector.load %arg8[%c0_26, %c0_27, %c0_28] : memref<1x256x512xbf16, #tpu.memory_space<vmem>>, vector<1x256x512xbf16>
    %39 = vector.shape_cast %38 : vector<1x256x512xbf16> to vector<256x512xbf16>
    %cst_29 = arith.constant dense<0.000000e+00> : vector<2x512xf32>
    %40 = tpu.matmul %37, %39, %cst_29 {dimension_numbers = #tpu.dot_dimension_numbers<[1], [0], [0], [1], [0, 0, 1, 1], [], []>} : vector<2x256xbf16>, vector<256x512xbf16>, vector<2x512xf32> -> vector<2x512xf32>
    %c0_30 = arith.constant 0 : index
    %c0_31 = arith.constant 0 : index
    %c0_32 = arith.constant 0 : index
    %41 = vector.load %arg9[%c0_30, %c0_31, %c0_32] : memref<1x1x512xf32, #tpu.memory_space<vmem>>, vector<1x1x512xf32>
    %42 = vector.shape_cast %41 : vector<1x1x512xf32> to vector<1x512xf32>
    %43 = vector.broadcast %42 : vector<1x512xf32> to vector<2x512xf32>
    %44 = arith.addf %40, %43 : vector<2x512xf32>
    %cst_33 = arith.constant 0.000000e+00 : f32
    %45 = vector.broadcast %cst_33 : f32 to vector<2x512xf32>
    %46 = arith.maximumf %44, %45 : vector<2x512xf32>
    %c0_34 = arith.constant 0 : index
    %c0_35 = arith.constant 0 : index
    %47 = vector.load %arg10[%c0_34, %c0_35] : memref<512x16xf32, #tpu.memory_space<vmem>>, vector<512x16xf32>
    %c0_36 = arith.constant 0 : index
    %c0_37 = arith.constant 0 : index
    %48 = vector.load %arg11[%c0_36, %c0_37] : memref<16x512xf32, #tpu.memory_space<vmem>>, vector<16x512xf32>
    %cst_38 = arith.constant dense<0.000000e+00> : vector<512xf32>
    %49 = vector.multi_reduction <add>, %46, %cst_38 [0] : vector<2x512xf32> to vector<512xf32>
    %50 = vector.shape_cast %49 : vector<512xf32> to vector<1x512xf32>
    %cst_39 = arith.constant dense<0.000000e+00> : vector<1x16xf32>
    %51 = tpu.matmul %50, %47, %cst_39 {dimension_numbers = #tpu.dot_dimension_numbers<[1], [0], [0], [1], [0, 0, 1, 1], [], []>, precision = #tpu.contract_precision<fp32>} : vector<1x512xf32>, vector<512x16xf32>, vector<1x16xf32> -> vector<1x16xf32>
    %cst_40 = arith.constant dense<0.000000e+00> : vector<1x512xf32>
    %52 = tpu.matmul %51, %48, %cst_40 {dimension_numbers = #tpu.dot_dimension_numbers<[1], [0], [0], [1], [0, 0, 1, 1], [], []>, precision = #tpu.contract_precision<fp32>} : vector<1x16xf32>, vector<16x512xf32>, vector<1x512xf32> -> vector<1x512xf32>
    %53 = vector.broadcast %52 : vector<1x512xf32> to vector<2x512xf32>
    %54 = arith.subf %46, %53 : vector<2x512xf32>
    %55 = arith.mulf %54, %54 : vector<2x512xf32>
    %cst_41 = arith.constant dense<0.000000e+00> : vector<512xf32>
    %56 = vector.multi_reduction <add>, %55, %cst_41 [0] : vector<2x512xf32> to vector<512xf32>
    %57 = vector.shape_cast %56 : vector<512xf32> to vector<1x512xf32>
    %cst_42 = arith.constant dense<0.000000e+00> : vector<1x16xf32>
    %58 = tpu.matmul %57, %47, %cst_42 {dimension_numbers = #tpu.dot_dimension_numbers<[1], [0], [0], [1], [0, 0, 1, 1], [], []>, precision = #tpu.contract_precision<fp32>} : vector<1x512xf32>, vector<512x16xf32>, vector<1x16xf32> -> vector<1x16xf32>
    %c0_43 = arith.constant 0 : index
    %c0_44 = arith.constant 0 : index
    %c0_45 = arith.constant 0 : index
    %59 = vector.load %arg12[%c0_43, %c0_44, %c0_45] : memref<1x1x16xf32, #tpu.memory_space<vmem>>, vector<1x1x16xf32>
    %60 = vector.shape_cast %59 : vector<1x1x16xf32> to vector<1x16xf32>
    %cst_46 = arith.constant 9.99999974E-6 : f32
    %61 = vector.broadcast %cst_46 : f32 to vector<1x16xf32>
    %62 = arith.addf %58, %61 : vector<1x16xf32>
    %63 = math.rsqrt %62 : vector<1x16xf32>
    %64 = arith.mulf %60, %63 : vector<1x16xf32>
    %cst_47 = arith.constant dense<0.000000e+00> : vector<1x512xf32>
    %65 = tpu.matmul %64, %48, %cst_47 {dimension_numbers = #tpu.dot_dimension_numbers<[1], [0], [0], [1], [0, 0, 1, 1], [], []>, precision = #tpu.contract_precision<fp32>} : vector<1x16xf32>, vector<16x512xf32>, vector<1x512xf32> -> vector<1x512xf32>
    %c0_48 = arith.constant 0 : index
    %c0_49 = arith.constant 0 : index
    %c0_50 = arith.constant 0 : index
    %66 = vector.load %arg13[%c0_48, %c0_49, %c0_50] : memref<1x1x16xf32, #tpu.memory_space<vmem>>, vector<1x1x16xf32>
    %67 = vector.shape_cast %66 : vector<1x1x16xf32> to vector<1x16xf32>
    %cst_51 = arith.constant dense<0.000000e+00> : vector<1x512xf32>
    %68 = tpu.matmul %67, %48, %cst_51 {dimension_numbers = #tpu.dot_dimension_numbers<[1], [0], [0], [1], [0, 0, 1, 1], [], []>, precision = #tpu.contract_precision<fp32>} : vector<1x16xf32>, vector<16x512xf32>, vector<1x512xf32> -> vector<1x512xf32>
    %69 = vector.broadcast %65 : vector<1x512xf32> to vector<2x512xf32>
    %70 = arith.mulf %54, %69 : vector<2x512xf32>
    %71 = vector.broadcast %68 : vector<1x512xf32> to vector<2x512xf32>
    %72 = arith.addf %70, %71 : vector<2x512xf32>
    %73 = arith.truncf %72 : vector<2x512xf32> to vector<2x512xbf16>
    %c0_52 = arith.constant 0 : index
    %c0_53 = arith.constant 0 : index
    %c0_54 = arith.constant 0 : index
    %74 = vector.load %arg14[%c0_52, %c0_53, %c0_54] : memref<1x512x128xbf16, #tpu.memory_space<vmem>>, vector<1x512x128xbf16>
    %75 = vector.shape_cast %74 : vector<1x512x128xbf16> to vector<512x128xbf16>
    %cst_55 = arith.constant dense<0.000000e+00> : vector<2x128xf32>
    %76 = tpu.matmul %73, %75, %cst_55 {dimension_numbers = #tpu.dot_dimension_numbers<[1], [0], [0], [1], [0, 0, 1, 1], [], []>} : vector<2x512xbf16>, vector<512x128xbf16>, vector<2x128xf32> -> vector<2x128xf32>
    %c0_56 = arith.constant 0 : index
    %c0_57 = arith.constant 0 : index
    %c0_58 = arith.constant 0 : index
    %77 = vector.load %arg15[%c0_56, %c0_57, %c0_58] : memref<1x1x128xf32, #tpu.memory_space<vmem>>, vector<1x1x128xf32>
    %78 = vector.shape_cast %77 : vector<1x1x128xf32> to vector<1x128xf32>
    %79 = vector.broadcast %78 : vector<1x128xf32> to vector<2x128xf32>
    %80 = arith.addf %76, %79 : vector<2x128xf32>
    %81 = arith.addf %80, %0 : vector<2x128xf32>
    %c0_59 = arith.constant 0 : index
    %c0_60 = arith.constant 0 : index
    %82 = vector.load %arg16[%c0_59, %c0_60] : memref<2x128xf32, #tpu.memory_space<vmem>>, vector<2x128xf32>
    tpu.vector_store %arg16[%c0_59, %c0_60], %81 {strides = array<i32>} : memref<2x128xf32, #tpu.memory_space<vmem>>, vector<2x128xf32>,
    return
  }
  func.func @transform_0(%arg0: i32) -> (i32, i32) {
    %c0_i32 = arith.constant 0 : i32
    %c0_i32_0 = arith.constant 0 : i32
    return %c0_i32, %arg0 : i32, i32
  }
  func.func @transform_1(%arg0: i32) -> (i32, i32, i32) {
    %c0_i32 = arith.constant 0 : i32
    %c0_i32_0 = arith.constant 0 : i32
    %c0_i32_1 = arith.constant 0 : i32
    return %arg0, %c0_i32, %c0_i32_0 : i32, i32, i32
  }
  func.func @transform_2(%arg0: i32) -> (i32, i32, i32) {
    %c0_i32 = arith.constant 0 : i32
    %c0_i32_0 = arith.constant 0 : i32
    %c0_i32_1 = arith.constant 0 : i32
    return %arg0, %c0_i32, %c0_i32_0 : i32, i32, i32
  }
  func.func @transform_3(%arg0: i32) -> (i32, i32) {
    %c0_i32 = arith.constant 0 : i32
    %c0_i32_0 = arith.constant 0 : i32
    %c0_i32_1 = arith.constant 0 : i32
    return %c0_i32, %c0_i32_0 : i32, i32
  }
  func.func @transform_4(%arg0: i32) -> (i32, i32) {
    %c0_i32 = arith.constant 0 : i32
    %c0_i32_0 = arith.constant 0 : i32
    %c0_i32_1 = arith.constant 0 : i32
    return %c0_i32, %c0_i32_0 : i32, i32
  }
  func.func @transform_5(%arg0: i32) -> (i32, i32, i32) {
    %c0_i32 = arith.constant 0 : i32
    %c0_i32_0 = arith.constant 0 : i32
    %c0_i32_1 = arith.constant 0 : i32
    return %arg0, %c0_i32, %c0_i32_0 : i32, i32, i32
  }
  func.func @transform_6(%arg0: i32) -> (i32, i32, i32) {
    %c0_i32 = arith.constant 0 : i32
    %c0_i32_0 = arith.constant 0 : i32
    %c0_i32_1 = arith.constant 0 : i32
    return %arg0, %c0_i32, %c0_i32_0 : i32, i32, i32
  }
  func.func @transform_7(%arg0: i32) -> (i32, i32, i32) {
    %c0_i32 = arith.constant 0 : i32
    %c0_i32_0 = arith.constant 0 : i32
    %c0_i32_1 = arith.constant 0 : i32
    return %arg0, %c0_i32, %c0_i32_0 : i32, i32, i32
  }
  func.func @transform_8(%arg0: i32) -> (i32, i32, i32) {
    %c0_i32 = arith.constant 0 : i32
    %c0_i32_0 = arith.constant 0 : i32
    %c0_i32_1 = arith.constant 0 : i32
    return %arg0, %c0_i32, %c0_i32_0 : i32, i32, i32
  }
  func.func @transform_9(%arg0: i32) -> (i32, i32) {
    %c0_i32 = arith.constant 0 : i32
    %c0_i32_0 = arith.constant 0 : i32
    %c0_i32_1 = arith.constant 0 : i32
    return %c0_i32, %c0_i32_0 : i32, i32
  }
  func.func @transform_10(%arg0: i32) -> (i32, i32) {
    %c0_i32 = arith.constant 0 : i32
    %c0_i32_0 = arith.constant 0 : i32
    %c0_i32_1 = arith.constant 0 : i32
    return %c0_i32, %c0_i32_0 : i32, i32
  }
  func.func @transform_11(%arg0: i32) -> (i32, i32, i32) {
    %c0_i32 = arith.constant 0 : i32
    %c0_i32_0 = arith.constant 0 : i32
    %c0_i32_1 = arith.constant 0 : i32
    return %arg0, %c0_i32, %c0_i32_0 : i32, i32, i32
  }
  func.func @transform_12(%arg0: i32) -> (i32, i32, i32) {
    %c0_i32 = arith.constant 0 : i32
    %c0_i32_0 = arith.constant 0 : i32
    %c0_i32_1 = arith.constant 0 : i32
    return %arg0, %c0_i32, %c0_i32_0 : i32, i32, i32
  }
  func.func @transform_13(%arg0: i32) -> (i32, i32, i32) {
    %c0_i32 = arith.constant 0 : i32
    %c0_i32_0 = arith.constant 0 : i32
    %c0_i32_1 = arith.constant 0 : i32
    return %arg0, %c0_i32, %c0_i32_0 : i32, i32, i32
  }
  func.func @transform_14(%arg0: i32) -> (i32, i32, i32) {
    %c0_i32 = arith.constant 0 : i32
    %c0_i32_0 = arith.constant 0 : i32
    %c0_i32_1 = arith.constant 0 : i32
    return %arg0, %c0_i32, %c0_i32_0 : i32, i32, i32
  }
  func.func @transform_15(%arg0: i32) -> (i32, i32) {
    %c0_i32 = arith.constant 0 : i32
    %c0_i32_0 = arith.constant 0 : i32
    return %c0_i32, %arg0 : i32, i32
  }
}

</mosaic_0001>

<bundles_post_ra>
// kernel: tpu_custom_call.1
= control target key start
LH: loop header
LB: loop body
LE: loop exit
PB: predicated region body
PF: predicated region fallthrough
CT: control target
= control target key end

     0   :  { %s17499_s0 = inlined_call_operand.vmem [shape: f32[2,256], index: 0, kind: input, shape index: {}]   ;;  %s17500_s1 = inlined_call_operand.vmem [shape: bf16[2,128,256], index: 1, kind: input, shape index: {}]   ;;  %s17501_s2 = inlined_call_operand.vmem [shape: f32[2,1,256], index: 2, kind: input, shape index: {}]   ;;  %s17502_s3 = inlined_call_operand.vmem [shape: f32[256,16], index: 3, kind: input, shape index: {}]   ;;  %s17503_s4 = inlined_call_operand.vmem [shape: f32[16,256], index: 4, kind: input, shape index: {}]   ;;  %s17504_s5 = inlined_call_operand.vmem [shape: f32[2,1,16], index: 5, kind: input, shape index: {}]   ;;  %s17505_s6 = inlined_call_operand.vmem [shape: f32[2,1,16], index: 6, kind: input, shape index: {}]   ;;  %s17506_s7 = inlined_call_operand.hbm [shape: bf16[2,256,512], index: 7, kind: input, shape index: {}]   ;;  %s17507_s8 = inlined_call_operand.vmem [shape: f32[2,1,512], index: 8, kind: input, shape index: {}]   ;;  %s17508_s9 = inlined_call_operand.vmem [shape: f32[512,16], index: 9, kind: input, shape index: {}]   ;;  %s17509_s10 = inlined_call_operand.vmem [shape: f32[16,512], index: 10, kind: input, shape index: {}]   ;;  %s17510_s11 = inlined_call_operand.vmem [shape: f32[2,1,16], index: 11, kind: input, shape index: {}]   ;;  %s17511_s12 = inlined_call_operand.hbm [shape: f32[2,1,16], index: 12, kind: input, shape index: {}]   ;;  %s17512_s13 = inlined_call_operand.vmem [shape: bf16[2,512,128], index: 13, kind: input, shape index: {}]   ;;  %s17513_s14 = inlined_call_operand.hbm [shape: f32[2,1,128], index: 14, kind: input, shape index: {}]   ;;  %s17514_s15 = inlined_call_operand.hbm [shape: f32[2,256], index: 15, kind: output, shape index: {}]  }
   0x1   :  { %18198 = sst [smem:[#allocation305_spill]] %s17506_s7 }
   0x2   :  { %18199 = sst [smem:[#allocation306_spill]] %s17507_s8 }
   0x3   :  { %18200 = sst [smem:[#allocation307_spill]] %s17508_s9 }
   0x4   :  { %18201 = sst [smem:[#allocation308_spill]] %s17509_s10 }
   0x5   :  { %18202 = sst [smem:[#allocation309_spill]] %s17510_s11 }
   0x6   :  { %18203 = sst [smem:[#allocation310_spill]] %s17511_s12 }
   0x7   :  { %18204 = sst [smem:[#allocation311_spill]] %s17514_s15 }
   0x8   :  { %20 = vsyncpa [#allocation3], 0 }
   0x9   :  { %22 = vsyncpa [#allocation3 + $0x1], 0 }
   0xa   :  { %23 = vsyncpa [#allocation6], 0 }
   0xb   :  { %25 = vsyncpa [#allocation6 + $0x1], 0 }
   0xc   :  { %26 = vsyncpa [#allocation4], 0 }
   0xd   :  { %28 = vsyncpa [#allocation4 + $0x1], 0  ;;  %s13724_s18 = smov 0   ;;  %s13726_s19 = smov 0  }
   0xe   :  { %s13728_s20 = smov 0   ;;  %s13730_s21 = smov 0  }
   0xf LB: > { %18205 = sst [smem:[#allocation12_spill]] %s13622_s18  ;;  %s13745_s22 = sadd.s32 4294967295, %s13634_s21   ;;  %s13634_s21 = sphi %s13730_s21, %s19205_s21   ;;  %s13630_s20 = sphi %s13728_s20, %s19207_s20   ;;  %s13626_s19 = sphi %s13726_s19, %s19209_s19   ;;  %s13622_s18 = sphi %s13724_s18, %s19208_s18  }
  0x10   : > { %18206 = sst [smem:[#allocation13_spill]] %s13630_s20  ;;  %s11823_s23 = sadd.s32 4294967294, %s13634_s21  }
  0x11   : > { %18207 = sst [smem:[#allocation14_spill]] %s13634_s21  ;;  %s13749_s24 = sadd.s32 1, %s13634_s21  }
  0x12   : > { %18208 = sst [smem:[#allocation15_spill]] %s13749_s24  ;;  %s213_s25 = sadd.s32 1, %s13630_s20 }
  0x13   : > { %s210_s26 = ssub.s32 %s13634_s21, %s13749_s24  ;;  %p220_p0 = scmp.ne.s32.totalorder %s13630_s20, %s13626_s19 }
  0x14   : > { %p211_p1 = scmp.eq.s32.totalorder %s210_s26, 0  ;;  %p221_p2 = scmp.eq.s32.totalorder %s13634_s21, 0 }
  0x15   : > { %p226_p3 = scmp.ne.s32.totalorder %s13626_s19, %s13622_s18  ;;  %p227_p4 = scmp.eq.s32.totalorder %s13745_s22, 0 }
  0x16   : > { %s13761_s27 = scalar_select %p211_p1, %s13630_s20, %s213_s25  }
  0x17   : > { %p222_p5 = por %p221_p2, %p220_p0  ;;  %p13763_p6 = por %p227_p4, %p226_p3 }
  0x18   : > { %18209 = sst [smem:[#allocation16_spill]] %s13761_s27  ;;  %p422_p7 = scmp.eq.s32.totalorder %s13745_s22, 1 }
  0x19   : > { %s18210_s28 = scalar_select %p13763_p6, 1, 0 }
  0x1a   : > { %p428_p8 = scmp.eq.s32.totalorder %s11823_s23, 1  ;;  %p13287_p10 = scmp.lt.s32.totalorder %s13634_s21, 2 }
  0x1b   : > { %p13770_p11 = por %p422_p7, %p220_p0  ;;  %s13779_s16 = sand.u32 1, %s13630_s20  }
  0x1c   : > { %p13774_p12 = por %p428_p8, %p226_p3  ;;  %p13781_p13 = pnand %p13287_p10, %p222_p5 }
  0x1d   : > { %s18211_s29 = scalar_select %p13770_p11, 1, 0 }
  0x1e   : > { %s18213_s30 = scalar_select %p13774_p12, 1, 0 }
  0x1f   : > { %18212 = sst [smem:[#allocation17_spill]] %s18211_s29  ;;  %s528_s25 = sand.u32 1, %s13634_s21  }
  0x20   : > { %18214 = sst [smem:[#allocation18_spill]] %s18213_s30  ;;  %s17524_s23 = sshll.u32 %s13634_s21, 4 }
  0x21   : > { %s531_s26 = scalar_lea.vmem [#allocation5], %s13779_s16  ;;  %s18216_s12 = sld [smem:[#allocation310_spill]] }
  0x22   : > { %s538_s27 = sshll.u32 %s531_s26, 4  ;;  %s13793_s29 = scalar_lea.sflag [#allocation6], %s528_s25  ;;  %s539_s27 = int_to_ptr.vmem [resolvable:$true] %s538_s27 }
  0x23   : > { %p13797_p1 = pneg %p13781_p13 }
  0x27   : > { %s536_s15 = scalar_lea.hbm %s18216_s12, %s17524_s23  ;;  %s13487_s10 = scalar_lea.hbm %s18216_s12, 32 }
  0x28   : > { %s13482_s20 = scalar_lea.hbm %s536_s15, 16  ;;  %p13488_p4 = scmp.lt.s32.totalorder %s536_s15, %s18216_s12 }
  0x29   : > { %p13483_p0 = scmp.ne.s32.totalorder %s536_s15, %s13482_s20  ;;  %p13489_p5 = scmp.lt.s32.totalorder %s13487_s10, %s13482_s20 }
  0x2b   : > { %p13485_p2 = pnand %p13797_p1, %p13483_p0  ;;  %p13490_p7 = por %p13489_p5, %p13488_p4 }
  0x2d   : > { %p13486_p3 = pneg %p13485_p2 }
  0x2f   : > { %p13491_p8 = pnand %p13490_p7, %p13486_p3 }
  0x31   : > { %13494 = shalt.err (!%p13491_p8)
}
  0x32   : > { %s13495_s25 = scalar_lea.vmem %s539_s27, 16  ;;  %s13636_s23 = smov [#allocation5]  }
  0x33   : > { %p13496_p10 = scmp.ne.s32.totalorder %s539_s27, %s13495_s25  ;;  %s13500_s8 = sshll.u32 %s13636_s23, 4  ;;  %s13501_s8 = int_to_ptr.vmem [resolvable:$false] %s13500_s8 }
  0x34   : > { %s13502_s9 = scalar_lea.vmem %s13501_s8, 32  ;;  %p13503_p0 = scmp.lt.s32.totalorder %s539_s27, %s13501_s8 }
  0x35   : > { %p13498_p9 = pnand %p13496_p10, %p13797_p1  ;;  %p13504_p2 = scmp.lt.s32.totalorder %s13502_s9, %s13495_s25 }
  0x37   : > { %p13499_p12 = pneg %p13498_p9  ;;  %p13505_p11 = por %p13504_p2, %p13503_p0 }
  0x39   : > { %p13506_p6 = pnand %p13505_p11, %p13499_p12 }
  0x3b   : > { %13509 = shalt.err (!%p13506_p6)
}
  0x3c   : > { %13279 = dma.hbm_to_vmem [thread:$0]  (!%p13781_p13), %s536_s15, 16, %s539_s27, %s13793_s29  }
  0x3d   : > { %s18218_s10 = sshll.u32 %s13634_s21, 4  ;;  %p11831_p9 = scmp.ge.s32.totalorder %s13634_s21, 1 }
  0x3e   : > { %s13819_s8 = scalar_lea.hbm %s17513_s14, %s18218_s10  ;;  %p568_p11 = scmp.lt.s32.totalorder %s13634_s21, 3 }
  0x3f   : > { %s11826_s9 = sshll.u32 %s13779_s16, 9  ;;  %s11958_s23 = sshll.u32 %s13634_s21, 13 }
  0x40   : > { %p13825_p6 = pnand %p11831_p9, %p568_p11  ;;  %s18220_s7 = sld [smem:[#allocation305_spill]] }
  0x41   : > { %s498_s15 = scalar_lea.vmem [#allocation2], %s11826_s9  ;;  %s495_s10 = scalar_lea.sflag [#allocation3], %s13779_s16 }
  0x42   : > { %s18219_s26 = scalar_select %p13825_p6, 1, 0 }
  0x43   : > { %s505_s27 = sshll.u32 %s498_s15, 4  ;;  %s13834_s27 = int_to_ptr.vmem [resolvable:$true] %s505_s27 }
  0x46   : > { %s13832_s25 = scalar_lea.hbm %s18220_s7, %s11958_s23  ;;  %s13515_s21 = scalar_lea.hbm %s18220_s7, 16384 }
  0x47   : > { %s13510_s11 = scalar_lea.hbm %s13832_s25, 8192  ;;  %p13516_p5 = scmp.lt.s32.totalorder %s13832_s25, %s18220_s7 }
  0x48   : > { %p13511_p12 = scmp.ne.s32.totalorder %s13832_s25, %s13510_s11  ;;  %p13517_p7 = scmp.lt.s32.totalorder %s13515_s21, %s13510_s11 }
  0x4a   : > { %p13513_p3 = pnand %p13511_p12, %p13797_p1  ;;  %p13518_p8 = por %p13517_p7, %p13516_p5 }
  0x4c   : > { %p13514_p4 = pneg %p13513_p3 }
  0x4e   : > { %p13519_p10 = pnand %p13518_p8, %p13514_p4 }
  0x50   : > { %13522 = shalt.err (!%p13519_p10)
}
  0x51   : > { %s13523_s9 = scalar_lea.vmem %s13834_s27, 8192  ;;  %s13637_s24 = smov [#allocation2]  }
  0x52   : > { %p13524_p0 = scmp.ne.s32.totalorder %s13834_s27, %s13523_s9  ;;  %s13528_s12 = sshll.u32 %s13637_s24, 4  ;;  %s13529_s12 = int_to_ptr.vmem [resolvable:$false] %s13528_s12 }
  0x53   : > { %s13530_s15 = scalar_lea.vmem %s13529_s12, 16384  ;;  %p13531_p11 = scmp.lt.s32.totalorder %s13834_s27, %s13529_s12 }
  0x54   : > { %p13526_p2 = pnand %p13524_p0, %p13797_p1  ;;  %p13532_p12 = scmp.lt.s32.totalorder %s13530_s15, %s13523_s9 }
  0x56   : > { %p13527_p9 = pneg %p13526_p2  ;;  %p13533_p3 = por %p13532_p12, %p13531_p11 }
  0x58   : > { %p13534_p6 = pnand %p13533_p3, %p13527_p9 }
  0x5a   : > { %13537 = shalt.err (!%p13534_p6)
}
  0x5b   : > { %s13638_s21 = smov 256   ;;  %s13639_s11 = smov 16  }
  0x5c   : > { %13276 = dma.hbm_to_vmem [thread:$0]  (!%p13781_p13), %s13832_s25, 8192, %s13834_s27, %s495_s10, %s13638_s21, %s13638_s21, %s13639_s11  }
  0x5d   : > { %s556_s20 = scalar_lea.vmem [#allocation7], %s13779_s16  ;;  %s13538_s23 = scalar_lea.hbm %s13819_s8, 16 }
  0x5e   : > { %s563_s18 = sshll.u32 %s556_s20, 4  ;;  %p13539_p4 = scmp.ne.s32.totalorder %s13819_s8, %s13538_s23  ;;  %s564_s18 = int_to_ptr.vmem [resolvable:$true] %s563_s18 }
  0x5f   : > { %s13543_s12 = scalar_lea.hbm %s17513_s14, 32  ;;  %p13544_p7 = scmp.lt.s32.totalorder %s13819_s8, %s17513_s14 }
  0x60   : > { %p13541_p6 = pnand %p13539_p4, %p13797_p1  ;;  %p13545_p8 = scmp.lt.s32.totalorder %s13543_s12, %s13538_s23 }
  0x62   : > { %p13542_p5 = pneg %p13541_p6  ;;  %p13546_p10 = por %p13545_p8, %p13544_p7 }
  0x64   : > { %p13547_p0 = pnand %p13546_p10, %p13542_p5 }
  0x66   : > { %13550 = shalt.err (!%p13547_p0)
}
  0x67   : > { %s13551_s16 = scalar_lea.vmem %s564_s18, 16  ;;  %s13640_s25 = smov [#allocation7]  }
  0x68   : > { %p13552_p2 = scmp.ne.s32.totalorder %s564_s18, %s13551_s16  ;;  %s13556_s27 = sshll.u32 %s13640_s25, 4  ;;  %s13557_s27 = int_to_ptr.vmem [resolvable:$false] %s13556_s27 }
  0x69   : > { %s13558_s10 = scalar_lea.vmem %s13557_s27, 32  ;;  %p13559_p12 = scmp.lt.s32.totalorder %s564_s18, %s13557_s27 }
  0x6a   : > { %p13554_p9 = pnand %p13552_p2, %p13797_p1  ;;  %p13560_p3 = scmp.lt.s32.totalorder %s13558_s10, %s13551_s16 }
  0x6c   : > { %p13555_p11 = pneg %p13554_p9  ;;  %p13561_p4 = por %p13560_p3, %p13559_p12 }
  0x6e   : > { %p13562_p6 = pnand %p13561_p4, %p13555_p11 }
  0x70   : > { %13565 = shalt.err (!%p13562_p6)
}
  0x71   : > { %13282 = dma.hbm_to_vmem [thread:$0]  (!%p13781_p13), %s13819_s8, 16, %s564_s18, %s13793_s29  }
  0x72   : > { %p18221_p5 = scmp.ne.s32.totalorder %s18219_s26, 0 }
  0x74   : > { %572 = sbr.rel (%p18221_p5) target bundleno = 3162 (0xc5a), region = 80 }
  0x79   : > { %s13880_s7 = sand.u32 1, %s13626_s19   ;;  %p18222_p1 = scmp.ne.s32.totalorder %s18210_s28, 0 }
  0x7a   : > { %s11832_s30 = sshll.u32 %s13880_s7, 9  ;;  %s575_s21 = scalar_lea.sflag [#allocation3], %s13880_s7 }
  0x7b   : > { %s13884_s11 = scalar_lea.vmem [#allocation2], %s11832_s30 }
  0x7c   : > { %13609 = dma.done.wait (%p18222_p1), %s575_s21, 8192  }
  0x7d   : > { %13611 = vsyncadd (%p18222_p1), %s575_s21, 4294959104  ;;  %s583_s29 = sand.u32 1, %s13745_s22   ;;  %s586_s8 = scalar_lea.vmem [#allocation5], %s13880_s7 }
  0x7e   : > { %s584_s17 = scalar_lea.sflag [#allocation6], %s583_s29 }
  0x7f   : > { %13613 = dma.done.wait (%p18222_p1), %s584_s17, 32  }
  0x80   : > { %13615 = vsyncadd (%p18222_p1), %s584_s17, 4294967264  ;;  %p680_p13 = scmp.lt.s32.totalorder %s13745_s22, 1  ;;  %v13641_v0 = vmov 0   ;;  %v896_v9 = vld [vmem:[%s17502_s3 + $0xf8] sm:$0xff]  ;;  %v895_v11 = vld [vmem:[%s17502_s3 + $0xf0] sm:$0xff]  ;;  %vm901_vm0 = vcmask 1041408  }
  0x81   : > { %854 = vmatprep.mubr.bf16.mxu0 %v13641_v0  ;;  %v880_v10 = vld [vmem:[%s17502_s3 + $0x78] sm:$0xff]  ;;  %v13924_v13 = vand.u32 4294901760, %v896_v9  ;;  %v879_v14 = vld [vmem:[%s17502_s3 + $0x70] sm:$0xff]  ;;  %v894_v17 = vld [vmem:[%s17502_s3 + $0xe8] sm:$0xff]  ;;  %v13939_v20 = vand.u32 4294901760, %v895_v11  ;;  %vm1778_vm1 = vcmask 130048  }
  0x82   : > { %s13898_s26 = scalar_select %p680_p13, %s13745_s22, 1  ;;  %v13930_v16 = vand.u32 4294901760, %v880_v10  ;;  %v878_v18 = vld [vmem:[%s17502_s3 + $0x68] sm:$0xff]  ;;  %v893_v21 = vld [vmem:[%s17502_s3 + $0xe0] sm:$0xff]  ;;  %v13948_v23 = vand.u32 4294901760, %v879_v14  ;;  %v13954_v25 = vand.u32 4294901760, %v894_v17 }
  0x83   : > { %18223 = vst [vmem:[#allocation19_spill] sm:$0xff] %v13924_v13  ;;  %v877_v22 = vld [vmem:[%s17502_s3 + $0x60] sm:$0xff]  ;;  %11961 = vmatprep.subr.mxu1 %v13924_v13  ;;  %v13952_v24 = vsub.f32 %v896_v9, %v13924_v13  ;;  %v13958_v27 = vand.u32 4294901760, %v878_v18  ;;  %v892_v28 = vld [vmem:[%s17502_s3 + $0xd8] sm:$0xff]  ;;  %v13968_v31 = vand.u32 4294901760, %v893_v21  ;;  %v13982_v35 = vsub.f32 %v895_v11, %v13939_v20  ;;  %s18503_s10 = sld [smem:[#allocation307_spill]] }
  0x84   : > { %s11959_s20 = sshll.u32 %s13898_s26, 7  ;;  %11962 = vmatpush3.msra.mxu1 %v13930_v16  ;;  %v876_v29 = vld [vmem:[%s17502_s3 + $0x58] sm:$0xff]  ;;  %s11834_s25 = sshll.u32 %s13898_s26, 1  ;;  %v13973_v32 = vsub.f32 %v880_v10, %v13930_v16  ;;  %v13975_v33 = vand.u32 4294901760, %v877_v22  ;;  %v13987_v37 = vsub.f32 %v879_v14, %v13948_v23  ;;  %v13990_v38 = vsub.f32 %v894_v17, %v13954_v25  ;;  %v891_v17 = vld [vmem:[%s17502_s3 + $0xd0] sm:$0xff] }
  0x85   : > { %s13904_s9 = scalar_lea.vmem %s17500_s1, %s11959_s20  ;;  %18224 = vst [vmem:[#allocation20_spill] sm:$0xff] %v13952_v24  ;;  %11963 = vmatprep.subr.mxu1 %v13939_v20  ;;  %v13979_v34 = vand.u32 4294901760, %v13952_v24  ;;  %18227 = vst [vmem:[#allocation23_spill] sm:$0xff] %v13982_v35  ;;  %s13999_s30 = scalar_lea.vmem %s17499_s0, %s11834_s25  ;;  %v14002_v40 = vsub.f32 %v878_v18, %v13958_v27  ;;  %v14005_v41 = vsub.f32 %v893_v21, %v13968_v31  ;;  %v14007_v42 = vand.u32 4294901760, %v892_v28 }
  0x86   : > { %v13325_v1 = vld [vmem:[%s13904_s9 + $0x74] ss:$8 sps:$4 sm:$0xff]   ;;  %v13327_v2 = vld [vmem:[%s13904_s9 + $0x70] ss:$8 sps:$4 sm:$0xff]   ;;  %v13328_v3 = vld [vmem:[%s13904_s9 + $0x64] ss:$8 sps:$4 sm:$0xff]   ;;  %11964 = vmatpush3.msra.mxu1 %v13948_v23  ;;  %v14015_v45 = vsub.f32 %v877_v22, %v13975_v33  ;;  %s692_s16 = scalar_lea.vmem %s17501_s2, %s11834_s25  ;;  %s698_s24 = scalar_lea.vmem %s17505_s6, %s13898_s26 }
  0x87   : > { %822 = vmatprep.subr.bf16.mxu0 %v13325_v1  ;;  %v13330_v4 = vld [vmem:[%s13904_s9 + $0x60] ss:$8 sps:$4 sm:$0xff]   ;;  %v13331_v5 = vld [vmem:[%s13904_s9 + $0x54] ss:$8 sps:$4 sm:$0xff]   ;;  %v13333_v6 = vld [vmem:[%s13904_s9 + $0x50] ss:$8 sps:$4 sm:$0xff]   ;;  %11965 = vmatprep.subr.mxu1 %v13954_v25  ;;  %v1144_v46 = vsub.f32 %v13952_v24, %v13979_v34  ;;  %v14023_v48 = vsub.f32 %v892_v28, %v14007_v42 }
  0x88   : > { %823 = vmatpush1.bf16.msra.mxu0 %v13327_v2  ;;  %v13334_v7 = vld [vmem:[%s13904_s9 + $0x44] ss:$8 sps:$4 sm:$0xff]   ;;  %v13336_v8 = vld [vmem:[%s13904_s9 + $0x40] ss:$8 sps:$4 sm:$0xff]   ;;  %v13337_v12 = vld [vmem:[%s13904_s9 + $0x34] ss:$8 sps:$4 sm:$0xff]   ;;  %11966 = vmatpush3.msra.mxu1 %v13958_v27 }
  0x89   : > { %824 = vmatprep.subr.bf16.mxu0 %v13328_v3  ;;  %v13339_v15 = vld [vmem:[%s13904_s9 + $0x30] ss:$8 sps:$4 sm:$0xff]   ;;  %v13340_v19 = vld [vmem:[%s13904_s9 + $0x24] ss:$8 sps:$4 sm:$0xff]   ;;  %v13342_v26 = vld [vmem:[%s13904_s9 + $0x20] ss:$8 sps:$4 sm:$0xff]   ;;  %11967 = vmatprep.subr.mxu1 %v13968_v31 }
  0x8a   : > { %v13343_v30 = vld [vmem:[%s13904_s9 + $0x14] ss:$8 sps:$4 sm:$0xff]   ;;  %18225 = vst [vmem:[#allocation21_spill] sm:$0xff] %v13973_v32  ;;  %18226 = vst [vmem:[#allocation22_spill] sm:$0xff] %v13979_v34  ;;  %v13345_v36 = vld [vmem:[%s13904_s9 + $0x10] ss:$8 sps:$4 sm:$0xff]   ;;  %11968 = vmatpush3.msra.mxu1 %v13975_v33 }
  0x8b   : > { %18228 = vst [vmem:[#allocation24_spill] sm:$0xff] %v13987_v37  ;;  %18229 = vst [vmem:[#allocation25_spill] sm:$0xff] %v13990_v38  ;;  %v13346_v39 = vld [vmem:[%s13904_s9 + $0x4] ss:$8 sps:$4 sm:$0xff]   ;;  %v14009_v43 = vand.u32 4294901760, %v876_v29  ;;  %v14012_v44 = vand.u32 4294901760, %v13973_v32  ;;  %11969 = vmatprep.subr.mxu1 %v14007_v42 }
  0x8c   : > { %825 = vmatpush1.bf16.msra.mxu0 %v13330_v4  ;;  %18230 = vst [vmem:[#allocation26_spill] sm:$0xff] %v14002_v40  ;;  %18231 = vst [vmem:[#allocation27_spill] sm:$0xff] %v14005_v41  ;;  %v14020_v47 = vand.u32 4294901760, %v13982_v35  ;;  %v13348_v50 = vld [vmem:[%s13904_s9] ss:$8 sps:$4 sm:$0xff]   ;;  %v14032_v52 = vand.u32 4294901760, %v13987_v37 }
  0x8d   : > { %826 = vmatprep.subr.bf16.mxu0 %v13331_v5  ;;  %18232 = vst [vmem:[#allocation28_spill] sm:$0xff] %v14012_v44  ;;  %18233 = vst [vmem:[#allocation29_spill] sm:$0xff] %v14015_v45  ;;  %v14026_v49 = vsub.f32 %v876_v29, %v14009_v43  ;;  %v712_v51 = vld [vmem:[%s13999_s30] sm:$0x3]  ;;  %11970 = vmatpush3.msra.mxu1 %v14009_v43  ;;  %v14036_v53 = vand.u32 4294901760, %v13990_v38  ;;  %v14039_v54 = vand.u32 4294901760, %v14002_v40 }
  0x8e   : > { %18234 = vst [vmem:[#allocation30_spill] sm:$0xff] %v14020_v47  ;;  %18235 = vst [vmem:[#allocation31_spill] sm:$0xff] %v14023_v48  ;;  %v14042_v55 = vand.u32 4294901760, %v14005_v41  ;;  %v1032_v56 = vsub.f32 %v13973_v32, %v14012_v44  ;;  %v14047_v57 = vand.u32 4294901760, %v14015_v45  ;;  %v14050_v58 = vand.u32 4294901760, %v14023_v48  ;;  %s11960_s9 = sshll.u32 %s13898_s26, 8 }
  0x8f   : > { %18236 = vst [vmem:[#allocation32_spill] sm:$0xff] %v14026_v49  ;;  %18237 = vst [vmem:[#allocation33_spill] sm:$0xff] %v14032_v52  ;;  %v14053_v59 = vand.u32 4294901760, %v14026_v49  ;;  %v14055_v60 = vand.u32 4294901760, %v1144_v46  ;;  %v1151_v61 = vsub.f32 %v13982_v35, %v14020_v47  ;;  %v1039_v62 = vsub.f32 %v13987_v37, %v14032_v52  ;;  %s14090_s17 = scalar_lea.vmem %s17512_s13, %s11960_s9  ;;  %v890_v22 = vld [vmem:[%s17502_s3 + $0xc8] sm:$0xff]  ;;  %s11838_s23 = sshll.u32 %s13898_s26, 2 }
  0x90   : > { %827 = vmatpush1.bf16.msra.mxu0 %v13333_v6  ;;  %18238 = vst [vmem:[#allocation34_spill] sm:$0xff] %v14036_v53  ;;  %18239 = vst [vmem:[#allocation35_spill] sm:$0xff] %v14039_v54  ;;  %v713_v63 = vpack.c.bf16 %v712_v51, %v712_v51  ;;  %v1158_v0 = vsub.f32 %v13990_v38, %v14036_v53  ;;  %v1046_v1 = vsub.f32 %v14002_v40, %v14039_v54  ;;  %v874_v29 = vld [vmem:[%s17502_s3 + $0x48] sm:$0xff]  ;;  %s18632_s12 = sld [smem:[#allocation306_spill]]  ;;  %s11955_s27 = sshll.u32 %s13745_s22, 5 }
  0x91   : > { %828 = vmatprep.subr.bf16.mxu0 %v13334_v7  ;;  %18240 = vst [vmem:[#allocation36_spill] sm:$0xff] %v14042_v55  ;;  %18241 = vst [vmem:[#allocation37_spill] sm:$0xff] %v14047_v57  ;;  %v1165_v2 = vsub.f32 %v14005_v41, %v14042_v55  ;;  %v14067_v3 = vand.u32 4294901760, %v1032_v56  ;;  %v1053_v4 = vsub.f32 %v14015_v45, %v14047_v57  ;;  %v14077_v7 = vand.u32 4294901760, %v1151_v61  ;;  %v873_v56 = vld [vmem:[%s17502_s3 + $0x40] sm:$0xff]  ;;  %s18871_s28 = sld [smem:[#allocation308_spill]] }
  0x92   : > { %18242 = vst [vmem:[#allocation38_spill] sm:$0xff] %v14050_v58  ;;  %18243 = vst [vmem:[#allocation39_spill] sm:$0xff] %v14053_v59  ;;  %v1172_v5 = vsub.f32 %v14023_v48, %v14050_v58  ;;  %v1060_v6 = vsub.f32 %v14026_v49, %v14053_v59  ;;  %v14081_v9 = vand.u32 4294901760, %v1158_v0  ;;  %v14083_v10 = vand.u32 4294901760, %v1046_v1  ;;  %v888_v0 = vld [vmem:[%s17502_s3 + $0xb8] sm:$0xff]  ;;  %s19197_s20 = sld [smem:[#allocation311_spill]] }
  0x93   : > { %18244 = vst [vmem:[#allocation40_spill] sm:$0xff] %v14055_v60  ;;  %18245 = vst [vmem:[#allocation41_spill] sm:$0xff] %v14067_v3  ;;  %v14085_v11 = vand.u32 4294901760, %v1165_v2  ;;  %v14110_v18 = vand.u32 4294901760, %v891_v17  ;;  %v14123_v28 = vand.u32 4294901760, %v890_v22 }
  0x94   : > { %829 = vmatpush1.bf16.msra.mxu0 %v13336_v8  ;;  %18246 = vst [vmem:[#allocation42_spill] sm:$0xff] %v14077_v7  ;;  %v14079_v8 = vand.u32 4294901760, %v1039_v62  ;;  %18248 = vst [vmem:[#allocation44_spill] sm:$0xff] %v14081_v9  ;;  %v14095_v14 = vand.u32 4294901760, %v1172_v5  ;;  %v14170_v5 = vand.u32 4294901760, %v888_v0 }
  0x95   : > { %830 = vmatprep.subr.bf16.mxu0 %v13337_v12  ;;  %18249 = vst [vmem:[#allocation45_spill] sm:$0xff] %v14083_v10  ;;  %18250 = vst [vmem:[#allocation46_spill] sm:$0xff] %v14085_v11  ;;  %v14093_v12 = vand.u32 4294901760, %v1053_v4  ;;  %11971 = vmatprep.subr.mxu1 %v14110_v18 }
  0x96   : > { %18247 = vst [vmem:[#allocation43_spill] sm:$0xff] %v14079_v8  ;;  %18252 = vst [vmem:[#allocation48_spill] sm:$0xff] %v14095_v14  ;;  %s702_s15 = scalar_lea.vmem %s18632_s12, %s11838_s23 }
  0x97   : > { %18251 = vst [vmem:[#allocation47_spill] sm:$0xff] %v14093_v12 }
  0x98   : > { %831 = vmatpush1.bf16.msra.mxu0 %v13339_v15  ;;  %v14097_v15 = vand.u32 4294901760, %v1060_v6  ;;  %v872_v6 = vld [vmem:[%s17502_s3 + $0x38] sm:$0xff]  ;;  %s19198_s23 = smov %s19197_s20  ;;  %s11627_s18 = scalar_lea.hbm %s19197_s20, %s11955_s27 }
  0x99   : > { %832 = vmatprep.subr.bf16.mxu0 %v13340_v19  ;;  %v875_v19 = vld [vmem:[%s17502_s3 + $0x50] sm:$0xff] }
  0x9a   : > { %18253 = vst [vmem:[#allocation49_spill] sm:$0xff] %v14097_v15  ;;  %v14115_v21 = vand.u32 4294901760, %v875_v19 }
  0x9c   : > { %833 = vmatpush1.bf16.msra.mxu0 %v13342_v26  ;;  %v14121_v26 = vsub.f32 %v891_v17, %v14110_v18  ;;  %11972 = vmatpush3.msra.mxu1 %v14115_v21 }
  0x9d   : > { %834 = vmatprep.subr.bf16.mxu0 %v13343_v30  ;;  %v14130_v30 = vsub.f32 %v875_v19, %v14115_v21  ;;  %11973 = vmatprep.subr.mxu1 %v14123_v28 }
  0x9e   : > { %18254 = vst [vmem:[#allocation50_spill] sm:$0xff] %v14121_v26  ;;  %v14139_v46 = vand.u32 4294901760, %v14121_v26 }
  0x9f   : > { %18255 = vst [vmem:[#allocation51_spill] sm:$0xff] %v14130_v30  ;;  %v14151_v61 = vand.u32 4294901760, %v14130_v30 }
  0xa0   : > { %835 = vmatpush1.bf16.msra.mxu0 %v13345_v36  ;;  %v14132_v36 = vand.u32 4294901760, %v874_v29  ;;  %18256 = vst [vmem:[#allocation52_spill] sm:$0xff] %v14139_v46  ;;  %v1179_v1 = vsub.f32 %v14121_v26, %v14139_v46 }
  0xa1   : > { %836 = vmatprep.subr.bf16.mxu0 %v13346_v39  ;;  %v889_v39 = vld [vmem:[%s17502_s3 + $0xc0] sm:$0xff]  ;;  %18258 = vst [vmem:[#allocation54_spill] sm:$0xff] %v14151_v61  ;;  %v1067_v17 = vsub.f32 %v14130_v30, %v14151_v61  ;;  %v884_v61 = vld [vmem:[%s17502_s3 + $0x98] sm:$0xff] }
  0xa2   : > { %v14144_v51 = vand.u32 4294901760, %v889_v39  ;;  %v14154_v62 = vsub.f32 %v874_v29, %v14132_v36  ;;  %11974 = vmatpush3.msra.mxu1 %v14132_v36  ;;  %v14184_v29 = vand.u32 4294901760, %v872_v6  ;;  %v14299_v57 = vand.u32 4294901760, %v884_v61 }
  0xa4   : > { %837 = vmatpush1.bf16.msra.mxu0 %v13348_v50  ;;  %v14142_v50 = vsub.f32 %v890_v22, %v14123_v28  ;;  %18259 = vst [vmem:[#allocation55_spill] sm:$0xff] %v14154_v62  ;;  %v14168_v4 = vsub.f32 %v889_v39, %v14144_v51  ;;  %11975 = vmatprep.subr.mxu1 %v14144_v51  ;;  %v14179_v19 = vand.u32 4294901760, %v14154_v62  ;;  %v14187_v39 = vand.u32 4294901760, %v1179_v1 }
  0xa5   : > { %11996 = vmatprep.subr.mxu0 %v14055_v60 }
  0xa6   : > { %18257 = vst [vmem:[#allocation53_spill] sm:$0xff] %v14142_v50  ;;  %v14165_v2 = vand.u32 4294901760, %v14142_v50  ;;  %18261 = vst [vmem:[#allocation57_spill] sm:$0xff] %v14168_v4  ;;  %v1074_v1 = vsub.f32 %v14154_v62, %v14179_v19 }
  0xa7   : > { %855 = vmatmul.mubr.bf16.vlgmr.msra.gmra.mxu0 %v713_v63  ;;  %v14156_v63 = vand.u32 4294901760, %v873_v56  ;;  %18262 = vst [vmem:[#allocation58_spill] sm:$0xff] %v14179_v19  ;;  %18264 = vst [vmem:[#allocation60_spill] sm:$0xff] %v14187_v39 }
  0xa8   : > { %11997 = vmatpush3.msra.mxu0 %v14067_v3  ;;  %18260 = vst [vmem:[#allocation56_spill] sm:$0xff] %v14165_v2  ;;  %v886_v3 = vld [vmem:[%s17502_s3 + $0xa8] sm:$0xff]  ;;  %v14227_v60 = vand.u32 4294901760, %v1074_v1 }
  0xa9   : > { %11998 = vmatprep.subr.mxu0 %v14077_v7  ;;  %v14182_v22 = vsub.f32 %v873_v56, %v14156_v63  ;;  %11976 = vmatpush3.msra.mxu1 %v14156_v63  ;;  %v887_v56 = vld [vmem:[%s17502_s3 + $0xb0] sm:$0xff]  ;;  %v14221_v7 = vsub.f32 %v872_v6, %v14184_v29 }
  0xaa   : > { %11999 = vmatpush3.msra.mxu0 %v14079_v8  ;;  %11977 = vmatprep.subr.mxu1 %v14170_v5  ;;  %18272 = vst [vmem:[#allocation68_spill] sm:$0xff] %v14227_v60 }
  0xab   : > { %12000 = vmatprep.subr.mxu0 %v14081_v9  ;;  %18263 = vst [vmem:[#allocation59_spill] sm:$0xff] %v14182_v22  ;;  %v871_v9 = vld [vmem:[%s17502_s3 + $0x30] sm:$0xff]  ;;  %11978 = vmatpush3.msra.mxu1 %v14184_v29  ;;  %18271 = vst [vmem:[#allocation67_spill] sm:$0xff] %v14221_v7 }
  0xac   : > { %12001 = vmatpush3.msra.mxu0 %v14083_v10  ;;  %v14206_v10 = vand.u32 4294901760, %v14182_v22  ;;  %v14244_v1 = vand.u32 4294901760, %v871_v9 }
  0xad   : > { %12002 = vmatprep.subr.mxu0 %v14085_v11  ;;  %v14201_v11 = vand.u32 4294901760, %v1067_v17 }
  0xae   : > { %12003 = vmatpush3.msra.mxu0 %v14093_v12  ;;  %v14195_v12 = vsub.f32 %v888_v0, %v14170_v5  ;;  %18268 = vst [vmem:[#allocation64_spill] sm:$0xff] %v14206_v10 }
  0xaf   : > { %12004 = vmatprep.subr.mxu0 %v14095_v14  ;;  %v14192_v14 = vand.u32 4294901760, %v14168_v4  ;;  %18267 = vst [vmem:[#allocation63_spill] sm:$0xff] %v14201_v11 }
  0xb0   : > { %12005 = vmatpush3.msra.mxu0 %v14097_v15  ;;  %v1186_v15 = vsub.f32 %v14142_v50, %v14165_v2  ;;  %18266 = vst [vmem:[#allocation62_spill] sm:$0xff] %v14195_v12  ;;  %v14218_v8 = vand.u32 4294901760, %v14195_v12  ;;  %v869_v2 = vld [vmem:[%s17502_s3 + $0x20] sm:$0xff] }
  0xb1   : > { %18265 = vst [vmem:[#allocation61_spill] sm:$0xff] %v14192_v14  ;;  %12006 = vmatprep.subr.mxu0 %v14187_v39  ;;  %v1193_v17 = vsub.f32 %v14168_v4, %v14192_v14  ;;  %v14231_v39 = vand.u32 4294901760, %v887_v56  ;;  %v870_v14 = vld [vmem:[%s17502_s3 + $0x28] sm:$0xff] }
  0xb2   : > { %v14213_v0 = vand.u32 4294901760, %v1186_v15  ;;  %18270 = vst [vmem:[#allocation66_spill] sm:$0xff] %v14218_v8  ;;  %12007 = vmatpush3.msra.mxu0 %v14201_v11  ;;  %v1081_v15 = vsub.f32 %v14182_v22, %v14206_v10  ;;  %v1200_v19 = vsub.f32 %v14195_v12, %v14218_v8  ;;  %v14242_v11 = vand.u32 4294901760, %v14221_v7  ;;  %v885_v10 = vld [vmem:[%s17502_s3 + $0xa0] sm:$0xff] }
  0xb3   : > { %v14237_v6 = vand.u32 4294901760, %v1193_v17  ;;  %v14258_v8 = vand.u32 4294901760, %v886_v3  ;;  %11979 = vmatprep.subr.mxu1 %v14231_v39 }
  0xb4   : > { %18269 = vst [vmem:[#allocation65_spill] sm:$0xff] %v14213_v0  ;;  %12008 = vmatprep.subr.mxu0 %v14213_v0  ;;  %18274 = vst [vmem:[#allocation70_spill] sm:$0xff] %v14242_v11  ;;  %v14253_v17 = vand.u32 4294901760, %v1081_v15  ;;  %v14256_v0 = vsub.f32 %v887_v56, %v14231_v39  ;;  %v14265_v46 = vand.u32 4294901760, %v1200_v19  ;;  %v14270_v15 = vsub.f32 %v871_v9, %v14244_v1  ;;  %v868_v9 = vld [vmem:[%s17502_s3 + $0x18] sm:$0xff] }
  0xb5   : > { %18273 = vst [vmem:[#allocation69_spill] sm:$0xff] %v14237_v6  ;;  %12009 = vmatpush3.msra.mxu0 %v14227_v60  ;;  %v1088_v60 = vsub.f32 %v14221_v7, %v14242_v11  ;;  %v14272_v56 = vand.u32 4294901760, %v870_v14  ;;  %11980 = vmatpush3.msra.mxu1 %v14244_v1  ;;  %v14280_v58 = vsub.f32 %v886_v3, %v14258_v8  ;;  %v14282_v19 = vand.u32 4294901760, %v885_v10 }
  0xb6   : > { %18275 = vst [vmem:[#allocation71_spill] sm:$0xff] %v14253_v17  ;;  %18276 = vst [vmem:[#allocation72_spill] sm:$0xff] %v14256_v0  ;;  %12010 = vmatprep.subr.mxu0 %v14237_v6  ;;  %v14277_v59 = vand.u32 4294901760, %v14256_v0  ;;  %v14284_v6 = vand.u32 4294901760, %v869_v2  ;;  %11981 = vmatprep.subr.mxu1 %v14258_v8  ;;  %v14323_v52 = vand.u32 4294901760, %v868_v9 }
  0xb7   : > { %18277 = vst [vmem:[#allocation73_spill] sm:$0xff] %v14265_v46  ;;  %18278 = vst [vmem:[#allocation74_spill] sm:$0xff] %v14270_v15  ;;  %12011 = vmatpush3.msra.mxu0 %v14253_v17  ;;  %v14291_v11 = vand.u32 4294901760, %v1088_v60  ;;  %v14294_v17 = vand.u32 4294901760, %v14270_v15  ;;  %v14297_v3 = vsub.f32 %v870_v14, %v14272_v56  ;;  %11982 = vmatpush3.msra.mxu1 %v14272_v56  ;;  %v14305_v54 = vand.u32 4294901760, %v14280_v58 }
  0xb8   : > { %18279 = vst [vmem:[#allocation75_spill] sm:$0xff] %v14277_v59  ;;  %18280 = vst [vmem:[#allocation76_spill] sm:$0xff] %v14280_v58  ;;  %12012 = vmatprep.subr.mxu0 %v14265_v46  ;;  %v1207_v55 = vsub.f32 %v14256_v0, %v14277_v59  ;;  %v14308_v46 = vsub.f32 %v885_v10, %v14282_v19  ;;  %v14311_v60 = vsub.f32 %v869_v2, %v14284_v6  ;;  %v883_v10 = vld [vmem:[%s17502_s3 + $0x90] sm:$0xff] }
  0xb9   : > { %18281 = vst [vmem:[#allocation77_spill] sm:$0xff] %v14291_v11  ;;  %18282 = vst [vmem:[#allocation78_spill] sm:$0xff] %v14294_v17  ;;  %11983 = vmatprep.subr.mxu1 %v14282_v19  ;;  %12013 = vmatpush3.msra.mxu0 %v14291_v11  ;;  %v1095_v14 = vsub.f32 %v14270_v15, %v14294_v17  ;;  %v14318_v53 = vand.u32 4294901760, %v14297_v3  ;;  %v14321_v59 = vsub.f32 %v884_v61, %v14299_v57  ;;  %v867_v61 = vld [vmem:[%s17502_s3 + $0x10] sm:$0xff] }
  0xba   : > { %18283 = vst [vmem:[#allocation79_spill] sm:$0xff] %v14297_v3  ;;  %18284 = vst [vmem:[#allocation80_spill] sm:$0xff] %v14305_v54  ;;  %11984 = vmatpush3.msra.mxu1 %v14284_v6  ;;  %v14329_v2 = vand.u32 4294901760, %v1207_v55  ;;  %v1214_v11 = vsub.f32 %v14280_v58, %v14305_v54  ;;  %v14334_v17 = vand.u32 4294901760, %v14308_v46  ;;  %v14337_v47 = vand.u32 4294901760, %v14311_v60  ;;  %v882_v58 = vld [vmem:[%s17502_s3 + $0x88] sm:$0xff] }
  0xbb   : > { %18285 = vst [vmem:[#allocation81_spill] sm:$0xff] %v14308_v46  ;;  %18286 = vst [vmem:[#allocation82_spill] sm:$0xff] %v14311_v60  ;;  %11985 = vmatprep.subr.mxu1 %v14299_v57  ;;  %v14343_v44 = vand.u32 4294901760, %v1095_v14  ;;  %v1102_v55 = vsub.f32 %v14297_v3, %v14318_v53  ;;  %v14348_v34 = vand.u32 4294901760, %v14321_v59  ;;  %v14351_v54 = vsub.f32 %v868_v9, %v14323_v52  ;;  %v866_v9 = vld [vmem:[%s17502_s3 + $0x8] sm:$0xff] }
  0xbc   : > { %18287 = vst [vmem:[#allocation83_spill] sm:$0xff] %v14318_v53  ;;  %18288 = vst [vmem:[#allocation84_spill] sm:$0xff] %v14321_v59  ;;  %11986 = vmatpush3.msra.mxu1 %v14323_v52  ;;  %12014 = vmatprep.subr.mxu0 %v14329_v2  ;;  %v14358_v15 = vand.u32 4294901760, %v1214_v11  ;;  %v1221_v14 = vsub.f32 %v14308_v46, %v14334_v17  ;;  %v1109_v53 = vsub.f32 %v14311_v60, %v14337_v47  ;;  %v865_v60 = vld [vmem:[%s17502_s3] sm:$0xff] }
  0xbd   : > { %18289 = vst [vmem:[#allocation85_spill] sm:$0xff] %v14323_v52  ;;  %18290 = vst [vmem:[#allocation86_spill] sm:$0xff] %v14329_v2  ;;  %v14364_v3 = vand.u32 4294901760, %v883_v10  ;;  %12015 = vmatpush3.msra.mxu0 %v14343_v44  ;;  %v14370_v0 = vand.u32 4294901760, %v1102_v55  ;;  %v1228_v11 = vsub.f32 %v14321_v59, %v14348_v34  ;;  %v14375_v2 = vand.u32 4294901760, %v14351_v54 }
  0xbe   : > { %18291 = vst [vmem:[#allocation87_spill] sm:$0xff] %v14334_v17  ;;  %18292 = vst [vmem:[#allocation88_spill] sm:$0xff] %v14337_v47  ;;  %v14377_v17 = vand.u32 4294901760, %v867_v61  ;;  %v881_v47 = vld [vmem:[%s17502_s3 + $0x80] sm:$0xff]  ;;  %12016 = vmatprep.subr.mxu0 %v14358_v15  ;;  %v14386_v55 = vand.u32 4294901760, %v1221_v14  ;;  %v14393_v59 = vand.u32 4294901760, %v882_v58 }
  0xbf   : > { %18293 = vst [vmem:[#allocation89_spill] sm:$0xff] %v14343_v44  ;;  %18294 = vst [vmem:[#allocation90_spill] sm:$0xff] %v14348_v34  ;;  %v14388_v44 = vand.u32 4294901760, %v1109_v53  ;;  %v14391_v34 = vsub.f32 %v883_v10, %v14364_v3  ;;  %11987 = vmatprep.subr.mxu1 %v14364_v3  ;;  %12017 = vmatpush3.msra.mxu0 %v14370_v0  ;;  %v14397_v46 = vand.u32 4294901760, %v1228_v11  ;;  %v14404_v14 = vand.u32 4294901760, %v866_v9 }
  0xc0   : > { %18295 = vst [vmem:[#allocation91_spill] sm:$0xff] %v14351_v54  ;;  %18296 = vst [vmem:[#allocation92_spill] sm:$0xff] %v14358_v15  ;;  %v1116_v52 = vsub.f32 %v14351_v54, %v14375_v2  ;;  %v14402_v15 = vsub.f32 %v867_v61, %v14377_v17  ;;  %11988 = vmatpush3.msra.mxu1 %v14377_v17  ;;  %12018 = vmatprep.subr.mxu0 %v14386_v55  ;;  %v14414_v11 = vand.u32 4294901760, %v881_v47 }
  0xc1   : > { %18297 = vst [vmem:[#allocation93_spill] sm:$0xff] %v14370_v0  ;;  %18298 = vst [vmem:[#allocation94_spill] sm:$0xff] %v14375_v2  ;;  %v14409_v53 = vand.u32 4294901760, %v14391_v34  ;;  %v14412_v10 = vsub.f32 %v882_v58, %v14393_v59  ;;  %v14416_v0 = vand.u32 4294901760, %v865_v60  ;;  %11989 = vmatprep.subr.mxu1 %v14393_v59  ;;  %12019 = vmatpush3.msra.mxu0 %v14388_v44 }
  0xc2   : > { %18299 = vst [vmem:[#allocation95_spill] sm:$0xff] %v14386_v55  ;;  %18300 = vst [vmem:[#allocation96_spill] sm:$0xff] %v14388_v44  ;;  %v14420_v61 = vand.u32 4294901760, %v1116_v52  ;;  %v14423_v2 = vand.u32 4294901760, %v14402_v15  ;;  %v14426_v55 = vsub.f32 %v866_v9, %v14404_v14  ;;  %11990 = vmatpush3.msra.mxu1 %v14404_v14  ;;  %12020 = vmatprep.subr.mxu0 %v14397_v46 }
  0xc3   : > { %18301 = vst [vmem:[#allocation97_spill] sm:$0xff] %v14391_v34  ;;  %18302 = vst [vmem:[#allocation98_spill] sm:$0xff] %v14397_v46  ;;  %v1235_v58 = vsub.f32 %v14391_v34, %v14409_v53  ;;  %v14433_v54 = vand.u32 4294901760, %v14412_v10  ;;  %v14436_v44 = vsub.f32 %v881_v47, %v14414_v11  ;;  %v14439_v52 = vsub.f32 %v865_v60, %v14416_v0 }
  0xc4   : > { %18303 = vst [vmem:[#allocation99_spill] sm:$0xff] %v14402_v15  ;;  %18304 = vst [vmem:[#allocation100_spill] sm:$0xff] %v14409_v53  ;;  %11991 = vmatprep.subr.mxu1 %v14414_v11  ;;  %12021 = vmatpush3.msra.mxu0 %v14420_v61  ;;  %v1123_v9 = vsub.f32 %v14402_v15, %v14423_v2  ;;  %v14446_v46 = vand.u32 4294901760, %v14426_v55 }
  0xc5   : > { %18305 = vst [vmem:[#allocation101_spill] sm:$0xff] %v14412_v10  ;;  %18306 = vst [vmem:[#allocation102_spill] sm:$0xff] %v14414_v11  ;;  %11992 = vmatpush3.msra.mxu1 %v14416_v0  ;;  %v14449_v53 = vand.u32 4294901760, %v1235_v58  ;;  %v1242_v47 = vsub.f32 %v14412_v10, %v14433_v54  ;;  %v14454_v60 = vand.u32 4294901760, %v14436_v44  ;;  %v14457_v34 = vand.u32 4294901760, %v14439_v52 }
  0xc6   : > { %18307 = vst [vmem:[#allocation103_spill] sm:$0xff] %v14416_v0  ;;  %18308 = vst [vmem:[#allocation104_spill] sm:$0xff] %v14420_v61  ;;  %12031 = vmatprep.subr.mxu1 %v13952_v24  ;;  %v14460_v61 = vand.u32 4294901760, %v1123_v9 }
  0xc7   : > { %18309 = vst [vmem:[#allocation105_spill] sm:$0xff] %v14423_v2  ;;  %18310 = vst [vmem:[#allocation106_spill] sm:$0xff] %v14426_v55  ;;  %v1130_v2 = vsub.f32 %v14426_v55, %v14446_v46  ;;  %12022 = vmatprep.subr.mxu0 %v14449_v53  ;;  %v14465_v58 = vand.u32 4294901760, %v1242_v47  ;;  %v1137_v10 = vsub.f32 %v14439_v52, %v14457_v34  ;;  %v732_v47 = vlaneseq }
  0xc8   : > { %18311 = vst [vmem:[#allocation107_spill] sm:$0xff] %v14433_v54  ;;  %18312 = vst [vmem:[#allocation108_spill] sm:$0xff] %v14436_v44  ;;  %v1249_v54 = vsub.f32 %v14436_v44, %v14454_v60  ;;  %12023 = vmatpush3.msra.mxu0 %v14460_v61 }
  0xc9   : > { %18313 = vst [vmem:[#allocation109_spill] sm:$0xff] %v14439_v52  ;;  %18314 = vst [vmem:[#allocation110_spill] sm:$0xff] %v14446_v46  ;;  %v14472_v15 = vand.u32 4294901760, %v1130_v2  ;;  %12024 = vmatprep.subr.mxu0 %v14465_v58  ;;  %v14477_v24 = vand.u32 4294901760, %v1137_v10  ;;  %v730_v2 = vld [vmem:[%s692_s16] sm:$0x3]  ;;  %s695_s16 = scalar_lea.vmem %s17504_s5, %s13898_s26 }
  0xca   : > { %18315 = vst [vmem:[#allocation111_spill] sm:$0xff] %v14449_v53  ;;  %18316 = vst [vmem:[#allocation112_spill] sm:$0xff] %v14454_v60  ;;  %v14475_v9 = vand.u32 4294901760, %v1249_v54  ;;  %v14483_v53 = vshrl.u32 %v732_v47, 7 }
  0xcb   : > { %18317 = vst [vmem:[#allocation113_spill] sm:$0xff] %v14457_v34  ;;  %18318 = vst [vmem:[#allocation114_spill] sm:$0xff] %v14460_v61  ;;  %12025 = vmatpush3.msra.mxu0 %v14472_v15 }
  0xcc   : > { %18319 = vst [vmem:[#allocation115_spill] sm:$0xff] %v14465_v58  ;;  %18320 = vst [vmem:[#allocation116_spill] sm:$0xff] %v14472_v15  ;;  %12026 = vmatprep.subr.mxu0 %v14475_v9  ;;  %v14491_v54 = vsub.s32 0, %v14483_v53  ;;  %v17656_v10 = vsub.s32 1, %v14483_v53 }
  0xcd   : > { %18321 = vst [vmem:[#allocation117_spill] sm:$0xff] %v14475_v9  ;;  %18322 = vst [vmem:[#allocation118_spill] sm:$0xff] %v14477_v24  ;;  %12027 = vmatpush3.msra.mxu0 %v14477_v24 }
  0xce   : > { %12066 = vmatprep.subr.mxu0 %v13924_v13  ;;  %18323 = vst [vmem:[#allocation119_spill] sm:$0xff] %v14483_v53  ;;  %18324 = vst [vmem:[#allocation120_spill] sm:$0xff] %v14491_v54  ;;  %v735_v9 = vrot.slane %v730_v2, %v14491_v54  ;;  %v739_v24 = vrot.slane %v730_v2, %v17656_v10 }
 0x167   : > { %v856_v15 = vpop.f32.mrf.mxu0 }
 0x168   : > { %v14497_v58 = vadd.f32 %v856_v15, %v735_v9 }
 0x169   : > { %v858_v47 = vpop.f32.mrf.mxu0 }
 0x16a   : > { %18325 = vst [vmem:[#allocation121_spill] sm:$0xff] %v14497_v58  ;;  %v17666_v61 = vmax.f32 %v14497_v58, 0.0  ;;  %v14500_v34 = vadd.f32 %v858_v47, %v739_v24 }
 0x16b   : > { %v860_v60 = vpop.f32.mrf.mxu0 }
 0x16c   : > { %18326 = vst [vmem:[#allocation122_spill] sm:$0xff] %v14500_v34  ;;  %v902_v46 = vsel %vm901_vm0, %v17666_v61, 0.0  ;;  %v17669_v52 = vmax.f32 %v14500_v34, 0.0 }
 0x16d   : > { %v903_v54 = vrot.slane %v902_v46, 4  ;;  %v861_v44 = vpop.f32.mrf.mxu0 }
 0x16e   : > { %v909_v15 = vsel %vm901_vm0, %v17669_v52, 0.0  ;;  %v18340_v52 = vld [vmem:[#allocation99_spill] sm:$0xff] }
 0x16f   : > { %v904_v9 = vadd.f32 %v903_v54, %v902_v46  ;;  %v910_v2 = vrot.slane %v909_v15, 4 }
 0x171   : > { %v905_v10 = vrot.slane %v904_v9, 2  ;;  %v911_v53 = vadd.f32 %v910_v2, %v909_v15  ;;  %v18328_v15 = vld [vmem:[#allocation72_spill] sm:$0xff] }
 0x172   : > { %v18330_v2 = vld [vmem:[#allocation76_spill] sm:$0xff] }
 0x173   : > { %v906_v55 = vadd.f32 %v905_v10, %v904_v9  ;;  %v912_v24 = vrot.slane %v911_v53, 2  ;;  %v18327_v10 = vld [vmem:[#allocation85_spill] sm:$0xff]  ;;  %v18329_v9 = vld [vmem:[#allocation74_spill] sm:$0xff] }
 0x175   : > { %v907_v47 = vrot.slane %v906_v55, 1  ;;  %v913_v60 = vadd.f32 %v912_v24, %v911_v53  ;;  %v18331_v24 = vld [vmem:[#allocation79_spill] sm:$0xff] }
 0x177   : > { %v908_v13 = vadd.f32 %v907_v47, %v906_v55  ;;  %v914_v58 = vrot.slane %v913_v60, 1  ;;  %v18332_v47 = vld [vmem:[#allocation81_spill] sm:$0xff] }
 0x179   : > { %v915_v0 = vadd.f32 %v914_v58, %v913_v60  ;;  %v14509_v61 = vand.u32 4294901760, %v908_v13  ;;  %v18333_v60 = vld [vmem:[#allocation102_spill] sm:$0xff] }
 0x17b   : > { %v14511_v11 = vand.u32 4294901760, %v915_v0  ;;  %v14514_v44 = vsub.f32 %v908_v13, %v14509_v61 }
 0x17d   : > { %1253 = vmatprep.mubr.f32.mxu0 %v14511_v11  ;;  %v1013_v46 = vsub.f32 %v915_v0, %v14511_v11  ;;  %v1020_v54 = vand.u32 4294901760, %v14514_v44 }
 0x17e   : > { %1255 = vmatmul.mubr.f32.vlgmr.msra.gmra.mxu0 %v14509_v61 }
 0x17f   : > { %12067 = vmatpush3.msra.mxu0 %v13930_v16  ;;  %v1014_v55 = vand.u32 4294901760, %v1013_v46  ;;  %v1021_v53 = vsub.f32 %v14514_v44, %v1020_v54 }
 0x180   : > { %12068 = vmatprep.subr.mxu0 %v13939_v20 }
 0x181   : > { %12069 = vmatpush3.msra.mxu0 %v13948_v23  ;;  %1497 = vmatprep.mubr.f32.mxu0 %v1014_v55  ;;  %v1015_v13 = vsub.f32 %v1013_v46, %v1014_v55  ;;  %v1022_v58 = vand.u32 4294901760, %v1021_v53  ;;  %v18335_v55 = vld [vmem:[#allocation103_spill] sm:$0xff]  ;;  %v18336_v53 = vld [vmem:[#allocation84_spill] sm:$0xff] }
 0x182   : > { %12070 = vmatprep.subr.mxu0 %v13954_v25 }
 0x183   : > { %12071 = vmatpush3.msra.mxu0 %v13958_v27  ;;  %v1016_v0 = vand.u32 4294901760, %v1015_v13  ;;  %v18337_v13 = vld [vmem:[#allocation19_spill] sm:$0xff] }
 0x184   : > { %12072 = vmatprep.subr.mxu0 %v13968_v31 }
 0x185   : > { %12073 = vmatpush3.msra.mxu0 %v13975_v33  ;;  %1017 = vmatprep.mubr.f32.mxu1 %v1016_v0  ;;  %v18338_v0 = vld [vmem:[#allocation91_spill] sm:$0xff] }
 0x186   : > { %12074 = vmatprep.subr.mxu0 %v14007_v42  ;;  %1023 = vmatmul.mubr.f32.vlgmr.msra.gmra.mxu1 %v1022_v58  ;;  %v18339_v58 = vld [vmem:[#allocation97_spill] sm:$0xff] }
 0x187   : > { %12032 = vmatpush3.msra.mxu1 %v13973_v32  ;;  %12075 = vmatpush3.msra.mxu0 %v14009_v43 }
 0x188   : > { %12033 = vmatprep.subr.mxu1 %v13982_v35  ;;  %1390 = vmatprep.mubr.f32.mxu1 %v1013_v46  ;;  %v18334_v46 = vld [vmem:[#allocation82_spill] sm:$0xff] }
 0x189   : > { %12076 = vmatprep.subr.mxu0 %v14110_v18  ;;  %12034 = vmatpush3.msra.mxu1 %v13987_v37 }
 0x18a   : > { %12077 = vmatpush3.msra.mxu0 %v14115_v21  ;;  %12035 = vmatprep.subr.mxu1 %v13990_v38 }
 0x18b   : > { %12078 = vmatprep.subr.mxu0 %v14123_v28  ;;  %12036 = vmatpush3.msra.mxu1 %v14002_v40 }
 0x18c   : > { %12079 = vmatpush3.msra.mxu0 %v14132_v36  ;;  %12037 = vmatprep.subr.mxu1 %v14005_v41 }
 0x18d   : > { %12080 = vmatprep.subr.mxu0 %v14144_v51  ;;  %12038 = vmatpush3.msra.mxu1 %v14015_v45 }
 0x18e   : > { %12081 = vmatpush3.msra.mxu0 %v14156_v63  ;;  %12039 = vmatprep.subr.mxu1 %v14023_v48 }
 0x18f   : > { %12082 = vmatprep.subr.mxu0 %v14170_v5  ;;  %12040 = vmatpush3.msra.mxu1 %v14026_v49 }
 0x190   : > { %12083 = vmatpush3.msra.mxu0 %v14184_v29  ;;  %12041 = vmatprep.subr.mxu1 %v14121_v26 }
 0x191   : > { %12084 = vmatprep.subr.mxu0 %v14231_v39  ;;  %12042 = vmatpush3.msra.mxu1 %v14130_v30 }
 0x192   : > { %12085 = vmatpush3.msra.mxu0 %v14244_v1  ;;  %12043 = vmatprep.subr.mxu1 %v14142_v50 }
 0x193   : > { %12086 = vmatprep.subr.mxu0 %v14258_v8  ;;  %12044 = vmatpush3.msra.mxu1 %v14154_v62 }
 0x194   : > { %12087 = vmatpush3.msra.mxu0 %v14272_v56  ;;  %12045 = vmatprep.subr.mxu1 %v14168_v4 }
 0x195   : > { %12088 = vmatprep.subr.mxu0 %v14282_v19  ;;  %12046 = vmatpush3.msra.mxu1 %v14182_v22 }
 0x196   : > { %12089 = vmatpush3.msra.mxu0 %v14284_v6  ;;  %12047 = vmatprep.subr.mxu1 %v14195_v12 }
 0x197   : > { %12090 = vmatprep.subr.mxu0 %v14299_v57  ;;  %12048 = vmatpush3.msra.mxu1 %v14221_v7 }
 0x198   : > { %12091 = vmatpush3.msra.mxu0 %v18327_v10  ;;  %12049 = vmatprep.subr.mxu1 %v18328_v15 }
 0x199   : > { %12092 = vmatprep.subr.mxu0 %v14364_v3  ;;  %12050 = vmatpush3.msra.mxu1 %v18329_v9 }
 0x19a   : > { %12093 = vmatpush3.msra.mxu0 %v14377_v17  ;;  %12051 = vmatprep.subr.mxu1 %v18330_v2  ;;  %v18380_v2 = vld [vmem:[#allocation44_spill] sm:$0xff] }
 0x19b   : > { %12094 = vmatprep.subr.mxu0 %v14393_v59  ;;  %12052 = vmatpush3.msra.mxu1 %v18331_v24  ;;  %v18378_v24 = vld [vmem:[#allocation43_spill] sm:$0xff] }
 0x19c   : > { %12095 = vmatpush3.msra.mxu0 %v14404_v14  ;;  %12053 = vmatprep.subr.mxu1 %v18332_v47  ;;  %v18376_v47 = vld [vmem:[#allocation42_spill] sm:$0xff] }
 0x19d   : > { %12096 = vmatprep.subr.mxu0 %v18333_v60  ;;  %12054 = vmatpush3.msra.mxu1 %v18334_v46  ;;  %v18344_v46 = vld [vmem:[#allocation109_spill] sm:$0xff] }
 0x19e   : > { %12097 = vmatpush3.msra.mxu0 %v18335_v55  ;;  %12055 = vmatprep.subr.mxu1 %v18336_v53  ;;  %v18341_v53 = vld [vmem:[#allocation101_spill] sm:$0xff] }
 0x19f   : > { %1501 = vmatmul.mubr.f32.vlgmr.msra.gmra.mxu0 %v1020_v54  ;;  %12136 = vmatprep.subr.mxu0 %v18337_v13  ;;  %v18342_v54 = vld [vmem:[#allocation106_spill] sm:$0xff] }
 0x1a0   : > { %12056 = vmatpush3.msra.mxu1 %v18338_v0  ;;  %12137 = vmatpush3.msra.mxu0 %v13930_v16  ;;  %v18343_v0 = vld [vmem:[#allocation108_spill] sm:$0xff] }
 0x1a1   : > { %1771 = vmatprep.mubr.f32.mxu0 %v14511_v11  ;;  %12057 = vmatprep.subr.mxu1 %v18339_v58  ;;  %v18374_v58 = vld [vmem:[#allocation41_spill] sm:$0xff] }
 0x1a2   : > { %12138 = vmatprep.subr.mxu0 %v13939_v20  ;;  %12058 = vmatpush3.msra.mxu1 %v18340_v52  ;;  %v18345_v52 = vld [vmem:[#allocation22_spill] sm:$0xff] }
 0x1a3   : > { %12139 = vmatpush3.msra.mxu0 %v13948_v23  ;;  %12059 = vmatprep.subr.mxu1 %v18341_v53  ;;  %v18346_v53 = vld [vmem:[#allocation28_spill] sm:$0xff] }
 0x1a4   : > { %12140 = vmatprep.subr.mxu0 %v13954_v25  ;;  %12060 = vmatpush3.msra.mxu1 %v18342_v54  ;;  %v18347_v54 = vld [vmem:[#allocation30_spill] sm:$0xff] }
 0x1a5   : > { %12141 = vmatpush3.msra.mxu0 %v13958_v27  ;;  %12061 = vmatprep.subr.mxu1 %v18343_v0  ;;  %v18348_v0 = vld [vmem:[#allocation33_spill] sm:$0xff] }
 0x1a6   : > { %12142 = vmatprep.subr.mxu0 %v13968_v31  ;;  %12062 = vmatpush3.msra.mxu1 %v18344_v46  ;;  %v18349_v46 = vld [vmem:[#allocation34_spill] sm:$0xff] }
 0x1a7   : > { %12143 = vmatpush3.msra.mxu0 %v13975_v33  ;;  %1393 = vmatmul.mubr.f32.vlgmr.msra.gmra.mxu1 %v14514_v44  ;;  %v18350_v44 = vld [vmem:[#allocation35_spill] sm:$0xff] }
 0x1a8   : > { %12101 = vmatprep.subr.mxu1 %v18345_v52  ;;  %12144 = vmatprep.subr.mxu0 %v14007_v42  ;;  %v18372_v52 = vld [vmem:[#allocation40_spill] sm:$0xff] }
 0x1a9   : > { %12102 = vmatpush3.msra.mxu1 %v18346_v53  ;;  %1667 = vmatprep.mubr.f32.mxu1 %v14511_v11  ;;  %v18351_v53 = vld [vmem:[#allocation36_spill] sm:$0xff]  ;;  %v18352_v11 = vld [vmem:[#allocation37_spill] sm:$0xff] }
 0x1aa   : > { %12145 = vmatpush3.msra.mxu0 %v14009_v43  ;;  %12103 = vmatprep.subr.mxu1 %v18347_v54  ;;  %v18353_v54 = vld [vmem:[#allocation38_spill] sm:$0xff] }
 0x1ab   : > { %12146 = vmatprep.subr.mxu0 %v14110_v18  ;;  %12104 = vmatpush3.msra.mxu1 %v18348_v0  ;;  %v18354_v0 = vld [vmem:[#allocation39_spill] sm:$0xff] }
 0x1ac   : > { %12147 = vmatpush3.msra.mxu0 %v14115_v21  ;;  %12105 = vmatprep.subr.mxu1 %v18349_v46  ;;  %v18355_v46 = vld [vmem:[#allocation52_spill] sm:$0xff] }
 0x1ad   : > { %12148 = vmatprep.subr.mxu0 %v14123_v28  ;;  %12106 = vmatpush3.msra.mxu1 %v18350_v44  ;;  %v18356_v44 = vld [vmem:[#allocation54_spill] sm:$0xff] }
 0x1ae   : > { %12149 = vmatpush3.msra.mxu0 %v14132_v36  ;;  %12107 = vmatprep.subr.mxu1 %v18351_v53  ;;  %v18357_v53 = vld [vmem:[#allocation56_spill] sm:$0xff] }
 0x1af   : > { %12150 = vmatprep.subr.mxu0 %v14144_v51  ;;  %12108 = vmatpush3.msra.mxu1 %v18352_v11  ;;  %v18358_v11 = vld [vmem:[#allocation58_spill] sm:$0xff] }
 0x1b0   : > { %12151 = vmatpush3.msra.mxu0 %v14156_v63  ;;  %12109 = vmatprep.subr.mxu1 %v18353_v54  ;;  %v18359_v54 = vld [vmem:[#allocation61_spill] sm:$0xff] }
 0x1b1   : > { %12152 = vmatprep.subr.mxu0 %v14170_v5  ;;  %12110 = vmatpush3.msra.mxu1 %v18354_v0  ;;  %v18360_v0 = vld [vmem:[#allocation64_spill] sm:$0xff] }
 0x1b2   : > { %12153 = vmatpush3.msra.mxu0 %v14184_v29  ;;  %12111 = vmatprep.subr.mxu1 %v18355_v46  ;;  %v18361_v46 = vld [vmem:[#allocation66_spill] sm:$0xff] }
 0x1b3   : > { %12154 = vmatprep.subr.mxu0 %v14231_v39  ;;  %12112 = vmatpush3.msra.mxu1 %v18356_v44  ;;  %v18362_v44 = vld [vmem:[#allocation70_spill] sm:$0xff] }
 0x1b4   : > { %12155 = vmatpush3.msra.mxu0 %v14244_v1  ;;  %12113 = vmatprep.subr.mxu1 %v18357_v53  ;;  %v18363_v53 = vld [vmem:[#allocation75_spill] sm:$0xff] }
 0x1b5   : > { %12156 = vmatprep.subr.mxu0 %v14258_v8  ;;  %12114 = vmatpush3.msra.mxu1 %v18358_v11  ;;  %v18364_v11 = vld [vmem:[#allocation78_spill] sm:$0xff] }
 0x1b6   : > { %12157 = vmatpush3.msra.mxu0 %v14272_v56  ;;  %12115 = vmatprep.subr.mxu1 %v18359_v54  ;;  %v18365_v54 = vld [vmem:[#allocation80_spill] sm:$0xff] }
 0x1b7   : > { %12158 = vmatprep.subr.mxu0 %v14282_v19  ;;  %12116 = vmatpush3.msra.mxu1 %v18360_v0  ;;  %v18366_v0 = vld [vmem:[#allocation83_spill] sm:$0xff] }
 0x1b8   : > { %12159 = vmatpush3.msra.mxu0 %v14284_v6  ;;  %12117 = vmatprep.subr.mxu1 %v18361_v46  ;;  %v18367_v46 = vld [vmem:[#allocation87_spill] sm:$0xff] }
 0x1b9   : > { %12160 = vmatprep.subr.mxu0 %v14299_v57  ;;  %12118 = vmatpush3.msra.mxu1 %v18362_v44  ;;  %v18368_v44 = vld [vmem:[#allocation88_spill] sm:$0xff] }
 0x1ba   : > { %12161 = vmatpush3.msra.mxu0 %v18327_v10  ;;  %12119 = vmatprep.subr.mxu1 %v18363_v53  ;;  %v18369_v53 = vld [vmem:[#allocation90_spill] sm:$0xff] }
 0x1bb   : > { %12162 = vmatprep.subr.mxu0 %v14364_v3  ;;  %12120 = vmatpush3.msra.mxu1 %v18364_v11  ;;  %v18370_v11 = vld [vmem:[#allocation94_spill] sm:$0xff] }
 0x1bc   : > { %12163 = vmatpush3.msra.mxu0 %v14377_v17  ;;  %12121 = vmatprep.subr.mxu1 %v18365_v54  ;;  %v18371_v54 = vld [vmem:[#allocation100_spill] sm:$0xff] }
 0x1bd   : > { %12164 = vmatprep.subr.mxu0 %v14393_v59  ;;  %12122 = vmatpush3.msra.mxu1 %v18366_v0  ;;  %v18373_v0 = vld [vmem:[#allocation105_spill] sm:$0xff] }
 0x1be   : > { %12165 = vmatpush3.msra.mxu0 %v14404_v14  ;;  %12123 = vmatprep.subr.mxu1 %v18367_v46  ;;  %v18375_v46 = vld [vmem:[#allocation107_spill] sm:$0xff] }
 0x1bf   : > { %12166 = vmatprep.subr.mxu0 %v18333_v60  ;;  %12124 = vmatpush3.msra.mxu1 %v18368_v44  ;;  %v18377_v44 = vld [vmem:[#allocation110_spill] sm:$0xff] }
 0x1c0   : > { %12167 = vmatpush3.msra.mxu0 %v18335_v55  ;;  %12125 = vmatprep.subr.mxu1 %v18369_v53  ;;  %v18379_v53 = vld [vmem:[#allocation112_spill] sm:$0xff] }
 0x1c1   : > { %1773 = vmatmul.mubr.f32.vlgmr.msra.gmra.mxu0 %v14509_v61  ;;  %12126 = vmatpush3.msra.mxu1 %v18370_v11  ;;  %v18381_v11 = vld [vmem:[#allocation113_spill] sm:$0xff] }
 0x1c2   : > { %12127 = vmatprep.subr.mxu1 %v18371_v54  ;;  %12206 = vmatprep.subr.mxu0 %v18372_v52  ;;  %v18382_v54 = vld [vmem:[#allocation45_spill] sm:$0xff]  ;;  %v18383_v52 = vld [vmem:[#allocation46_spill] sm:$0xff] }
 0x1c3   : > { %12128 = vmatpush3.msra.mxu1 %v18373_v0  ;;  %12207 = vmatpush3.msra.mxu0 %v18374_v58  ;;  %v18384_v58 = vld [vmem:[#allocation47_spill] sm:$0xff] }
 0x1c4   : > { %12129 = vmatprep.subr.mxu1 %v18375_v46  ;;  %12208 = vmatprep.subr.mxu0 %v18376_v47  ;;  %v18385_v46 = vld [vmem:[#allocation48_spill] sm:$0xff]  ;;  %v18386_v47 = vld [vmem:[#allocation49_spill] sm:$0xff] }
 0x1c5   : > { %12130 = vmatpush3.msra.mxu1 %v18377_v44  ;;  %12209 = vmatpush3.msra.mxu0 %v18378_v24  ;;  %v18387_v44 = vld [vmem:[#allocation60_spill] sm:$0xff]  ;;  %v18388_v24 = vld [vmem:[#allocation63_spill] sm:$0xff] }
 0x1c6   : > { %12131 = vmatprep.subr.mxu1 %v18379_v53  ;;  %12210 = vmatprep.subr.mxu0 %v18380_v2  ;;  %v18389_v53 = vld [vmem:[#allocation65_spill] sm:$0xff]  ;;  %v18390_v2 = vld [vmem:[#allocation68_spill] sm:$0xff] }
 0x1c7   : > { %12132 = vmatpush3.msra.mxu1 %v18381_v11  ;;  %12211 = vmatpush3.msra.mxu0 %v18382_v54  ;;  %v18391_v11 = vld [vmem:[#allocation69_spill] sm:$0xff]  ;;  %v18392_v54 = vld [vmem:[#allocation71_spill] sm:$0xff] }
 0x1c8   : > { %1669 = vmatmul.mubr.f32.vlgmr.msra.gmra.mxu1 %v14509_v61  ;;  %12212 = vmatprep.subr.mxu0 %v18383_v52  ;;  %v18393_v61 = vld [vmem:[#allocation73_spill] sm:$0xff] }
 0x1c9   : > { %12213 = vmatpush3.msra.mxu0 %v18384_v58  ;;  %v18394_v52 = vld [vmem:[#allocation77_spill] sm:$0xff]  ;;  %v18395_v58 = vld [vmem:[#allocation86_spill] sm:$0xff] }
 0x1ca   : > { %12214 = vmatprep.subr.mxu0 %v18385_v46  ;;  %v18396_v46 = vld [vmem:[#allocation89_spill] sm:$0xff] }
 0x1cb   : > { %12215 = vmatpush3.msra.mxu0 %v18386_v47  ;;  %v18397_v47 = vld [vmem:[#allocation92_spill] sm:$0xff] }
 0x1cc   : > { %12216 = vmatprep.subr.mxu0 %v18387_v44  ;;  %v18398_v44 = vld [vmem:[#allocation93_spill] sm:$0xff] }
 0x1cd   : > { %12217 = vmatpush3.msra.mxu0 %v18388_v24  ;;  %v18399_v24 = vld [vmem:[#allocation95_spill] sm:$0xff] }
 0x1ce   : > { %12218 = vmatprep.subr.mxu0 %v18389_v53  ;;  %v18400_v53 = vld [vmem:[#allocation96_spill] sm:$0xff] }
 0x1cf   : > { %12219 = vmatpush3.msra.mxu0 %v18390_v2  ;;  %v18401_v2 = vld [vmem:[#allocation98_spill] sm:$0xff] }
 0x1d0   : > { %12220 = vmatprep.subr.mxu0 %v18391_v11  ;;  %v18402_v11 = vld [vmem:[#allocation104_spill] sm:$0xff] }
 0x1d1   : > { %12221 = vmatpush3.msra.mxu0 %v18392_v54  ;;  %v18403_v54 = vld [vmem:[#allocation111_spill] sm:$0xff] }
 0x1d2   : > { %12222 = vmatprep.subr.mxu0 %v18393_v61  ;;  %v18404_v61 = vld [vmem:[#allocation114_spill] sm:$0xff] }
 0x1d3   : > { %12223 = vmatpush3.msra.mxu0 %v18394_v52  ;;  %v18405_v52 = vld [vmem:[#allocation115_spill] sm:$0xff] }
 0x1d4   : > { %12224 = vmatprep.subr.mxu0 %v18395_v58  ;;  %v18406_v58 = vld [vmem:[#allocation116_spill] sm:$0xff] }
 0x1d5   : > { %12225 = vmatpush3.msra.mxu0 %v18396_v46  ;;  %v18407_v46 = vld [vmem:[#allocation117_spill] sm:$0xff] }
 0x1d6   : > { %12226 = vmatprep.subr.mxu0 %v18397_v47  ;;  %v18408_v47 = vld [vmem:[#allocation118_spill] sm:$0xff] }
 0x1d7   : > { %12227 = vmatpush3.msra.mxu0 %v18398_v44  ;;  %v900_v44 = vld [vmem:[%s17503_s4 + $0x18] sm:$0xff] }
 0x1d8   : > { %12228 = vmatprep.subr.mxu0 %v18399_v24  ;;  %v14692_v24 = vand.u32 4294901760, %v900_v44 }
 0x1d9   : > { %12229 = vmatpush3.msra.mxu0 %v18400_v53  ;;  %v899_v53 = vld [vmem:[%s17503_s4 + $0x10] sm:$0xff] }
 0x1da   : > { %12230 = vmatprep.subr.mxu0 %v18401_v2  ;;  %18409 = vst [vmem:[#allocation85_spill] sm:$0xff] %v14692_v24  ;;  %v14697_v2 = vand.u32 4294901760, %v899_v53  ;;  %1811 = vmatprep.subr.mxu1 %v14692_v24 }
 0x1db   : > { %12231 = vmatpush3.msra.mxu0 %v18402_v11  ;;  %v898_v11 = vld [vmem:[%s17503_s4 + $0x8] sm:$0xff] }
 0x1dc   : > { %12232 = vmatprep.subr.mxu0 %v18403_v54  ;;  %18410 = vst [vmem:[#allocation102_spill] sm:$0xff] %v14697_v2  ;;  %v897_v54 = vld [vmem:[%s17503_s4] sm:$0xff]  ;;  %1813 = vmatpush1.msra.mxu1 %v14697_v2  ;;  %v14726_v34 = vsub.f32 %v899_v53, %v14697_v2  ;;  %v18422_v53 = vld [vmem:[#allocation20_spill] sm:$0xff] }
 0x1dd   : > { %12233 = vmatpush3.msra.mxu0 %v18404_v61  ;;  %v14706_v61 = vand.u32 4294901760, %v898_v11 }
 0x1de   : > { %12234 = vmatprep.subr.mxu0 %v18405_v52  ;;  %v17670_v52 = vmov 0.0  }
 0x1df   : > { %12235 = vmatpush3.msra.mxu0 %v18406_v58  ;;  %18411 = vst [vmem:[#allocation103_spill] sm:$0xff] %v14706_v61  ;;  %1850 = vmatprep.mubr.f32.mxu1 %v17670_v52  ;;  %v14710_v58 = vsub.f32 %v900_v44, %v14692_v24 }
 0x1e0   : > { %12236 = vmatprep.subr.mxu0 %v18407_v46  ;;  %v14713_v46 = vand.u32 4294901760, %v897_v54  ;;  %1815 = vmatprep.subr.mxu1 %v14706_v61 }
 0x1e1   : > { %12237 = vmatpush3.msra.mxu0 %v18408_v47  ;;  %v14717_v47 = vand.u32 4294901760, %v14710_v58 }
 0x1e2   : > { %12276 = vmatprep.subr.mxu0 %v18337_v13  ;;  %18412 = vst [vmem:[#allocation19_spill] sm:$0xff] %v14713_v46  ;;  %1817 = vmatpush1.msra.mxu1 %v14713_v46 }
 0x1e3   : > { %18413 = vst [vmem:[#allocation40_spill] sm:$0xff] %v14717_v47  ;;  %v1893_v0 = vsub.f32 %v14710_v58, %v14717_v47 }
 0x1e5   : > { %v14722_v9 = vand.u32 4294901760, %v1893_v0 }
 0x1e7   : > { %18414 = vst [vmem:[#allocation41_spill] sm:$0xff] %v14722_v9  ;;  %1895 = vmatprep.subr.mxu1 %v14722_v9 }
 0x23e   : > { %v12028_v52 = vpop.f32.mrf.mxu0 }
 0x240   : > { %v12029_v12 = vpop.f32.mrf.mxu0 }
 0x241   : > { %v12030_v50 = vadd.f32 %v12029_v12, %v12028_v52  ;;  %v14732_v12 = vsub.f32 %v897_v54, %v14713_v46 }
 0x246   : > { %v11993_v44 = vpop.f32.mrf.mxu1 }
 0x248   : > { %v11994_v15 = vpop.f32.mrf.mxu1 }
 0x249   : > { %v11995_v62 = vadd.f32 %v11994_v15, %v11993_v44  ;;  %v14729_v15 = vsub.f32 %v898_v11, %v14706_v61 }
 0x24b   : > { %v1257_v49 = vadd.f32 %v12030_v50, %v11995_v62 }
 0x25f   : > { %v12098_v22 = vpop.f32.mrf.mxu0 }
 0x261   : > { %v12099_v26 = vpop.f32.mrf.mxu0 }
 0x262   : > { %v12100_v40 = vadd.f32 %v12099_v26, %v12098_v22  ;;  %v14736_v26 = vand.u32 4294901760, %v14726_v34 }
 0x264   : > { %18415 = vst [vmem:[#allocation42_spill] sm:$0xff] %v14736_v26 }
 0x267   : > { %v12063_v7 = vpop.f32.mrf.mxu1 }
 0x269   : > { %v12064_v4 = vpop.f32.mrf.mxu1 }
 0x26a   : > { %v12065_v30 = vadd.f32 %v12064_v4, %v12063_v7 }
 0x26c   : > { %v1395_v45 = vadd.f32 %v12065_v30, %v1257_v49 }
 0x26e   : > { %v1503_v37 = vadd.f32 %v12100_v40, %v1395_v45  ;;  %v1899_v45 = vsub.f32 %v14726_v34, %v14736_v26 }
 0x270   : > { %v14750_v50 = vand.u32 4294901760, %v1899_v45 }
 0x272   : > { %18418 = vst [vmem:[#allocation45_spill] sm:$0xff] %v14750_v50 }
 0x281   : > { %v12168_v48 = vpop.f32.mrf.mxu0 }
 0x283   : > { %v12169_v0 = vpop.f32.mrf.mxu0 }
 0x284   : > { %v12170_v35 = vadd.f32 %v12169_v0, %v12168_v48 }
 0x288   : > { %v12133_v41 = vpop.f32.mrf.mxu1 }
 0x28a   : > { %v12134_v38 = vpop.f32.mrf.mxu1 }
 0x28b   : > { %v12135_v9 = vadd.f32 %v12134_v38, %v12133_v41  ;;  %v14739_v38 = vand.u32 4294901760, %v14729_v15 }
 0x28d   : > { %v1671_v32 = vadd.f32 %v12135_v9, %v1503_v37  ;;  %18416 = vst [vmem:[#allocation43_spill] sm:$0xff] %v14739_v38  ;;  %v14742_v37 = vand.u32 4294901760, %v14732_v12  ;;  %v18421_v9 = vmov 0.0  }
 0x28f   : > { %v1775_v7 = vadd.f32 %v12170_v35, %v1671_v32  ;;  %18417 = vst [vmem:[#allocation44_spill] sm:$0xff] %v14742_v37  ;;  %v1905_v35 = vsub.f32 %v14729_v15, %v14739_v38  ;;  %v1911_v48 = vsub.f32 %v14732_v12, %v14742_v37 }
 0x291   : > { %v1780_v49 = vsel %vm1778_vm1, %v1775_v7, 0  ;;  %v14752_v4 = vand.u32 4294901760, %v1905_v35  ;;  %v14754_v22 = vand.u32 4294901760, %v1911_v48 }
 0x292   : > { %v1851_v40 = vand.u32 4294901760, %v1780_v49 }
 0x293   : > { %18419 = vst [vmem:[#allocation46_spill] sm:$0xff] %v14752_v4  ;;  %18420 = vst [vmem:[#allocation47_spill] sm:$0xff] %v14754_v22 }
 0x294   : > { %v1852_v41 = vsub.f32 %v1780_v49, %v1851_v40 }
 0x296   : > { %v1853_v32 = vand.u32 4294901760, %v1852_v41 }
 0x298   : > { %v1854_v30 = vsub.f32 %v1852_v41, %v1853_v32 }
 0x29a   : > { %v1855_v62 = vand.u32 4294901760, %v1854_v30 }
 0x29c   : > { %1856 = vmatmul.mubr.f32.vlgmr.msra.gmra.mxu1 %v1855_v62 }
 0x29d   : > { %1901 = vmatpush1.msra.mxu1 %v14750_v50  ;;  %1946 = vmatprep.mubr.f32.mxu1 %v18421_v9 }
 0x29e   : > { %1907 = vmatprep.subr.mxu1 %v14752_v4 }
 0x29f   : > { %1913 = vmatpush1.msra.mxu1 %v14754_v22 }
 0x2a0   : > { %1984 = vmatprep.subr.mxu1 %v14710_v58  ;;  %1948 = vmatmul.mubr.f32.vlgmr.msra.gmra.mxu1 %v1851_v40 }
 0x2a1   : > { %1987 = vmatpush1.msra.mxu1 %v14726_v34  ;;  %2026 = vmatprep.mubr.f32.mxu1 %v18421_v9 }
 0x2a2   : > { %1990 = vmatprep.subr.mxu1 %v14729_v15 }
 0x2a3   : > { %1993 = vmatpush1.msra.mxu1 %v14732_v12 }
 0x2a4   : > { %2064 = vmatprep.subr.mxu1 %v14692_v24  ;;  %2029 = vmatmul.mubr.f32.vlgmr.msra.gmra.mxu1 %v1852_v41 }
 0x2a5   : > { %2066 = vmatpush1.msra.mxu1 %v14697_v2  ;;  %2103 = vmatprep.mubr.f32.mxu1 %v18421_v9 }
 0x2a6   : > { %2068 = vmatprep.subr.mxu1 %v14706_v61 }
 0x2a7   : > { %2070 = vmatpush1.msra.mxu1 %v14713_v46 }
 0x2a8   : > { %2144 = vmatprep.subr.mxu1 %v14717_v47  ;;  %2107 = vmatmul.mubr.f32.vlgmr.msra.gmra.mxu1 %v1853_v32 }
 0x2a9   : > { %2148 = vmatpush1.msra.mxu1 %v14736_v26  ;;  %2189 = vmatprep.mubr.f32.mxu1 %v18421_v9  ;;  %v18423_v26 = vld [vmem:[#allocation120_spill] sm:$0xff] }
 0x2aa   : > { %2152 = vmatprep.subr.mxu1 %v14739_v38 }
 0x2ab   : > { %2156 = vmatpush1.msra.mxu1 %v14742_v37 }
 0x2ac   : > { %2226 = vmatprep.subr.mxu1 %v14692_v24  ;;  %2191 = vmatmul.mubr.f32.vlgmr.msra.gmra.mxu1 %v1851_v40 }
 0x2ad   : > { %2228 = vmatpush1.msra.mxu1 %v14697_v2  ;;  %2265 = vmatprep.mubr.f32.mxu1 %v18421_v9  ;;  %v18424_v2 = vld [vmem:[#allocation121_spill] sm:$0xff] }
 0x2ae   : > { %2230 = vmatprep.subr.mxu1 %v14706_v61  ;;  %v18425_v24 = vmax.f32 %v18424_v2, 0.0 }
 0x2af   : > { %2232 = vmatpush1.msra.mxu1 %v14713_v46 }
 0x2b0   : > { %2267 = vmatmul.mubr.f32.vlgmr.msra.gmra.mxu1 %v1851_v40  ;;  %12171 = vmatprep.subr.mxu1 %v18337_v13 }
 0x2b1   : > { %12172 = vmatpush3.msra.mxu1 %v13930_v16 }
 0x2b2   : > { %12173 = vmatprep.subr.mxu1 %v13939_v20 }
 0x2b3   : > { %12174 = vmatpush3.msra.mxu1 %v13948_v23 }
 0x2b4   : > { %12175 = vmatprep.subr.mxu1 %v13954_v25 }
 0x2b5   : > { %12176 = vmatpush3.msra.mxu1 %v13958_v27 }
 0x2b6   : > { %12177 = vmatprep.subr.mxu1 %v13968_v31 }
 0x2b7   : > { %12178 = vmatpush3.msra.mxu1 %v13975_v33 }
 0x2b8   : > { %12179 = vmatprep.subr.mxu1 %v14007_v42 }
 0x2b9   : > { %12180 = vmatpush3.msra.mxu1 %v14009_v43 }
 0x2ba   : > { %12181 = vmatprep.subr.mxu1 %v14110_v18 }
 0x2bb   : > { %12182 = vmatpush3.msra.mxu1 %v14115_v21 }
 0x2bc   : > { %12183 = vmatprep.subr.mxu1 %v14123_v28 }
 0x2bd   : > { %12184 = vmatpush3.msra.mxu1 %v14132_v36 }
 0x2be   : > { %12185 = vmatprep.subr.mxu1 %v14144_v51 }
 0x2bf   : > { %12186 = vmatpush3.msra.mxu1 %v14156_v63 }
 0x2c0   : > { %12187 = vmatprep.subr.mxu1 %v14170_v5 }
 0x2c1   : > { %12188 = vmatpush3.msra.mxu1 %v14184_v29 }
 0x2c2   : > { %12189 = vmatprep.subr.mxu1 %v14231_v39 }
 0x2c3   : > { %12190 = vmatpush3.msra.mxu1 %v14244_v1 }
 0x2c4   : > { %12191 = vmatprep.subr.mxu1 %v14258_v8 }
 0x2c5   : > { %12192 = vmatpush3.msra.mxu1 %v14272_v56 }
 0x2c6   : > { %12193 = vmatprep.subr.mxu1 %v14282_v19 }
 0x2c7   : > { %12194 = vmatpush3.msra.mxu1 %v14284_v6 }
 0x2c8   : > { %12195 = vmatprep.subr.mxu1 %v14299_v57 }
 0x2c9   : > { %12196 = vmatpush3.msra.mxu1 %v18327_v10 }
 0x2ca   : > { %12197 = vmatprep.subr.mxu1 %v14364_v3 }
 0x2cb   : > { %12198 = vmatpush3.msra.mxu1 %v14377_v17 }
 0x2cc   : > { %12199 = vmatprep.subr.mxu1 %v14393_v59 }
 0x2cd   : > { %12200 = vmatpush3.msra.mxu1 %v14404_v14 }
 0x2ce   : > { %12201 = vmatprep.subr.mxu1 %v18333_v60 }
 0x2cf   : > { %12202 = vmatpush3.msra.mxu1 %v18335_v55 }
 0x2d0   : > { %12241 = vmatprep.subr.mxu1 %v18422_v53 }
 0x35c   : > { %v1857_v11 = vpop.f32.mrf.mxu1 }
 0x35e   : > { %v1859_v54 = vpop.f32.mrf.mxu1 }
 0x360   : > { %v1949_v52 = vpop.f32.mrf.mxu1 }
 0x361   : > { %v1950_v40 = vadd.f32 %v1949_v52, %v1857_v11  ;;  %v18426_v52 = vld [vmem:[#allocation122_spill] sm:$0xff] }
 0x362   : > { %v1951_v44 = vpop.f32.mrf.mxu1 }
 0x363   : > { %v1952_v45 = vadd.f32 %v1951_v44, %v1859_v54  ;;  %v18427_v44 = vmax.f32 %v18426_v52, 0.0 }
 0x364   : > { %v2030_v0 = vpop.f32.mrf.mxu1 }
 0x365   : > { %v2031_v32 = vadd.f32 %v2030_v0, %v1950_v40 }
 0x366   : > { %v2032_v7 = vpop.f32.mrf.mxu1 }
 0x367   : > { %v2033_v48 = vadd.f32 %v2032_v7, %v1952_v45 }
 0x368   : > { %v2108_v49 = vpop.f32.mrf.mxu1 }
 0x369   : > { %v2109_v30 = vadd.f32 %v2108_v49, %v2031_v32 }
 0x36a   : > { %v2110_v41 = vpop.f32.mrf.mxu1 }
 0x36b   : > { %v2111_v22 = vadd.f32 %v2110_v41, %v2033_v48 }
 0x36c   : > { %v2192_v35 = vpop.f32.mrf.mxu1 }
 0x36d   : > { %v2193_v4 = vadd.f32 %v2192_v35, %v2109_v30 }
 0x36e   : > { %v2194_v62 = vpop.f32.mrf.mxu1 }
 0x36f   : > { %v2195_v37 = vadd.f32 %v2194_v62, %v2111_v22 }
 0x370   : > { %v2268_v50 = vpop.f32.mrf.mxu1 }
 0x371   : > { %v2269_v53 = vadd.f32 %v2268_v50, %v2193_v4 }
 0x372   : > { %v2270_v38 = vpop.f32.mrf.mxu1 }
 0x373   : > { %v2276_v46 = vrot.slane %v2269_v53, %v18423_v26  ;;  %v2271_v61 = vadd.f32 %v2270_v38, %v2195_v37 }
 0x375   : > { %v14816_v47 = vsub.f32 %v18425_v24, %v2276_v46  ;;  %v2280_v11 = vrot.slane %v2271_v61, %v18423_v26 }
 0x377   : > { %v2283_v54 = vmul.f32 %v14816_v47, %v14816_v47  ;;  %v14823_v0 = vsub.f32 %v18427_v44, %v2280_v11 }
 0x379   : > { %v2285_v22 = vsel %vm901_vm0, %v2283_v54, 0.0  ;;  %v2284_v50 = vmul.f32 %v14823_v0, %v14823_v0 }
 0x37a   : > { %v2286_v4 = vrot.slane %v2285_v22, 4 }
 0x37b   : > { %v2292_v38 = vsel %vm901_vm0, %v2284_v50, 0.0  ;;  %v18428_v50 = vld [vmem:[#allocation21_spill] sm:$0xff] }
 0x37c   : > { %v2287_v2 = vadd.f32 %v2286_v4, %v2285_v22  ;;  %v2293_v24 = vrot.slane %v2292_v38, 4  ;;  %v18429_v4 = vld [vmem:[#allocation23_spill] sm:$0xff] }
 0x37e   : > { %v2288_v46 = vrot.slane %v2287_v2, 2  ;;  %v2294_v37 = vadd.f32 %v2293_v24, %v2292_v38  ;;  %v18430_v38 = vld [vmem:[#allocation24_spill] sm:$0xff]  ;;  %v18432_v24 = vld [vmem:[#allocation26_spill] sm:$0xff] }
 0x380   : > { %v2295_v61 = vrot.slane %v2294_v37, 2  ;;  %v2289_v7 = vadd.f32 %v2288_v46, %v2287_v2  ;;  %v18431_v2 = vld [vmem:[#allocation25_spill] sm:$0xff]  ;;  %v18433_v46 = vld [vmem:[#allocation27_spill] sm:$0xff] }
 0x382   : > { %v2296_v49 = vadd.f32 %v2295_v61, %v2294_v37  ;;  %v2290_v40 = vrot.slane %v2289_v7, 1  ;;  %v18434_v37 = vld [vmem:[#allocation29_spill] sm:$0xff]  ;;  %v18435_v61 = vld [vmem:[#allocation31_spill] sm:$0xff] }
 0x384   : > { %v2297_v41 = vrot.slane %v2296_v49, 1  ;;  %v2291_v45 = vadd.f32 %v2290_v40, %v2289_v7  ;;  %v18436_v7 = vld [vmem:[#allocation32_spill] sm:$0xff]  ;;  %v18438_v40 = vld [vmem:[#allocation51_spill] sm:$0xff] }
 0x386   : > { %v2298_v32 = vadd.f32 %v2297_v41, %v2296_v49  ;;  %v14829_v35 = vand.u32 4294901760, %v2291_v45  ;;  %v18437_v49 = vld [vmem:[#allocation50_spill] sm:$0xff]  ;;  %v18439_v41 = vld [vmem:[#allocation53_spill] sm:$0xff] }
 0x388   : > { %v14831_v48 = vand.u32 4294901760, %v2298_v32  ;;  %v14834_v30 = vsub.f32 %v2291_v45, %v14829_v35  ;;  %v18440_v45 = vld [vmem:[#allocation55_spill] sm:$0xff] }
 0x38a   : > { %2637 = vmatprep.mubr.f32.mxu0 %v14831_v48  ;;  %v2397_v62 = vsub.f32 %v2298_v32, %v14831_v48  ;;  %v2404_v53 = vand.u32 4294901760, %v14834_v30  ;;  %v18441_v32 = vld [vmem:[#allocation57_spill] sm:$0xff] }
 0x38b   : > { %2639 = vmatmul.mubr.f32.vlgmr.msra.gmra.mxu0 %v14829_v35 }
 0x38c   : > { %12277 = vmatpush3.msra.mxu0 %v13930_v16  ;;  %v2398_v11 = vand.u32 4294901760, %v2397_v62  ;;  %v2405_v54 = vsub.f32 %v14834_v30, %v2404_v53 }
 0x38d   : > { %12278 = vmatprep.subr.mxu0 %v13939_v20 }
 0x38e   : > { %12279 = vmatpush3.msra.mxu0 %v13948_v23  ;;  %2881 = vmatprep.mubr.f32.mxu0 %v2398_v11  ;;  %v2399_v52 = vsub.f32 %v2397_v62, %v2398_v11  ;;  %v2406_v22 = vand.u32 4294901760, %v2405_v54  ;;  %v18443_v11 = vld [vmem:[#allocation62_spill] sm:$0xff]  ;;  %v18444_v54 = vld [vmem:[#allocation67_spill] sm:$0xff] }
 0x38f   : > { %12280 = vmatprep.subr.mxu0 %v13954_v25 }
 0x390   : > { %12281 = vmatpush3.msra.mxu0 %v13958_v27  ;;  %v2400_v44 = vand.u32 4294901760, %v2399_v52  ;;  %v18445_v52 = vld [vmem:[#allocation72_spill] sm:$0xff] }
 0x391   : > { %12282 = vmatprep.subr.mxu0 %v13968_v31 }
 0x392   : > { %12283 = vmatpush3.msra.mxu0 %v13975_v33  ;;  %2401 = vmatprep.mubr.f32.mxu1 %v2400_v44  ;;  %v18446_v44 = vld [vmem:[#allocation74_spill] sm:$0xff] }
 0x393   : > { %12284 = vmatprep.subr.mxu0 %v14007_v42  ;;  %2407 = vmatmul.mubr.f32.vlgmr.msra.gmra.mxu1 %v2406_v22  ;;  %v18447_v22 = vld [vmem:[#allocation76_spill] sm:$0xff] }
 0x394   : > { %12242 = vmatpush3.msra.mxu1 %v18428_v50  ;;  %12285 = vmatpush3.msra.mxu0 %v14009_v43  ;;  %v18448_v50 = vld [vmem:[#allocation79_spill] sm:$0xff] }
 0x395   : > { %12243 = vmatprep.subr.mxu1 %v18429_v4  ;;  %2774 = vmatprep.mubr.f32.mxu1 %v2397_v62  ;;  %v18442_v62 = vld [vmem:[#allocation59_spill] sm:$0xff]  ;;  %v18449_v4 = vld [vmem:[#allocation81_spill] sm:$0xff] }
 0x396   : > { %12286 = vmatprep.subr.mxu0 %v14110_v18  ;;  %12244 = vmatpush3.msra.mxu1 %v18430_v38  ;;  %v18450_v38 = vld [vmem:[#allocation82_spill] sm:$0xff] }
 0x397   : > { %12287 = vmatpush3.msra.mxu0 %v14115_v21  ;;  %12245 = vmatprep.subr.mxu1 %v18431_v2  ;;  %v18451_v2 = vld [vmem:[#allocation84_spill] sm:$0xff] }
 0x398   : > { %12288 = vmatprep.subr.mxu0 %v14123_v28  ;;  %12246 = vmatpush3.msra.mxu1 %v18432_v24  ;;  %v18452_v24 = vld [vmem:[#allocation91_spill] sm:$0xff] }
 0x399   : > { %12289 = vmatpush3.msra.mxu0 %v14132_v36  ;;  %12247 = vmatprep.subr.mxu1 %v18433_v46  ;;  %v18453_v46 = vld [vmem:[#allocation97_spill] sm:$0xff] }
 0x39a   : > { %12290 = vmatprep.subr.mxu0 %v14144_v51  ;;  %12248 = vmatpush3.msra.mxu1 %v18434_v37  ;;  %v18454_v37 = vld [vmem:[#allocation99_spill] sm:$0xff] }
 0x39b   : > { %12291 = vmatpush3.msra.mxu0 %v14156_v63  ;;  %12249 = vmatprep.subr.mxu1 %v18435_v61  ;;  %v18455_v61 = vld [vmem:[#allocation101_spill] sm:$0xff] }
 0x39c   : > { %12292 = vmatprep.subr.mxu0 %v14170_v5  ;;  %12250 = vmatpush3.msra.mxu1 %v18436_v7  ;;  %v18491_v7 = vld [vmem:[#allocation40_spill] sm:$0xff] }
 0x39d   : > { %12293 = vmatpush3.msra.mxu0 %v14184_v29  ;;  %12251 = vmatprep.subr.mxu1 %v18437_v49  ;;  %v18492_v49 = vld [vmem:[#allocation85_spill] sm:$0xff] }
 0x39e   : > { %12294 = vmatprep.subr.mxu0 %v14231_v39  ;;  %12252 = vmatpush3.msra.mxu1 %v18438_v40  ;;  %v18493_v40 = vld [vmem:[#allocation102_spill] sm:$0xff] }
 0x39f   : > { %12295 = vmatpush3.msra.mxu0 %v14244_v1  ;;  %12253 = vmatprep.subr.mxu1 %v18439_v41  ;;  %v18494_v41 = vld [vmem:[#allocation103_spill] sm:$0xff] }
 0x3a0   : > { %12296 = vmatprep.subr.mxu0 %v14258_v8  ;;  %12254 = vmatpush3.msra.mxu1 %v18440_v45  ;;  %v18495_v45 = vld [vmem:[#allocation19_spill] sm:$0xff] }
 0x3a1   : > { %12297 = vmatpush3.msra.mxu0 %v14272_v56  ;;  %12255 = vmatprep.subr.mxu1 %v18441_v32  ;;  %v18496_v32 = vld [vmem:[#allocation41_spill] sm:$0xff] }
 0x3a2   : > { %12298 = vmatprep.subr.mxu0 %v14282_v19  ;;  %12256 = vmatpush3.msra.mxu1 %v18442_v62 }
 0x3a3   : > { %12299 = vmatpush3.msra.mxu0 %v14284_v6  ;;  %12257 = vmatprep.subr.mxu1 %v18443_v11 }
 0x3a4   : > { %12300 = vmatprep.subr.mxu0 %v14299_v57  ;;  %12258 = vmatpush3.msra.mxu1 %v18444_v54 }
 0x3a5   : > { %12301 = vmatpush3.msra.mxu0 %v18327_v10  ;;  %12259 = vmatprep.subr.mxu1 %v18445_v52 }
 0x3a6   : > { %12302 = vmatprep.subr.mxu0 %v14364_v3  ;;  %12260 = vmatpush3.msra.mxu1 %v18446_v44 }
 0x3a7   : > { %12303 = vmatpush3.msra.mxu0 %v14377_v17  ;;  %12261 = vmatprep.subr.mxu1 %v18447_v22 }
 0x3a8   : > { %12304 = vmatprep.subr.mxu0 %v14393_v59  ;;  %12262 = vmatpush3.msra.mxu1 %v18448_v50 }
 0x3a9   : > { %12305 = vmatpush3.msra.mxu0 %v14404_v14  ;;  %12263 = vmatprep.subr.mxu1 %v18449_v4 }
 0x3aa   : > { %12306 = vmatprep.subr.mxu0 %v18333_v60  ;;  %12264 = vmatpush3.msra.mxu1 %v18450_v38 }
 0x3ab   : > { %12307 = vmatpush3.msra.mxu0 %v18335_v55  ;;  %12265 = vmatprep.subr.mxu1 %v18451_v2 }
 0x3ac   : > { %2885 = vmatmul.mubr.f32.vlgmr.msra.gmra.mxu0 %v2404_v53  ;;  %12346 = vmatprep.subr.mxu0 %v18337_v13  ;;  %v18456_v53 = vld [vmem:[#allocation106_spill] sm:$0xff]  ;;  %v18457_v13 = vld [vmem:[#allocation108_spill] sm:$0xff] }
 0x3ad   : > { %12266 = vmatpush3.msra.mxu1 %v18452_v24  ;;  %12347 = vmatpush3.msra.mxu0 %v13930_v16  ;;  %v18458_v16 = vld [vmem:[#allocation109_spill] sm:$0xff] }
 0x3ae   : > { %3155 = vmatprep.mubr.f32.mxu0 %v14831_v48  ;;  %12267 = vmatprep.subr.mxu1 %v18453_v46 }
 0x3af   : > { %12348 = vmatprep.subr.mxu0 %v13939_v20  ;;  %12268 = vmatpush3.msra.mxu1 %v18454_v37  ;;  %v18459_v20 = vld [vmem:[#allocation22_spill] sm:$0xff] }
 0x3b0   : > { %12349 = vmatpush3.msra.mxu0 %v13948_v23  ;;  %12269 = vmatprep.subr.mxu1 %v18455_v61  ;;  %v18460_v23 = vld [vmem:[#allocation28_spill] sm:$0xff] }
 0x3b1   : > { %12350 = vmatprep.subr.mxu0 %v13954_v25  ;;  %12270 = vmatpush3.msra.mxu1 %v18456_v53  ;;  %v18461_v25 = vld [vmem:[#allocation30_spill] sm:$0xff] }
 0x3b2   : > { %12351 = vmatpush3.msra.mxu0 %v13958_v27  ;;  %12271 = vmatprep.subr.mxu1 %v18457_v13  ;;  %v18462_v27 = vld [vmem:[#allocation33_spill] sm:$0xff] }
 0x3b3   : > { %12352 = vmatprep.subr.mxu0 %v13968_v31  ;;  %12272 = vmatpush3.msra.mxu1 %v18458_v16  ;;  %v18463_v31 = vld [vmem:[#allocation34_spill] sm:$0xff] }
 0x3b4   : > { %12353 = vmatpush3.msra.mxu0 %v13975_v33  ;;  %2777 = vmatmul.mubr.f32.vlgmr.msra.gmra.mxu1 %v14834_v30  ;;  %v18464_v33 = vld [vmem:[#allocation35_spill] sm:$0xff]  ;;  %v18490_v30 = vld [vmem:[#allocation113_spill] sm:$0xff] }
 0x3b5   : > { %12311 = vmatprep.subr.mxu1 %v18459_v20  ;;  %12354 = vmatprep.subr.mxu0 %v14007_v42  ;;  %v18465_v42 = vld [vmem:[#allocation36_spill] sm:$0xff] }
 0x3b6   : > { %12312 = vmatpush3.msra.mxu1 %v18460_v23  ;;  %3051 = vmatprep.mubr.f32.mxu1 %v14831_v48  ;;  %v18485_v48 = vld [vmem:[#allocation100_spill] sm:$0xff] }
 0x3b7   : > { %12355 = vmatpush3.msra.mxu0 %v14009_v43  ;;  %12313 = vmatprep.subr.mxu1 %v18461_v25  ;;  %v18466_v43 = vld [vmem:[#allocation37_spill] sm:$0xff] }
 0x3b8   : > { %12356 = vmatprep.subr.mxu0 %v14110_v18  ;;  %12314 = vmatpush3.msra.mxu1 %v18462_v27  ;;  %v18467_v18 = vld [vmem:[#allocation38_spill] sm:$0xff] }
 0x3b9   : > { %12357 = vmatpush3.msra.mxu0 %v14115_v21  ;;  %12315 = vmatprep.subr.mxu1 %v18463_v31  ;;  %v18468_v21 = vld [vmem:[#allocation39_spill] sm:$0xff] }
 0x3ba   : > { %12358 = vmatprep.subr.mxu0 %v14123_v28  ;;  %12316 = vmatpush3.msra.mxu1 %v18464_v33  ;;  %v18469_v28 = vld [vmem:[#allocation52_spill] sm:$0xff] }
 0x3bb   : > { %12359 = vmatpush3.msra.mxu0 %v14132_v36  ;;  %12317 = vmatprep.subr.mxu1 %v18465_v42  ;;  %v18470_v36 = vld [vmem:[#allocation54_spill] sm:$0xff] }
 0x3bc   : > { %12360 = vmatprep.subr.mxu0 %v14144_v51  ;;  %12318 = vmatpush3.msra.mxu1 %v18466_v43  ;;  %v18471_v51 = vld [vmem:[#allocation56_spill] sm:$0xff]  ;;  %v3658_v42 = vld [vmem:[%s698_s24] sm:$0x1]  ;;  %s11616_s24 = scalar_lea.sflag [#allocation4], %s13880_s7 }
 0x3bd   : > { %12361 = vmatpush3.msra.mxu0 %v14156_v63  ;;  %12319 = vmatprep.subr.mxu1 %v18467_v18  ;;  %v18472_v63 = vld [vmem:[#allocation58_spill] sm:$0xff]  ;;  %v3660_v43 = vsel %vm1778_vm1, %v3658_v42, 0 }
 0x3be   : > { %12362 = vmatprep.subr.mxu0 %v14170_v5  ;;  %12320 = vmatpush3.msra.mxu1 %v18468_v21  ;;  %v18473_v5 = vld [vmem:[#allocation61_spill] sm:$0xff]  ;;  %v14997_v18 = vand.u32 4294901760, %v3660_v43  ;;  %v2299_v21 = vld [vmem:[%s695_s16] sm:$0x1]  ;;  %s19172_s16 = sld [smem:[#allocation309_spill]] }
 0x3bf   : > { %12363 = vmatpush3.msra.mxu0 %v14184_v29  ;;  %12321 = vmatprep.subr.mxu1 %v18469_v28  ;;  %v18474_v29 = vld [vmem:[#allocation64_spill] sm:$0xff] }
 0x3c0   : > { %12364 = vmatprep.subr.mxu0 %v14231_v39  ;;  %12322 = vmatpush3.msra.mxu1 %v18470_v36  ;;  %v18475_v39 = vld [vmem:[#allocation66_spill] sm:$0xff] }
 0x3c1   : > { %12365 = vmatpush3.msra.mxu0 %v14244_v1  ;;  %12323 = vmatprep.subr.mxu1 %v18471_v51  ;;  %v18476_v1 = vld [vmem:[#allocation70_spill] sm:$0xff]  ;;  %v15000_v51 = vsub.f32 %v3660_v43, %v14997_v18  ;;  %v13406_v43 = vld [vmem:[%s13884_s11 + $0x1c8] ss:$16 sps:$4 sm:$0xff]  }
 0x3c2   : > { %12366 = vmatprep.subr.mxu0 %v14258_v8  ;;  %12324 = vmatpush3.msra.mxu1 %v18472_v63  ;;  %v18477_v8 = vld [vmem:[#allocation75_spill] sm:$0xff]  ;;  %v13403_v42 = vld [vmem:[%s13884_s11 + $0x1c0] ss:$16 sps:$4 sm:$0xff]  }
 0x3c3   : > { %12367 = vmatpush3.msra.mxu0 %v14272_v56  ;;  %12325 = vmatprep.subr.mxu1 %v18473_v5  ;;  %v18478_v56 = vld [vmem:[#allocation78_spill] sm:$0xff] }
 0x3c4   : > { %12368 = vmatprep.subr.mxu0 %v14282_v19  ;;  %12326 = vmatpush3.msra.mxu1 %v18474_v29  ;;  %v18479_v19 = vld [vmem:[#allocation80_spill] sm:$0xff]  ;;  %v3733_v29 = vand.u32 4294901760, %v15000_v51  ;;  %s705_s25 = scalar_lea.vmem %s19172_s16, %s13898_s26  ;;  %s594_s26 = scalar_lea.vmem [#allocation7], %s13880_s7 }
 0x3c5   : > { %12369 = vmatpush3.msra.mxu0 %v14284_v6  ;;  %12327 = vmatprep.subr.mxu1 %v18475_v39  ;;  %v18480_v6 = vld [vmem:[#allocation83_spill] sm:$0xff] }
 0x3c6   : > { %12370 = vmatprep.subr.mxu0 %v14299_v57  ;;  %12328 = vmatpush3.msra.mxu1 %v18476_v1  ;;  %v18481_v57 = vld [vmem:[#allocation87_spill] sm:$0xff] }
 0x3c7   : > { %12371 = vmatpush3.msra.mxu0 %v18327_v10  ;;  %12329 = vmatprep.subr.mxu1 %v18477_v8  ;;  %v18482_v10 = vld [vmem:[#allocation88_spill] sm:$0xff]  ;;  %v18497_v8 = vld [vmem:[#allocation42_spill] sm:$0xff] }
 0x3c8   : > { %12372 = vmatprep.subr.mxu0 %v14364_v3  ;;  %12330 = vmatpush3.msra.mxu1 %v18478_v56  ;;  %v18483_v3 = vld [vmem:[#allocation90_spill] sm:$0xff]  ;;  %v3734_v56 = vsub.f32 %v15000_v51, %v3733_v29 }
 0x3c9   : > { %12373 = vmatpush3.msra.mxu0 %v14377_v17  ;;  %12331 = vmatprep.subr.mxu1 %v18479_v19  ;;  %v18484_v17 = vld [vmem:[#allocation94_spill] sm:$0xff]  ;;  %v18498_v19 = vld [vmem:[#allocation43_spill] sm:$0xff] }
 0x3ca   : > { %12374 = vmatprep.subr.mxu0 %v14393_v59  ;;  %12332 = vmatpush3.msra.mxu1 %v18480_v6  ;;  %v18486_v59 = vld [vmem:[#allocation105_spill] sm:$0xff] }
 0x3cb   : > { %12375 = vmatpush3.msra.mxu0 %v14404_v14  ;;  %12333 = vmatprep.subr.mxu1 %v18481_v57  ;;  %v18487_v14 = vld [vmem:[#allocation107_spill] sm:$0xff]  ;;  %v18499_v57 = vld [vmem:[#allocation44_spill] sm:$0xff] }
 0x3cc   : > { %12376 = vmatprep.subr.mxu0 %v18333_v60  ;;  %12334 = vmatpush3.msra.mxu1 %v18482_v10  ;;  %v18488_v60 = vld [vmem:[#allocation110_spill] sm:$0xff] }
 0x3cd   : > { %12377 = vmatpush3.msra.mxu0 %v18335_v55  ;;  %12335 = vmatprep.subr.mxu1 %v18483_v3  ;;  %v18489_v55 = vld [vmem:[#allocation112_spill] sm:$0xff]  ;;  %v3735_v3 = vand.u32 4294901760, %v3734_v56  ;;  %v13424_v56 = vld [vmem:[%s13884_s11 + $0x168] ss:$16 sps:$4 sm:$0xff]  }
 0x3ce   : > { %3157 = vmatmul.mubr.f32.vlgmr.msra.gmra.mxu0 %v14829_v35  ;;  %12336 = vmatpush3.msra.mxu1 %v18484_v17  ;;  %v18500_v17 = vld [vmem:[#allocation45_spill] sm:$0xff] }
 0x3cf   : > { %12337 = vmatprep.subr.mxu1 %v18485_v48  ;;  %3369 = vmatprep.subr.mxu0 %v14710_v58  ;;  %v18501_v48 = vld [vmem:[#allocation46_spill] sm:$0xff] }
 0x3d0   : > { %12338 = vmatpush3.msra.mxu1 %v18486_v59  ;;  %3372 = vmatpush1.msra.mxu0 %v14726_v34  ;;  %v18502_v59 = vld [vmem:[#allocation47_spill] sm:$0xff] }
 0x3d1   : > { %12339 = vmatprep.subr.mxu1 %v18487_v14  ;;  %3375 = vmatprep.subr.mxu0 %v14729_v15  ;;  %v13357_v14 = vld [vmem:[%s13884_s11 + $0xc4] ss:$16 sps:$4 sm:$0xff]  }
 0x3d2   : > { %12340 = vmatpush3.msra.mxu1 %v18488_v60  ;;  %3378 = vmatpush1.msra.mxu0 %v14732_v12  ;;  %v13360_v60 = vld [vmem:[%s13884_s11 + $0xcc] ss:$16 sps:$4 sm:$0xff]  }
 0x3d3   : > { %12341 = vmatprep.subr.mxu1 %v18489_v55  ;;  %3411 = vmatprep.mubr.f32.mxu0 %v18421_v9  ;;  %v13355_v55 = vld [vmem:[%s13884_s11 + $0xc0] ss:$16 sps:$4 sm:$0xff]  }
 0x3d4   : > { %12342 = vmatpush3.msra.mxu1 %v18490_v30  ;;  %3529 = vmatprep.subr.mxu0 %v18491_v7  ;;  %v13363_v30 = vld [vmem:[%s13884_s11 + $0xa4] ss:$16 sps:$4 sm:$0xff]  }
 0x3d5   : > { %3053 = vmatmul.mubr.f32.vlgmr.msra.gmra.mxu1 %v14829_v35  ;;  %3196 = vmatprep.subr.mxu1 %v18492_v49 }
 0x3d6   : > { %3198 = vmatpush1.msra.mxu1 %v18493_v40  ;;  %3235 = vmatprep.mubr.f32.mxu1 %v18421_v9 }
 0x3d7   : > { %3200 = vmatprep.subr.mxu1 %v18494_v41 }
 0x3d8   : > { %3202 = vmatpush1.msra.mxu1 %v18495_v45 }
 0x3d9   : > { %3280 = vmatprep.subr.mxu1 %v18496_v32 }
 0x44b   : > { %v12238_v11 = vpop.f32.mrf.mxu0 }
 0x44d   : > { %v12239_v22 = vpop.f32.mrf.mxu0 }
 0x44e   : > { %v12240_v38 = vadd.f32 %v12239_v22, %v12238_v11  ;;  %v13375_v11 = vld [vmem:[%s13884_s11 + $0x64] ss:$16 sps:$4 sm:$0xff]  }
 0x44f   : > { %v13381_v22 = vld [vmem:[%s13884_s11 + $0x44] ss:$16 sps:$4 sm:$0xff]  }
 0x453   : > { %v12203_v62 = vpop.f32.mrf.mxu1 }
 0x455   : > { %v12204_v54 = vpop.f32.mrf.mxu1 }
 0x456   : > { %v12205_v44 = vadd.f32 %v12204_v54, %v12203_v62  ;;  %v13367_v62 = vld [vmem:[%s13884_s11 + $0x80] ss:$16 sps:$4 sm:$0xff]   ;;  %v13370_v54 = vld [vmem:[%s13884_s11 + $0x88] ss:$16 sps:$4 sm:$0xff]  }
 0x458   : > { %v2409_v4 = vadd.f32 1e-05, %v12205_v44  ;;  %v13373_v44 = vld [vmem:[%s13884_s11 + $0x60] ss:$16 sps:$4 sm:$0xff]  }
 0x45a   : > { %v2641_v46 = vadd.f32 %v12240_v38, %v2409_v4  ;;  %v13379_v4 = vld [vmem:[%s13884_s11 + $0x40] ss:$16 sps:$4 sm:$0xff]   ;;  %v13382_v38 = vld [vmem:[%s13884_s11 + $0x48] ss:$16 sps:$4 sm:$0xff]  }
 0x46c   : > { %v12308_v50 = vpop.f32.mrf.mxu0 }
 0x46e   : > { %v12309_v24 = vpop.f32.mrf.mxu0 }
 0x46f   : > { %v12310_v13 = vadd.f32 %v12309_v24, %v12308_v50  ;;  %v13376_v50 = vld [vmem:[%s13884_s11 + $0x68] ss:$16 sps:$4 sm:$0xff]   ;;  %v13387_v24 = vld [vmem:[%s13884_s11 + $0x24] ss:$16 sps:$4 sm:$0xff]  }
 0x474   : > { %v12273_v52 = vpop.f32.mrf.mxu1 }
 0x476   : > { %v12274_v35 = vpop.f32.mrf.mxu1 }
 0x477   : > { %v12275_v2 = vadd.f32 %v12274_v35, %v12273_v52  ;;  %v13378_v52 = vld [vmem:[%s13884_s11 + $0x6c] ss:$16 sps:$4 sm:$0xff]  }
 0x478   : > { %v13384_v35 = vld [vmem:[%s13884_s11 + $0x4c] ss:$16 sps:$4 sm:$0xff]  }
 0x479   : > { %v2779_v61 = vadd.f32 %v12275_v2, %v2641_v46  ;;  %v13385_v2 = vld [vmem:[%s13884_s11 + $0x20] ss:$16 sps:$4 sm:$0xff]   ;;  %v13388_v46 = vld [vmem:[%s13884_s11 + $0x28] ss:$16 sps:$4 sm:$0xff]  }
 0x47b   : > { %v2887_v23 = vadd.f32 %v12310_v13, %v2779_v61  ;;  %v13391_v61 = vld [vmem:[%s13884_s11] ss:$16 sps:$4 sm:$0xff]   ;;  %v13394_v13 = vld [vmem:[%s13884_s11 + $0x8] ss:$16 sps:$4 sm:$0xff]  }
 0x48e   : > { %v12378_v37 = vpop.f32.mrf.mxu0 }
 0x490   : > { %v12379_v16 = vpop.f32.mrf.mxu0 }
 0x491   : > { %v12380_v27 = vadd.f32 %v12379_v16, %v12378_v37  ;;  %v13390_v37 = vld [vmem:[%s13884_s11 + $0x2c] ss:$16 sps:$4 sm:$0xff]  }
 0x492   : > { %v13396_v16 = vld [vmem:[%s13884_s11 + $0xc] ss:$16 sps:$4 sm:$0xff]  }
 0x495   : > { %v12343_v53 = vpop.f32.mrf.mxu1 }
 0x497   : > { %v12344_v20 = vpop.f32.mrf.mxu1 }
 0x498   : > { %v12345_v25 = vadd.f32 %v12344_v20, %v12343_v53  ;;  %v13393_v53 = vld [vmem:[%s13884_s11 + $0x4] ss:$16 sps:$4 sm:$0xff]  }
 0x499   : > { %v13399_v20 = vld [vmem:[%s13884_s11 + $0x1e4] ss:$16 sps:$4 sm:$0xff]  }
 0x49a   : > { %v3055_v31 = vadd.f32 %v12345_v25, %v2887_v23  ;;  %v13402_v23 = vld [vmem:[%s13884_s11 + $0x1ec] ss:$16 sps:$4 sm:$0xff]   ;;  %v13397_v25 = vld [vmem:[%s13884_s11 + $0x1e0] ss:$16 sps:$4 sm:$0xff]  }
 0x49c   : > { %v3159_v33 = vadd.f32 %v12380_v27, %v3055_v31  ;;  %v13400_v27 = vld [vmem:[%s13884_s11 + $0x1e8] ss:$16 sps:$4 sm:$0xff]   ;;  %v13405_v31 = vld [vmem:[%s13884_s11 + $0x1c4] ss:$16 sps:$4 sm:$0xff]  }
 0x49e   : > { %13477 = vrsqrt.f32 %v3159_v33  ;;  %v13408_v33 = vld [vmem:[%s13884_s11 + $0x1cc] ss:$16 sps:$4 sm:$0xff]  }
 0x4ab   : > { %v13478_v28 = vpop.eup %13477 }
 0x4ac   : > { %v3163_v36 = vmul.f32 %v13478_v28, %v2299_v21  ;;  %v13414_v21 = vld [vmem:[%s13884_s11 + $0x1ac] ss:$16 sps:$4 sm:$0xff]   ;;  %v13409_v28 = vld [vmem:[%s13884_s11 + $0x1a0] ss:$16 sps:$4 sm:$0xff]  }
 0x4ae   : > { %v3165_v63 = vsel %vm1778_vm1, %v3163_v36, 0  ;;  %v13412_v36 = vld [vmem:[%s13884_s11 + $0x1a8] ss:$16 sps:$4 sm:$0xff]  }
 0x4af   : > { %v3236_v5 = vand.u32 4294901760, %v3165_v63 }
 0x4b1   : > { %v3237_v39 = vsub.f32 %v3165_v63, %v3236_v5  ;;  %v13420_v63 = vld [vmem:[%s13884_s11 + $0x18c] ss:$16 sps:$4 sm:$0xff]  }
 0x4b3   : > { %3414 = vmatmul.mubr.f32.vlgmr.msra.gmra.mxu0 %v3237_v39  ;;  %v3238_v1 = vand.u32 4294901760, %v3237_v39 }
 0x4b4   : > { %3533 = vmatpush1.msra.mxu0 %v18497_v8  ;;  %3574 = vmatprep.mubr.f32.mxu0 %v18421_v9 }
 0x4b5   : > { %3537 = vmatprep.subr.mxu0 %v18498_v19  ;;  %v3239_v6 = vsub.f32 %v3237_v39, %v3238_v1  ;;  %v13423_v39 = vld [vmem:[%s13884_s11 + $0x164] ss:$16 sps:$4 sm:$0xff]  }
 0x4b6   : > { %3541 = vmatpush1.msra.mxu0 %v18499_v57 }
 0x4b7   : > { %3576 = vmatmul.mubr.f32.vlgmr.msra.gmra.mxu0 %v3236_v5  ;;  %v3240_v10 = vand.u32 4294901760, %v3239_v6  ;;  %3691 = vmatprep.subr.mxu0 %v18492_v49  ;;  %v13432_v6 = vld [vmem:[%s13884_s11 + $0x14c] ss:$16 sps:$4 sm:$0xff]  }
 0x4b8   : > { %3693 = vmatpush1.msra.mxu0 %v18493_v40  ;;  %3730 = vmatprep.mubr.f32.mxu0 %v18421_v9 }
 0x4b9   : > { %3241 = vmatmul.mubr.f32.vlgmr.msra.gmra.mxu1 %v3240_v10  ;;  %3695 = vmatprep.subr.mxu0 %v18494_v41  ;;  %v13430_v10 = vld [vmem:[%s13884_s11 + $0x148] ss:$16 sps:$4 sm:$0xff]  }
 0x4ba   : > { %3286 = vmatpush1.msra.mxu1 %v18500_v17  ;;  %3331 = vmatprep.mubr.f32.mxu1 %v18421_v9 }
 0x4bb   : > { %3292 = vmatprep.subr.mxu1 %v18501_v48  ;;  %3697 = vmatpush1.msra.mxu0 %v18495_v45 }
 0x4bc   : > { %3298 = vmatpush1.msra.mxu1 %v18502_v59  ;;  %3736 = vmatmul.mubr.f32.vlgmr.msra.gmra.mxu0 %v3735_v3  ;;  %v13435_v3 = vld [vmem:[%s13884_s11 + $0x124] ss:$16 sps:$4 sm:$0xff]  }
 0x4bd   : > { %3449 = vmatprep.subr.mxu1 %v18492_v49  ;;  %3333 = vmatmul.mubr.f32.vlgmr.msra.gmra.mxu1 %v3236_v5 }
 0x4be   : > { %3451 = vmatpush1.msra.mxu1 %v18493_v40  ;;  %3488 = vmatprep.mubr.f32.mxu1 %v18421_v9 }
 0x4bf   : > { %3453 = vmatprep.subr.mxu1 %v18494_v41  ;;  %3864 = vmatprep.subr.mxu0 %v14710_v58  ;;  %v13349_v58 = vld [vmem:[%s13884_s11 + $0xe0] ss:$16 sps:$4 sm:$0xff]  }
 0x4c0   : > { %3455 = vmatpush1.msra.mxu1 %v18495_v45  ;;  %3867 = vmatpush1.msra.mxu0 %v14726_v34  ;;  %v13351_v34 = vld [vmem:[%s13884_s11 + $0xe4] ss:$16 sps:$4 sm:$0xff]  }
 0x4c1   : > { %3611 = vmatprep.subr.mxu1 %v18492_v49  ;;  %3492 = vmatmul.mubr.f32.vlgmr.msra.gmra.mxu1 %v3238_v1  ;;  %v13426_v1 = vld [vmem:[%s13884_s11 + $0x16c] ss:$16 sps:$4 sm:$0xff]  }
 0x4c2   : > { %3613 = vmatpush1.msra.mxu1 %v18493_v40  ;;  %3650 = vmatprep.mubr.f32.mxu1 %v18421_v9 }
 0x4c3   : > { %3615 = vmatprep.subr.mxu1 %v18494_v41  ;;  %3870 = vmatprep.subr.mxu0 %v14729_v15  ;;  %v13354_v15 = vld [vmem:[%s13884_s11 + $0xec] ss:$16 sps:$4 sm:$0xff]  }
 0x4c4   : > { %3617 = vmatpush1.msra.mxu1 %v18495_v45  ;;  %3873 = vmatpush1.msra.mxu0 %v14732_v12  ;;  %v13352_v12 = vld [vmem:[%s13884_s11 + $0xe8] ss:$16 sps:$4 sm:$0xff]  }
 0x4c5   : > { %3775 = vmatprep.subr.mxu1 %v18496_v32  ;;  %3652 = vmatmul.mubr.f32.vlgmr.msra.gmra.mxu1 %v3236_v5  ;;  %v13372_v32 = vld [vmem:[%s13884_s11 + $0x8c] ss:$16 sps:$4 sm:$0xff]   ;;  %v13415_v5 = vld [vmem:[%s13884_s11 + $0x180] ss:$16 sps:$4 sm:$0xff]  }
 0x4c6   : > { %3781 = vmatpush1.msra.mxu1 %v18500_v17  ;;  %3826 = vmatprep.mubr.f32.mxu1 %v18421_v9  ;;  %v13438_v17 = vld [vmem:[%s13884_s11 + $0x12c] ss:$16 sps:$4 sm:$0xff]  }
 0x4c7   : > { %3787 = vmatprep.subr.mxu1 %v18501_v48  ;;  %3906 = vmatprep.mubr.f32.mxu0 %v18421_v9  ;;  %v13433_v48 = vld [vmem:[%s13884_s11 + $0x120] ss:$16 sps:$4 sm:$0xff]  }
 0x4c8   : > { %3793 = vmatpush1.msra.mxu1 %v18502_v59  ;;  %3909 = vmatmul.mubr.f32.vlgmr.msra.gmra.mxu0 %v15000_v51  ;;  %v13417_v51 = vld [vmem:[%s13884_s11 + $0x184] ss:$16 sps:$4 sm:$0xff]   ;;  %v13436_v59 = vld [vmem:[%s13884_s11 + $0x128] ss:$16 sps:$4 sm:$0xff]  }
 0x4c9   : > { %3944 = vmatprep.subr.mxu1 %v18492_v49  ;;  %3828 = vmatmul.mubr.f32.vlgmr.msra.gmra.mxu1 %v14997_v18 }
 0x4ca   : > { %3946 = vmatpush1.msra.mxu1 %v18493_v40  ;;  %4024 = vmatprep.subr.mxu0 %v18491_v7  ;;  %v13358_v7 = vld [vmem:[%s13884_s11 + $0xc8] ss:$16 sps:$4 sm:$0xff]  }
 0x4cb   : > { %3948 = vmatprep.subr.mxu1 %v18494_v41  ;;  %4028 = vmatpush1.msra.mxu0 %v18497_v8  ;;  %v13421_v8 = vld [vmem:[%s13884_s11 + $0x160] ss:$16 sps:$4 sm:$0xff]  }
 0x4cc   : > { %3950 = vmatpush1.msra.mxu1 %v18495_v45  ;;  %4032 = vmatprep.subr.mxu0 %v18498_v19  ;;  %v13429_v19 = vld [vmem:[%s13884_s11 + $0x144] ss:$16 sps:$4 sm:$0xff]  }
 0x4cd   : > { %3983 = vmatprep.mubr.f32.mxu1 %v18421_v9  ;;  %4036 = vmatpush1.msra.mxu0 %v18499_v57  ;;  %v13427_v57 = vld [vmem:[%s13884_s11 + $0x140] ss:$16 sps:$4 sm:$0xff]  }
 0x4ce   : > { %4069 = vmatprep.mubr.f32.mxu0 %v18421_v9  ;;  %4106 = vmatprep.subr.mxu1 %v18492_v49  ;;  %v13366_v49 = vld [vmem:[%s13884_s11 + $0xac] ss:$16 sps:$4 sm:$0xff]  }
 0x4cf   : > { %3987 = vmatmul.mubr.f32.vlgmr.msra.gmra.mxu1 %v3733_v29  ;;  %4071 = vmatmul.mubr.f32.vlgmr.msra.gmra.mxu0 %v14997_v18  ;;  %v13418_v29 = vld [vmem:[%s13884_s11 + $0x188] ss:$16 sps:$4 sm:$0xff]  }
 0x4d0   : > { %4108 = vmatpush1.msra.mxu1 %v18493_v40  ;;  %4145 = vmatprep.mubr.f32.mxu1 %v18421_v9  ;;  %v13361_v40 = vld [vmem:[%s13884_s11 + $0xa0] ss:$16 sps:$4 sm:$0xff]  }
 0x4d1   : > { %4110 = vmatprep.subr.mxu1 %v18494_v41  ;;  %4581 = vmatprep.subr.bf16.mxu0 %v13351_v34  ;;  %v13369_v41 = vld [vmem:[%s13884_s11 + $0x84] ss:$16 sps:$4 sm:$0xff]  }
 0x4d2   : > { %4112 = vmatpush1.msra.mxu1 %v18495_v45  ;;  %4582 = vmatpush1.bf16.msra.mxu0 %v13349_v58  ;;  %v13364_v45 = vld [vmem:[%s13884_s11 + $0xa8] ss:$16 sps:$4 sm:$0xff]   ;;  %v13441_v34 = vld [vmem:[%s13884_s11 + $0x104] ss:$16 sps:$4 sm:$0xff]   ;;  %v13444_v58 = vld [vmem:[%s13884_s11 + $0x10c] ss:$16 sps:$4 sm:$0xff]  }
 0x4d3   : > { %4147 = vmatmul.mubr.f32.vlgmr.msra.gmra.mxu1 %v14997_v18  ;;  %4622 = vmatprep.subr.bf16.mxu1 %v13354_v15  ;;  %v13411_v18 = vld [vmem:[%s13884_s11 + $0x1a4] ss:$16 sps:$4 sm:$0xff]   ;;  %v13439_v15 = vld [vmem:[%s13884_s11 + $0x100] ss:$16 sps:$4 sm:$0xff]  }
 0x4d4   : > { %4623 = vmatpush1.bf16.msra.mxu1 %v13352_v12  ;;  %4583 = vmatprep.subr.bf16.mxu0 %v13357_v14  ;;  %v13442_v12 = vld [vmem:[%s13884_s11 + $0x108] ss:$16 sps:$4 sm:$0xff]   ;;  %v4687_v9 = vld [vmem:[%s18503_s10 + $0xa0] sm:$0xff] }
 0x4d5   : > { %4624 = vmatprep.subr.bf16.mxu1 %v13360_v60  ;;  %v4698_v14 = vld [vmem:[%s18503_s10 + $0xf8] sm:$0xff] }
 0x4d6   : > { %4584 = vmatpush1.bf16.msra.mxu0 %v13355_v55  ;;  %v15124_v60 = vand.u32 4294901760, %v4698_v14 }
 0x4d7   : > { %4585 = vmatprep.subr.bf16.mxu0 %v13363_v30 }
 0x4d8   : > { %4625 = vmatpush1.bf16.msra.mxu1 %v13358_v7  ;;  %18504 = vst [vmem:[#allocation48_spill] sm:$0xff] %v15124_v60  ;;  %v15127_v55 = vsub.f32 %v4698_v14, %v15124_v60 }
 0x4d9   : > { %4626 = vmatprep.subr.bf16.mxu1 %v13366_v49 }
 0x4da   : > { %4586 = vmatpush1.bf16.msra.mxu0 %v13361_v40  ;;  %18505 = vst [vmem:[#allocation49_spill] sm:$0xff] %v15127_v55  ;;  %v15131_v30 = vand.u32 4294901760, %v15127_v55 }
 0x4db   : > { %4587 = vmatprep.subr.bf16.mxu0 %v13369_v41 }
 0x4dc   : > { %4627 = vmatpush1.bf16.msra.mxu1 %v13364_v45  ;;  %18506 = vst [vmem:[#allocation60_spill] sm:$0xff] %v15131_v30  ;;  %v4995_v7 = vsub.f32 %v15127_v55, %v15131_v30 }
 0x4dd   : > { %4628 = vmatprep.subr.bf16.mxu1 %v13372_v32 }
 0x4de   : > { %4588 = vmatpush1.bf16.msra.mxu0 %v13367_v62  ;;  %v15135_v49 = vand.u32 4294901760, %v4995_v7 }
 0x4df   : > { %4589 = vmatprep.subr.bf16.mxu0 %v13375_v11 }
 0x4e0   : > { %4629 = vmatpush1.bf16.msra.mxu1 %v13370_v54  ;;  %18507 = vst [vmem:[#allocation63_spill] sm:$0xff] %v15135_v49 }
 0x4e1   : > { %4630 = vmatprep.subr.bf16.mxu1 %v13378_v52 }
 0x4e2   : > { %4590 = vmatpush1.bf16.msra.mxu0 %v13373_v44 }
 0x4e3   : > { %4591 = vmatprep.subr.bf16.mxu0 %v13381_v22 }
 0x4e4   : > { %4631 = vmatpush1.bf16.msra.mxu1 %v13376_v50 }
 0x4e5   : > { %4632 = vmatprep.subr.bf16.mxu1 %v13384_v35 }
 0x4e6   : > { %4592 = vmatpush1.bf16.msra.mxu0 %v13379_v4 }
 0x4e7   : > { %4593 = vmatprep.subr.bf16.mxu0 %v13387_v24 }
 0x4e8   : > { %4633 = vmatpush1.bf16.msra.mxu1 %v13382_v38 }
 0x4e9   : > { %4634 = vmatprep.subr.bf16.mxu1 %v13390_v37  ;;  %v4682_v37 = vld [vmem:[%s18503_s10 + $0x78] sm:$0xff] }
 0x4ea   : > { %4594 = vmatpush1.bf16.msra.mxu0 %v13385_v2 }
 0x4eb   : > { %4595 = vmatprep.subr.bf16.mxu0 %v13393_v53 }
 0x4ec   : > { %4635 = vmatpush1.bf16.msra.mxu1 %v13388_v46 }
 0x4ed   : > { %4636 = vmatprep.subr.bf16.mxu1 %v13396_v16 }
 0x4ee   : > { %4596 = vmatpush1.bf16.msra.mxu0 %v13391_v61 }
 0x4ef   : > { %4597 = vmatprep.subr.bf16.mxu0 %v13399_v20 }
 0x4f0   : > { %4637 = vmatpush1.bf16.msra.mxu1 %v13394_v13 }
 0x4f1   : > { %4638 = vmatprep.subr.bf16.mxu1 %v13402_v23  ;;  %v15141_v23 = vand.u32 4294901760, %v4682_v37 }
 0x4f2   : > { %4598 = vmatpush2.bf16.msra.mxu0 %v13397_v25 }
 0x4f3   : > { %4599 = vmatprep.subr.bf16.mxu0 %v13405_v31  ;;  %18508 = vst [vmem:[#allocation65_spill] sm:$0xff] %v15141_v23 }
 0x4f4   : > { %4639 = vmatpush2.bf16.msra.mxu1 %v13400_v27  ;;  %v4697_v27 = vld [vmem:[%s18503_s10 + $0xf0] sm:$0xff] }
 0x4f5   : > { %4640 = vmatprep.subr.bf16.mxu1 %v13408_v33 }
 0x4f6   : > { %4600 = vmatpush2.bf16.msra.mxu0 %v13403_v42 }
 0x4f7   : > { %4601 = vmatprep.subr.bf16.mxu0 %v13411_v18 }
 0x4f8   : > { %4641 = vmatpush2.bf16.msra.mxu1 %v13406_v43  ;;  %v4681_v43 = vld [vmem:[%s18503_s10 + $0x70] sm:$0xff] }
 0x4f9   : > { %4642 = vmatprep.subr.bf16.mxu1 %v13414_v21 }
 0x4fa   : > { %4602 = vmatpush2.bf16.msra.mxu0 %v13409_v28 }
 0x4fb   : > { %4603 = vmatprep.subr.bf16.mxu0 %v13417_v51  ;;  %v4680_v51 = vld [vmem:[%s18503_s10 + $0x68] sm:$0xff] }
 0x4fc   : > { %4643 = vmatpush2.bf16.msra.mxu1 %v13412_v36  ;;  %v4696_v36 = vld [vmem:[%s18503_s10 + $0xe8] sm:$0xff] }
 0x4fd   : > { %4644 = vmatprep.subr.bf16.mxu1 %v13420_v63  ;;  %v15156_v63 = vsub.f32 %v4682_v37, %v15141_v23 }
 0x4fe   : > { %4604 = vmatpush2.bf16.msra.mxu0 %v13415_v5  ;;  %v15158_v5 = vand.u32 4294901760, %v4697_v27 }
 0x4ff   : > { %4605 = vmatprep.subr.bf16.mxu0 %v13423_v39  ;;  %18509 = vst [vmem:[#allocation68_spill] sm:$0xff] %v15156_v63  ;;  %v15160_v39 = vand.u32 4294901760, %v4681_v43 }
 0x500   : > { %4645 = vmatpush2.bf16.msra.mxu1 %v13418_v29  ;;  %18510 = vst [vmem:[#allocation69_spill] sm:$0xff] %v15158_v5 }
 0x501   : > { %4646 = vmatprep.subr.bf16.mxu1 %v13426_v1  ;;  %18511 = vst [vmem:[#allocation71_spill] sm:$0xff] %v15160_v39  ;;  %v4695_v1 = vld [vmem:[%s18503_s10 + $0xe0] sm:$0xff] }
 0x502   : > { %4606 = vmatpush2.bf16.msra.mxu0 %v13421_v8 }
 0x503   : > { %4607 = vmatprep.subr.bf16.mxu0 %v13429_v19 }
 0x504   : > { %4647 = vmatpush2.bf16.msra.mxu1 %v13424_v56 }
 0x505   : > { %4648 = vmatprep.subr.bf16.mxu1 %v13432_v6  ;;  %v15165_v6 = vand.u32 4294901760, %v4696_v36 }
 0x506   : > { %4608 = vmatpush2.bf16.msra.mxu0 %v13427_v57  ;;  %v15167_v57 = vand.u32 4294901760, %v4680_v51 }
 0x507   : > { %4609 = vmatprep.subr.bf16.mxu0 %v13435_v3  ;;  %18512 = vst [vmem:[#allocation73_spill] sm:$0xff] %v15165_v6 }
 0x508   : > { %4649 = vmatpush2.bf16.msra.mxu1 %v13430_v10  ;;  %18513 = vst [vmem:[#allocation77_spill] sm:$0xff] %v15167_v57  ;;  %v4679_v10 = vld [vmem:[%s18503_s10 + $0x60] sm:$0xff] }
 0x509   : > { %4650 = vmatprep.subr.bf16.mxu1 %v13438_v17 }
 0x50a   : > { %4610 = vmatpush2.bf16.msra.mxu0 %v13433_v48  ;;  %v4694_v48 = vld [vmem:[%s18503_s10 + $0xd8] sm:$0xff] }
 0x50b   : > { %4611 = vmatprep.subr.bf16.mxu0 %v13441_v34  ;;  %v15176_v34 = vand.u32 4294901760, %v15156_v63 }
 0x50c   : > { %4651 = vmatpush2.bf16.msra.mxu1 %v13436_v59 }
 0x50d   : > { %4652 = vmatprep.subr.bf16.mxu1 %v13444_v58  ;;  %18514 = vst [vmem:[#allocation86_spill] sm:$0xff] %v15176_v34  ;;  %v15179_v58 = vsub.f32 %v4697_v27, %v15158_v5 }
 0x50e   : > { %4612 = vmatpush2.bf16.msra.mxu0 %v13439_v15  ;;  %v15181_v15 = vand.u32 4294901760, %v4695_v1 }
 0x50f   : > { %12381 = vmatprep.subr.mxu0 %v15124_v60  ;;  %18515 = vst [vmem:[#allocation89_spill] sm:$0xff] %v15179_v58 }
 0x510   : > { %4653 = vmatpush2.bf16.msra.mxu1 %v13442_v12  ;;  %18516 = vst [vmem:[#allocation92_spill] sm:$0xff] %v15181_v15  ;;  %v4678_v12 = vld [vmem:[%s18503_s10 + $0x58] sm:$0xff] }
 0x511   : > { %12416 = vmatprep.subr.mxu1 %v15135_v49 }
 0x573   : > { %v3415_v40 = vpop.f32.mrf.mxu0 }
 0x575   : > { %v3417_v41 = vpop.f32.mrf.mxu0 }
 0x577   : > { %v3577_v32 = vpop.f32.mrf.mxu0 }
 0x579   : > { %v3242_v45 = vpop.f32.mrf.mxu1  ;;  %v3579_v54 = vpop.f32.mrf.mxu0 }
 0x57b   : > { %v3244_v62 = vpop.f32.mrf.mxu1 }
 0x57c   : > { %v3737_v50 = vpop.f32.mrf.mxu0 }
 0x57d   : > { %v3334_v11 = vpop.f32.mrf.mxu1 }
 0x57e   : > { %v3335_v52 = vadd.f32 %v3334_v11, %v3242_v45  ;;  %v3739_v24 = vpop.f32.mrf.mxu0  ;;  %v15193_v11 = vsub.f32 %v4696_v36, %v15165_v6 }
 0x57f   : > { %v3336_v44 = vpop.f32.mrf.mxu1 }
 0x580   : > { %v3337_v22 = vadd.f32 %v3336_v44, %v3244_v62  ;;  %v3416_v4 = vadd.f32 %v3415_v40, %v3335_v52  ;;  %v15187_v40 = vsub.f32 %v4681_v43, %v15160_v39  ;;  %18519 = vst [vmem:[#allocation96_spill] sm:$0xff] %v15193_v11  ;;  %v15198_v52 = vand.u32 4294901760, %v4694_v48 }
 0x581   : > { %v3493_v35 = vpop.f32.mrf.mxu1 }
 0x582   : > { %v3418_v2 = vadd.f32 %v3417_v41, %v3337_v22  ;;  %v3494_v61 = vadd.f32 %v3493_v35, %v3416_v4  ;;  %18517 = vst [vmem:[#allocation93_spill] sm:$0xff] %v15187_v40  ;;  %v15189_v41 = vand.u32 4294901760, %v4679_v10  ;;  %18521 = vst [vmem:[#allocation104_spill] sm:$0xff] %v15198_v52  ;;  %v15201_v35 = vand.u32 4294901760, %v4678_v12 }
 0x583   : > { %v3495_v38 = vpop.f32.mrf.mxu1  ;;  %v15211_v37 = vand.u32 4294901760, %v15187_v40 }
 0x584   : > { %v3496_v13 = vadd.f32 %v3495_v38, %v3418_v2  ;;  %v3578_v31 = vadd.f32 %v3577_v32, %v3494_v61  ;;  %18518 = vst [vmem:[#allocation95_spill] sm:$0xff] %v15189_v41  ;;  %18522 = vst [vmem:[#allocation111_spill] sm:$0xff] %v15201_v35  ;;  %v15204_v38 = vand.u32 4294901760, %v15179_v58  ;;  %v15207_v2 = vsub.f32 %v4695_v1, %v15181_v15 }
 0x585   : > { %v3653_v46 = vpop.f32.mrf.mxu1  ;;  %18525 = vst [vmem:[#allocation116_spill] sm:$0xff] %v15211_v37  ;;  %v15214_v61 = vsub.f32 %v4679_v10, %v15189_v41 }
 0x586   : > { %v3580_v18 = vadd.f32 %v3579_v54, %v3496_v13  ;;  %v3654_v8 = vadd.f32 %v3653_v46, %v3578_v31  ;;  %v15196_v54 = vsub.f32 %v4680_v51, %v15167_v57  ;;  %18523 = vst [vmem:[#allocation114_spill] sm:$0xff] %v15204_v38  ;;  %18524 = vst [vmem:[#allocation115_spill] sm:$0xff] %v15207_v2  ;;  %v15236_v43 = vand.u32 4294901760, %v15207_v2 }
 0x587   : > { %v3655_v53 = vpop.f32.mrf.mxu1  ;;  %18526 = vst [vmem:[#allocation117_spill] sm:$0xff] %v15214_v61  ;;  %v4883_v13 = vsub.f32 %v15156_v63, %v15176_v34 }
 0x588   : > { %v3910_v16 = vpop.f32.mrf.mxu0  ;;  %v3656_v3 = vadd.f32 %v3655_v53, %v3580_v18  ;;  %v4156_v45 = vrot.slane %v3654_v8, %v18423_v26  ;;  %18520 = vst [vmem:[#allocation98_spill] sm:$0xff] %v15196_v54  ;;  %v15228_v31 = vand.u32 4294901760, %v15196_v54  ;;  %18531 = vst [vmem:[#allocation21_spill] sm:$0xff] %v15236_v43  ;;  %v5016_v10 = vsub.f32 %v15207_v2, %v15236_v43 }
 0x589   : > { %v3829_v20 = vpop.f32.mrf.mxu1 }
 0x58a   : > { %v3830_v25 = vadd.f32 %v3829_v20, %v3737_v50  ;;  %v3912_v42 = vpop.f32.mrf.mxu0  ;;  %v4160_v44 = vrot.slane %v3656_v3, %v18423_v26  ;;  %v4161_v53 = vmul.f32 %v4156_v45, %v14816_v47  ;;  %v15223_v20 = vsub.f32 %v4694_v48, %v15198_v52  ;;  %18529 = vst [vmem:[#allocation121_spill] sm:$0xff] %v15228_v31 }
 0x58b   : > { %v3831_v33 = vpop.f32.mrf.mxu1  ;;  %v4897_v1 = vsub.f32 %v15196_v54, %v15228_v31 }
 0x58c   : > { %v3911_v21 = vadd.f32 %v3910_v16, %v3830_v25  ;;  %v3832_v28 = vadd.f32 %v3831_v33, %v3739_v24  ;;  %v15220_v16 = vand.u32 4294901760, %v15193_v11  ;;  %18528 = vst [vmem:[#allocation20_spill] sm:$0xff] %v15223_v20  ;;  %v4162_v25 = vmul.f32 %v4160_v44, %v14823_v0  ;;  %v4693_v44 = vld [vmem:[%s18503_s10 + $0xd0] sm:$0xff] }
 0x58d   : > { %v15231_v33 = vsub.f32 %v4678_v12, %v15201_v35  ;;  %v15241_v0 = vand.u32 4294901760, %v15214_v61  ;;  %v15246_v36 = vand.u32 4294901760, %v15223_v20  ;;  %v15268_v12 = vand.u32 4294901760, %v4897_v1 }
 0x58e   : > { %v3913_v29 = vadd.f32 %v3912_v42, %v3832_v28  ;;  %18527 = vst [vmem:[#allocation118_spill] sm:$0xff] %v15220_v16  ;;  %v5002_v42 = vsub.f32 %v15179_v58, %v15204_v38  ;;  %v5009_v28 = vsub.f32 %v15193_v11, %v15220_v16 }
 0x58f   : > { %v3988_v56 = vpop.f32.mrf.mxu1  ;;  %v4072_v19 = vpop.f32.mrf.mxu0  ;;  %18530 = vst [vmem:[#allocation122_spill] sm:$0xff] %v15231_v33  ;;  %18532 = vst [vmem:[#allocation23_spill] sm:$0xff] %v15241_v0  ;;  %v15253_v8 = vand.u32 4294901760, %v15231_v33 }
 0x590   : > { %v3989_v17 = vadd.f32 %v3988_v56, %v3911_v21  ;;  %v4890_v21 = vsub.f32 %v15187_v40, %v15211_v37  ;;  %18533 = vst [vmem:[#allocation24_spill] sm:$0xff] %v15246_v36  ;;  %v15263_v48 = vand.u32 4294901760, %v5009_v28  ;;  %18539 = vst [vmem:[#allocation32_spill] sm:$0xff] %v15268_v12  ;;  %v4675_v28 = vld [vmem:[%s18503_s10 + $0x40] sm:$0xff]  ;;  %v4670_v37 = vld [vmem:[%s18503_s10 + $0x18] sm:$0xff] }
 0x591   : > { %v3990_v59 = vpop.f32.mrf.mxu1  ;;  %v4074_v32 = vpop.f32.mrf.mxu0  ;;  %18535 = vst [vmem:[#allocation26_spill] sm:$0xff] %v15253_v8 }
 0x592   : > { %v4073_v14 = vadd.f32 %v4072_v19, %v3989_v17  ;;  %v3991_v7 = vadd.f32 %v3990_v59, %v3913_v29  ;;  %v15248_v29 = vand.u32 4294901760, %v4883_v13  ;;  %v15255_v19 = vand.u32 4294901760, %v5002_v42  ;;  %18538 = vst [vmem:[#allocation31_spill] sm:$0xff] %v15263_v48  ;;  %v4676_v13 = vld [vmem:[%s18503_s10 + $0x48] sm:$0xff] }
 0x593   : > { %v4148_v62 = vpop.f32.mrf.mxu1  ;;  %v15259_v3 = vand.u32 4294901760, %v4890_v21  ;;  %v4904_v17 = vsub.f32 %v15214_v61, %v15241_v0  ;;  %v5023_v59 = vsub.f32 %v15223_v20, %v15246_v36 }
 0x594   : > { %v4075_v22 = vadd.f32 %v4074_v32, %v3991_v7  ;;  %v4149_v50 = vadd.f32 %v4148_v62, %v4073_v14  ;;  %18534 = vst [vmem:[#allocation25_spill] sm:$0xff] %v15248_v29  ;;  %18536 = vst [vmem:[#allocation27_spill] sm:$0xff] %v15255_v19  ;;  %v4911_v14 = vsub.f32 %v15231_v33, %v15253_v8  ;;  %v15274_v7 = vand.u32 4294901760, %v5016_v10  ;;  %v4690_v10 = vld [vmem:[%s18503_s10 + $0xb8] sm:$0xff] }
 0x595   : > { %v4150_v4 = vpop.f32.mrf.mxu1  ;;  %18537 = vst [vmem:[#allocation29_spill] sm:$0xff] %v15259_v3  ;;  %v15278_v45 = vand.u32 4294901760, %v4904_v17  ;;  %v15282_v32 = vand.u32 4294901760, %v5023_v59  ;;  %v15455_v8 = vand.u32 4294901760, %v4687_v9 }
 0x596   : > { %v4166_v24 = vrot.slane %v4149_v50, %v18423_v26  ;;  %v4151_v46 = vadd.f32 %v4150_v4, %v4075_v22  ;;  %18540 = vst [vmem:[#allocation50_spill] sm:$0xff] %v15274_v7  ;;  %v15286_v62 = vand.u32 4294901760, %v4911_v14  ;;  %v15300_v22 = vand.u32 4294901760, %v4693_v44  ;;  %v4677_v50 = vld [vmem:[%s18503_s10 + $0x50] sm:$0xff] }
 0x597   : > { %18541 = vst [vmem:[#allocation51_spill] sm:$0xff] %v15278_v45  ;;  %18542 = vst [vmem:[#allocation53_spill] sm:$0xff] %v15282_v32  ;;  %v15305_v4 = vand.u32 4294901760, %v4677_v50 }
 0x598   : > { %v4170_v27 = vrot.slane %v4151_v46, %v18423_v26  ;;  %v4171_v47 = vadd.f32 %v4166_v24, %v4161_v53  ;;  %18543 = vst [vmem:[#allocation55_spill] sm:$0xff] %v15286_v62  ;;  %18544 = vst [vmem:[#allocation57_spill] sm:$0xff] %v15300_v22  ;;  %v4692_v24 = vld [vmem:[%s18503_s10 + $0xc8] sm:$0xff]  ;;  %v15311_v46 = vsub.f32 %v4693_v44, %v15300_v22  ;;  %v15360_v44 = vand.u32 4294901760, %v4690_v10 }
 0x599   : > { %18545 = vst [vmem:[#allocation59_spill] sm:$0xff] %v15305_v4  ;;  %v15313_v53 = vand.u32 4294901760, %v4692_v24  ;;  %18579 = vst [vmem:[#allocation70_spill] sm:$0xff] %v15455_v8 }
 0x59a   : > { %v4172_v18 = vadd.f32 %v4170_v27, %v4162_v25  ;;  %v4173_v56 = vpack.c.bf16 %v4171_v47, %v4171_v47  ;;  %18546 = vst [vmem:[#allocation62_spill] sm:$0xff] %v15311_v46  ;;  %v15320_v25 = vsub.f32 %v4677_v50, %v15305_v4  ;;  %v15322_v27 = vand.u32 4294901760, %v4676_v13  ;;  %v4691_v47 = vld [vmem:[%s18503_s10 + $0xc0] sm:$0xff]  ;;  %18558 = vst [vmem:[#allocation101_spill] sm:$0xff] %v15360_v44 }
 0x59b   : > { %18547 = vst [vmem:[#allocation67_spill] sm:$0xff] %v15313_v53  ;;  %v15329_v42 = vand.u32 4294901760, %v15311_v46  ;;  %v15334_v21 = vand.u32 4294901760, %v4691_v47 }
 0x59c   : > { %v4174_v51 = vpack.c.bf16 %v4172_v18, %v4172_v18  ;;  %18548 = vst [vmem:[#allocation72_spill] sm:$0xff] %v15320_v25  ;;  %18549 = vst [vmem:[#allocation74_spill] sm:$0xff] %v15322_v27  ;;  %v15332_v18 = vsub.f32 %v4692_v24, %v15313_v53  ;;  %v15344_v1 = vsub.f32 %v4676_v13, %v15322_v27 }
 0x59d   : > { %18550 = vst [vmem:[#allocation76_spill] sm:$0xff] %v15329_v42  ;;  %18552 = vst [vmem:[#allocation81_spill] sm:$0xff] %v15334_v21  ;;  %v5030_v17 = vsub.f32 %v15311_v46, %v15329_v42  ;;  %v15358_v14 = vsub.f32 %v4691_v47, %v15334_v21 }
 0x59e   : > { %4613 = vmatprep.mubr.bf16.mxu0 %v4174_v51  ;;  %4654 = vmatprep.mubr.bf16.mxu1 %v4174_v51  ;;  %18551 = vst [vmem:[#allocation79_spill] sm:$0xff] %v15332_v18  ;;  %v15341_v51 = vand.u32 4294901760, %v15320_v25  ;;  %18554 = vst [vmem:[#allocation84_spill] sm:$0xff] %v15344_v1  ;;  %v15355_v59 = vand.u32 4294901760, %v15332_v18  ;;  %v15366_v24 = vand.u32 4294901760, %v15344_v1 }
 0x59f   : > { %4614 = vmatmul.mubr.bf16.vlgmr.msra.gmra.mxu0 %v4173_v56  ;;  %4655 = vmatmul.mubr.bf16.vlgmr.msra.gmra.mxu1 %v4173_v56  ;;  %v15346_v56 = vand.u32 4294901760, %v4675_v28  ;;  %18557 = vst [vmem:[#allocation99_spill] sm:$0xff] %v15358_v14 }
 0x5a0   : > { %12417 = vmatpush3.msra.mxu1 %v15248_v29  ;;  %12382 = vmatpush3.msra.mxu0 %v15141_v23  ;;  %18553 = vst [vmem:[#allocation82_spill] sm:$0xff] %v15341_v51  ;;  %18556 = vst [vmem:[#allocation97_spill] sm:$0xff] %v15355_v59  ;;  %v4918_v50 = vsub.f32 %v15320_v25, %v15341_v51  ;;  %v5037_v47 = vsub.f32 %v15332_v18, %v15355_v59  ;;  %v4688_v29 = vld [vmem:[%s18503_s10 + $0xa8] sm:$0xff] }
 0x5a1   : > { %12418 = vmatprep.subr.mxu1 %v15255_v19  ;;  %12383 = vmatprep.subr.mxu0 %v15158_v5  ;;  %18555 = vst [vmem:[#allocation91_spill] sm:$0xff] %v15346_v56  ;;  %18559 = vst [vmem:[#allocation106_spill] sm:$0xff] %v15366_v24  ;;  %v15369_v13 = vsub.f32 %v4675_v28, %v15346_v56  ;;  %v4673_v19 = vld [vmem:[%s18503_s10 + $0x30] sm:$0xff]  ;;  %v15436_v42 = vand.u32 4294901760, %v4688_v29 }
 0x5a2   : > { %12419 = vmatpush3.msra.mxu1 %v15259_v3  ;;  %12384 = vmatpush3.msra.mxu0 %v15160_v39  ;;  %v15386_v28 = vand.u32 4294901760, %v4918_v50 }
 0x5a3   : > { %12420 = vmatprep.subr.mxu1 %v15263_v48  ;;  %12385 = vmatprep.subr.mxu0 %v15165_v6  ;;  %18560 = vst [vmem:[#allocation108_spill] sm:$0xff] %v15369_v13  ;;  %v15394_v48 = vand.u32 4294901760, %v5037_v47  ;;  %v15399_v3 = vand.u32 4294901760, %v15369_v13  ;;  %v4672_v47 = vld [vmem:[%s18503_s10 + $0x28] sm:$0xff]  ;;  %18574 = vst [vmem:[#allocation56_spill] sm:$0xff] %v15436_v42  ;;  %v15465_v43 = vsub.f32 %v4688_v29, %v15436_v42 }
 0x5a4   : > { %12421 = vmatpush3.msra.mxu1 %v15268_v12  ;;  %12386 = vmatpush3.msra.mxu0 %v15167_v57  ;;  %18564 = vst [vmem:[#allocation30_spill] sm:$0xff] %v15386_v28  ;;  %v4689_v12 = vld [vmem:[%s18503_s10 + $0xb0] sm:$0xff] }
 0x5a5   : > { %12422 = vmatprep.subr.mxu1 %v15274_v7  ;;  %12387 = vmatprep.subr.mxu0 %v15181_v15  ;;  %v4674_v7 = vld [vmem:[%s18503_s10 + $0x38] sm:$0xff]  ;;  %18565 = vst [vmem:[#allocation33_spill] sm:$0xff] %v15394_v48  ;;  %18566 = vst [vmem:[#allocation34_spill] sm:$0xff] %v15399_v3  ;;  %v15428_v51 = vand.u32 4294901760, %v4689_v12 }
 0x5a6   : > { %12423 = vmatpush3.msra.mxu1 %v15278_v45  ;;  %12388 = vmatpush3.msra.mxu0 %v15189_v41  ;;  %v15380_v45 = vsub.f32 %v4690_v10, %v15360_v44  ;;  %v15416_v49 = vand.u32 4294901760, %v4674_v7  ;;  %18582 = vst [vmem:[#allocation80_spill] sm:$0xff] %v15465_v43 }
 0x5a7   : > { %12424 = vmatprep.subr.mxu1 %v15282_v32  ;;  %12389 = vmatprep.subr.mxu0 %v15198_v52  ;;  %v15377_v32 = vand.u32 4294901760, %v15358_v14  ;;  %18571 = vst [vmem:[#allocation39_spill] sm:$0xff] %v15428_v51 }
 0x5a8   : > { %12425 = vmatpush3.msra.mxu1 %v15286_v62  ;;  %12390 = vmatpush3.msra.mxu0 %v15201_v35  ;;  %v15372_v62 = vand.u32 4294901760, %v5030_v17  ;;  %18563 = vst [vmem:[#allocation28_spill] sm:$0xff] %v15380_v45  ;;  %v4925_v17 = vsub.f32 %v15344_v1, %v15366_v24  ;;  %v15402_v50 = vand.u32 4294901760, %v15380_v45  ;;  %18569 = vst [vmem:[#allocation37_spill] sm:$0xff] %v15416_v49 }
 0x5a9   : > { %12391 = vmatprep.subr.mxu0 %v15300_v22  ;;  %18562 = vst [vmem:[#allocation22_spill] sm:$0xff] %v15377_v32  ;;  %v5044_v10 = vsub.f32 %v15358_v14, %v15377_v32  ;;  %v4932_v24 = vsub.f32 %v15369_v13, %v15399_v3  ;;  %v15453_v3 = vsub.f32 %v4689_v12, %v15428_v51 }
 0x5aa   : > { %12392 = vmatpush3.msra.mxu0 %v15305_v4  ;;  %18561 = vst [vmem:[#allocation109_spill] sm:$0xff] %v15372_v62  ;;  %12426 = vmatprep.subr.mxu1 %v15372_v62  ;;  %18567 = vst [vmem:[#allocation35_spill] sm:$0xff] %v15402_v50  ;;  %v15414_v62 = vand.u32 4294901760, %v4925_v17  ;;  %v5051_v59 = vsub.f32 %v15380_v45, %v15402_v50  ;;  %v15432_v17 = vsub.f32 %v4674_v7, %v15416_v49  ;;  %v4686_v50 = vld [vmem:[%s18503_s10 + $0x98] sm:$0xff] }
 0x5ab   : > { %12393 = vmatprep.subr.mxu0 %v15313_v53  ;;  %12427 = vmatpush3.msra.mxu1 %v15386_v28  ;;  %v15422_v32 = vand.u32 4294901760, %v5044_v10  ;;  %v15434_v28 = vand.u32 4294901760, %v4673_v19  ;;  %v4671_v10 = vld [vmem:[%s18503_s10 + $0x20] sm:$0xff]  ;;  %v15448_v7 = vand.u32 4294901760, %v4932_v24  ;;  %18578 = vst [vmem:[#allocation66_spill] sm:$0xff] %v15453_v3  ;;  %v15473_v12 = vand.u32 4294901760, %v15453_v3 }
 0x5ac   : > { %12394 = vmatpush3.msra.mxu0 %v15322_v27  ;;  %18568 = vst [vmem:[#allocation36_spill] sm:$0xff] %v15414_v62  ;;  %12428 = vmatprep.subr.mxu1 %v15394_v48  ;;  %18572 = vst [vmem:[#allocation52_spill] sm:$0xff] %v15432_v17  ;;  %v15438_v48 = vand.u32 4294901760, %v4672_v47  ;;  %v15459_v36 = vand.u32 4294901760, %v15432_v17 }
 0x5ad   : > { %12395 = vmatprep.subr.mxu0 %v15334_v21  ;;  %18570 = vst [vmem:[#allocation38_spill] sm:$0xff] %v15422_v32  ;;  %12429 = vmatpush3.msra.mxu1 %v15414_v62  ;;  %18573 = vst [vmem:[#allocation54_spill] sm:$0xff] %v15434_v28  ;;  %v15450_v62 = vand.u32 4294901760, %v5051_v59  ;;  %v15462_v0 = vsub.f32 %v4673_v19, %v15434_v28  ;;  %v15476_v59 = vsub.f32 %v4687_v9, %v15455_v8 }
 0x5ae   : > { %12396 = vmatpush3.msra.mxu0 %v15346_v56  ;;  %18575 = vst [vmem:[#allocation58_spill] sm:$0xff] %v15438_v48  ;;  %12430 = vmatprep.subr.mxu1 %v15422_v32  ;;  %18576 = vst [vmem:[#allocation61_spill] sm:$0xff] %v15448_v7  ;;  %v15468_v24 = vsub.f32 %v4672_v47, %v15438_v48  ;;  %v15478_v32 = vand.u32 4294901760, %v4671_v10  ;;  %v15480_v19 = vand.u32 4294901760, %v4686_v50 }
 0x5af   : > { %12397 = vmatprep.subr.mxu0 %v15360_v44  ;;  %18577 = vst [vmem:[#allocation64_spill] sm:$0xff] %v15450_v62  ;;  %18580 = vst [vmem:[#allocation75_spill] sm:$0xff] %v15459_v36  ;;  %12431 = vmatpush3.msra.mxu1 %v15448_v7  ;;  %v4939_v29 = vsub.f32 %v15432_v17, %v15459_v36  ;;  %v15487_v47 = vand.u32 4294901760, %v15462_v0  ;;  %v15490_v7 = vand.u32 4294901760, %v15465_v43  ;;  %v15499_v16 = vand.u32 4294901760, %v15476_v59 }
 0x5b0   : > { %12398 = vmatpush3.msra.mxu0 %v15416_v49  ;;  %18581 = vst [vmem:[#allocation78_spill] sm:$0xff] %v15462_v0  ;;  %18583 = vst [vmem:[#allocation83_spill] sm:$0xff] %v15468_v24  ;;  %12432 = vmatprep.subr.mxu1 %v15450_v62  ;;  %v15493_v9 = vand.u32 4294901760, %v15468_v24  ;;  %v5058_v31 = vsub.f32 %v15453_v3, %v15473_v12  ;;  %v15502_v62 = vsub.f32 %v4671_v10, %v15478_v32 }
 0x5b1   : > { %12399 = vmatprep.subr.mxu0 %v15428_v51  ;;  %18584 = vst [vmem:[#allocation87_spill] sm:$0xff] %v15473_v12  ;;  %18585 = vst [vmem:[#allocation88_spill] sm:$0xff] %v15476_v59  ;;  %v15505_v36 = vsub.f32 %v4686_v50, %v15480_v19  ;;  %v15511_v38 = vand.u32 4294901760, %v4939_v29  ;;  %v4946_v12 = vsub.f32 %v15462_v0, %v15487_v47  ;;  %v4685_v50 = vld [vmem:[%s18503_s10 + $0x90] sm:$0xff]  ;;  %v4683_v0 = vld [vmem:[%s18503_s10 + $0x80] sm:$0xff] }
 0x5b2   : > { %12400 = vmatpush3.msra.mxu0 %v15434_v28  ;;  %18586 = vst [vmem:[#allocation90_spill] sm:$0xff] %v15478_v32  ;;  %18587 = vst [vmem:[#allocation94_spill] sm:$0xff] %v15480_v19  ;;  %v5065_v34 = vsub.f32 %v15465_v43, %v15490_v7  ;;  %v4953_v10 = vsub.f32 %v15468_v24, %v15493_v9  ;;  %v15523_v30 = vand.u32 4294901760, %v5058_v31  ;;  %v15528_v3 = vand.u32 4294901760, %v15502_v62  ;;  %v4668_v31 = vld [vmem:[%s18503_s10 + $0x8] sm:$0xff] }
 0x5b3   : > { %12401 = vmatprep.subr.mxu0 %v15436_v42  ;;  %18588 = vst [vmem:[#allocation100_spill] sm:$0xff] %v15487_v47  ;;  %18589 = vst [vmem:[#allocation105_spill] sm:$0xff] %v15490_v7  ;;  %v5072_v29 = vsub.f32 %v15476_v59, %v15499_v16  ;;  %v15531_v47 = vand.u32 4294901760, %v15505_v36  ;;  %v4684_v7 = vld [vmem:[%s18503_s10 + $0x88] sm:$0xff]  ;;  %12433 = vmatpush3.msra.mxu1 %v15511_v38  ;;  %v15550_v43 = vand.u32 4294901760, %v4670_v37 }
 0x5b4   : > { %18590 = vst [vmem:[#allocation107_spill] sm:$0xff] %v15493_v9  ;;  %12402 = vmatpush3.msra.mxu0 %v15438_v48  ;;  %18591 = vst [vmem:[#allocation110_spill] sm:$0xff] %v15499_v16  ;;  %v4669_v9 = vld [vmem:[%s18503_s10 + $0x10] sm:$0xff]  ;;  %v15544_v16 = vand.u32 4294901760, %v4946_v12  ;;  %v15546_v59 = vand.u32 4294901760, %v5065_v34  ;;  %v15548_v24 = vand.u32 4294901760, %v4953_v10  ;;  %12434 = vmatprep.subr.mxu1 %v15523_v30 }
 0x5b5   : > { %18592 = vst [vmem:[#allocation112_spill] sm:$0xff] %v15502_v62  ;;  %18593 = vst [vmem:[#allocation113_spill] sm:$0xff] %v15505_v36  ;;  %12403 = vmatprep.subr.mxu0 %v15455_v8  ;;  %v15556_v17 = vand.u32 4294901760, %v5072_v29  ;;  %v5079_v12 = vsub.f32 %v15505_v36, %v15531_v47  ;;  %v15562_v34 = vand.u32 4294901760, %v4685_v50  ;;  %v15566_v10 = vsub.f32 %v4670_v37, %v15550_v43  ;;  %v4667_v29 = vld [vmem:[%s18503_s10] sm:$0xff] }
 0x5b6   : > { %18594 = vst [vmem:[#allocation40_spill] sm:$0xff] %v15511_v38  ;;  %12404 = vmatpush3.msra.mxu0 %v15478_v32  ;;  %18595 = vst [vmem:[#allocation85_spill] sm:$0xff] %v15523_v30  ;;  %12435 = vmatpush3.msra.mxu1 %v15544_v16  ;;  %v15568_v38 = vand.u32 4294901760, %v4669_v9  ;;  %v15570_v45 = vand.u32 4294901760, %v4684_v7  ;;  %v15572_v30 = vand.u32 4294901760, %v4668_v31 }
 0x5b7   : > { %18596 = vst [vmem:[#allocation102_spill] sm:$0xff] %v15528_v3  ;;  %18597 = vst [vmem:[#allocation103_spill] sm:$0xff] %v15531_v47  ;;  %12405 = vmatprep.subr.mxu0 %v15480_v19  ;;  %v4960_v19 = vsub.f32 %v15502_v62, %v15528_v3  ;;  %12436 = vmatprep.subr.mxu1 %v15546_v59  ;;  %v15584_v37 = vsub.f32 %v4685_v50, %v15562_v34  ;;  %v15586_v3 = vand.u32 4294901760, %v4683_v0 }
 0x5b8   : > { %18598 = vst [vmem:[#allocation19_spill] sm:$0xff] %v15544_v16  ;;  %18599 = vst [vmem:[#allocation41_spill] sm:$0xff] %v15546_v59  ;;  %12406 = vmatpush3.msra.mxu0 %v15550_v43  ;;  %v15581_v16 = vand.u32 4294901760, %v5079_v12  ;;  %12437 = vmatpush3.msra.mxu1 %v15548_v24  ;;  %v15591_v36 = vand.u32 4294901760, %v15566_v10  ;;  %v15594_v62 = vsub.f32 %v4669_v9, %v15568_v38  ;;  %v15610_v59 = vand.u32 4294901760, %v4667_v29 }
 0x5b9   : > { %18600 = vst [vmem:[#allocation42_spill] sm:$0xff] %v15548_v24  ;;  %18601 = vst [vmem:[#allocation43_spill] sm:$0xff] %v15550_v43  ;;  %v15579_v47 = vand.u32 4294901760, %v4960_v19  ;;  %12407 = vmatprep.subr.mxu0 %v15562_v34  ;;  %v15597_v19 = vsub.f32 %v4684_v7, %v15570_v45  ;;  %v15600_v12 = vsub.f32 %v4668_v31, %v15572_v30  ;;  %12438 = vmatprep.subr.mxu1 %v15556_v17 }
 0x5ba   : > { %18602 = vst [vmem:[#allocation44_spill] sm:$0xff] %v15556_v17  ;;  %18603 = vst [vmem:[#allocation45_spill] sm:$0xff] %v15562_v34  ;;  %12408 = vmatpush3.msra.mxu0 %v15568_v38  ;;  %v15605_v50 = vand.u32 4294901760, %v15584_v37  ;;  %v15608_v24 = vsub.f32 %v4683_v0, %v15586_v3  ;;  %v4967_v7 = vsub.f32 %v15566_v10, %v15591_v36  ;;  %v15617_v9 = vand.u32 4294901760, %v15594_v62 }
 0x5bb   : > { %18604 = vst [vmem:[#allocation46_spill] sm:$0xff] %v15566_v10  ;;  %18605 = vst [vmem:[#allocation47_spill] sm:$0xff] %v15568_v38  ;;  %12409 = vmatprep.subr.mxu0 %v15570_v45  ;;  %12439 = vmatpush3.msra.mxu1 %v15579_v47  ;;  %v15620_v31 = vand.u32 4294901760, %v15597_v19  ;;  %v15623_v17 = vand.u32 4294901760, %v15600_v12 }
 0x5bc   : > { %18606 = vst [vmem:[#allocation123_spill] sm:$0xff] %v15570_v45  ;;  %18607 = vst [vmem:[#allocation124_spill] sm:$0xff] %v15572_v30  ;;  %12410 = vmatpush3.msra.mxu0 %v15572_v30  ;;  %12440 = vmatprep.subr.mxu1 %v15581_v16  ;;  %v5086_v0 = vsub.f32 %v15584_v37, %v15605_v50  ;;  %v15636_v10 = vand.u32 4294901760, %v4967_v7  ;;  %v4974_v45 = vsub.f32 %v15594_v62, %v15617_v9 }
 0x5bd   : > { %18608 = vst [vmem:[#allocation125_spill] sm:$0xff] %v15579_v47  ;;  %18609 = vst [vmem:[#allocation126_spill] sm:$0xff] %v15581_v16  ;;  %v15630_v47 = vand.u32 4294901760, %v15608_v24  ;;  %12411 = vmatprep.subr.mxu0 %v15586_v3  ;;  %v5093_v30 = vsub.f32 %v15597_v19, %v15620_v31  ;;  %v4981_v16 = vsub.f32 %v15600_v12, %v15623_v17 }
 0x5be   : > { %18610 = vst [vmem:[#allocation127_spill] sm:$0xff] %v15584_v37  ;;  %18611 = vst [vmem:[#allocation128_spill] sm:$0xff] %v15586_v3  ;;  %12412 = vmatpush3.msra.mxu0 %v15610_v59  ;;  %12441 = vmatpush3.msra.mxu1 %v15636_v10  ;;  %v15654_v7 = vand.u32 4294901760, %v4974_v45  ;;  %v18633_v45 = vld [vmem:[#allocation119_spill] sm:$0xff] }
 0x5bf   : > { %18612 = vst [vmem:[#allocation129_spill] sm:$0xff] %v15591_v36  ;;  %18613 = vst [vmem:[#allocation130_spill] sm:$0xff] %v15594_v62  ;;  %v15633_v36 = vsub.f32 %v4667_v29, %v15610_v59  ;;  %v5100_v29 = vsub.f32 %v15608_v24, %v15630_v47  ;;  %12451 = vmatprep.subr.mxu0 %v15127_v55 }
 0x5c0   : > { %18614 = vst [vmem:[#allocation131_spill] sm:$0xff] %v15597_v19  ;;  %18615 = vst [vmem:[#allocation132_spill] sm:$0xff] %v15600_v12 }
 0x5c1   : > { %18616 = vst [vmem:[#allocation133_spill] sm:$0xff] %v15605_v50  ;;  %18617 = vst [vmem:[#allocation134_spill] sm:$0xff] %v15608_v24  ;;  %v15645_v50 = vand.u32 4294901760, %v5086_v0  ;;  %v15650_v37 = vand.u32 4294901760, %v15633_v36  ;;  %v15661_v0 = vand.u32 4294901760, %v5100_v29 }
 0x5c2   : > { %18618 = vst [vmem:[#allocation135_spill] sm:$0xff] %v15610_v59  ;;  %18619 = vst [vmem:[#allocation136_spill] sm:$0xff] %v15617_v9 }
 0x5c3   : > { %18620 = vst [vmem:[#allocation137_spill] sm:$0xff] %v15620_v31  ;;  %18621 = vst [vmem:[#allocation138_spill] sm:$0xff] %v15623_v17  ;;  %v15656_v31 = vand.u32 4294901760, %v5093_v30  ;;  %v15658_v17 = vand.u32 4294901760, %v4981_v16  ;;  %12442 = vmatprep.subr.mxu1 %v15645_v50  ;;  %v15677_v30 = vld [vmem:[%s702_s15] sm:$0xf] }
 0x5c4   : > { %18622 = vst [vmem:[#allocation139_spill] sm:$0xff] %v15630_v47  ;;  %18623 = vst [vmem:[#allocation140_spill] sm:$0xff] %v15633_v36  ;;  %v4988_v47 = vsub.f32 %v15633_v36, %v15650_v37  ;;  %12443 = vmatpush3.msra.mxu1 %v15654_v7  ;;  %v4244_v16 = vrot.slane %v15677_v30, %v18423_v26  ;;  %s13643_s15 = smov [#allocation8]  }
 0x5c5   : > { %18624 = vst [vmem:[#allocation141_spill] sm:$0xff] %v15636_v10  ;;  %18625 = vst [vmem:[#allocation142_spill] sm:$0xff] %v15645_v50  ;;  %12444 = vmatprep.subr.mxu1 %v15656_v31  ;;  %s13570_s22 = sshll.u32 %s13643_s15, 4  ;;  %s13571_s22 = int_to_ptr.vmem [resolvable:$false] %s13570_s22 }
 0x5c6   : > { %18626 = vst [vmem:[#allocation143_spill] sm:$0xff] %v15650_v37  ;;  %18627 = vst [vmem:[#allocation144_spill] sm:$0xff] %v15654_v7  ;;  %v15667_v55 = vand.u32 4294901760, %v4988_v47  ;;  %12445 = vmatpush3.msra.mxu1 %v15658_v17  ;;  %v18634_v47 = vsub.s32 1, %v18633_v45  ;;  %s13572_s16 = scalar_lea.vmem %s13571_s22, 64 }
 0x5c7   : > { %18628 = vst [vmem:[#allocation145_spill] sm:$0xff] %v15656_v31  ;;  %18629 = vst [vmem:[#allocation146_spill] sm:$0xff] %v15658_v17  ;;  %12446 = vmatprep.subr.mxu1 %v15661_v0 }
 0x5c8   : > { %18630 = vst [vmem:[#allocation147_spill] sm:$0xff] %v15661_v0  ;;  %18631 = vst [vmem:[#allocation148_spill] sm:$0xff] %v15667_v55  ;;  %12447 = vmatpush3.msra.mxu1 %v15667_v55  ;;  %v4248_v29 = vrot.slane %v15677_v30, %v18634_v47 }
 0x5c9   : > { %12486 = vmatprep.subr.mxu1 %v15124_v60 }
 0x65f   : > { %v4615_v17 = vpop.f32.mrf.mxu0  ;;  %v15684_v0 = vpop.f32.mrf.mxu1 }
 0x660   : > { %18635 = vst [vmem:[#allocation119_spill] sm:$0xff] %v15684_v0  ;;  %v15686_v55 = vadd.f32 %v4615_v17, %v4244_v16 }
 0x661   : > { %v4617_v31 = vpop.f32.mrf.mxu0  ;;  %v15688_v7 = vpop.f32.mrf.mxu1 }
 0x662   : > { %18636 = vst [vmem:[#allocation149_spill] sm:$0xff] %v15686_v55  ;;  %v17854_v50 = vmax.f32 %v15686_v55, 0.0  ;;  %v15691_v10 = vadd.f32 %v4617_v31, %v4248_v29 }
 0x663   : > { %v4619_v37 = vpop.f32.mrf.mxu0  ;;  %v4660_v9 = vpop.f32.mrf.mxu1 }
 0x664   : > { %18637 = vst [vmem:[#allocation150_spill] sm:$0xff] %v15691_v10  ;;  %v4739_v26 = vsel %vm901_vm0, %v17854_v50, 0.0  ;;  %v17859_v47 = vmax.f32 %v15691_v10, 0.0  ;;  %v18680_v10 = vld [vmem:[#allocation26_spill] sm:$0xff] }
 0x665   : > { %v4740_v36 = vrot.slane %v4739_v26, 4  ;;  %v4620_v24 = vpop.f32.mrf.mxu0  ;;  %v4661_v0 = vpop.f32.mrf.mxu1 }
 0x666   : > { %v4746_v17 = vsel %vm901_vm0, %v17859_v47, 0.0  ;;  %v18651_v47 = vld [vmem:[#allocation135_spill] sm:$0xff] }
 0x667   : > { %v4741_v16 = vadd.f32 %v4740_v36, %v4739_v26  ;;  %v4747_v12 = vrot.slane %v4746_v17, 4 }
 0x669   : > { %v4742_v19 = vrot.slane %v4741_v16, 2  ;;  %v4748_v31 = vadd.f32 %v4747_v12, %v4746_v17 }
 0x66b   : > { %v4743_v29 = vadd.f32 %v4742_v19, %v4741_v16  ;;  %v4749_v37 = vrot.slane %v4748_v31, 2  ;;  %v18639_v16 = vld [vmem:[#allocation28_spill] sm:$0xff] }
 0x66d   : > { %v4744_v9 = vrot.slane %v4743_v29, 1  ;;  %v4750_v62 = vadd.f32 %v4749_v37, %v4748_v31  ;;  %v18640_v31 = vld [vmem:[#allocation94_spill] sm:$0xff] }
 0x66e   : > { %v18642_v37 = vld [vmem:[#allocation66_spill] sm:$0xff] }
 0x66f   : > { %v4745_v55 = vadd.f32 %v4744_v9, %v4743_v29  ;;  %v4751_v60 = vrot.slane %v4750_v62, 1  ;;  %v18641_v29 = vld [vmem:[#allocation52_spill] sm:$0xff]  ;;  %v18643_v9 = vld [vmem:[#allocation78_spill] sm:$0xff] }
 0x671   : > { %v4752_v50 = vadd.f32 %v4751_v60, %v4750_v62  ;;  %v15700_v59 = vand.u32 4294901760, %v4745_v55 }
 0x673   : > { %v15702_v3 = vand.u32 4294901760, %v4752_v50  ;;  %v15705_v24 = vsub.f32 %v4745_v55, %v15700_v59 }
 0x675   : > { %5104 = vmatprep.mubr.f32.mxu1 %v15702_v3  ;;  %v4864_v26 = vsub.f32 %v4752_v50, %v15702_v3  ;;  %v17860_v36 = vand.u32 4294901760, %v15705_v24  ;;  %v4255_v50 = vsub.s32 3, %v18633_v45 }
 0x676   : > { %5106 = vmatmul.mubr.f32.vlgmr.msra.gmra.mxu1 %v15700_v59 }
 0x677   : > { %12487 = vmatpush3.msra.mxu1 %v15141_v23  ;;  %v4865_v19 = vand.u32 4294901760, %v4864_v26  ;;  %v4872_v60 = vsub.f32 %v15705_v24, %v17860_v36  ;;  %v4256_v0 = vrot.slane %v15677_v30, %v4255_v50  ;;  %v18650_v50 = vld [vmem:[#allocation112_spill] sm:$0xff]  ;;  %v18652_v36 = vld [vmem:[#allocation113_spill] sm:$0xff] }
 0x678   : > { %12488 = vmatprep.subr.mxu1 %v15158_v5 }
 0x679   : > { %12489 = vmatpush3.msra.mxu1 %v15160_v39  ;;  %5348 = vmatprep.mubr.f32.mxu1 %v4865_v19  ;;  %v4866_v55 = vsub.f32 %v4864_v26, %v4865_v19  ;;  %v4873_v12 = vand.u32 4294901760, %v4872_v60  ;;  %v15754_v17 = vadd.f32 %v15688_v7, %v4256_v0  ;;  %v18644_v7 = vld [vmem:[#allocation80_spill] sm:$0xff]  ;;  %v18645_v19 = vld [vmem:[#allocation123_spill] sm:$0xff] }
 0x67a   : > { %12490 = vmatprep.subr.mxu1 %v15165_v6  ;;  %v18646_v60 = vld [vmem:[#allocation83_spill] sm:$0xff] }
 0x67b   : > { %12491 = vmatpush3.msra.mxu1 %v15167_v57  ;;  %v4867_v62 = vand.u32 4294901760, %v4866_v55  ;;  %18638 = vst [vmem:[#allocation151_spill] sm:$0xff] %v15754_v17  ;;  %v18647_v55 = vld [vmem:[#allocation124_spill] sm:$0xff] }
 0x67c   : > { %12492 = vmatprep.subr.mxu1 %v15181_v15 }
 0x67d   : > { %12493 = vmatpush3.msra.mxu1 %v15189_v41  ;;  %4868 = vmatprep.mubr.f32.mxu0 %v4867_v62  ;;  %v18648_v62 = vld [vmem:[#allocation88_spill] sm:$0xff] }
 0x67e   : > { %12494 = vmatprep.subr.mxu1 %v15198_v52  ;;  %4874 = vmatmul.mubr.f32.vlgmr.msra.gmra.mxu0 %v4873_v12  ;;  %v18649_v12 = vld [vmem:[#allocation128_spill] sm:$0xff] }
 0x67f   : > { %12452 = vmatpush3.msra.mxu0 %v15156_v63  ;;  %12495 = vmatpush3.msra.mxu1 %v15201_v35 }
 0x680   : > { %12453 = vmatprep.subr.mxu0 %v15179_v58  ;;  %5241 = vmatprep.mubr.f32.mxu0 %v4864_v26  ;;  %v17861_v26 = vmax.f32 %v15754_v17, 0.0  ;;  %v4725_v58 = vld [vmem:[%s18503_s10 + $0x1d0] sm:$0xff] }
 0x681   : > { %12496 = vmatprep.subr.mxu1 %v15300_v22  ;;  %12454 = vmatpush3.msra.mxu0 %v15187_v40 }
 0x682   : > { %12497 = vmatpush3.msra.mxu1 %v15305_v4  ;;  %12455 = vmatprep.subr.mxu0 %v15193_v11  ;;  %v4760_v0 = vsel %vm901_vm0, %v17861_v26, 0.0  ;;  %v18656_v26 = vld [vmem:[#allocation127_spill] sm:$0xff] }
 0x683   : > { %12498 = vmatprep.subr.mxu1 %v15313_v53  ;;  %12456 = vmatpush3.msra.mxu0 %v15196_v54 }
 0x684   : > { %12499 = vmatpush3.msra.mxu1 %v15322_v27  ;;  %12457 = vmatprep.subr.mxu0 %v15207_v2 }
 0x685   : > { %12500 = vmatprep.subr.mxu1 %v15334_v21  ;;  %12458 = vmatpush3.msra.mxu0 %v15214_v61  ;;  %v18673_v61 = vld [vmem:[#allocation21_spill] sm:$0xff] }
 0x686   : > { %12501 = vmatpush3.msra.mxu1 %v15346_v56  ;;  %12459 = vmatprep.subr.mxu0 %v15223_v20  ;;  %v4251_v20 = vsub.s32 2, %v18633_v45 }
 0x687   : > { %12502 = vmatprep.subr.mxu1 %v15360_v44  ;;  %12460 = vmatpush3.msra.mxu0 %v15231_v33  ;;  %v18672_v33 = vld [vmem:[#allocation121_spill] sm:$0xff] }
 0x688   : > { %12503 = vmatpush3.msra.mxu1 %v15416_v49  ;;  %12461 = vmatprep.subr.mxu0 %v15311_v46  ;;  %v4727_v46 = vld [vmem:[%s18503_s10 + $0x1e0] sm:$0xff] }
 0x689   : > { %12504 = vmatprep.subr.mxu1 %v15428_v51  ;;  %12462 = vmatpush3.msra.mxu0 %v15320_v25  ;;  %v15876_v54 = vand.u32 4294901760, %v4727_v46 }
 0x68a   : > { %12505 = vmatpush3.msra.mxu1 %v15434_v28  ;;  %12463 = vmatprep.subr.mxu0 %v15332_v18  ;;  %v18670_v18 = vld [vmem:[#allocation118_spill] sm:$0xff] }
 0x68b   : > { %12506 = vmatprep.subr.mxu1 %v15436_v42  ;;  %12464 = vmatpush3.msra.mxu0 %v15344_v1 }
 0x68c   : > { %12507 = vmatpush3.msra.mxu1 %v15438_v48  ;;  %12465 = vmatprep.subr.mxu0 %v15358_v14  ;;  %v18665_v14 = vld [vmem:[#allocation86_spill] sm:$0xff] }
 0x68d   : > { %12508 = vmatprep.subr.mxu1 %v15455_v8  ;;  %12466 = vmatpush3.msra.mxu0 %v15369_v13 }
 0x68e   : > { %12509 = vmatpush3.msra.mxu1 %v15478_v32  ;;  %12467 = vmatprep.subr.mxu0 %v18639_v16 }
 0x68f   : > { %12510 = vmatprep.subr.mxu1 %v18640_v31  ;;  %12468 = vmatpush3.msra.mxu0 %v18641_v29  ;;  %v18659_v29 = vld [vmem:[#allocation132_spill] sm:$0xff] }
 0x690   : > { %12511 = vmatpush3.msra.mxu1 %v15550_v43  ;;  %12469 = vmatprep.subr.mxu0 %v18642_v37 }
 0x691   : > { %12512 = vmatprep.subr.mxu1 %v15562_v34  ;;  %12470 = vmatpush3.msra.mxu0 %v18643_v9  ;;  %v18655_v9 = vld [vmem:[#allocation46_spill] sm:$0xff] }
 0x692   : > { %12513 = vmatpush3.msra.mxu1 %v15568_v38  ;;  %12471 = vmatprep.subr.mxu0 %v18644_v7  ;;  %v18653_v7 = vand.u32 4294901760, %v15705_v24 }
 0x693   : > { %12514 = vmatprep.subr.mxu1 %v18645_v19  ;;  %12472 = vmatpush3.msra.mxu0 %v18646_v60  ;;  %v18654_v60 = vld [vmem:[#allocation48_spill] sm:$0xff] }
 0x694   : > { %12515 = vmatpush3.msra.mxu1 %v18647_v55  ;;  %12473 = vmatprep.subr.mxu0 %v18648_v62  ;;  %v4761_v62 = vrot.slane %v4760_v0, 4 }
 0x695   : > { %12516 = vmatprep.subr.mxu1 %v18649_v12  ;;  %12474 = vmatpush3.msra.mxu0 %v18650_v50  ;;  %v4730_v50 = vld [vmem:[%s18503_s10 + $0x1f8] sm:$0xff] }
 0x696   : > { %12517 = vmatpush3.msra.mxu1 %v18651_v47  ;;  %12475 = vmatprep.subr.mxu0 %v18652_v36  ;;  %v4714_v36 = vld [vmem:[%s18503_s10 + $0x178] sm:$0xff]  ;;  %v15795_v37 = vand.u32 4294901760, %v4730_v50  ;;  %v4762_v17 = vadd.f32 %v4761_v62, %v4760_v0  ;;  %v4713_v62 = vld [vmem:[%s18503_s10 + $0x170] sm:$0xff] }
 0x697   : > { %5352 = vmatmul.mubr.f32.vlgmr.msra.gmra.mxu1 %v18653_v7  ;;  %12556 = vmatprep.subr.mxu1 %v18654_v60  ;;  %v18657_v7 = vld [vmem:[#allocation130_spill] sm:$0xff]  ;;  %v15799_v16 = vand.u32 4294901760, %v4714_v36  ;;  %v18663_v0 = vld [vmem:[#allocation60_spill] sm:$0xff]  ;;  %v15830_v1 = vand.u32 4294901760, %v4713_v62  ;;  %v18717_v60 = vld [vmem:[#allocation87_spill] sm:$0xff] }
 0x698   : > { %12476 = vmatpush3.msra.mxu0 %v18655_v9  ;;  %12557 = vmatpush3.msra.mxu1 %v15141_v23  ;;  %v18658_v9 = vld [vmem:[#allocation131_spill] sm:$0xff] }
 0x699   : > { %5622 = vmatprep.mubr.f32.mxu1 %v15702_v3  ;;  %12477 = vmatprep.subr.mxu0 %v18656_v26  ;;  %v4729_v26 = vld [vmem:[%s18503_s10 + $0x1f0] sm:$0xff]  ;;  %v15864_v2 = vsub.f32 %v4713_v62, %v15830_v1  ;;  %v4710_v62 = vld [vmem:[%s18503_s10 + $0x158] sm:$0xff] }
 0x69a   : > { %12558 = vmatprep.subr.mxu1 %v15158_v5  ;;  %12478 = vmatpush3.msra.mxu0 %v18657_v7  ;;  %v18660_v7 = vld [vmem:[#allocation134_spill] sm:$0xff]  ;;  %v15813_v13 = vand.u32 4294901760, %v4729_v26 }
 0x69b   : > { %12559 = vmatpush3.msra.mxu1 %v15160_v39  ;;  %12479 = vmatprep.subr.mxu0 %v18658_v9  ;;  %v18661_v9 = vld [vmem:[#allocation140_spill] sm:$0xff]  ;;  %18674 = vst [vmem:[#allocation157_spill] sm:$0xff] %v15864_v2 }
 0x69c   : > { %12560 = vmatprep.subr.mxu1 %v15165_v6  ;;  %12480 = vmatpush3.msra.mxu0 %v18659_v29  ;;  %v15811_v29 = vsub.f32 %v4730_v50, %v15795_v37  ;;  %v18666_v50 = vld [vmem:[#allocation114_spill] sm:$0xff] }
 0x69d   : > { %12561 = vmatpush3.msra.mxu1 %v15167_v57  ;;  %12481 = vmatprep.subr.mxu0 %v18660_v7  ;;  %v15821_v7 = vsub.f32 %v4714_v36, %v15799_v16  ;;  %v4712_v36 = vld [vmem:[%s18503_s10 + $0x168] sm:$0xff] }
 0x69e   : > { %12562 = vmatprep.subr.mxu1 %v15181_v15  ;;  %12482 = vmatpush3.msra.mxu0 %v18661_v9  ;;  %18662 = vst [vmem:[#allocation152_spill] sm:$0xff] %v15811_v29  ;;  %v4763_v9 = vrot.slane %v4762_v17, 2  ;;  %v18699_v15 = vld [vmem:[#allocation119_spill] sm:$0xff] }
 0x69f   : > { %12563 = vmatpush3.msra.mxu1 %v15189_v41  ;;  %5244 = vmatmul.mubr.f32.vlgmr.msra.gmra.mxu0 %v15705_v24  ;;  %18664 = vst [vmem:[#allocation153_spill] sm:$0xff] %v15821_v7  ;;  %v4728_v24 = vld [vmem:[%s18503_s10 + $0x1e8] sm:$0xff] }
 0x6a0   : > { %12521 = vmatprep.subr.mxu0 %v18663_v0  ;;  %12564 = vmatprep.subr.mxu1 %v15198_v52  ;;  %v18667_v0 = vld [vmem:[#allocation116_spill] sm:$0xff]  ;;  %v15848_v25 = vand.u32 4294901760, %v4728_v24 }
 0x6a1   : > { %12522 = vmatpush3.msra.mxu0 %v18665_v14  ;;  %5518 = vmatprep.mubr.f32.mxu0 %v15702_v3  ;;  %v15838_v3 = vand.u32 4294901760, %v15811_v29  ;;  %v15841_v14 = vsub.f32 %v4729_v26, %v15813_v13  ;;  %v15855_v26 = vand.u32 4294901760, %v4712_v36 }
 0x6a2   : > { %12565 = vmatpush3.msra.mxu1 %v15201_v35  ;;  %12523 = vmatprep.subr.mxu0 %v18666_v50  ;;  %v15846_v50 = vand.u32 4294901760, %v15821_v7  ;;  %v4723_v35 = vld [vmem:[%s18503_s10 + $0x1c0] sm:$0xff] }
 0x6a3   : > { %12566 = vmatprep.subr.mxu1 %v15300_v22  ;;  %12524 = vmatpush3.msra.mxu0 %v18667_v0  ;;  %18668 = vst [vmem:[#allocation154_spill] sm:$0xff] %v15838_v3  ;;  %18669 = vst [vmem:[#allocation155_spill] sm:$0xff] %v15841_v14  ;;  %v4764_v0 = vadd.f32 %v4763_v9, %v4762_v17  ;;  %v4726_v17 = vld [vmem:[%s18503_s10 + $0x1d8] sm:$0xff]  ;;  %v18675_v9 = vld [vmem:[#allocation23_spill] sm:$0xff]  ;;  %v15874_v45 = vand.u32 4294901760, %v15841_v14 }
 0x6a4   : > { %12567 = vmatpush3.msra.mxu1 %v15305_v4  ;;  %12525 = vmatprep.subr.mxu0 %v18670_v18  ;;  %18671 = vst [vmem:[#allocation156_spill] sm:$0xff] %v15846_v50  ;;  %v4711_v18 = vld [vmem:[%s18503_s10 + $0x160] sm:$0xff]  ;;  %v5745_v11 = vsub.f32 %v15821_v7, %v15846_v50  ;;  %v18690_v22 = vld [vmem:[#allocation97_spill] sm:$0xff] }
 0x6a5   : > { %12568 = vmatprep.subr.mxu1 %v15313_v53  ;;  %12526 = vmatpush3.msra.mxu0 %v18672_v33  ;;  %v5857_v33 = vsub.f32 %v15811_v29, %v15838_v3  ;;  %18676 = vst [vmem:[#allocation158_spill] sm:$0xff] %v15874_v45  ;;  %v15888_v40 = vand.u32 4294901760, %v4711_v18  ;;  %v4765_v63 = vrot.slane %v4764_v0, 1  ;;  %v15907_v53 = vand.u32 4294901760, %v15864_v2  ;;  %v18736_v50 = vld [vmem:[#allocation102_spill] sm:$0xff] }
 0x6a6   : > { %12569 = vmatpush3.msra.mxu1 %v15322_v27  ;;  %12527 = vmatprep.subr.mxu0 %v18673_v61  ;;  %v18677_v61 = vld [vmem:[#allocation24_spill] sm:$0xff] }
 0x6a7   : > { %12570 = vmatprep.subr.mxu1 %v15334_v21  ;;  %12528 = vmatpush3.msra.mxu0 %v18675_v9  ;;  %v15886_v9 = vsub.f32 %v4728_v24, %v15848_v25  ;;  %18679 = vst [vmem:[#allocation160_spill] sm:$0xff] %v15888_v40  ;;  %v4709_v24 = vld [vmem:[%s18503_s10 + $0x150] sm:$0xff]  ;;  %v4252_v21 = vrot.slane %v15677_v30, %v4251_v20  ;;  %18684 = vst [vmem:[#allocation163_spill] sm:$0xff] %v15907_v53  ;;  %v15916_v4 = vand.u32 4294901760, %v5857_v33 }
 0x6a8   : > { %12571 = vmatpush3.msra.mxu1 %v15346_v56  ;;  %12529 = vmatprep.subr.mxu0 %v18677_v61  ;;  %v15896_v56 = vsub.f32 %v4712_v36, %v15855_v26  ;;  %v15898_v61 = vand.u32 4294901760, %v4726_v17  ;;  %v18683_v27 = vld [vmem:[#allocation76_spill] sm:$0xff]  ;;  %v4724_v36 = vld [vmem:[%s18503_s10 + $0x1c8] sm:$0xff]  ;;  %v5864_v20 = vsub.f32 %v15841_v14, %v15874_v45  ;;  %v15921_v30 = vsub.f32 %v4727_v46, %v15876_v54 }
 0x6a9   : > { %18678 = vst [vmem:[#allocation159_spill] sm:$0xff] %v15886_v9  ;;  %12572 = vmatprep.subr.mxu1 %v15360_v44  ;;  %12530 = vmatpush3.msra.mxu0 %v18680_v10  ;;  %v15909_v44 = vand.u32 4294901760, %v4710_v62  ;;  %v18686_v10 = vld [vmem:[#allocation82_spill] sm:$0xff]  ;;  %18687 = vst [vmem:[#allocation165_spill] sm:$0xff] %v15916_v4  ;;  %v15933_v33 = vand.u32 4294901760, %v15886_v9  ;;  %v15938_v46 = vand.u32 4294901760, %v4709_v24  ;;  %v4766_v52 = vadd.f32 %v4765_v63, %v4764_v0 }
 0x6aa   : > { %18681 = vst [vmem:[#allocation161_spill] sm:$0xff] %v15896_v56  ;;  %18682 = vst [vmem:[#allocation162_spill] sm:$0xff] %v15898_v61  ;;  %12573 = vmatpush3.msra.mxu1 %v15416_v49  ;;  %12531 = vmatprep.subr.mxu0 %v18683_v27  ;;  %v15923_v27 = vand.u32 4294901760, %v4725_v58  ;;  %v4708_v49 = vld [vmem:[%s18503_s10 + $0x148] sm:$0xff]  ;;  %v15951_v41 = vand.u32 4294901760, %v4724_v36  ;;  %v15957_v57 = vadd.f32 %v18699_v15, %v4252_v21  ;;  %v18701_v63 = vld [vmem:[#allocation22_spill] sm:$0xff] }
 0x6ab   : > { %18685 = vst [vmem:[#allocation164_spill] sm:$0xff] %v15909_v44  ;;  %12574 = vmatprep.subr.mxu1 %v15428_v51  ;;  %12532 = vmatpush3.msra.mxu0 %v18686_v10  ;;  %18688 = vst [vmem:[#allocation166_spill] sm:$0xff] %v15921_v30  ;;  %v15930_v51 = vand.u32 4294901760, %v5745_v11  ;;  %v15936_v10 = vsub.f32 %v4711_v18, %v15888_v40  ;;  %v15946_v11 = vand.u32 4294901760, %v15896_v56  ;;  %v4707_v18 = vld [vmem:[%s18503_s10 + $0x140] sm:$0xff]  ;;  %v15970_v6 = vand.u32 4294901760, %v5864_v20 }
 0x6ac   : > { %18689 = vst [vmem:[#allocation167_spill] sm:$0xff] %v15923_v27  ;;  %12575 = vmatpush3.msra.mxu1 %v15434_v28  ;;  %12533 = vmatprep.subr.mxu0 %v18690_v22  ;;  %18692 = vst [vmem:[#allocation169_spill] sm:$0xff] %v15933_v33  ;;  %v18695_v28 = vld [vmem:[#allocation106_spill] sm:$0xff]  ;;  %v15949_v22 = vsub.f32 %v4726_v17, %v15898_v61  ;;  %v5752_v0 = vsub.f32 %v15864_v2, %v15907_v53  ;;  %v15966_v17 = vand.u32 4294901760, %v4708_v49  ;;  %v18729_v53 = vld [vmem:[#allocation107_spill] sm:$0xff] }
 0x6ad   : > { %18691 = vst [vmem:[#allocation168_spill] sm:$0xff] %v15930_v51  ;;  %18693 = vst [vmem:[#allocation170_spill] sm:$0xff] %v15936_v10  ;;  %12576 = vmatprep.subr.mxu1 %v15436_v42  ;;  %12534 = vmatpush3.msra.mxu0 %v18695_v28  ;;  %v15964_v28 = vsub.f32 %v4710_v62, %v15909_v44  ;;  %v18704_v42 = vld [vmem:[#allocation34_spill] sm:$0xff]  ;;  %v15973_v15 = vand.u32 4294901760, %v15921_v30  ;;  %v15976_v21 = vsub.f32 %v4725_v58, %v15923_v27  ;;  %v18709_v62 = vld [vmem:[#allocation35_spill] sm:$0xff] }
 0x6ae   : > { %18694 = vst [vmem:[#allocation171_spill] sm:$0xff] %v15938_v46  ;;  %18696 = vst [vmem:[#allocation172_spill] sm:$0xff] %v15946_v11  ;;  %12577 = vmatpush3.msra.mxu1 %v15438_v48  ;;  %12535 = vmatprep.subr.mxu0 %v18701_v63  ;;  %v15978_v63 = vand.u32 4294901760, %v4723_v35  ;;  %v5871_v48 = vsub.f32 %v15886_v9, %v15933_v33  ;;  %v15988_v20 = vsub.f32 %v4709_v24, %v15938_v46  ;;  %v4722_v58 = vld [vmem:[%s18503_s10 + $0x1b8] sm:$0xff] }
 0x6af   : > { %18697 = vst [vmem:[#allocation173_spill] sm:$0xff] %v15949_v22  ;;  %18698 = vst [vmem:[#allocation174_spill] sm:$0xff] %v15951_v41  ;;  %12578 = vmatprep.subr.mxu1 %v15455_v8  ;;  %12536 = vmatpush3.msra.mxu0 %v18704_v42  ;;  %v15985_v8 = vand.u32 4294901760, %v15936_v10  ;;  %v15990_v42 = vand.u32 4294901760, %v4707_v18  ;;  %v5759_v39 = vsub.f32 %v15896_v56, %v15946_v11  ;;  %v16002_v5 = vand.u32 4294901760, %v15949_v22  ;;  %v18721_v11 = vld [vmem:[#allocation100_spill] sm:$0xff] }
 0x6b0   : > { %18700 = vst [vmem:[#allocation119_spill] sm:$0xff] %v15957_v57  ;;  %18702 = vst [vmem:[#allocation175_spill] sm:$0xff] %v15964_v28  ;;  %12579 = vmatpush3.msra.mxu1 %v15478_v32  ;;  %12537 = vmatprep.subr.mxu0 %v18709_v62  ;;  %v18713_v32 = vld [vmem:[#allocation75_spill] sm:$0xff]  ;;  %v15997_v62 = vand.u32 4294901760, %v4766_v52  ;;  %v16005_v24 = vsub.f32 %v4724_v36, %v15951_v41  ;;  %v16016_v33 = vsub.f32 %v4708_v49, %v15966_v17  ;;  %v4706_v49 = vld [vmem:[%s18503_s10 + $0x138] sm:$0xff] }
 0x6b1   : > { %18703 = vst [vmem:[#allocation176_spill] sm:$0xff] %v15966_v17  ;;  %18705 = vst [vmem:[#allocation177_spill] sm:$0xff] %v15970_v6  ;;  %12580 = vmatprep.subr.mxu1 %v18640_v31  ;;  %12538 = vmatpush3.msra.mxu0 %v18713_v32  ;;  %v16010_v31 = vand.u32 4294901760, %v5752_v0  ;;  %v16013_v32 = vand.u32 4294901760, %v15964_v28  ;;  %v5878_v36 = vsub.f32 %v15921_v30, %v15973_v15  ;;  %v16023_v23 = vand.u32 4294901760, %v15976_v21  ;;  %v4701_v30 = vld [vmem:[%s18503_s10 + $0x110] sm:$0xff] }
 0x6b2   : > { %18706 = vst [vmem:[#allocation178_spill] sm:$0xff] %v15973_v15  ;;  %18707 = vst [vmem:[#allocation179_spill] sm:$0xff] %v15976_v21  ;;  %12581 = vmatpush3.msra.mxu1 %v15550_v43  ;;  %12539 = vmatprep.subr.mxu0 %v18717_v60  ;;  %v16026_v60 = vsub.f32 %v4723_v35, %v15978_v63  ;;  %v16028_v0 = vand.u32 4294901760, %v4722_v58  ;;  %v5766_v43 = vsub.f32 %v15936_v10, %v15985_v8  ;;  %v18770_v56 = vld [vmem:[#allocation143_spill] sm:$0xff] }
 0x6b3   : > { %18708 = vst [vmem:[#allocation180_spill] sm:$0xff] %v15978_v63  ;;  %18710 = vst [vmem:[#allocation181_spill] sm:$0xff] %v15985_v8  ;;  %12582 = vmatprep.subr.mxu1 %v15562_v34  ;;  %12540 = vmatpush3.msra.mxu0 %v18721_v11  ;;  %v18725_v34 = vld [vmem:[#allocation105_spill] sm:$0xff]  ;;  %v16035_v11 = vand.u32 4294901760, %v5871_v48  ;;  %v16040_v15 = vand.u32 4294901760, %v15988_v20  ;;  %v16043_v35 = vsub.f32 %v4707_v18, %v15990_v42  ;;  %v16047_v45 = vand.u32 4294901760, %v5759_v39 }
 0x6b4   : > { %18711 = vst [vmem:[#allocation182_spill] sm:$0xff] %v15988_v20  ;;  %18712 = vst [vmem:[#allocation183_spill] sm:$0xff] %v15990_v42  ;;  %12583 = vmatpush3.msra.mxu1 %v15568_v38  ;;  %12541 = vmatprep.subr.mxu0 %v18725_v34  ;;  %v5885_v34 = vsub.f32 %v15949_v22, %v16002_v5  ;;  %v16052_v48 = vsub.f32 %v4766_v52, %v15997_v62  ;;  %v16055_v38 = vand.u32 4294901760, %v16005_v24  ;;  %v4721_v18 = vld [vmem:[%s18503_s10 + $0x1b0] sm:$0xff]  ;;  %v18733_v39 = vld [vmem:[#allocation110_spill] sm:$0xff] }
 0x6b5   : > { %18714 = vst [vmem:[#allocation184_spill] sm:$0xff] %v15997_v62  ;;  %18715 = vst [vmem:[#allocation185_spill] sm:$0xff] %v16002_v5  ;;  %12584 = vmatprep.subr.mxu1 %v18645_v19  ;;  %12542 = vmatpush3.msra.mxu0 %v18729_v53  ;;  %v18732_v8 = vmax.f32 %v15957_v57, 0.0  ;;  %v5773_v53 = vsub.f32 %v15964_v28, %v16013_v32  ;;  %v16068_v52 = vand.u32 4294901760, %v16016_v33  ;;  %v16070_v5 = vand.u32 4294901760, %v4706_v49 }
 0x6b6   : > { %18716 = vst [vmem:[#allocation186_spill] sm:$0xff] %v16005_v24  ;;  %18718 = vst [vmem:[#allocation187_spill] sm:$0xff] %v16010_v31  ;;  %12585 = vmatpush3.msra.mxu1 %v18647_v55  ;;  %12543 = vmatprep.subr.mxu0 %v18733_v39  ;;  %v16074_v3 = vand.u32 4294901760, %v5878_v36  ;;  %v16079_v57 = vand.u32 4294901760, %v16026_v60  ;;  %v16082_v39 = vsub.f32 %v4722_v58, %v16028_v0  ;;  %v4705_v55 = vld [vmem:[%s18503_s10 + $0x130] sm:$0xff]  ;;  %v4720_v58 = vld [vmem:[%s18503_s10 + $0x1a8] sm:$0xff] }
 0x6b7   : > { %18719 = vst [vmem:[#allocation188_spill] sm:$0xff] %v16013_v32  ;;  %18720 = vst [vmem:[#allocation189_spill] sm:$0xff] %v16016_v33  ;;  %v4753_v19 = vsel %vm901_vm0, %v18732_v8, 0.0  ;;  %12586 = vmatprep.subr.mxu1 %v18649_v12  ;;  %12544 = vmatpush3.msra.mxu0 %v18736_v50  ;;  %v5892_v8 = vsub.f32 %v15976_v21, %v16023_v23  ;;  %v18740_v12 = vld [vmem:[#allocation103_spill] sm:$0xff]  ;;  %v16089_v50 = vand.u32 4294901760, %v5766_v43  ;;  %v16096_v32 = vand.u32 4294901760, %v4721_v18 }
 0x6b8   : > { %18722 = vst [vmem:[#allocation190_spill] sm:$0xff] %v16023_v23  ;;  %18723 = vst [vmem:[#allocation191_spill] sm:$0xff] %v16026_v60  ;;  %12587 = vmatpush3.msra.mxu1 %v18651_v47  ;;  %12545 = vmatprep.subr.mxu0 %v18740_v12  ;;  %v5780_v36 = vsub.f32 %v15988_v20, %v16040_v15  ;;  %v16094_v23 = vand.u32 4294901760, %v16043_v35  ;;  %v4754_v21 = vrot.slane %v4753_v19, 4  ;;  %v16103_v12 = vand.u32 4294901760, %v5885_v34  ;;  %v18745_v20 = vld [vmem:[#allocation129_spill] sm:$0xff] }
 0x6b9   : > { %18724 = vst [vmem:[#allocation192_spill] sm:$0xff] %v16028_v0  ;;  %18726 = vst [vmem:[#allocation193_spill] sm:$0xff] %v16035_v11  ;;  %5624 = vmatmul.mubr.f32.vlgmr.msra.gmra.mxu1 %v15700_v59  ;;  %12626 = vmatprep.subr.mxu1 %v15916_v4  ;;  %v5899_v47 = vsub.f32 %v16005_v24, %v16055_v38  ;;  %v16113_v28 = vand.u32 4294901760, %v5773_v53  ;;  %v5787_v4 = vsub.f32 %v16016_v33, %v16068_v52  ;;  %v18749_v24 = vld [vmem:[#allocation133_spill] sm:$0xff]  ;;  %v18753_v33 = vld [vmem:[#allocation136_spill] sm:$0xff] }
 0x6ba   : > { %18727 = vst [vmem:[#allocation194_spill] sm:$0xff] %v16040_v15  ;;  %18728 = vst [vmem:[#allocation195_spill] sm:$0xff] %v16043_v35  ;;  %v4704_v15 = vld [vmem:[%s18503_s10 + $0x128] sm:$0xff]  ;;  %12546 = vmatpush3.msra.mxu0 %v18745_v20  ;;  %12627 = vmatpush3.msra.mxu1 %v15930_v51  ;;  %v16118_v34 = vsub.f32 %v4706_v49, %v16070_v5  ;;  %v16120_v43 = vand.u32 4294901760, %v4705_v55  ;;  %v16127_v20 = vand.u32 4294901760, %v5892_v8  ;;  %v16132_v51 = vand.u32 4294901760, %v16082_v39 }
 0x6bb   : > { %18730 = vst [vmem:[#allocation196_spill] sm:$0xff] %v16047_v45  ;;  %18731 = vst [vmem:[#allocation197_spill] sm:$0xff] %v16055_v38  ;;  %v4719_v38 = vld [vmem:[%s18503_s10 + $0x1a0] sm:$0xff]  ;;  %5966 = vmatprep.mubr.f32.mxu1 %v15997_v62  ;;  %12547 = vmatprep.subr.mxu0 %v18749_v24  ;;  %v5906_v53 = vsub.f32 %v16026_v60, %v16079_v57  ;;  %v16134_v49 = vand.u32 4294901760, %v4720_v58  ;;  %v16141_v62 = vand.u32 4294901760, %v5780_v36  ;;  %v4718_v60 = vld [vmem:[%s18503_s10 + $0x198] sm:$0xff] }
 0x6bc   : > { %18734 = vst [vmem:[#allocation198_spill] sm:$0xff] %v16068_v52  ;;  %18735 = vst [vmem:[#allocation199_spill] sm:$0xff] %v16070_v5  ;;  %v4703_v52 = vld [vmem:[%s18503_s10 + $0x120] sm:$0xff]  ;;  %12628 = vmatprep.subr.mxu1 %v15970_v6  ;;  %12548 = vmatpush3.msra.mxu0 %v18753_v33  ;;  %v5794_v8 = vsub.f32 %v16043_v35, %v16094_v23  ;;  %v16146_v24 = vsub.f32 %v4721_v18, %v16096_v32  ;;  %v18757_v6 = vld [vmem:[#allocation137_spill] sm:$0xff]  ;;  %v18758_v36 = vand.u32 4294901760, %v16052_v48 }
 0x6bd   : > { %18737 = vst [vmem:[#allocation200_spill] sm:$0xff] %v16074_v3  ;;  %18738 = vst [vmem:[#allocation201_spill] sm:$0xff] %v16079_v57  ;;  %v16148_v57 = vand.u32 4294901760, %v4704_v15  ;;  %v4755_v22 = vadd.f32 %v4754_v21, %v4753_v19  ;;  %12629 = vmatpush3.msra.mxu1 %v16010_v31  ;;  %12549 = vmatprep.subr.mxu0 %v18757_v6  ;;  %v16158_v10 = vand.u32 4294901760, %v5899_v47  ;;  %v4702_v18 = vld [vmem:[%s18503_s10 + $0x118] sm:$0xff]  ;;  %v18761_v35 = vld [vmem:[#allocation138_spill] sm:$0xff] }
 0x6be   : > { %18739 = vst [vmem:[#allocation202_spill] sm:$0xff] %v16082_v39  ;;  %18741 = vst [vmem:[#allocation203_spill] sm:$0xff] %v16089_v50  ;;  %v5728_v33 = vsub.f32 %v16052_v48, %v18758_v36  ;;  %12630 = vmatprep.subr.mxu1 %v16035_v11  ;;  %12550 = vmatpush3.msra.mxu0 %v18761_v35  ;;  %v16167_v19 = vand.u32 4294901760, %v5787_v4  ;;  %v16170_v21 = vand.u32 4294901760, %v16118_v34  ;;  %v16175_v47 = vand.u32 4294901760, %v4703_v52  ;;  %v4717_v36 = vld [vmem:[%s18503_s10 + $0x190] sm:$0xff] }
 0x6bf   : > { %18742 = vst [vmem:[#allocation204_spill] sm:$0xff] %v16094_v23  ;;  %18743 = vst [vmem:[#allocation205_spill] sm:$0xff] %v16096_v32  ;;  %v16160_v23 = vand.u32 4294901760, %v4719_v38  ;;  %v16173_v6 = vsub.f32 %v4705_v55, %v16120_v43  ;;  %12631 = vmatpush3.msra.mxu1 %v16047_v45  ;;  %v18766_v31 = vld [vmem:[#allocation139_spill] sm:$0xff]  ;;  %v16182_v11 = vand.u32 4294901760, %v5906_v53  ;;  %v5913_v4 = vsub.f32 %v16082_v39, %v16132_v51 }
 0x6c0   : > { %18744 = vst [vmem:[#allocation206_spill] sm:$0xff] %v16103_v12  ;;  %18746 = vst [vmem:[#allocation207_spill] sm:$0xff] %v16113_v28  ;;  %12551 = vmatprep.subr.mxu0 %v18766_v31  ;;  %v16187_v35 = vsub.f32 %v4720_v58, %v16134_v49  ;;  %v16189_v55 = vand.u32 4294901760, %v4718_v60  ;;  %12632 = vmatprep.subr.mxu1 %v16074_v3  ;;  %v16196_v45 = vand.u32 4294901760, %v5794_v8  ;;  %v16199_v53 = vand.u32 4294901760, %v16146_v24 }
 0x6c1   : > { %18747 = vst [vmem:[#allocation208_spill] sm:$0xff] %v16118_v34  ;;  %18748 = vst [vmem:[#allocation209_spill] sm:$0xff] %v16120_v43  ;;  %12552 = vmatpush3.msra.mxu0 %v18770_v56  ;;  %v16202_v31 = vsub.f32 %v4704_v15, %v16148_v57  ;;  %v16204_v58 = vand.u32 4294901760, %v4702_v18  ;;  %v4756_v39 = vrot.slane %v4755_v22, 2  ;;  %12633 = vmatpush3.msra.mxu1 %v16089_v50  ;;  %v5729_v56 = vand.u32 4294901760, %v5728_v33  ;;  %v4700_v15 = vld [vmem:[%s18503_s10 + $0x108] sm:$0xff] }
 0x6c2   : > { %18750 = vst [vmem:[#allocation210_spill] sm:$0xff] %v16127_v20  ;;  %18751 = vst [vmem:[#allocation211_spill] sm:$0xff] %v16132_v51  ;;  %v4716_v51 = vld [vmem:[%s18503_s10 + $0x188] sm:$0xff]  ;;  %5520 = vmatmul.mubr.f32.vlgmr.msra.gmra.mxu0 %v15700_v59  ;;  %v16212_v8 = vsub.f32 %v4719_v38, %v16160_v23  ;;  %v16214_v3 = vand.u32 4294901760, %v4717_v36  ;;  %12591 = vmatprep.subr.mxu0 %v15795_v37  ;;  %v5801_v9 = vsub.f32 %v16118_v34, %v16170_v21  ;;  %v4715_v33 = vld [vmem:[%s18503_s10 + $0x180] sm:$0xff] }
 0x6c3   : > { %18752 = vst [vmem:[#allocation212_spill] sm:$0xff] %v16134_v49  ;;  %18754 = vst [vmem:[#allocation213_spill] sm:$0xff] %v16141_v62  ;;  %12634 = vmatprep.subr.mxu1 %v16103_v12  ;;  %v16224_v50 = vand.u32 4294901760, %v16173_v6  ;;  %v16227_v59 = vsub.f32 %v4703_v52, %v16175_v47  ;;  %v16229_v38 = vand.u32 4294901760, %v4701_v30  ;;  %12592 = vmatpush3.msra.mxu0 %v15799_v16  ;;  %v16235_v2 = vand.u32 4294901760, %v5913_v4  ;;  %v4699_v52 = vld [vmem:[%s18503_s10 + $0x100] sm:$0xff] }
 0x6c4   : > { %18755 = vst [vmem:[#allocation214_spill] sm:$0xff] %v16146_v24  ;;  %18756 = vst [vmem:[#allocation215_spill] sm:$0xff] %v16148_v57  ;;  %5730 = vmatprep.mubr.f32.mxu0 %v5729_v56  ;;  %v16238_v12 = vand.u32 4294901760, %v16187_v35  ;;  %v16243_v34 = vand.u32 4294901760, %v4716_v51  ;;  %12635 = vmatpush3.msra.mxu1 %v16113_v28  ;;  %v5920_v56 = vsub.f32 %v16146_v24, %v16199_v53  ;;  %v16253_v4 = vand.u32 4294901760, %v16202_v31 }
 0x6c5   : > { %18759 = vst [vmem:[#allocation216_spill] sm:$0xff] %v16158_v10  ;;  %18760 = vst [vmem:[#allocation217_spill] sm:$0xff] %v16160_v23  ;;  %12593 = vmatprep.subr.mxu0 %v15813_v13  ;;  %v16256_v14 = vsub.f32 %v4702_v18, %v16204_v58  ;;  %v4757_v7 = vadd.f32 %v4756_v39, %v4755_v22  ;;  %12636 = vmatprep.subr.mxu1 %v16127_v20  ;;  %v16263_v28 = vand.u32 4294901760, %v16212_v8 }
 0x6c6   : > { %18762 = vst [vmem:[#allocation218_spill] sm:$0xff] %v16167_v19  ;;  %18763 = vst [vmem:[#allocation219_spill] sm:$0xff] %v16170_v21  ;;  %v16241_v21 = vsub.f32 %v4718_v60, %v16189_v55  ;;  %v16258_v60 = vand.u32 4294901760, %v4700_v15  ;;  %12594 = vmatpush3.msra.mxu0 %v15830_v1  ;;  %v16266_v29 = vsub.f32 %v4717_v36, %v16214_v3  ;;  %12637 = vmatpush3.msra.mxu1 %v16141_v62 }
 0x6c7   : > { %18764 = vst [vmem:[#allocation220_spill] sm:$0xff] %v16173_v6  ;;  %18765 = vst [vmem:[#allocation221_spill] sm:$0xff] %v16175_v47  ;;  %12595 = vmatprep.subr.mxu0 %v15848_v25  ;;  %v5808_v18 = vsub.f32 %v16173_v6, %v16224_v50  ;;  %v16275_v22 = vand.u32 4294901760, %v16227_v59  ;;  %v16278_v39 = vsub.f32 %v4701_v30, %v16229_v38  ;;  %v16280_v20 = vand.u32 4294901760, %v4699_v52 }
 0x6c8   : > { %18767 = vst [vmem:[#allocation222_spill] sm:$0xff] %v16182_v11  ;;  %18768 = vst [vmem:[#allocation223_spill] sm:$0xff] %v16187_v35  ;;  %12638 = vmatprep.subr.mxu1 %v16158_v10  ;;  %12596 = vmatpush3.msra.mxu0 %v15855_v26  ;;  %v16284_v36 = vand.u32 4294901760, %v5801_v9  ;;  %v5927_v62 = vsub.f32 %v16187_v35, %v16238_v12  ;;  %v16289_v24 = vand.u32 4294901760, %v16241_v21  ;;  %v16296_v30 = vand.u32 4294901760, %v5920_v56 }
 0x6c9   : > { %18769 = vst [vmem:[#allocation224_spill] sm:$0xff] %v16189_v55  ;;  %18771 = vst [vmem:[#allocation225_spill] sm:$0xff] %v16196_v45  ;;  %12639 = vmatpush3.msra.mxu1 %v16167_v19  ;;  %12597 = vmatprep.subr.mxu0 %v15876_v54  ;;  %v5815_v10 = vsub.f32 %v16202_v31, %v16253_v4  ;;  %v16301_v9 = vand.u32 4294901760, %v16256_v14  ;;  %v4758_v35 = vrot.slane %v4757_v7, 1  ;;  %v16311_v56 = vand.u32 4294901760, %v16266_v29 }
 0x6ca   : > { %18772 = vst [vmem:[#allocation226_spill] sm:$0xff] %v16199_v53  ;;  %18773 = vst [vmem:[#allocation227_spill] sm:$0xff] %v16202_v31  ;;  %v16268_v53 = vand.u32 4294901760, %v4715_v33  ;;  %12640 = vmatprep.subr.mxu1 %v16182_v11  ;;  %12598 = vmatpush3.msra.mxu0 %v15888_v40  ;;  %v5822_v11 = vsub.f32 %v16227_v59, %v16275_v22 }
 0x6cb   : > { %18774 = vst [vmem:[#allocation228_spill] sm:$0xff] %v16204_v58  ;;  %18775 = vst [vmem:[#allocation229_spill] sm:$0xff] %v16212_v8  ;;  %12641 = vmatpush3.msra.mxu1 %v16196_v45  ;;  %12599 = vmatprep.subr.mxu0 %v15898_v61  ;;  %v5941_v45 = vsub.f32 %v16241_v21, %v16289_v24 }
 0x6cc   : > { %18776 = vst [vmem:[#allocation230_spill] sm:$0xff] %v16214_v3  ;;  %18777 = vst [vmem:[#allocation231_spill] sm:$0xff] %v16224_v50  ;;  %v16292_v50 = vsub.f32 %v4716_v51, %v16243_v34  ;;  %v5934_v51 = vsub.f32 %v16212_v8, %v16263_v28  ;;  %v16314_v19 = vsub.f32 %v4715_v33, %v16268_v53  ;;  %12642 = vmatprep.subr.mxu1 %v16235_v2 }
 0x6cd   : > { %18778 = vst [vmem:[#allocation232_spill] sm:$0xff] %v16227_v59  ;;  %18779 = vst [vmem:[#allocation233_spill] sm:$0xff] %v16229_v38  ;;  %12600 = vmatpush3.msra.mxu0 %v15909_v44  ;;  %v16330_v33 = vand.u32 4294901760, %v5927_v62  ;;  %12643 = vmatpush3.msra.mxu1 %v16284_v36  ;;  %v4759_v62 = vadd.f32 %v4758_v35, %v4757_v7 }
 0x6ce   : > { %18780 = vst [vmem:[#allocation234_spill] sm:$0xff] %v16235_v2  ;;  %18781 = vst [vmem:[#allocation235_spill] sm:$0xff] %v16238_v12  ;;  %v16304_v12 = vsub.f32 %v4700_v15, %v16258_v60  ;;  %v16318_v15 = vand.u32 4294901760, %v5808_v18  ;;  %v16335_v18 = vand.u32 4294901760, %v16292_v50  ;;  %12601 = vmatprep.subr.mxu0 %v15923_v27  ;;  %12644 = vmatprep.subr.mxu1 %v16296_v30 }
 0x6cf   : > { %18782 = vst [vmem:[#allocation236_spill] sm:$0xff] %v16241_v21  ;;  %18783 = vst [vmem:[#allocation237_spill] sm:$0xff] %v16243_v34  ;;  %12602 = vmatpush3.msra.mxu0 %v15938_v46  ;;  %v16353_v21 = vand.u32 4294901760, %v16314_v19 }
 0x6d0   : > { %18784 = vst [vmem:[#allocation238_spill] sm:$0xff] %v16253_v4  ;;  %18785 = vst [vmem:[#allocation239_spill] sm:$0xff] %v16256_v14  ;;  %v16323_v4 = vand.u32 4294901760, %v16278_v39  ;;  %v16344_v2 = vand.u32 4294901760, %v16304_v12  ;;  %12645 = vmatpush3.msra.mxu1 %v16318_v15  ;;  %12603 = vmatprep.subr.mxu0 %v15951_v41 }
 0x6d1   : > { %18786 = vst [vmem:[#allocation240_spill] sm:$0xff] %v16258_v60  ;;  %18787 = vst [vmem:[#allocation241_spill] sm:$0xff] %v16263_v28  ;;  %v16326_v28 = vsub.f32 %v4699_v52, %v16280_v20  ;;  %v5829_v52 = vsub.f32 %v16256_v14, %v16301_v9  ;;  %12646 = vmatprep.subr.mxu1 %v16330_v33  ;;  %12604 = vmatpush3.msra.mxu0 %v15966_v17 }
 0x6d2   : > { %18788 = vst [vmem:[#allocation242_spill] sm:$0xff] %v16266_v29  ;;  %18789 = vst [vmem:[#allocation243_spill] sm:$0xff] %v16268_v53  ;;  %v5836_v7 = vsub.f32 %v16278_v39, %v16323_v4  ;;  %12605 = vmatprep.subr.mxu0 %v15978_v63 }
 0x6d3   : > { %18790 = vst [vmem:[#allocation244_spill] sm:$0xff] %v16275_v22  ;;  %18791 = vst [vmem:[#allocation245_spill] sm:$0xff] %v16278_v39  ;;  %v16339_v22 = vand.u32 4294901760, %v5815_v10  ;;  %v16357_v10 = vand.u32 4294901760, %v5822_v11  ;;  %v16362_v35 = vand.u32 4294901760, %v16326_v28  ;;  %v16372_v11 = vand.u32 4294901760, %v5829_v52  ;;  %12606 = vmatpush3.msra.mxu0 %v15990_v42 }
 0x6d4   : > { %18792 = vst [vmem:[#allocation246_spill] sm:$0xff] %v16280_v20  ;;  %18793 = vst [vmem:[#allocation247_spill] sm:$0xff] %v16284_v36  ;;  %v5948_v36 = vsub.f32 %v16266_v29, %v16311_v56  ;;  %12607 = vmatprep.subr.mxu0 %v16028_v0  ;;  %v16386_v52 = vand.u32 4294901760, %v5836_v7 }
 0x6d5   : > { %18794 = vst [vmem:[#allocation248_spill] sm:$0xff] %v16289_v24  ;;  %18795 = vst [vmem:[#allocation249_spill] sm:$0xff] %v16292_v50  ;;  %v16348_v24 = vand.u32 4294901760, %v5934_v51  ;;  %v16366_v51 = vand.u32 4294901760, %v5941_v45  ;;  %12647 = vmatpush3.msra.mxu1 %v16339_v22  ;;  %v5962_v45 = vsub.f32 %v16314_v19, %v16353_v21  ;;  %12608 = vmatpush3.msra.mxu0 %v16070_v5 }
 0x6d6   : > { %18796 = vst [vmem:[#allocation250_spill] sm:$0xff] %v16296_v30  ;;  %18797 = vst [vmem:[#allocation251_spill] sm:$0xff] %v16301_v9  ;;  %v5955_v30 = vsub.f32 %v16292_v50, %v16335_v18  ;;  %12609 = vmatprep.subr.mxu0 %v16096_v32 }
 0x6d7   : > { %18798 = vst [vmem:[#allocation252_spill] sm:$0xff] %v16304_v12  ;;  %18799 = vst [vmem:[#allocation253_spill] sm:$0xff] %v16311_v56  ;;  %12648 = vmatprep.subr.mxu1 %v16348_v24  ;;  %12610 = vmatpush3.msra.mxu0 %v16120_v43  ;;  %v16400_v7 = vand.u32 4294901760, %v5962_v45 }
 0x6d8   : > { %18800 = vst [vmem:[#allocation254_spill] sm:$0xff] %v16314_v19  ;;  %18801 = vst [vmem:[#allocation255_spill] sm:$0xff] %v16318_v15  ;;  %v5843_v15 = vsub.f32 %v16304_v12, %v16344_v2  ;;  %12649 = vmatpush3.msra.mxu1 %v16357_v10  ;;  %12611 = vmatprep.subr.mxu0 %v16134_v49 }
 0x6d9   : > { %18802 = vst [vmem:[#allocation256_spill] sm:$0xff] %v16323_v4  ;;  %18803 = vst [vmem:[#allocation257_spill] sm:$0xff] %v16326_v28  ;;  %v16382_v4 = vand.u32 4294901760, %v4759_v62  ;;  %12650 = vmatprep.subr.mxu1 %v16366_v51  ;;  %12612 = vmatpush3.msra.mxu0 %v16148_v57 }
 0x6da   : > { %18804 = vst [vmem:[#allocation258_spill] sm:$0xff] %v16330_v33  ;;  %18805 = vst [vmem:[#allocation259_spill] sm:$0xff] %v16335_v18  ;;  %v16378_v33 = vand.u32 4294901760, %v5948_v36  ;;  %v16392_v36 = vand.u32 4294901760, %v5955_v30  ;;  %12651 = vmatpush3.msra.mxu1 %v16372_v11  ;;  %12613 = vmatprep.subr.mxu0 %v16160_v23 }
 0x6db   : > { %18806 = vst [vmem:[#allocation260_spill] sm:$0xff] %v16339_v22  ;;  %18807 = vst [vmem:[#allocation261_spill] sm:$0xff] %v16344_v2  ;;  %v5850_v22 = vsub.f32 %v16326_v28, %v16362_v35  ;;  %12614 = vmatpush3.msra.mxu0 %v16175_v47 }
 0x6dc   : > { %18808 = vst [vmem:[#allocation262_spill] sm:$0xff] %v16348_v24  ;;  %18809 = vst [vmem:[#allocation263_spill] sm:$0xff] %v16353_v21  ;;  %v16396_v24 = vand.u32 4294901760, %v5843_v15  ;;  %12652 = vmatprep.subr.mxu1 %v16378_v33  ;;  %12615 = vmatprep.subr.mxu0 %v16189_v55 }
 0x6dd   : > { %18810 = vst [vmem:[#allocation264_spill] sm:$0xff] %v16357_v10  ;;  %18811 = vst [vmem:[#allocation265_spill] sm:$0xff] %v16362_v35  ;;  %v16403_v10 = vsub.f32 %v4759_v62, %v16382_v4  ;;  %12653 = vmatpush3.msra.mxu1 %v16386_v52  ;;  %v16407_v30 = vand.u32 4294901760, %v5850_v22  ;;  %12616 = vmatpush3.msra.mxu0 %v16204_v58  ;;  %v18820_v22 = vand.u32 4294901760, %v16052_v48 }
 0x6de   : > { %18812 = vst [vmem:[#allocation266_spill] sm:$0xff] %v16366_v51  ;;  %18813 = vst [vmem:[#allocation267_spill] sm:$0xff] %v16372_v11  ;;  %12654 = vmatprep.subr.mxu1 %v16392_v36  ;;  %12617 = vmatprep.subr.mxu0 %v16214_v3 }
 0x6df   : > { %18814 = vst [vmem:[#allocation268_spill] sm:$0xff] %v16378_v33  ;;  %18815 = vst [vmem:[#allocation269_spill] sm:$0xff] %v16386_v52  ;;  %12655 = vmatpush3.msra.mxu1 %v16396_v24  ;;  %v18057_v15 = vand.u32 4294901760, %v16403_v10  ;;  %12618 = vmatpush3.msra.mxu0 %v16229_v38 }
 0x6e0   : > { %18816 = vst [vmem:[#allocation270_spill] sm:$0xff] %v16392_v36  ;;  %18817 = vst [vmem:[#allocation271_spill] sm:$0xff] %v16396_v24  ;;  %12656 = vmatprep.subr.mxu1 %v16400_v7  ;;  %12619 = vmatprep.subr.mxu0 %v16243_v34 }
 0x6e1   : > { %18818 = vst [vmem:[#allocation272_spill] sm:$0xff] %v16400_v7  ;;  %18819 = vst [vmem:[#allocation273_spill] sm:$0xff] %v16407_v30  ;;  %12657 = vmatpush3.msra.mxu1 %v16407_v30  ;;  %v5734_v62 = vsub.f32 %v16403_v10, %v18057_v15  ;;  %12620 = vmatpush3.msra.mxu0 %v16258_v60  ;;  %v18822_v15 = vld [vmem:[#allocation153_spill] sm:$0xff]  ;;  %v18823_v30 = vld [vmem:[#allocation155_spill] sm:$0xff] }
 0x6e2   : > { %5968 = vmatmul.mubr.f32.vlgmr.msra.gmra.mxu1 %v16382_v4  ;;  %12696 = vmatprep.subr.mxu1 %v15795_v37  ;;  %v18825_v7 = vld [vmem:[#allocation159_spill] sm:$0xff] }
 0x6e3   : > { %12697 = vmatpush3.msra.mxu1 %v15799_v16  ;;  %6210 = vmatprep.mubr.f32.mxu1 %v18820_v22  ;;  %v5735_v45 = vand.u32 4294901760, %v5734_v62  ;;  %v18821_v22 = vld [vmem:[#allocation152_spill] sm:$0xff]  ;;  %v18824_v62 = vld [vmem:[#allocation157_spill] sm:$0xff] }
 0x6e4   : > { %12698 = vmatprep.subr.mxu1 %v15813_v13  ;;  %12621 = vmatprep.subr.mxu0 %v16268_v53 }
 0x6e5   : > { %12699 = vmatpush3.msra.mxu1 %v15830_v1  ;;  %12622 = vmatpush3.msra.mxu0 %v16280_v20 }
 0x6e6   : > { %12700 = vmatprep.subr.mxu1 %v15848_v25  ;;  %5736 = vmatmul.mubr.f32.vlgmr.msra.gmra.mxu0 %v5735_v45  ;;  %v18826_v45 = vld [vmem:[#allocation161_spill] sm:$0xff] }
 0x6e7   : > { %12701 = vmatpush3.msra.mxu1 %v15855_v26  ;;  %12661 = vmatprep.subr.mxu0 %v18821_v22 }
 0x6e8   : > { %12702 = vmatprep.subr.mxu1 %v15876_v54  ;;  %12662 = vmatpush3.msra.mxu0 %v18822_v15  ;;  %v18827_v15 = vld [vmem:[#allocation166_spill] sm:$0xff] }
 0x6e9   : > { %12703 = vmatpush3.msra.mxu1 %v15888_v40  ;;  %6103 = vmatprep.mubr.f32.mxu0 %v16052_v48  ;;  %v18828_v48 = vld [vmem:[#allocation170_spill] sm:$0xff] }
 0x6ea   : > { %12704 = vmatprep.subr.mxu1 %v15898_v61  ;;  %12663 = vmatprep.subr.mxu0 %v18823_v30  ;;  %v18829_v30 = vld [vmem:[#allocation173_spill] sm:$0xff] }
 0x6eb   : > { %12705 = vmatpush3.msra.mxu1 %v15909_v44  ;;  %12664 = vmatpush3.msra.mxu0 %v18824_v62  ;;  %v18830_v62 = vld [vmem:[#allocation175_spill] sm:$0xff] }
 0x6ec   : > { %12706 = vmatprep.subr.mxu1 %v15923_v27  ;;  %12665 = vmatprep.subr.mxu0 %v18825_v7  ;;  %v18831_v7 = vld [vmem:[#allocation179_spill] sm:$0xff] }
 0x6ed   : > { %12707 = vmatpush3.msra.mxu1 %v15938_v46  ;;  %12666 = vmatpush3.msra.mxu0 %v18826_v45  ;;  %v18832_v45 = vld [vmem:[#allocation182_spill] sm:$0xff] }
 0x6ee   : > { %12708 = vmatprep.subr.mxu1 %v15951_v41  ;;  %12667 = vmatprep.subr.mxu0 %v18827_v15  ;;  %v18833_v15 = vld [vmem:[#allocation186_spill] sm:$0xff] }
 0x6ef   : > { %12709 = vmatpush3.msra.mxu1 %v15966_v17  ;;  %12668 = vmatpush3.msra.mxu0 %v18828_v48  ;;  %v18834_v48 = vld [vmem:[#allocation189_spill] sm:$0xff] }
 0x6f0   : > { %12710 = vmatprep.subr.mxu1 %v15978_v63  ;;  %12669 = vmatprep.subr.mxu0 %v18829_v30  ;;  %v18835_v30 = vld [vmem:[#allocation191_spill] sm:$0xff] }
 0x6f1   : > { %12711 = vmatpush3.msra.mxu1 %v15990_v42  ;;  %12670 = vmatpush3.msra.mxu0 %v18830_v62  ;;  %v18836_v62 = vld [vmem:[#allocation195_spill] sm:$0xff] }
 0x6f2   : > { %12712 = vmatprep.subr.mxu1 %v16028_v0  ;;  %12671 = vmatprep.subr.mxu0 %v18831_v7  ;;  %v18837_v7 = vld [vmem:[#allocation202_spill] sm:$0xff] }
 0x6f3   : > { %12713 = vmatpush3.msra.mxu1 %v16070_v5  ;;  %12672 = vmatpush3.msra.mxu0 %v18832_v45  ;;  %v18838_v45 = vld [vmem:[#allocation208_spill] sm:$0xff] }
 0x6f4   : > { %12714 = vmatprep.subr.mxu1 %v16096_v32  ;;  %12673 = vmatprep.subr.mxu0 %v18833_v15  ;;  %v18839_v15 = vld [vmem:[#allocation214_spill] sm:$0xff] }
 0x6f5   : > { %12715 = vmatpush3.msra.mxu1 %v16120_v43  ;;  %12674 = vmatpush3.msra.mxu0 %v18834_v48 }
 0x6f6   : > { %12716 = vmatprep.subr.mxu1 %v16134_v49  ;;  %12675 = vmatprep.subr.mxu0 %v18835_v30  ;;  %v18840_v30 = vld [vmem:[#allocation223_spill] sm:$0xff] }
 0x6f7   : > { %12717 = vmatpush3.msra.mxu1 %v16148_v57  ;;  %12676 = vmatpush3.msra.mxu0 %v18836_v62 }
 0x6f8   : > { %12718 = vmatprep.subr.mxu1 %v16160_v23  ;;  %12677 = vmatprep.subr.mxu0 %v18837_v7 }
 0x6f9   : > { %12719 = vmatpush3.msra.mxu1 %v16175_v47  ;;  %12678 = vmatpush3.msra.mxu0 %v18838_v45 }
 0x6fa   : > { %12720 = vmatprep.subr.mxu1 %v16189_v55  ;;  %12679 = vmatprep.subr.mxu0 %v18839_v15  ;;  %v18841_v15 = vld [vmem:[#allocation236_spill] sm:$0xff] }
 0x6fb   : > { %12721 = vmatpush3.msra.mxu1 %v16204_v58  ;;  %12680 = vmatpush3.msra.mxu0 %v16173_v6  ;;  %v18842_v6 = vand.u32 4294901760, %v16403_v10 }
 0x6fc   : > { %12722 = vmatprep.subr.mxu1 %v16214_v3  ;;  %12681 = vmatprep.subr.mxu0 %v18840_v30 }
 0x6fd   : > { %12723 = vmatpush3.msra.mxu1 %v16229_v38  ;;  %12682 = vmatpush3.msra.mxu0 %v16202_v31  ;;  %v18843_v31 = vld [vmem:[#allocation184_spill] sm:$0xff] }
 0x6fe   : > { %12724 = vmatprep.subr.mxu1 %v16243_v34  ;;  %12683 = vmatprep.subr.mxu0 %v16212_v8 }
 0x6ff   : > { %12725 = vmatpush3.msra.mxu1 %v16258_v60  ;;  %12684 = vmatpush3.msra.mxu0 %v16227_v59 }
 0x700   : > { %12726 = vmatprep.subr.mxu1 %v16268_v53  ;;  %12685 = vmatprep.subr.mxu0 %v18841_v15 }
 0x701   : > { %12727 = vmatpush3.msra.mxu1 %v16280_v20  ;;  %12686 = vmatpush3.msra.mxu0 %v16256_v14 }
 0x702   : > { %6214 = vmatmul.mubr.f32.vlgmr.msra.gmra.mxu1 %v18842_v6  ;;  %12766 = vmatprep.subr.mxu1 %v15795_v37  ;;  %v18844_v6 = vld [vmem:[#allocation154_spill] sm:$0xff] }
 0x703   : > { %12767 = vmatpush3.msra.mxu1 %v15799_v16  ;;  %6484 = vmatprep.mubr.f32.mxu1 %v18843_v31 }
 0x704   : > { %12687 = vmatprep.subr.mxu0 %v16266_v29  ;;  %12768 = vmatprep.subr.mxu1 %v15813_v13 }
 0x705   : > { %12688 = vmatpush3.msra.mxu0 %v16278_v39  ;;  %12769 = vmatpush3.msra.mxu1 %v15830_v1 }
 0x706   : > { %12689 = vmatprep.subr.mxu0 %v16292_v50  ;;  %12770 = vmatprep.subr.mxu1 %v15848_v25  ;;  %v18845_v50 = vld [vmem:[#allocation156_spill] sm:$0xff] }
 0x707   : > { %12690 = vmatpush3.msra.mxu0 %v16304_v12  ;;  %12771 = vmatpush3.msra.mxu1 %v15855_v26  ;;  %v18846_v12 = vld [vmem:[#allocation158_spill] sm:$0xff] }
 0x708   : > { %12691 = vmatprep.subr.mxu0 %v16314_v19  ;;  %12772 = vmatprep.subr.mxu1 %v15876_v54  ;;  %v18847_v19 = vld [vmem:[#allocation163_spill] sm:$0xff] }
 0x709   : > { %12692 = vmatpush3.msra.mxu0 %v16326_v28  ;;  %12773 = vmatpush3.msra.mxu1 %v15888_v40  ;;  %v18848_v28 = vld [vmem:[#allocation169_spill] sm:$0xff] }
 0x70a   : > { %6106 = vmatmul.mubr.f32.vlgmr.msra.gmra.mxu0 %v16403_v10  ;;  %12731 = vmatprep.subr.mxu0 %v18844_v6  ;;  %v18849_v10 = vld [vmem:[#allocation172_spill] sm:$0xff]  ;;  %v18970_v40 = vld [vmem:[#allocation149_spill] sm:$0xff] }
 0x70b   : > { %12774 = vmatprep.subr.mxu1 %v15898_v61  ;;  %12732 = vmatpush3.msra.mxu0 %v18845_v50  ;;  %v18850_v50 = vld [vmem:[#allocation178_spill] sm:$0xff] }
 0x70c   : > { %6380 = vmatprep.mubr.f32.mxu0 %v18843_v31  ;;  %12775 = vmatpush3.msra.mxu1 %v15909_v44  ;;  %v18851_v31 = vld [vmem:[#allocation181_spill] sm:$0xff] }
 0x70d   : > { %12733 = vmatprep.subr.mxu0 %v18846_v12  ;;  %12776 = vmatprep.subr.mxu1 %v15923_v27  ;;  %v18852_v12 = vld [vmem:[#allocation185_spill] sm:$0xff]  ;;  %v18969_v27 = vld [vmem:[#allocation120_spill] sm:$0xff] }
 0x70e   : > { %12734 = vmatpush3.msra.mxu0 %v18847_v19  ;;  %12777 = vmatpush3.msra.mxu1 %v15938_v46  ;;  %v18853_v19 = vld [vmem:[#allocation188_spill] sm:$0xff] }
 0x70f   : > { %12735 = vmatprep.subr.mxu0 %v18848_v28  ;;  %12778 = vmatprep.subr.mxu1 %v15951_v41  ;;  %v18854_v28 = vld [vmem:[#allocation190_spill] sm:$0xff] }
 0x710   : > { %12736 = vmatpush3.msra.mxu0 %v18849_v10  ;;  %12779 = vmatpush3.msra.mxu1 %v15966_v17  ;;  %v18855_v10 = vld [vmem:[#allocation194_spill] sm:$0xff] }
 0x711   : > { %12737 = vmatprep.subr.mxu0 %v18850_v50  ;;  %12780 = vmatprep.subr.mxu1 %v15978_v63  ;;  %v18856_v50 = vld [vmem:[#allocation197_spill] sm:$0xff] }
 0x712   : > { %12738 = vmatpush3.msra.mxu0 %v18851_v31  ;;  %12781 = vmatpush3.msra.mxu1 %v15990_v42  ;;  %v18857_v31 = vld [vmem:[#allocation198_spill] sm:$0xff] }
 0x713   : > { %12739 = vmatprep.subr.mxu0 %v18852_v12  ;;  %12782 = vmatprep.subr.mxu1 %v16028_v0  ;;  %v18858_v12 = vld [vmem:[#allocation201_spill] sm:$0xff] }
 0x714   : > { %12740 = vmatpush3.msra.mxu0 %v18853_v19  ;;  %12783 = vmatpush3.msra.mxu1 %v16070_v5  ;;  %v18859_v19 = vld [vmem:[#allocation204_spill] sm:$0xff] }
 0x715   : > { %12741 = vmatprep.subr.mxu0 %v18854_v28  ;;  %12784 = vmatprep.subr.mxu1 %v16096_v32  ;;  %v18860_v28 = vld [vmem:[#allocation211_spill] sm:$0xff] }
 0x716   : > { %12742 = vmatpush3.msra.mxu0 %v18855_v10  ;;  %12785 = vmatpush3.msra.mxu1 %v16120_v43  ;;  %v18861_v10 = vld [vmem:[#allocation219_spill] sm:$0xff] }
 0x717   : > { %12743 = vmatprep.subr.mxu0 %v18856_v50  ;;  %12786 = vmatprep.subr.mxu1 %v16134_v49  ;;  %v18862_v50 = vld [vmem:[#allocation226_spill] sm:$0xff] }
 0x718   : > { %12744 = vmatpush3.msra.mxu0 %v18857_v31  ;;  %12787 = vmatpush3.msra.mxu1 %v16148_v57  ;;  %v18863_v31 = vld [vmem:[#allocation231_spill] sm:$0xff] }
 0x719   : > { %12745 = vmatprep.subr.mxu0 %v18858_v12  ;;  %12788 = vmatprep.subr.mxu1 %v16160_v23  ;;  %v18864_v12 = vld [vmem:[#allocation235_spill] sm:$0xff] }
 0x71a   : > { %12746 = vmatpush3.msra.mxu0 %v18859_v19  ;;  %12789 = vmatpush3.msra.mxu1 %v16175_v47  ;;  %v18865_v19 = vld [vmem:[#allocation238_spill] sm:$0xff] }
 0x71b   : > { %12747 = vmatprep.subr.mxu0 %v18860_v28  ;;  %12790 = vmatprep.subr.mxu1 %v16189_v55  ;;  %v18866_v28 = vld [vmem:[#allocation241_spill] sm:$0xff] }
 0x71c   : > { %12748 = vmatpush3.msra.mxu0 %v18861_v10  ;;  %12791 = vmatpush3.msra.mxu1 %v16204_v58  ;;  %v18867_v10 = vld [vmem:[#allocation244_spill] sm:$0xff] }
 0x71d   : > { %12749 = vmatprep.subr.mxu0 %v18862_v50  ;;  %12792 = vmatprep.subr.mxu1 %v16214_v3  ;;  %v18868_v50 = vld [vmem:[#allocation248_spill] sm:$0xff] }
 0x71e   : > { %12750 = vmatpush3.msra.mxu0 %v18863_v31  ;;  %12793 = vmatpush3.msra.mxu1 %v16229_v38 }
 0x71f   : > { %12751 = vmatprep.subr.mxu0 %v18864_v12  ;;  %12794 = vmatprep.subr.mxu1 %v16243_v34  ;;  %v18869_v12 = vmov 0.0  }
 0x720   : > { %12752 = vmatpush3.msra.mxu0 %v18865_v19  ;;  %12795 = vmatpush3.msra.mxu1 %v16258_v60  ;;  %v18870_v19 = vld [vmem:[#allocation256_spill] sm:$0xff] }
 0x721   : > { %12753 = vmatprep.subr.mxu0 %v18866_v28  ;;  %12796 = vmatprep.subr.mxu1 %v16268_v53 }
 0x722   : > { %12754 = vmatpush3.msra.mxu0 %v18867_v10  ;;  %12797 = vmatpush3.msra.mxu1 %v16280_v20 }
 0x723   : > { %12755 = vmatprep.subr.mxu0 %v18868_v50  ;;  %6486 = vmatmul.mubr.f32.vlgmr.msra.gmra.mxu1 %v16382_v4 }
 0x724   : > { %12756 = vmatpush3.msra.mxu0 %v16301_v9  ;;  %6658 = vmatprep.mubr.f32.mxu1 %v18869_v12 }
 0x725   : > { %12757 = vmatprep.subr.mxu0 %v16311_v56  ;;  %v4736_v56 = vld [vmem:[%s18871_s28 + $0x28] sm:$0xff] }
 0x726   : > { %12758 = vmatpush3.msra.mxu0 %v18870_v19  ;;  %v16572_v9 = vand.u32 4294901760, %v4736_v56 }
 0x727   : > { %12759 = vmatprep.subr.mxu0 %v16335_v18  ;;  %v4735_v18 = vld [vmem:[%s18871_s28 + $0x20] sm:$0xff] }
 0x728   : > { %12760 = vmatpush3.msra.mxu0 %v16344_v2  ;;  %18872 = vst [vmem:[#allocation184_spill] sm:$0xff] %v16572_v9  ;;  %v16577_v19 = vand.u32 4294901760, %v4735_v18  ;;  %v4731_v2 = vld [vmem:[%s18871_s28] sm:$0xff] }
 0x729   : > { %12761 = vmatprep.subr.mxu0 %v16353_v21  ;;  %v16594_v10 = vand.u32 4294901760, %v4731_v2 }
 0x72a   : > { %12762 = vmatpush3.msra.mxu0 %v16362_v35  ;;  %18873 = vst [vmem:[#allocation274_spill] sm:$0xff] %v16577_v19  ;;  %v4732_v35 = vld [vmem:[%s18871_s28 + $0x8] sm:$0xff]  ;;  %v16592_v50 = vsub.f32 %v4735_v18, %v16577_v19 }
 0x72b   : > { %6382 = vmatmul.mubr.f32.vlgmr.msra.gmra.mxu0 %v16382_v4  ;;  %v16583_v4 = vsub.f32 %v4736_v56, %v16572_v9  ;;  %v16585_v21 = vand.u32 4294901760, %v4732_v35  ;;  %6523 = vmatprep.subr.mxu0 %v16572_v9  ;;  %18877 = vst [vmem:[#allocation278_spill] sm:$0xff] %v16594_v10  ;;  %v16608_v6 = vsub.f32 %v4731_v2, %v16594_v10 }
 0x72c   : > { %6562 = vmatprep.mubr.f32.mxu0 %v18869_v12  ;;  %18876 = vst [vmem:[#allocation277_spill] sm:$0xff] %v16592_v50  ;;  %6525 = vmatpush1.msra.mxu0 %v16577_v19  ;;  %v16605_v31 = vand.u32 4294901760, %v16592_v50 }
 0x72d   : > { %18874 = vst [vmem:[#allocation275_spill] sm:$0xff] %v16583_v4  ;;  %18875 = vst [vmem:[#allocation276_spill] sm:$0xff] %v16585_v21  ;;  %v16598_v28 = vand.u32 4294901760, %v16583_v4  ;;  %v16601_v56 = vsub.f32 %v4732_v35, %v16585_v21  ;;  %6527 = vmatprep.subr.mxu0 %v16585_v21  ;;  %v16620_v29 = vand.u32 4294901760, %v16608_v6 }
 0x72e   : > { %18880 = vst [vmem:[#allocation281_spill] sm:$0xff] %v16605_v31  ;;  %18881 = vst [vmem:[#allocation282_spill] sm:$0xff] %v16608_v6  ;;  %6529 = vmatpush1.msra.mxu0 %v16594_v10  ;;  %v6611_v35 = vsub.f32 %v16592_v50, %v16605_v31 }
 0x72f   : > { %18878 = vst [vmem:[#allocation279_spill] sm:$0xff] %v16598_v28  ;;  %18879 = vst [vmem:[#allocation280_spill] sm:$0xff] %v16601_v56  ;;  %v6605_v18 = vsub.f32 %v16583_v4, %v16598_v28  ;;  %v16614_v39 = vand.u32 4294901760, %v16601_v56  ;;  %6696 = vmatprep.subr.mxu0 %v16583_v4  ;;  %v6623_v59 = vsub.f32 %v16608_v6, %v16620_v29 }
 0x730   : > { %18883 = vst [vmem:[#allocation284_spill] sm:$0xff] %v16620_v29  ;;  %v16626_v15 = vand.u32 4294901760, %v6611_v35 }
 0x731   : > { %18882 = vst [vmem:[#allocation283_spill] sm:$0xff] %v16614_v39  ;;  %v16622_v14 = vand.u32 4294901760, %v6605_v18  ;;  %v6617_v2 = vsub.f32 %v16601_v56, %v16614_v39  ;;  %v16634_v4 = vand.u32 4294901760, %v6623_v59 }
 0x732   : > { %18885 = vst [vmem:[#allocation286_spill] sm:$0xff] %v16626_v15 }
 0x733   : > { %18884 = vst [vmem:[#allocation285_spill] sm:$0xff] %v16622_v14  ;;  %6607 = vmatprep.subr.mxu1 %v16622_v14  ;;  %v16631_v8 = vand.u32 4294901760, %v6617_v2  ;;  %18887 = vst [vmem:[#allocation288_spill] sm:$0xff] %v16634_v4 }
 0x734   : > { %6613 = vmatpush1.msra.mxu1 %v16626_v15 }
 0x735   : > { %18886 = vst [vmem:[#allocation287_spill] sm:$0xff] %v16631_v8  ;;  %6619 = vmatprep.subr.mxu1 %v16631_v8 }
 0x736   : > { %6625 = vmatpush1.msra.mxu1 %v16634_v4  ;;  %v12448_v35 = vpop.f32.mrf.mxu1 }
 0x737   : > { %6776 = vmatprep.subr.mxu1 %v16572_v9 }
 0x738   : > { %v12449_v7 = vpop.f32.mrf.mxu1 }
 0x739   : > { %v12450_v22 = vadd.f32 %v12449_v7, %v12448_v35 }
 0x73e   : > { %v12413_v18 = vpop.f32.mrf.mxu0 }
 0x740   : > { %v12414_v30 = vpop.f32.mrf.mxu0 }
 0x741   : > { %v12415_v14 = vadd.f32 %v12414_v30, %v12413_v18 }
 0x743   : > { %v5108_v59 = vadd.f32 %v12450_v22, %v12415_v14 }
 0x757   : > { %v12518_v62 = vpop.f32.mrf.mxu1 }
 0x759   : > { %v12519_v15 = vpop.f32.mrf.mxu1 }
 0x75a   : > { %v12520_v4 = vadd.f32 %v12519_v15, %v12518_v62 }
 0x75f   : > { %v12483_v45 = vpop.f32.mrf.mxu0 }
 0x761   : > { %v12484_v48 = vpop.f32.mrf.mxu0 }
 0x762   : > { %v12485_v20 = vadd.f32 %v12484_v48, %v12483_v45 }
 0x764   : > { %v5246_v8 = vadd.f32 %v12485_v20, %v5108_v59 }
 0x766   : > { %v5354_v58 = vadd.f32 %v12520_v4, %v5246_v8  ;;  %v4738_v8 = vld [vmem:[%s18871_s28 + $0x38] sm:$0xff] }
 0x779   : > { %v12588_v53 = vpop.f32.mrf.mxu1 }
 0x77b   : > { %v12589_v3 = vpop.f32.mrf.mxu1 }
 0x77c   : > { %v12590_v57 = vadd.f32 %v12589_v3, %v12588_v53  ;;  %v4737_v3 = vld [vmem:[%s18871_s28 + $0x30] sm:$0xff] }
 0x77d   : > { %v16650_v53 = vand.u32 4294901760, %v4737_v3 }
 0x77f   : > { %18889 = vst [vmem:[#allocation290_spill] sm:$0xff] %v16650_v53 }
 0x782   : > { %v12553_v2 = vpop.f32.mrf.mxu0 }
 0x784   : > { %v12554_v60 = vpop.f32.mrf.mxu0 }
 0x785   : > { %v12555_v38 = vadd.f32 %v12554_v60, %v12553_v2 }
 0x787   : > { %v5522_v23 = vadd.f32 %v12555_v38, %v5354_v58  ;;  %v4733_v58 = vld [vmem:[%s18871_s28 + $0x10] sm:$0xff] }
 0x789   : > { %v5626_v18 = vadd.f32 %v12590_v57, %v5522_v23  ;;  %v4734_v23 = vld [vmem:[%s18871_s28 + $0x18] sm:$0xff] }
 0x78a   : > { %v16655_v15 = vand.u32 4294901760, %v4734_v23 }
 0x78c   : > { %18890 = vst [vmem:[#allocation291_spill] sm:$0xff] %v16655_v15 }
 0x7a2   : > { %v12658_v55 = vpop.f32.mrf.mxu1 }
 0x7a4   : > { %v12659_v30 = vpop.f32.mrf.mxu1 }
 0x7a5   : > { %v12660_v14 = vadd.f32 %v12659_v30, %v12658_v55  ;;  %v16660_v30 = vand.u32 4294901760, %v4733_v58 }
 0x7a6   : > { %v12623_v34 = vpop.f32.mrf.mxu0 }
 0x7a7   : > { %18892 = vst [vmem:[#allocation293_spill] sm:$0xff] %v16660_v30 }
 0x7a8   : > { %v12624_v47 = vpop.f32.mrf.mxu0 }
 0x7a9   : > { %v12625_v36 = vadd.f32 %v12624_v47, %v12623_v34  ;;  %v16648_v47 = vand.u32 4294901760, %v4738_v8 }
 0x7ab   : > { %v5738_v48 = vadd.f32 %v12625_v36, %v5626_v18  ;;  %18888 = vst [vmem:[#allocation289_spill] sm:$0xff] %v16648_v47  ;;  %v16658_v2 = vsub.f32 %v4738_v8, %v16648_v47  ;;  %v16663_v18 = vsub.f32 %v4737_v3, %v16650_v53 }
 0x7ad   : > { %v5970_v20 = vadd.f32 %v12660_v14, %v5738_v48  ;;  %18891 = vst [vmem:[#allocation292_spill] sm:$0xff] %v16658_v2  ;;  %18893 = vst [vmem:[#allocation294_spill] sm:$0xff] %v16663_v18  ;;  %v16670_v14 = vand.u32 4294901760, %v16658_v2 }
 0x7af   : > { %18895 = vst [vmem:[#allocation296_spill] sm:$0xff] %v16670_v14 }
 0x7c2   : > { %v12728_v7 = vpop.f32.mrf.mxu1 }
 0x7c4   : > { %v12729_v35 = vpop.f32.mrf.mxu1 }
 0x7c5   : > { %v12730_v57 = vadd.f32 %v12729_v35, %v12728_v7 }
 0x7ca   : > { %v12693_v24 = vpop.f32.mrf.mxu0 }
 0x7cc   : > { %v12694_v45 = vpop.f32.mrf.mxu0 }
 0x7cd   : > { %v12695_v22 = vadd.f32 %v12694_v45, %v12693_v24  ;;  %v16666_v45 = vsub.f32 %v4734_v23, %v16655_v15 }
 0x7cf   : > { %v6108_v60 = vadd.f32 %v12695_v22, %v5970_v20  ;;  %18894 = vst [vmem:[#allocation295_spill] sm:$0xff] %v16666_v45  ;;  %v16673_v22 = vsub.f32 %v4733_v58, %v16660_v30  ;;  %v16678_v20 = vand.u32 4294901760, %v16663_v18 }
 0x7d1   : > { %v6216_v38 = vadd.f32 %v12730_v57, %v6108_v60  ;;  %18896 = vst [vmem:[#allocation297_spill] sm:$0xff] %v16673_v22  ;;  %18897 = vst [vmem:[#allocation298_spill] sm:$0xff] %v16678_v20  ;;  %v7096_v60 = vsub.f32 %v16658_v2, %v16670_v14  ;;  %v16692_v3 = vand.u32 4294901760, %v16673_v22  ;;  %v7102_v23 = vsub.f32 %v16663_v18, %v16678_v20 }
 0x7d3   : > { %18899 = vst [vmem:[#allocation300_spill] sm:$0xff] %v16692_v3  ;;  %v7114_v58 = vsub.f32 %v16673_v22, %v16692_v3 }
 0x7e3   : > { %v12798_v59 = vpop.f32.mrf.mxu1 }
 0x7e5   : > { %v12799_v24 = vpop.f32.mrf.mxu1 }
 0x7e6   : > { %v12800_v62 = vadd.f32 %v12799_v24, %v12798_v59  ;;  %v16681_v59 = vand.u32 4294901760, %v16666_v45 }
 0x7e8   : > { %18898 = vst [vmem:[#allocation299_spill] sm:$0xff] %v16681_v59  ;;  %v7108_v57 = vsub.f32 %v16666_v45, %v16681_v59 }
 0x7eb   : > { %v12763_v34 = vpop.f32.mrf.mxu0 }
 0x7ed   : > { %v12764_v55 = vpop.f32.mrf.mxu0 }
 0x7ee   : > { %v12765_v36 = vadd.f32 %v12764_v55, %v12763_v34  ;;  %v16705_v55 = vand.u32 4294901760, %v7096_v60  ;;  %v18906_v60 = vld [vmem:[#allocation27_spill] sm:$0xff] }
 0x7f0   : > { %v6384_v4 = vadd.f32 %v12765_v36, %v6216_v38  ;;  %18900 = vst [vmem:[#allocation301_spill] sm:$0xff] %v16705_v55  ;;  %v16710_v36 = vand.u32 4294901760, %v7102_v23  ;;  %v18908_v23 = vld [vmem:[#allocation31_spill] sm:$0xff] }
 0x7f2   : > { %v6488_v7 = vadd.f32 %v12800_v62, %v6384_v4  ;;  %18901 = vst [vmem:[#allocation302_spill] sm:$0xff] %v16710_v36  ;;  %v16713_v62 = vand.u32 4294901760, %v7108_v57  ;;  %v16718_v4 = vand.u32 4294901760, %v7114_v58  ;;  %v18909_v57 = vld [vmem:[#allocation32_spill] sm:$0xff]  ;;  %v18912_v58 = vld [vmem:[#allocation65_spill] sm:$0xff] }
 0x7f4   : > { %v6492_v48 = vsel %vm1778_vm1, %v6488_v7, 0  ;;  %18902 = vst [vmem:[#allocation303_spill] sm:$0xff] %v16713_v62  ;;  %18903 = vst [vmem:[#allocation304_spill] sm:$0xff] %v16718_v4  ;;  %v18904_v7 = vld [vmem:[#allocation63_spill] sm:$0xff] }
 0x7f5   : > { %v16675_v35 = vand.u32 4294901760, %v6492_v48 }
 0x7f7   : > { %v16684_v8 = vsub.f32 %v6492_v48, %v16675_v35  ;;  %6660 = vmatmul.mubr.f32.vlgmr.msra.gmra.mxu1 %v16675_v35  ;;  %v18905_v48 = vld [vmem:[#allocation25_spill] sm:$0xff] }
 0x7f8   : > { %6778 = vmatpush1.msra.mxu1 %v16577_v19  ;;  %6815 = vmatprep.mubr.f32.mxu1 %v18869_v12 }
 0x7f9   : > { %6780 = vmatprep.subr.mxu1 %v16585_v21  ;;  %v6565_v34 = vand.u32 4294901760, %v16684_v8 }
 0x7fa   : > { %6782 = vmatpush1.msra.mxu1 %v16594_v10 }
 0x7fb   : > { %6819 = vmatmul.mubr.f32.vlgmr.msra.gmra.mxu1 %v6565_v34  ;;  %6938 = vmatprep.subr.mxu1 %v16572_v9  ;;  %v6566_v24 = vsub.f32 %v16684_v8, %v6565_v34 }
 0x7fc   : > { %6940 = vmatpush1.msra.mxu1 %v16577_v19  ;;  %6977 = vmatprep.mubr.f32.mxu1 %v18869_v12 }
 0x7fd   : > { %6942 = vmatprep.subr.mxu1 %v16585_v21  ;;  %v6567_v38 = vand.u32 4294901760, %v6566_v24  ;;  %v18911_v24 = vld [vmem:[#allocation50_spill] sm:$0xff] }
 0x7fe   : > { %6944 = vmatpush1.msra.mxu1 %v16594_v10  ;;  %v18968_v10 = vld [vmem:[#allocation49_spill] sm:$0xff] }
 0x7ff   : > { %6568 = vmatmul.mubr.f32.vlgmr.msra.gmra.mxu0 %v6567_v38  ;;  %6979 = vmatmul.mubr.f32.vlgmr.msra.gmra.mxu1 %v16675_v35 }
 0x800   : > { %6699 = vmatpush1.msra.mxu0 %v16592_v50  ;;  %7098 = vmatprep.subr.mxu1 %v16705_v55  ;;  %v18964_v55 = vld [vmem:[#allocation123_spill] sm:$0xff]  ;;  %v18966_v50 = vld [vmem:[#allocation128_spill] sm:$0xff] }
 0x801   : > { %6702 = vmatprep.subr.mxu0 %v16601_v56  ;;  %7104 = vmatpush1.msra.mxu1 %v16710_v36  ;;  %v18959_v36 = vld [vmem:[#allocation147_spill] sm:$0xff]  ;;  %v18961_v56 = vld [vmem:[#allocation148_spill] sm:$0xff] }
 0x802   : > { %6705 = vmatpush1.msra.mxu0 %v16608_v6  ;;  %7110 = vmatprep.subr.mxu1 %v16713_v62  ;;  %v18955_v62 = vld [vmem:[#allocation145_spill] sm:$0xff]  ;;  %v18957_v6 = vld [vmem:[#allocation146_spill] sm:$0xff] }
 0x803   : > { %6738 = vmatprep.mubr.f32.mxu0 %v18869_v12  ;;  %6856 = vmatprep.subr.mxu0 %v16598_v28  ;;  %v18953_v28 = vld [vmem:[#allocation144_spill] sm:$0xff] }
 0x804   : > { %7116 = vmatpush1.msra.mxu1 %v16718_v4  ;;  %7149 = vmatprep.mubr.f32.mxu1 %v18869_v12  ;;  %v18951_v4 = vld [vmem:[#allocation142_spill] sm:$0xff] }
 0x805   : > { %6741 = vmatmul.mubr.f32.vlgmr.msra.gmra.mxu0 %v16684_v8  ;;  %7151 = vmatmul.mubr.f32.vlgmr.msra.gmra.mxu1 %v16675_v35 }
 0x806   : > { %6860 = vmatpush1.msra.mxu0 %v16605_v31  ;;  %7267 = vmatprep.subr.mxu1 %v16648_v47  ;;  %v18949_v31 = vld [vmem:[#allocation141_spill] sm:$0xff] }
 0x807   : > { %6864 = vmatprep.subr.mxu0 %v16614_v39  ;;  %7269 = vmatpush1.msra.mxu1 %v16650_v53  ;;  %v18945_v39 = vld [vmem:[#allocation125_spill] sm:$0xff] }
 0x808   : > { %6868 = vmatpush1.msra.mxu0 %v16620_v29  ;;  %7271 = vmatprep.subr.mxu1 %v16655_v15  ;;  %v18941_v29 = vld [vmem:[#allocation42_spill] sm:$0xff] }
 0x809   : > { %6901 = vmatprep.mubr.f32.mxu0 %v18869_v12  ;;  %7273 = vmatpush1.msra.mxu1 %v16660_v30 }
 0x80a   : > { %7306 = vmatprep.mubr.f32.mxu1 %v18869_v12  ;;  %6903 = vmatmul.mubr.f32.vlgmr.msra.gmra.mxu0 %v16675_v35 }
 0x80b   : > { %7014 = vmatprep.subr.mxu0 %v16648_v47  ;;  %7310 = vmatmul.mubr.f32.vlgmr.msra.gmra.mxu1 %v6565_v34  ;;  %v18907_v34 = vld [vmem:[#allocation29_spill] sm:$0xff] }
 0x80c   : > { %7429 = vmatprep.subr.mxu1 %v16648_v47  ;;  %7016 = vmatpush1.msra.mxu0 %v16650_v53  ;;  %v18947_v47 = vld [vmem:[#allocation126_spill] sm:$0xff] }
 0x80d   : > { %7431 = vmatpush1.msra.mxu1 %v16650_v53  ;;  %7018 = vmatprep.subr.mxu0 %v16655_v15  ;;  %v18943_v53 = vld [vmem:[#allocation44_spill] sm:$0xff] }
 0x80e   : > { %7433 = vmatprep.subr.mxu1 %v16655_v15  ;;  %7020 = vmatpush1.msra.mxu0 %v16660_v30  ;;  %v18939_v15 = vld [vmem:[#allocation41_spill] sm:$0xff] }
 0x80f   : > { %7053 = vmatprep.mubr.f32.mxu0 %v18869_v12  ;;  %7435 = vmatpush1.msra.mxu1 %v16660_v30  ;;  %v18937_v30 = vld [vmem:[#allocation19_spill] sm:$0xff] }
 0x810   : > { %7468 = vmatprep.mubr.f32.mxu1 %v18869_v12  ;;  %7059 = vmatmul.mubr.f32.vlgmr.msra.gmra.mxu0 %v6567_v38  ;;  %v18913_v38 = vld [vmem:[#allocation51_spill] sm:$0xff] }
 0x811   : > { %7187 = vmatprep.subr.mxu0 %v16658_v2  ;;  %7470 = vmatmul.mubr.f32.vlgmr.msra.gmra.mxu1 %v16675_v35  ;;  %v18935_v2 = vld [vmem:[#allocation85_spill] sm:$0xff] }
 0x812   : > { %7190 = vmatpush1.msra.mxu0 %v16663_v18  ;;  %7229 = vmatprep.mubr.f32.mxu0 %v18869_v12  ;;  %v18933_v18 = vld [vmem:[#allocation40_spill] sm:$0xff] }
 0x813   : > { %7193 = vmatprep.subr.mxu0 %v16666_v45  ;;  %12836 = vmatprep.subr.mxu1 %v18904_v7  ;;  %v18914_v7 = vld [vmem:[#allocation69_spill] sm:$0xff]  ;;  %v18931_v45 = vld [vmem:[#allocation64_spill] sm:$0xff] }
 0x814   : > { %7196 = vmatpush1.msra.mxu0 %v16673_v22  ;;  %12837 = vmatpush3.msra.mxu1 %v18905_v48  ;;  %v18915_v48 = vld [vmem:[#allocation53_spill] sm:$0xff] }
 0x815   : > { %7232 = vmatmul.mubr.f32.vlgmr.msra.gmra.mxu0 %v16684_v8  ;;  %7347 = vmatprep.subr.mxu0 %v16670_v14  ;;  %v18910_v8 = vld [vmem:[#allocation48_spill] sm:$0xff]  ;;  %v18927_v14 = vld [vmem:[#allocation38_spill] sm:$0xff]  ;;  %v18929_v22 = vld [vmem:[#allocation61_spill] sm:$0xff] }
 0x816   : > { %7351 = vmatpush1.msra.mxu0 %v16678_v20  ;;  %7392 = vmatprep.mubr.f32.mxu0 %v18869_v12  ;;  %v18925_v20 = vld [vmem:[#allocation36_spill] sm:$0xff] }
 0x817   : > { %7355 = vmatprep.subr.mxu0 %v16681_v59  ;;  %12838 = vmatprep.subr.mxu1 %v18906_v60  ;;  %v18916_v60 = vld [vmem:[#allocation71_spill] sm:$0xff]  ;;  %v18923_v59 = vld [vmem:[#allocation33_spill] sm:$0xff] }
 0x818   : > { %7359 = vmatpush1.msra.mxu0 %v16692_v3  ;;  %12839 = vmatpush3.msra.mxu1 %v18907_v34  ;;  %v18917_v34 = vld [vmem:[#allocation55_spill] sm:$0xff]  ;;  %v18921_v3 = vld [vmem:[#allocation30_spill] sm:$0xff] }
 0x819   : > { %7394 = vmatmul.mubr.f32.vlgmr.msra.gmra.mxu0 %v16675_v35  ;;  %12840 = vmatprep.subr.mxu1 %v18908_v23  ;;  %v18918_v35 = vld [vmem:[#allocation73_spill] sm:$0xff] }
 0x81a   : > { %12841 = vmatpush3.msra.mxu1 %v18909_v57  ;;  %12801 = vmatprep.subr.mxu0 %v18910_v8  ;;  %v18919_v23 = vld [vmem:[#allocation109_spill] sm:$0xff] }
 0x81b   : > { %12842 = vmatprep.subr.mxu1 %v18911_v24  ;;  %12802 = vmatpush3.msra.mxu0 %v18912_v58  ;;  %v18920_v57 = vld [vmem:[#allocation77_spill] sm:$0xff]  ;;  %v18922_v24 = vld [vmem:[#allocation92_spill] sm:$0xff] }
 0x81c   : > { %12843 = vmatpush3.msra.mxu1 %v18913_v38  ;;  %12803 = vmatprep.subr.mxu0 %v18914_v7  ;;  %v18924_v38 = vld [vmem:[#allocation95_spill] sm:$0xff] }
 0x81d   : > { %12844 = vmatprep.subr.mxu1 %v18915_v48  ;;  %12804 = vmatpush3.msra.mxu0 %v18916_v60  ;;  %v18926_v48 = vld [vmem:[#allocation104_spill] sm:$0xff] }
 0x81e   : > { %12845 = vmatpush3.msra.mxu1 %v18917_v34  ;;  %12805 = vmatprep.subr.mxu0 %v18918_v35  ;;  %v18928_v34 = vld [vmem:[#allocation111_spill] sm:$0xff] }
 0x81f   : > { %12846 = vmatprep.subr.mxu1 %v18919_v23  ;;  %12806 = vmatpush3.msra.mxu0 %v18920_v57  ;;  %v18930_v23 = vld [vmem:[#allocation57_spill] sm:$0xff] }
 0x820   : > { %12847 = vmatpush3.msra.mxu1 %v18921_v3  ;;  %12807 = vmatprep.subr.mxu0 %v18922_v24  ;;  %v18932_v3 = vld [vmem:[#allocation59_spill] sm:$0xff] }
 0x821   : > { %12848 = vmatprep.subr.mxu1 %v18923_v59  ;;  %12808 = vmatpush3.msra.mxu0 %v18924_v38  ;;  %v18934_v59 = vld [vmem:[#allocation67_spill] sm:$0xff] }
 0x822   : > { %12849 = vmatpush3.msra.mxu1 %v18925_v20  ;;  %12809 = vmatprep.subr.mxu0 %v18926_v48  ;;  %v18936_v20 = vld [vmem:[#allocation74_spill] sm:$0xff] }
 0x823   : > { %12850 = vmatprep.subr.mxu1 %v18927_v14  ;;  %12810 = vmatpush3.msra.mxu0 %v18928_v34  ;;  %v18938_v14 = vld [vmem:[#allocation81_spill] sm:$0xff] }
 0x824   : > { %12851 = vmatpush3.msra.mxu1 %v18929_v22  ;;  %12811 = vmatprep.subr.mxu0 %v18930_v23  ;;  %v18940_v22 = vld [vmem:[#allocation91_spill] sm:$0xff] }
 0x825   : > { %12852 = vmatprep.subr.mxu1 %v18931_v45  ;;  %12812 = vmatpush3.msra.mxu0 %v18932_v3  ;;  %v18942_v45 = vld [vmem:[#allocation101_spill] sm:$0xff] }
 0x826   : > { %12853 = vmatpush3.msra.mxu1 %v18933_v18  ;;  %12813 = vmatprep.subr.mxu0 %v18934_v59  ;;  %v18944_v18 = vld [vmem:[#allocation37_spill] sm:$0xff] }
 0x827   : > { %12854 = vmatprep.subr.mxu1 %v18935_v2  ;;  %12814 = vmatpush3.msra.mxu0 %v18936_v20  ;;  %v18946_v2 = vld [vmem:[#allocation39_spill] sm:$0xff] }
 0x828   : > { %12855 = vmatpush3.msra.mxu1 %v18937_v30  ;;  %12815 = vmatprep.subr.mxu0 %v18938_v14  ;;  %v18948_v30 = vld [vmem:[#allocation54_spill] sm:$0xff] }
 0x829   : > { %12856 = vmatprep.subr.mxu1 %v18939_v15  ;;  %12816 = vmatpush3.msra.mxu0 %v18940_v22  ;;  %v18950_v15 = vld [vmem:[#allocation56_spill] sm:$0xff] }
 0x82a   : > { %12857 = vmatpush3.msra.mxu1 %v18941_v29  ;;  %12817 = vmatprep.subr.mxu0 %v18942_v45  ;;  %v18952_v29 = vld [vmem:[#allocation58_spill] sm:$0xff] }
 0x82b   : > { %12858 = vmatprep.subr.mxu1 %v18943_v53  ;;  %12818 = vmatpush3.msra.mxu0 %v18944_v18  ;;  %v18954_v53 = vld [vmem:[#allocation70_spill] sm:$0xff] }
 0x82c   : > { %12859 = vmatpush3.msra.mxu1 %v18945_v39  ;;  %12819 = vmatprep.subr.mxu0 %v18946_v2  ;;  %v18956_v39 = vld [vmem:[#allocation90_spill] sm:$0xff] }
 0x82d   : > { %12860 = vmatprep.subr.mxu1 %v18947_v47  ;;  %12820 = vmatpush3.msra.mxu0 %v18948_v30  ;;  %v18958_v47 = vld [vmem:[#allocation94_spill] sm:$0xff] }
 0x82e   : > { %12861 = vmatpush3.msra.mxu1 %v18949_v31  ;;  %12821 = vmatprep.subr.mxu0 %v18950_v15  ;;  %v18960_v31 = vld [vmem:[#allocation43_spill] sm:$0xff] }
 0x82f   : > { %12862 = vmatprep.subr.mxu1 %v18951_v4  ;;  %12822 = vmatpush3.msra.mxu0 %v18952_v29  ;;  %v18962_v4 = vld [vmem:[#allocation45_spill] sm:$0xff] }
 0x830   : > { %12863 = vmatpush3.msra.mxu1 %v18953_v28  ;;  %12823 = vmatprep.subr.mxu0 %v18954_v53  ;;  %v18963_v28 = vld [vmem:[#allocation47_spill] sm:$0xff] }
 0x831   : > { %12864 = vmatprep.subr.mxu1 %v18955_v62  ;;  %12824 = vmatpush3.msra.mxu0 %v18956_v39  ;;  %v18965_v62 = vld [vmem:[#allocation124_spill] sm:$0xff] }
 0x832   : > { %12865 = vmatpush3.msra.mxu1 %v18957_v6  ;;  %12825 = vmatprep.subr.mxu0 %v18958_v47  ;;  %v18967_v6 = vld [vmem:[#allocation135_spill] sm:$0xff] }
 0x833   : > { %12866 = vmatprep.subr.mxu1 %v18959_v36  ;;  %12826 = vmatpush3.msra.mxu0 %v18960_v31 }
 0x834   : > { %12867 = vmatpush3.msra.mxu1 %v18961_v56  ;;  %12827 = vmatprep.subr.mxu0 %v18962_v4 }
 0x835   : > { %12906 = vmatprep.subr.mxu1 %v18910_v8  ;;  %12828 = vmatpush3.msra.mxu0 %v18963_v28 }
 0x836   : > { %12829 = vmatprep.subr.mxu0 %v18964_v55 }
 0x837   : > { %12830 = vmatpush3.msra.mxu0 %v18965_v62 }
 0x838   : > { %12831 = vmatprep.subr.mxu0 %v18966_v50 }
 0x839   : > { %12832 = vmatpush3.msra.mxu0 %v18967_v6 }
 0x83a   : > { %12871 = vmatprep.subr.mxu0 %v18968_v10 }
 0x8b7   : > { %v6661_v36 = vpop.f32.mrf.mxu1 }
 0x8b9   : > { %v6663_v21 = vpop.f32.mrf.mxu1 }
 0x8bb   : > { %v6820_v9 = vpop.f32.mrf.mxu1 }
 0x8bd   : > { %v6822_v52 = vpop.f32.mrf.mxu1 }
 0x8bf   : > { %v6569_v19 = vpop.f32.mrf.mxu0  ;;  %v6980_v51 = vpop.f32.mrf.mxu1 }
 0x8c0   : > { %v6662_v12 = vadd.f32 %v6661_v36, %v6569_v19  ;;  %v18971_v19 = vmax.f32 %v18970_v40, 0.0 }
 0x8c1   : > { %v6571_v56 = vpop.f32.mrf.mxu0  ;;  %v6982_v46 = vpop.f32.mrf.mxu1 }
 0x8c2   : > { %v6664_v43 = vadd.f32 %v6663_v21, %v6571_v56 }
 0x8c5   : > { %v6742_v49 = vpop.f32.mrf.mxu0 }
 0x8c6   : > { %v6743_v33 = vadd.f32 %v6742_v49, %v6662_v12 }
 0x8c7   : > { %v6744_v32 = vpop.f32.mrf.mxu0 }
 0x8c8   : > { %v6745_v11 = vadd.f32 %v6744_v32, %v6664_v43  ;;  %v6821_v5 = vadd.f32 %v6820_v9, %v6743_v33  ;;  %v18972_v43 = vld [vmem:[#allocation150_spill] sm:$0xff] }
 0x8c9   : > { %v18973_v49 = vmax.f32 %v18972_v43, 0.0 }
 0x8ca   : > { %v6904_v0 = vpop.f32.mrf.mxu0  ;;  %v6823_v42 = vadd.f32 %v6822_v52, %v6745_v11 }
 0x8cb   : > { %v6905_v63 = vadd.f32 %v6904_v0, %v6821_v5 }
 0x8cc   : > { %v6906_v17 = vpop.f32.mrf.mxu0 }
 0x8cd   : > { %v6981_v41 = vadd.f32 %v6980_v51, %v6905_v63  ;;  %v6907_v10 = vadd.f32 %v6906_v17, %v6823_v42 }
 0x8cf   : > { %v7479_v44 = vrot.slane %v6981_v41, %v18969_v27  ;;  %v6983_v61 = vadd.f32 %v6982_v46, %v6907_v10  ;;  %v16847_v10 = vpop.f32.mrf.mxu1 }
 0x8d1   : > { %v16832_v36 = vsub.f32 %v18971_v19, %v7479_v44  ;;  %v7483_v12 = vrot.slane %v6983_v61, %v18969_v27  ;;  %v16845_v61 = vpop.f32.mrf.mxu0 }
 0x8d3   : > { %v7496_v32 = vmul.f32 %v16832_v36, %v16832_v36  ;;  %v16839_v21 = vsub.f32 %v18973_v49, %v7483_v12  ;;  %v7062_v11 = vpop.f32.mrf.mxu0 }
 0x8d5   : > { %v7500_v5 = vsel %vm901_vm0, %v7496_v32, 0.0  ;;  %v7497_v42 = vmul.f32 %v16839_v21, %v16839_v21  ;;  %v16851_v32 = vpop.f32.mrf.mxu0 }
 0x8d6   : > { %v7501_v41 = vrot.slane %v7500_v5, 4 }
 0x8d7   : > { %v7507_v46 = vsel %vm901_vm0, %v7497_v42, 0.0 }
 0x8d8   : > { %v7502_v40 = vadd.f32 %v7501_v41, %v7500_v5  ;;  %v7508_v44 = vrot.slane %v7507_v46, 4  ;;  %v7154_v5 = vpop.f32.mrf.mxu1 }
 0x8da   : > { %v7509_v63 = vadd.f32 %v7508_v44, %v7507_v46  ;;  %v7503_v17 = vrot.slane %v7502_v40, 2  ;;  %v7235_v46 = vpop.f32.mrf.mxu0  ;;  %v7155_v44 = vadd.f32 %v7154_v5, %v7062_v11  ;;  %v18974_v5 = vld [vmem:[#allocation68_spill] sm:$0xff] }
 0x8dc   : > { %v7510_v0 = vrot.slane %v7509_v63, 2  ;;  %v7504_v9 = vadd.f32 %v7503_v17, %v7502_v40  ;;  %v16867_v17 = vpop.f32.mrf.mxu1 }
 0x8de   : > { %v7511_v33 = vadd.f32 %v7510_v0, %v7509_v63  ;;  %v7505_v51 = vrot.slane %v7504_v9, 1 }
 0x8e0   : > { %v7512_v52 = vrot.slane %v7511_v33, 1  ;;  %v7506_v56 = vadd.f32 %v7505_v51, %v7504_v9  ;;  %v7236_v9 = vadd.f32 %v7235_v46, %v7155_v44  ;;  %v18975_v46 = vld [vmem:[#allocation89_spill] sm:$0xff] }
 0x8e1   : > { %v18976_v44 = vld [vmem:[#allocation93_spill] sm:$0xff] }
 0x8e2   : > { %v7513_v19 = vadd.f32 %v7512_v52, %v7511_v33  ;;  %v16849_v12 = vand.u32 4294901760, %v7506_v56  ;;  %v16871_v33 = vpop.f32.mrf.mxu0  ;;  %v7313_v52 = vpop.f32.mrf.mxu1 }
 0x8e4   : > { %v16853_v43 = vand.u32 4294901760, %v7513_v19  ;;  %v16856_v49 = vsub.f32 %v7506_v56, %v16849_v12  ;;  %v7314_v56 = vadd.f32 %v7313_v52, %v7236_v9  ;;  %v18978_v9 = vld [vmem:[#allocation98_spill] sm:$0xff] }
 0x8e6   : > { %7866 = vmatprep.mubr.f32.mxu1 %v16853_v43  ;;  %v7626_v42 = vsub.f32 %v7513_v19, %v16853_v43  ;;  %v7633_v41 = vand.u32 4294901760, %v16856_v49  ;;  %v7397_v19 = vpop.f32.mrf.mxu0 }
 0x8e7   : > { %7868 = vmatmul.mubr.f32.vlgmr.msra.gmra.mxu1 %v16849_v12 }
 0x8e8   : > { %12907 = vmatpush3.msra.mxu1 %v18912_v58  ;;  %v7627_v40 = vand.u32 4294901760, %v7626_v42  ;;  %v7634_v63 = vsub.f32 %v16856_v49, %v7633_v41 }
 0x8e9   : > { %12908 = vmatprep.subr.mxu1 %v18914_v7 }
 0x8ea   : > { %12909 = vmatpush3.msra.mxu1 %v18916_v60  ;;  %8110 = vmatprep.mubr.f32.mxu1 %v7627_v40  ;;  %v7628_v0 = vsub.f32 %v7626_v42, %v7627_v40  ;;  %v7635_v11 = vand.u32 4294901760, %v7634_v63  ;;  %v16880_v40 = vpop.f32.mrf.mxu1  ;;  %v7398_v63 = vadd.f32 %v7397_v19, %v7314_v56  ;;  %v18981_v56 = vld [vmem:[#allocation20_spill] sm:$0xff]  ;;  %v18982_v19 = vld [vmem:[#allocation122_spill] sm:$0xff] }
 0x8eb   : > { %12910 = vmatprep.subr.mxu1 %v18918_v35 }
 0x8ec   : > { %12911 = vmatpush3.msra.mxu1 %v18920_v57  ;;  %v7629_v51 = vand.u32 4294901760, %v7628_v0  ;;  %v18977_v0 = vld [vmem:[#allocation96_spill] sm:$0xff] }
 0x8ed   : > { %12912 = vmatprep.subr.mxu1 %v18922_v24 }
 0x8ee   : > { %12913 = vmatpush3.msra.mxu1 %v18924_v38  ;;  %7630 = vmatprep.mubr.f32.mxu0 %v7629_v51  ;;  %v18979_v51 = vld [vmem:[#allocation115_spill] sm:$0xff] }
 0x8ef   : > { %12914 = vmatprep.subr.mxu1 %v18926_v48  ;;  %7636 = vmatmul.mubr.f32.vlgmr.msra.gmra.mxu0 %v7635_v11  ;;  %v18980_v11 = vld [vmem:[#allocation117_spill] sm:$0xff] }
 0x8f0   : > { %12872 = vmatpush3.msra.mxu0 %v18974_v5  ;;  %12915 = vmatpush3.msra.mxu1 %v18928_v34  ;;  %v18983_v5 = vld [vmem:[#allocation62_spill] sm:$0xff] }
 0x8f1   : > { %12873 = vmatprep.subr.mxu0 %v18975_v46  ;;  %8003 = vmatprep.mubr.f32.mxu0 %v7626_v42  ;;  %v7473_v42 = vpop.f32.mrf.mxu1  ;;  %v18984_v46 = vld [vmem:[#allocation72_spill] sm:$0xff] }
 0x8f2   : > { %12916 = vmatprep.subr.mxu1 %v18930_v23  ;;  %12874 = vmatpush3.msra.mxu0 %v18976_v44  ;;  %v7474_v52 = vadd.f32 %v7473_v42, %v7398_v63  ;;  %v18985_v63 = vld [vmem:[#allocation79_spill] sm:$0xff] }
 0x8f3   : > { %12917 = vmatpush3.msra.mxu1 %v18932_v3  ;;  %12875 = vmatprep.subr.mxu0 %v18977_v0  ;;  %v18986_v0 = vld [vmem:[#allocation84_spill] sm:$0xff]  ;;  %v18989_v42 = vld [vmem:[#allocation151_spill] sm:$0xff] }
 0x8f4   : > { %12918 = vmatprep.subr.mxu1 %v18934_v59  ;;  %12876 = vmatpush3.msra.mxu0 %v18978_v9  ;;  %v7491_v44 = vrot.slane %v7474_v52, %v18969_v27  ;;  %v18987_v9 = vld [vmem:[#allocation99_spill] sm:$0xff]  ;;  %v18991_v52 = vld [vmem:[#allocation28_spill] sm:$0xff] }
 0x8f5   : > { %12919 = vmatpush3.msra.mxu1 %v18936_v20  ;;  %12877 = vmatprep.subr.mxu0 %v18979_v51  ;;  %v18988_v51 = vld [vmem:[#allocation108_spill] sm:$0xff] }
 0x8f6   : > { %12920 = vmatprep.subr.mxu1 %v18938_v14  ;;  %12878 = vmatpush3.msra.mxu0 %v18980_v11  ;;  %v18990_v11 = vmax.f32 %v18989_v42, 0.0 }
 0x8f7   : > { %12921 = vmatpush3.msra.mxu1 %v18940_v22  ;;  %12879 = vmatprep.subr.mxu0 %v18981_v56 }
 0x8f8   : > { %12922 = vmatprep.subr.mxu1 %v18942_v45  ;;  %12880 = vmatpush3.msra.mxu0 %v18982_v19  ;;  %v16911_v56 = vsub.f32 %v18990_v11, %v7491_v44  ;;  %v18992_v19 = vld [vmem:[#allocation52_spill] sm:$0xff]  ;;  %v18999_v11 = vld [vmem:[#allocation113_spill] sm:$0xff] }
 0x8f9   : > { %12923 = vmatpush3.msra.mxu1 %v18944_v18  ;;  %12881 = vmatprep.subr.mxu0 %v18983_v5  ;;  %v18993_v5 = vld [vmem:[#allocation66_spill] sm:$0xff] }
 0x8fa   : > { %12924 = vmatprep.subr.mxu1 %v18946_v2  ;;  %12882 = vmatpush3.msra.mxu0 %v18984_v46  ;;  %v18994_v46 = vld [vmem:[#allocation78_spill] sm:$0xff]  ;;  %v7499_v44 = vmul.f32 %v16911_v56, %v16911_v56 }
 0x8fb   : > { %12925 = vmatpush3.msra.mxu1 %v18948_v30  ;;  %12883 = vmatprep.subr.mxu0 %v18985_v63  ;;  %v18995_v63 = vld [vmem:[#allocation80_spill] sm:$0xff] }
 0x8fc   : > { %12926 = vmatprep.subr.mxu1 %v18950_v15  ;;  %12884 = vmatpush3.msra.mxu0 %v18986_v0  ;;  %v18996_v0 = vld [vmem:[#allocation83_spill] sm:$0xff]  ;;  %v7521_v42 = vsel %vm901_vm0, %v7499_v44, 0.0 }
 0x8fd   : > { %12927 = vmatpush3.msra.mxu1 %v18952_v29  ;;  %12885 = vmatprep.subr.mxu0 %v18987_v9  ;;  %v18997_v9 = vld [vmem:[#allocation88_spill] sm:$0xff] }
 0x8fe   : > { %12928 = vmatprep.subr.mxu1 %v18954_v53  ;;  %12886 = vmatpush3.msra.mxu0 %v18988_v51  ;;  %v18998_v51 = vld [vmem:[#allocation112_spill] sm:$0xff] }
 0x8ff   : > { %12929 = vmatpush3.msra.mxu1 %v18956_v39  ;;  %12887 = vmatprep.subr.mxu0 %v18991_v52  ;;  %v7153_v52 = vadd.f32 %v16847_v10, %v16845_v61  ;;  %v19004_v61 = vld [vmem:[#allocation132_spill] sm:$0xff]  ;;  %v19005_v10 = vld [vmem:[#allocation134_spill] sm:$0xff] }
 0x900   : > { %12930 = vmatprep.subr.mxu1 %v18958_v47  ;;  %12888 = vmatpush3.msra.mxu0 %v18992_v19  ;;  %v19000_v19 = vld [vmem:[#allocation46_spill] sm:$0xff] }
 0x901   : > { %12931 = vmatpush3.msra.mxu1 %v18960_v31  ;;  %12889 = vmatprep.subr.mxu0 %v18993_v5  ;;  %v7522_v5 = vrot.slane %v7521_v42, 4  ;;  %v7234_v44 = vadd.f32 %v16851_v32, %v7153_v52 }
 0x902   : > { %12932 = vmatprep.subr.mxu1 %v18962_v4  ;;  %12890 = vmatpush3.msra.mxu0 %v18994_v46  ;;  %v19001_v46 = vld [vmem:[#allocation127_spill] sm:$0xff] }
 0x903   : > { %12933 = vmatpush3.msra.mxu1 %v18963_v28  ;;  %12891 = vmatprep.subr.mxu0 %v18995_v63  ;;  %v19002_v63 = vld [vmem:[#allocation130_spill] sm:$0xff] }
 0x904   : > { %12934 = vmatprep.subr.mxu1 %v18964_v55  ;;  %12892 = vmatpush3.msra.mxu0 %v18996_v0 }
 0x905   : > { %12935 = vmatpush3.msra.mxu1 %v18965_v62  ;;  %12893 = vmatprep.subr.mxu0 %v18997_v9  ;;  %v19021_v9 = vld [vmem:[#allocation119_spill] sm:$0xff] }
 0x906   : > { %12936 = vmatprep.subr.mxu1 %v18966_v50  ;;  %12894 = vmatpush3.msra.mxu0 %v18998_v51  ;;  %v19022_v51 = vmax.f32 %v19021_v9, 0.0  ;;  %v19061_v9 = vld [vmem:[#allocation247_spill] sm:$0xff] }
 0x907   : > { %12937 = vmatpush3.msra.mxu1 %v18967_v6  ;;  %12895 = vmatprep.subr.mxu0 %v18999_v11 }
 0x908   : > { %8114 = vmatmul.mubr.f32.vlgmr.msra.gmra.mxu1 %v7633_v41  ;;  %12976 = vmatprep.subr.mxu1 %v18910_v8  ;;  %v19003_v8 = vld [vmem:[#allocation131_spill] sm:$0xff]  ;;  %v7312_v41 = vadd.f32 %v16867_v17, %v7234_v44 }
 0x909   : > { %12896 = vmatpush3.msra.mxu0 %v19000_v19  ;;  %12977 = vmatpush3.msra.mxu1 %v18912_v58  ;;  %v7523_v58 = vadd.f32 %v7522_v5, %v7521_v42 }
 0x90a   : > { %8384 = vmatprep.mubr.f32.mxu1 %v16853_v43  ;;  %12897 = vmatprep.subr.mxu0 %v19001_v46  ;;  %v7396_v32 = vadd.f32 %v16871_v33, %v7312_v41  ;;  %v19034_v46 = vld [vmem:[#allocation165_spill] sm:$0xff] }
 0x90b   : > { %12978 = vmatprep.subr.mxu1 %v18914_v7  ;;  %12898 = vmatpush3.msra.mxu0 %v19002_v63  ;;  %v19006_v7 = vld [vmem:[#allocation140_spill] sm:$0xff]  ;;  %v19035_v63 = vld [vmem:[#allocation129_spill] sm:$0xff] }
 0x90c   : > { %12979 = vmatpush3.msra.mxu1 %v18916_v60  ;;  %12899 = vmatprep.subr.mxu0 %v19003_v8  ;;  %v19007_v60 = vld [vmem:[#allocation60_spill] sm:$0xff]  ;;  %v7472_v17 = vadd.f32 %v16880_v40, %v7396_v32  ;;  %v19038_v8 = vld [vmem:[#allocation177_spill] sm:$0xff] }
 0x90d   : > { %12980 = vmatprep.subr.mxu1 %v18918_v35  ;;  %12900 = vmatpush3.msra.mxu0 %v19004_v61  ;;  %v19008_v35 = vld [vmem:[#allocation86_spill] sm:$0xff]  ;;  %v19046_v32 = vld [vmem:[#allocation200_spill] sm:$0xff] }
 0x90e   : > { %12981 = vmatpush3.msra.mxu1 %v18920_v57  ;;  %12901 = vmatprep.subr.mxu0 %v19005_v10  ;;  %v7524_v57 = vrot.slane %v7523_v58, 2  ;;  %v7487_v0 = vrot.slane %v7472_v17, %v18969_v27  ;;  %v19041_v10 = vld [vmem:[#allocation137_spill] sm:$0xff]  ;;  %v19050_v17 = vld [vmem:[#allocation207_spill] sm:$0xff] }
 0x90f   : > { %12982 = vmatprep.subr.mxu1 %v18922_v24  ;;  %12902 = vmatpush3.msra.mxu0 %v19006_v7  ;;  %v19009_v24 = vld [vmem:[#allocation114_spill] sm:$0xff]  ;;  %v19042_v7 = vld [vmem:[#allocation193_spill] sm:$0xff] }
 0x910   : > { %12983 = vmatpush3.msra.mxu1 %v18924_v38  ;;  %8006 = vmatmul.mubr.f32.vlgmr.msra.gmra.mxu0 %v16856_v49  ;;  %v19010_v38 = vld [vmem:[#allocation116_spill] sm:$0xff]  ;;  %v19011_v49 = vld [vmem:[#allocation118_spill] sm:$0xff]  ;;  %v16990_v42 = vsub.f32 %v19022_v51, %v7487_v0  ;;  %v19062_v51 = vld [vmem:[#allocation167_spill] sm:$0xff] }
 0x911   : > { %12941 = vmatprep.subr.mxu0 %v19007_v60  ;;  %12984 = vmatprep.subr.mxu1 %v18926_v48  ;;  %v19012_v48 = vld [vmem:[#allocation121_spill] sm:$0xff]  ;;  %v19043_v60 = vld [vmem:[#allocation138_spill] sm:$0xff]  ;;  %v19056_v0 = vld [vmem:[#allocation160_spill] sm:$0xff] }
 0x912   : > { %12942 = vmatpush3.msra.mxu0 %v19008_v35  ;;  %8280 = vmatprep.mubr.f32.mxu0 %v16853_v43  ;;  %v7525_v43 = vadd.f32 %v7524_v57, %v7523_v58  ;;  %v7498_v52 = vmul.f32 %v16990_v42, %v16990_v42  ;;  %v19040_v58 = vld [vmem:[#allocation187_spill] sm:$0xff]  ;;  %v19044_v35 = vld [vmem:[#allocation196_spill] sm:$0xff] }
 0x913   : > { %12985 = vmatpush3.msra.mxu1 %v18928_v34  ;;  %12943 = vmatprep.subr.mxu0 %v19009_v24  ;;  %v19013_v34 = vld [vmem:[#allocation21_spill] sm:$0xff]  ;;  %v19045_v57 = vld [vmem:[#allocation139_spill] sm:$0xff] }
 0x914   : > { %12986 = vmatprep.subr.mxu1 %v18930_v23  ;;  %12944 = vmatpush3.msra.mxu0 %v19010_v38  ;;  %v19014_v23 = vld [vmem:[#allocation23_spill] sm:$0xff]  ;;  %v7526_v33 = vrot.slane %v7525_v43, 1  ;;  %v7514_v5 = vsel %vm901_vm0, %v7498_v52, 0.0  ;;  %v19066_v52 = vld [vmem:[#allocation174_spill] sm:$0xff] }
 0x915   : > { %12987 = vmatpush3.msra.mxu1 %v18932_v3  ;;  %12945 = vmatprep.subr.mxu0 %v19011_v49  ;;  %v19015_v3 = vld [vmem:[#allocation24_spill] sm:$0xff]  ;;  %v19047_v24 = vld [vmem:[#allocation143_spill] sm:$0xff] }
 0x916   : > { %12988 = vmatprep.subr.mxu1 %v18934_v59  ;;  %12946 = vmatpush3.msra.mxu0 %v19012_v48  ;;  %v19016_v59 = vld [vmem:[#allocation26_spill] sm:$0xff]  ;;  %v7527_v40 = vadd.f32 %v7526_v33, %v7525_v43  ;;  %v19048_v38 = vld [vmem:[#allocation203_spill] sm:$0xff] }
 0x917   : > { %12989 = vmatpush3.msra.mxu1 %v18936_v20  ;;  %12947 = vmatprep.subr.mxu0 %v19013_v34  ;;  %v19017_v20 = vld [vmem:[#allocation76_spill] sm:$0xff]  ;;  %v19049_v43 = vld [vmem:[#allocation206_spill] sm:$0xff] }
 0x918   : > { %12990 = vmatprep.subr.mxu1 %v18938_v14  ;;  %12948 = vmatpush3.msra.mxu0 %v19014_v23  ;;  %v19018_v14 = vld [vmem:[#allocation82_spill] sm:$0xff]  ;;  %v17000_v11 = vand.u32 4294901760, %v7527_v40 }
 0x919   : > { %12991 = vmatpush3.msra.mxu1 %v18940_v22  ;;  %12949 = vmatprep.subr.mxu0 %v19015_v3  ;;  %v19019_v22 = vld [vmem:[#allocation97_spill] sm:$0xff]  ;;  %v19051_v34 = vld [vmem:[#allocation210_spill] sm:$0xff] }
 0x91a   : > { %12992 = vmatprep.subr.mxu1 %v18942_v45  ;;  %12950 = vmatpush3.msra.mxu0 %v19016_v59  ;;  %v19020_v45 = vld [vmem:[#allocation106_spill] sm:$0xff]  ;;  %v17013_v19 = vsub.f32 %v7527_v40, %v17000_v11  ;;  %v19052_v3 = vld [vmem:[#allocation213_spill] sm:$0xff]  ;;  %v19060_v40 = vld [vmem:[#allocation164_spill] sm:$0xff] }
 0x91b   : > { %12993 = vmatpush3.msra.mxu1 %v18944_v18  ;;  %12951 = vmatprep.subr.mxu0 %v19017_v20  ;;  %v19023_v18 = vld [vmem:[#allocation22_spill] sm:$0xff] }
 0x91c   : > { %12994 = vmatprep.subr.mxu1 %v18946_v2  ;;  %12952 = vmatpush3.msra.mxu0 %v19018_v14  ;;  %v19024_v2 = vld [vmem:[#allocation34_spill] sm:$0xff]  ;;  %v8489_v44 = vand.u32 4294901760, %v17013_v19  ;;  %v19057_v14 = vld [vmem:[#allocation225_spill] sm:$0xff] }
 0x91d   : > { %12995 = vmatpush3.msra.mxu1 %v18948_v30  ;;  %12953 = vmatprep.subr.mxu0 %v19019_v22  ;;  %v19025_v30 = vld [vmem:[#allocation35_spill] sm:$0xff]  ;;  %v19054_v59 = vld [vmem:[#allocation218_spill] sm:$0xff] }
 0x91e   : > { %12996 = vmatprep.subr.mxu1 %v18950_v15  ;;  %12954 = vmatpush3.msra.mxu0 %v19020_v45  ;;  %v19026_v15 = vld [vmem:[#allocation75_spill] sm:$0xff]  ;;  %v8490_v41 = vsub.f32 %v17013_v19, %v8489_v44  ;;  %v19055_v33 = vld [vmem:[#allocation222_spill] sm:$0xff] }
 0x91f   : > { %12997 = vmatpush3.msra.mxu1 %v18952_v29  ;;  %12955 = vmatprep.subr.mxu0 %v19023_v18  ;;  %v19027_v29 = vld [vmem:[#allocation87_spill] sm:$0xff]  ;;  %v19058_v22 = vld [vmem:[#allocation162_spill] sm:$0xff] }
 0x920   : > { %12998 = vmatprep.subr.mxu1 %v18954_v53  ;;  %12956 = vmatpush3.msra.mxu0 %v19024_v2  ;;  %v19028_v53 = vld [vmem:[#allocation100_spill] sm:$0xff]  ;;  %v8491_v49 = vand.u32 4294901760, %v8490_v41  ;;  %v19059_v45 = vld [vmem:[#allocation234_spill] sm:$0xff]  ;;  %v19064_v2 = vld [vmem:[#allocation171_spill] sm:$0xff] }
 0x921   : > { %12999 = vmatpush3.msra.mxu1 %v18956_v39  ;;  %12957 = vmatprep.subr.mxu0 %v19025_v30  ;;  %v19029_v39 = vld [vmem:[#allocation105_spill] sm:$0xff]  ;;  %v19063_v18 = vld [vmem:[#allocation250_spill] sm:$0xff] }
 0x922   : > { %13000 = vmatprep.subr.mxu1 %v18958_v47  ;;  %12958 = vmatpush3.msra.mxu0 %v19026_v15  ;;  %v19030_v47 = vld [vmem:[#allocation107_spill] sm:$0xff]  ;;  %v19083_v41 = vld [vmem:[#allocation270_spill] sm:$0xff] }
 0x923   : > { %13001 = vmatpush3.msra.mxu1 %v18960_v31  ;;  %12959 = vmatprep.subr.mxu0 %v19027_v29  ;;  %v19031_v31 = vld [vmem:[#allocation110_spill] sm:$0xff]  ;;  %v19065_v15 = vld [vmem:[#allocation255_spill] sm:$0xff] }
 0x924   : > { %13002 = vmatprep.subr.mxu1 %v18962_v4  ;;  %12960 = vmatpush3.msra.mxu0 %v19028_v53  ;;  %v19032_v4 = vld [vmem:[#allocation102_spill] sm:$0xff]  ;;  %v19068_v53 = vld [vmem:[#allocation176_spill] sm:$0xff] }
 0x925   : > { %13003 = vmatpush3.msra.mxu1 %v18963_v28  ;;  %12961 = vmatprep.subr.mxu0 %v19029_v39  ;;  %v19033_v28 = vld [vmem:[#allocation103_spill] sm:$0xff]  ;;  %v19067_v29 = vld [vmem:[#allocation258_spill] sm:$0xff]  ;;  %v19069_v39 = vld [vmem:[#allocation260_spill] sm:$0xff] }
 0x926   : > { %13004 = vmatprep.subr.mxu1 %v18964_v55  ;;  %12962 = vmatpush3.msra.mxu0 %v19030_v47  ;;  %v7515_v55 = vrot.slane %v7514_v5, 4  ;;  %v19070_v47 = vld [vmem:[#allocation180_spill] sm:$0xff] }
 0x927   : > { %13005 = vmatpush3.msra.mxu1 %v18965_v62  ;;  %12963 = vmatprep.subr.mxu0 %v19031_v31  ;;  %v19036_v62 = vld [vmem:[#allocation168_spill] sm:$0xff]  ;;  %v19072_v31 = vld [vmem:[#allocation183_spill] sm:$0xff] }
 0x928   : > { %13006 = vmatprep.subr.mxu1 %v18966_v50  ;;  %12964 = vmatpush3.msra.mxu0 %v19032_v4  ;;  %v19037_v50 = vld [vmem:[#allocation133_spill] sm:$0xff]  ;;  %v7516_v61 = vadd.f32 %v7515_v55, %v7514_v5  ;;  %v19071_v5 = vld [vmem:[#allocation262_spill] sm:$0xff]  ;;  %v19074_v55 = vld [vmem:[#allocation192_spill] sm:$0xff] }
 0x929   : > { %13007 = vmatpush3.msra.mxu1 %v18967_v6  ;;  %12965 = vmatprep.subr.mxu0 %v19033_v28  ;;  %v19039_v6 = vld [vmem:[#allocation136_spill] sm:$0xff] }
 0x92a   : > { %8386 = vmatmul.mubr.f32.vlgmr.msra.gmra.mxu1 %v16849_v12  ;;  %13046 = vmatprep.subr.mxu1 %v19034_v46  ;;  %v7517_v48 = vrot.slane %v7516_v61, 2  ;;  %v19073_v28 = vld [vmem:[#allocation264_spill] sm:$0xff]  ;;  %v19075_v46 = vld [vmem:[#allocation266_spill] sm:$0xff] }
 0x92b   : > { %12966 = vmatpush3.msra.mxu0 %v19035_v63  ;;  %13047 = vmatpush3.msra.mxu1 %v19036_v62  ;;  %v19076_v63 = vld [vmem:[#allocation199_spill] sm:$0xff] }
 0x92c   : > { %8728 = vmatprep.mubr.f32.mxu1 %v17000_v11  ;;  %12967 = vmatprep.subr.mxu0 %v19037_v50  ;;  %v7518_v23 = vadd.f32 %v7517_v48, %v7516_v61  ;;  %v19077_v62 = vld [vmem:[#allocation267_spill] sm:$0xff]  ;;  %v19078_v50 = vld [vmem:[#allocation205_spill] sm:$0xff]  ;;  %v19091_v48 = vld [vmem:[#allocation228_spill] sm:$0xff] }
 0x92d   : > { %13048 = vmatprep.subr.mxu1 %v19038_v8  ;;  %12968 = vmatpush3.msra.mxu0 %v19039_v6  ;;  %v19079_v8 = vld [vmem:[#allocation268_spill] sm:$0xff]  ;;  %v19080_v6 = vld [vmem:[#allocation209_spill] sm:$0xff] }
 0x92e   : > { %13049 = vmatpush3.msra.mxu1 %v19040_v58  ;;  %12969 = vmatprep.subr.mxu0 %v19041_v10  ;;  %v7519_v20 = vrot.slane %v7518_v23, 1  ;;  %v19081_v58 = vld [vmem:[#allocation269_spill] sm:$0xff]  ;;  %v19082_v10 = vld [vmem:[#allocation212_spill] sm:$0xff] }
 0x92f   : > { %13050 = vmatprep.subr.mxu1 %v19042_v7  ;;  %12970 = vmatpush3.msra.mxu0 %v19043_v60  ;;  %v19084_v7 = vld [vmem:[#allocation215_spill] sm:$0xff] }
 0x930   : > { %13051 = vmatpush3.msra.mxu1 %v19044_v35  ;;  %12971 = vmatprep.subr.mxu0 %v19045_v57  ;;  %v7520_v30 = vadd.f32 %v7519_v20, %v7518_v23  ;;  %v19085_v60 = vld [vmem:[#allocation271_spill] sm:$0xff]  ;;  %v19086_v35 = vld [vmem:[#allocation217_spill] sm:$0xff]  ;;  %v19087_v57 = vld [vmem:[#allocation272_spill] sm:$0xff] }
 0x931   : > { %13052 = vmatprep.subr.mxu1 %v19046_v32  ;;  %12972 = vmatpush3.msra.mxu0 %v19047_v24  ;;  %v19088_v32 = vld [vmem:[#allocation221_spill] sm:$0xff] }
 0x932   : > { %13053 = vmatpush3.msra.mxu1 %v19048_v38  ;;  %8282 = vmatmul.mubr.f32.vlgmr.msra.gmra.mxu0 %v16849_v12  ;;  %v19053_v12 = vld [vmem:[#allocation216_spill] sm:$0xff]  ;;  %v17075_v4 = vand.u32 4294901760, %v7520_v30  ;;  %v19089_v38 = vld [vmem:[#allocation273_spill] sm:$0xff] }
 0x933   : > { %13011 = vmatprep.subr.mxu0 %v15795_v37  ;;  %13054 = vmatprep.subr.mxu1 %v19049_v43  ;;  %v19092_v43 = vld [vmem:[#allocation230_spill] sm:$0xff]  ;;  %v19094_v23 = vld [vmem:[#allocation237_spill] sm:$0xff] }
 0x934   : > { %13012 = vmatpush3.msra.mxu0 %v15799_v16  ;;  %8492 = vmatprep.mubr.f32.mxu0 %v8491_v49  ;;  %v17086_v61 = vsub.f32 %v7520_v30, %v17075_v4  ;;  %v19090_v49 = vld [vmem:[#allocation224_spill] sm:$0xff]  ;;  %v19099_v20 = vld [vmem:[#allocation153_spill] sm:$0xff]  ;;  %v19104_v30 = vld [vmem:[#allocation166_spill] sm:$0xff] }
 0x935   : > { %13055 = vmatpush3.msra.mxu1 %v19050_v17  ;;  %13013 = vmatprep.subr.mxu0 %v15813_v13 }
 0x936   : > { %13056 = vmatprep.subr.mxu1 %v19051_v34  ;;  %13014 = vmatpush3.msra.mxu0 %v15830_v1  ;;  %v8495_v24 = vand.u32 4294901760, %v17086_v61  ;;  %v19093_v34 = vld [vmem:[#allocation233_spill] sm:$0xff] }
 0x937   : > { %13057 = vmatpush3.msra.mxu1 %v19052_v3  ;;  %13015 = vmatprep.subr.mxu0 %v15848_v25  ;;  %v19095_v3 = vld [vmem:[#allocation240_spill] sm:$0xff] }
 0x938   : > { %13058 = vmatprep.subr.mxu1 %v19053_v12  ;;  %13016 = vmatpush3.msra.mxu0 %v15855_v26  ;;  %v8496_v17 = vsub.f32 %v17086_v61, %v8495_v24 }
 0x939   : > { %13059 = vmatpush3.msra.mxu1 %v19054_v59  ;;  %13017 = vmatprep.subr.mxu0 %v15876_v54  ;;  %v19097_v59 = vld [vmem:[#allocation246_spill] sm:$0xff] }
 0x93a   : > { %13060 = vmatprep.subr.mxu1 %v19055_v33  ;;  %13018 = vmatpush3.msra.mxu0 %v19056_v0  ;;  %v8497_v12 = vand.u32 4294901760, %v8496_v17  ;;  %v19098_v33 = vld [vmem:[#allocation152_spill] sm:$0xff]  ;;  %v19119_v17 = vld [vmem:[#allocation227_spill] sm:$0xff] }
 0x93b   : > { %13061 = vmatpush3.msra.mxu1 %v19057_v14  ;;  %13019 = vmatprep.subr.mxu0 %v19058_v22  ;;  %v19100_v14 = vld [vmem:[#allocation155_spill] sm:$0xff] }
 0x93c   : > { %13062 = vmatprep.subr.mxu1 %v19059_v45  ;;  %13020 = vmatpush3.msra.mxu0 %v19060_v40  ;;  %v19101_v45 = vld [vmem:[#allocation157_spill] sm:$0xff] }
 0x93d   : > { %13063 = vmatpush3.msra.mxu1 %v19061_v9  ;;  %13021 = vmatprep.subr.mxu0 %v19062_v51  ;;  %v19102_v9 = vld [vmem:[#allocation159_spill] sm:$0xff] }
 0x93e   : > { %13064 = vmatprep.subr.mxu1 %v19063_v18  ;;  %13022 = vmatpush3.msra.mxu0 %v19064_v2  ;;  %v19103_v18 = vld [vmem:[#allocation161_spill] sm:$0xff] }
 0x93f   : > { %13065 = vmatpush3.msra.mxu1 %v19065_v15  ;;  %13023 = vmatprep.subr.mxu0 %v19066_v52  ;;  %v19106_v15 = vld [vmem:[#allocation173_spill] sm:$0xff] }
 0x940   : > { %13066 = vmatprep.subr.mxu1 %v19067_v29  ;;  %13024 = vmatpush3.msra.mxu0 %v19068_v53  ;;  %v19107_v29 = vld [vmem:[#allocation175_spill] sm:$0xff] }
 0x941   : > { %13067 = vmatpush3.msra.mxu1 %v19069_v39  ;;  %13025 = vmatprep.subr.mxu0 %v19070_v47  ;;  %v19108_v39 = vld [vmem:[#allocation179_spill] sm:$0xff] }
 0x942   : > { %13068 = vmatprep.subr.mxu1 %v19071_v5  ;;  %13026 = vmatpush3.msra.mxu0 %v19072_v31  ;;  %v19109_v5 = vld [vmem:[#allocation182_spill] sm:$0xff] }
 0x943   : > { %13069 = vmatpush3.msra.mxu1 %v19073_v28  ;;  %13027 = vmatprep.subr.mxu0 %v19074_v55  ;;  %v19110_v28 = vld [vmem:[#allocation186_spill] sm:$0xff] }
 0x944   : > { %13070 = vmatprep.subr.mxu1 %v19075_v46  ;;  %13028 = vmatpush3.msra.mxu0 %v19076_v63  ;;  %v19111_v46 = vld [vmem:[#allocation189_spill] sm:$0xff] }
 0x945   : > { %13071 = vmatpush3.msra.mxu1 %v19077_v62  ;;  %13029 = vmatprep.subr.mxu0 %v19078_v50  ;;  %v19112_v62 = vld [vmem:[#allocation191_spill] sm:$0xff] }
 0x946   : > { %13072 = vmatprep.subr.mxu1 %v19079_v8  ;;  %13030 = vmatpush3.msra.mxu0 %v19080_v6  ;;  %v19113_v8 = vld [vmem:[#allocation195_spill] sm:$0xff] }
 0x947   : > { %13073 = vmatpush3.msra.mxu1 %v19081_v58  ;;  %13031 = vmatprep.subr.mxu0 %v19082_v10  ;;  %v19114_v58 = vld [vmem:[#allocation202_spill] sm:$0xff] }
 0x948   : > { %13074 = vmatprep.subr.mxu1 %v19083_v41  ;;  %13032 = vmatpush3.msra.mxu0 %v19084_v7  ;;  %v19115_v41 = vld [vmem:[#allocation208_spill] sm:$0xff] }
 0x949   : > { %13075 = vmatpush3.msra.mxu1 %v19085_v60  ;;  %13033 = vmatprep.subr.mxu0 %v19086_v35  ;;  %v19116_v60 = vld [vmem:[#allocation214_spill] sm:$0xff] }
 0x94a   : > { %13076 = vmatprep.subr.mxu1 %v19087_v57  ;;  %13034 = vmatpush3.msra.mxu0 %v19088_v32  ;;  %v19117_v57 = vld [vmem:[#allocation220_spill] sm:$0xff] }
 0x94b   : > { %13077 = vmatpush3.msra.mxu1 %v19089_v38  ;;  %13035 = vmatprep.subr.mxu0 %v19090_v49  ;;  %v19118_v38 = vld [vmem:[#allocation223_spill] sm:$0xff] }
 0x94c   : > { %8730 = vmatmul.mubr.f32.vlgmr.msra.gmra.mxu1 %v17075_v4  ;;  %13116 = vmatprep.subr.mxu1 %v15795_v37 }
 0x94d   : > { %13036 = vmatpush3.msra.mxu0 %v19091_v48  ;;  %13117 = vmatpush3.msra.mxu1 %v15799_v16 }
 0x94e   : > { %8972 = vmatprep.mubr.f32.mxu1 %v8489_v44  ;;  %13037 = vmatprep.subr.mxu0 %v19092_v43  ;;  %v19096_v44 = vld [vmem:[#allocation243_spill] sm:$0xff] }
 0x94f   : > { %13118 = vmatprep.subr.mxu1 %v15813_v13  ;;  %13038 = vmatpush3.msra.mxu0 %v19093_v34 }
 0x950   : > { %13119 = vmatpush3.msra.mxu1 %v15830_v1  ;;  %13039 = vmatprep.subr.mxu0 %v19094_v23 }
 0x951   : > { %13120 = vmatprep.subr.mxu1 %v15848_v25  ;;  %13040 = vmatpush3.msra.mxu0 %v19095_v3 }
 0x952   : > { %13121 = vmatpush3.msra.mxu1 %v15855_v26  ;;  %13041 = vmatprep.subr.mxu0 %v19096_v44 }
 0x953   : > { %13122 = vmatprep.subr.mxu1 %v15876_v54  ;;  %13042 = vmatpush3.msra.mxu0 %v19097_v59 }
 0x954   : > { %13123 = vmatpush3.msra.mxu1 %v19056_v0  ;;  %8498 = vmatmul.mubr.f32.vlgmr.msra.gmra.mxu0 %v8497_v12  ;;  %v19120_v12 = vld [vmem:[#allocation229_spill] sm:$0xff] }
 0x955   : > { %13081 = vmatprep.subr.mxu0 %v19098_v33  ;;  %13124 = vmatprep.subr.mxu1 %v19058_v22  ;;  %v19121_v33 = vld [vmem:[#allocation232_spill] sm:$0xff] }
 0x956   : > { %13082 = vmatpush3.msra.mxu0 %v19099_v20  ;;  %8865 = vmatprep.mubr.f32.mxu0 %v17013_v19  ;;  %v19105_v19 = vld [vmem:[#allocation170_spill] sm:$0xff]  ;;  %v19122_v20 = vld [vmem:[#allocation236_spill] sm:$0xff] }
 0x957   : > { %13125 = vmatpush3.msra.mxu1 %v19060_v40  ;;  %13083 = vmatprep.subr.mxu0 %v19100_v14  ;;  %v19123_v14 = vld [vmem:[#allocation239_spill] sm:$0xff] }
 0x958   : > { %13126 = vmatprep.subr.mxu1 %v19062_v51  ;;  %13084 = vmatpush3.msra.mxu0 %v19101_v45  ;;  %v19124_v45 = vld [vmem:[#allocation242_spill] sm:$0xff] }
 0x959   : > { %13127 = vmatpush3.msra.mxu1 %v19064_v2  ;;  %13085 = vmatprep.subr.mxu0 %v19102_v9  ;;  %v19125_v9 = vld [vmem:[#allocation245_spill] sm:$0xff] }
 0x95a   : > { %13128 = vmatprep.subr.mxu1 %v19066_v52  ;;  %13086 = vmatpush3.msra.mxu0 %v19103_v18  ;;  %v19126_v18 = vld [vmem:[#allocation249_spill] sm:$0xff] }
 0x95b   : > { %13129 = vmatpush3.msra.mxu1 %v19068_v53  ;;  %13087 = vmatprep.subr.mxu0 %v19104_v30  ;;  %v19160_v30 = vld [vmem:[#allocation259_spill] sm:$0xff] }
 0x95c   : > { %13130 = vmatprep.subr.mxu1 %v19070_v47  ;;  %13088 = vmatpush3.msra.mxu0 %v19105_v19  ;;  %v19162_v19 = vld [vmem:[#allocation261_spill] sm:$0xff] }
 0x95d   : > { %13131 = vmatpush3.msra.mxu1 %v19072_v31  ;;  %13089 = vmatprep.subr.mxu0 %v19106_v15  ;;  %v19164_v15 = vld [vmem:[#allocation263_spill] sm:$0xff] }
 0x95e   : > { %13132 = vmatprep.subr.mxu1 %v19074_v55  ;;  %13090 = vmatpush3.msra.mxu0 %v19107_v29  ;;  %v19165_v29 = vmov 0.0  }
 0x95f   : > { %13133 = vmatpush3.msra.mxu1 %v19076_v63  ;;  %13091 = vmatprep.subr.mxu0 %v19108_v39  ;;  %v19166_v39 = vld [vmem:[#allocation265_spill] sm:$0xff] }
 0x960   : > { %13134 = vmatprep.subr.mxu1 %v19078_v50  ;;  %13092 = vmatpush3.msra.mxu0 %v19109_v5  ;;  %v19167_v5 = vld [vmem:[#allocation184_spill] sm:$0xff] }
 0x961   : > { %13135 = vmatpush3.msra.mxu1 %v19080_v6  ;;  %13093 = vmatprep.subr.mxu0 %v19110_v28  ;;  %v19168_v28 = vld [vmem:[#allocation274_spill] sm:$0xff] }
 0x962   : > { %13136 = vmatprep.subr.mxu1 %v19082_v10  ;;  %13094 = vmatpush3.msra.mxu0 %v19111_v46  ;;  %v19169_v46 = vld [vmem:[#allocation276_spill] sm:$0xff] }
 0x963   : > { %13137 = vmatpush3.msra.mxu1 %v19084_v7  ;;  %13095 = vmatprep.subr.mxu0 %v19112_v62  ;;  %v19170_v62 = vld [vmem:[#allocation278_spill] sm:$0xff] }
 0x964   : > { %13138 = vmatprep.subr.mxu1 %v19086_v35  ;;  %13096 = vmatpush3.msra.mxu0 %v19113_v8  ;;  %v19171_v8 = vld [vmem:[#allocation275_spill] sm:$0xff] }
 0x965   : > { %13139 = vmatpush3.msra.mxu1 %v19088_v32  ;;  %13097 = vmatprep.subr.mxu0 %v19114_v58 }
 0x966   : > { %13140 = vmatprep.subr.mxu1 %v19090_v49  ;;  %13098 = vmatpush3.msra.mxu0 %v19115_v41 }
 0x967   : > { %13141 = vmatpush3.msra.mxu1 %v19091_v48  ;;  %13099 = vmatprep.subr.mxu0 %v19116_v60 }
 0x968   : > { %13142 = vmatprep.subr.mxu1 %v19092_v43  ;;  %13100 = vmatpush3.msra.mxu0 %v19117_v57 }
 0x969   : > { %13143 = vmatpush3.msra.mxu1 %v19093_v34  ;;  %13101 = vmatprep.subr.mxu0 %v19118_v38 }
 0x96a   : > { %13144 = vmatprep.subr.mxu1 %v19094_v23  ;;  %13102 = vmatpush3.msra.mxu0 %v19119_v17 }
 0x96b   : > { %13145 = vmatpush3.msra.mxu1 %v19095_v3  ;;  %13103 = vmatprep.subr.mxu0 %v19120_v12 }
 0x96c   : > { %13146 = vmatprep.subr.mxu1 %v19096_v44  ;;  %13104 = vmatpush3.msra.mxu0 %v19121_v33 }
 0x96d   : > { %13147 = vmatpush3.msra.mxu1 %v19097_v59  ;;  %13105 = vmatprep.subr.mxu0 %v19122_v20 }
 0x96e   : > { %8976 = vmatmul.mubr.f32.vlgmr.msra.gmra.mxu1 %v8495_v24  ;;  %13186 = vmatprep.subr.mxu1 %v15795_v37  ;;  %v19127_v24 = vld [vmem:[#allocation252_spill] sm:$0xff]  ;;  %v19128_v37 = vld [vmem:[#allocation254_spill] sm:$0xff] }
 0x96f   : > { %13106 = vmatpush3.msra.mxu0 %v19123_v14  ;;  %13187 = vmatpush3.msra.mxu1 %v15799_v16  ;;  %v19129_v16 = vld [vmem:[#allocation257_spill] sm:$0xff] }
 0x970   : > { %9246 = vmatprep.mubr.f32.mxu1 %v17000_v11  ;;  %13107 = vmatprep.subr.mxu0 %v19124_v45 }
 0x971   : > { %13188 = vmatprep.subr.mxu1 %v15813_v13  ;;  %13108 = vmatpush3.msra.mxu0 %v19125_v9  ;;  %v19130_v13 = vld [vmem:[#allocation154_spill] sm:$0xff] }
 0x972   : > { %13189 = vmatpush3.msra.mxu1 %v15830_v1  ;;  %13109 = vmatprep.subr.mxu0 %v19126_v18  ;;  %v19131_v1 = vld [vmem:[#allocation156_spill] sm:$0xff] }
 0x973   : > { %13190 = vmatprep.subr.mxu1 %v15848_v25  ;;  %13110 = vmatpush3.msra.mxu0 %v19127_v24  ;;  %v19132_v25 = vld [vmem:[#allocation158_spill] sm:$0xff] }
 0x974   : > { %13191 = vmatpush3.msra.mxu1 %v15855_v26  ;;  %13111 = vmatprep.subr.mxu0 %v19128_v37  ;;  %v19134_v26 = vld [vmem:[#allocation169_spill] sm:$0xff] }
 0x975   : > { %13192 = vmatprep.subr.mxu1 %v15876_v54  ;;  %13112 = vmatpush3.msra.mxu0 %v19129_v16  ;;  %v19133_v54 = vld [vmem:[#allocation163_spill] sm:$0xff] }
 0x976   : > { %13193 = vmatpush3.msra.mxu1 %v19056_v0  ;;  %8868 = vmatmul.mubr.f32.vlgmr.msra.gmra.mxu0 %v17086_v61  ;;  %v19135_v0 = vld [vmem:[#allocation172_spill] sm:$0xff]  ;;  %v19149_v61 = vld [vmem:[#allocation231_spill] sm:$0xff] }
 0x977   : > { %13151 = vmatprep.subr.mxu0 %v19130_v13  ;;  %13194 = vmatprep.subr.mxu1 %v19058_v22  ;;  %v19136_v22 = vld [vmem:[#allocation178_spill] sm:$0xff] }
 0x978   : > { %13152 = vmatpush3.msra.mxu0 %v19131_v1  ;;  %9142 = vmatprep.mubr.f32.mxu0 %v17000_v11  ;;  %v19137_v11 = vld [vmem:[#allocation181_spill] sm:$0xff] }
 0x979   : > { %13195 = vmatpush3.msra.mxu1 %v19060_v40  ;;  %13153 = vmatprep.subr.mxu0 %v19132_v25  ;;  %v19138_v40 = vld [vmem:[#allocation185_spill] sm:$0xff] }
 0x97a   : > { %13196 = vmatprep.subr.mxu1 %v19062_v51  ;;  %13154 = vmatpush3.msra.mxu0 %v19133_v54  ;;  %v19139_v51 = vld [vmem:[#allocation188_spill] sm:$0xff] }
 0x97b   : > { %13197 = vmatpush3.msra.mxu1 %v19064_v2  ;;  %13155 = vmatprep.subr.mxu0 %v19134_v26  ;;  %v19140_v2 = vld [vmem:[#allocation190_spill] sm:$0xff] }
 0x97c   : > { %13198 = vmatprep.subr.mxu1 %v19066_v52  ;;  %13156 = vmatpush3.msra.mxu0 %v19135_v0  ;;  %v19141_v52 = vld [vmem:[#allocation194_spill] sm:$0xff] }
 0x97d   : > { %13199 = vmatpush3.msra.mxu1 %v19068_v53  ;;  %13157 = vmatprep.subr.mxu0 %v19136_v22  ;;  %v19142_v53 = vld [vmem:[#allocation197_spill] sm:$0xff] }
 0x97e   : > { %13200 = vmatprep.subr.mxu1 %v19070_v47  ;;  %13158 = vmatpush3.msra.mxu0 %v19137_v11  ;;  %v19143_v47 = vld [vmem:[#allocation198_spill] sm:$0xff] }
 0x97f   : > { %13201 = vmatpush3.msra.mxu1 %v19072_v31  ;;  %13159 = vmatprep.subr.mxu0 %v19138_v40  ;;  %v19144_v31 = vld [vmem:[#allocation201_spill] sm:$0xff] }
 0x980   : > { %13202 = vmatprep.subr.mxu1 %v19074_v55  ;;  %13160 = vmatpush3.msra.mxu0 %v19139_v51  ;;  %v19145_v55 = vld [vmem:[#allocation204_spill] sm:$0xff] }
 0x981   : > { %13203 = vmatpush3.msra.mxu1 %v19076_v63  ;;  %13161 = vmatprep.subr.mxu0 %v19140_v2  ;;  %v19146_v63 = vld [vmem:[#allocation211_spill] sm:$0xff] }
 0x982   : > { %13204 = vmatprep.subr.mxu1 %v19078_v50  ;;  %13162 = vmatpush3.msra.mxu0 %v19141_v52  ;;  %v19147_v50 = vld [vmem:[#allocation219_spill] sm:$0xff] }
 0x983   : > { %13205 = vmatpush3.msra.mxu1 %v19080_v6  ;;  %13163 = vmatprep.subr.mxu0 %v19142_v53  ;;  %v19148_v6 = vld [vmem:[#allocation226_spill] sm:$0xff] }
 0x984   : > { %13206 = vmatprep.subr.mxu1 %v19082_v10  ;;  %13164 = vmatpush3.msra.mxu0 %v19143_v47  ;;  %v19150_v10 = vld [vmem:[#allocation235_spill] sm:$0xff] }
 0x985   : > { %13207 = vmatpush3.msra.mxu1 %v19084_v7  ;;  %13165 = vmatprep.subr.mxu0 %v19144_v31  ;;  %v19151_v7 = vld [vmem:[#allocation238_spill] sm:$0xff] }
 0x986   : > { %13208 = vmatprep.subr.mxu1 %v19086_v35  ;;  %13166 = vmatpush3.msra.mxu0 %v19145_v55  ;;  %v19152_v35 = vld [vmem:[#allocation241_spill] sm:$0xff] }
 0x987   : > { %13209 = vmatpush3.msra.mxu1 %v19088_v32  ;;  %13167 = vmatprep.subr.mxu0 %v19146_v63  ;;  %v19153_v32 = vld [vmem:[#allocation244_spill] sm:$0xff] }
 0x988   : > { %13210 = vmatprep.subr.mxu1 %v19090_v49  ;;  %13168 = vmatpush3.msra.mxu0 %v19147_v50  ;;  %v19154_v49 = vld [vmem:[#allocation248_spill] sm:$0xff] }
 0x989   : > { %13211 = vmatpush3.msra.mxu1 %v19091_v48  ;;  %13169 = vmatprep.subr.mxu0 %v19148_v6  ;;  %v19155_v48 = vld [vmem:[#allocation251_spill] sm:$0xff] }
 0x98a   : > { %13212 = vmatprep.subr.mxu1 %v19092_v43  ;;  %13170 = vmatpush3.msra.mxu0 %v19149_v61  ;;  %v19156_v43 = vld [vmem:[#allocation253_spill] sm:$0xff] }
 0x98b   : > { %13213 = vmatpush3.msra.mxu1 %v19093_v34  ;;  %13171 = vmatprep.subr.mxu0 %v19150_v10  ;;  %v19157_v34 = vld [vmem:[#allocation285_spill] sm:$0xff] }
 0x98c   : > { %13214 = vmatprep.subr.mxu1 %v19094_v23  ;;  %13172 = vmatpush3.msra.mxu0 %v19151_v7  ;;  %v19158_v23 = vld [vmem:[#allocation256_spill] sm:$0xff] }
 0x98d   : > { %13215 = vmatpush3.msra.mxu1 %v19095_v3  ;;  %13173 = vmatprep.subr.mxu0 %v19152_v35  ;;  %v19159_v3 = vld [vmem:[#allocation286_spill] sm:$0xff] }
 0x98e   : > { %13216 = vmatprep.subr.mxu1 %v19096_v44  ;;  %13174 = vmatpush3.msra.mxu0 %v19153_v32  ;;  %v19161_v44 = vld [vmem:[#allocation287_spill] sm:$0xff] }
 0x98f   : > { %13217 = vmatpush3.msra.mxu1 %v19097_v59  ;;  %13175 = vmatprep.subr.mxu0 %v19154_v49  ;;  %v19163_v59 = vld [vmem:[#allocation288_spill] sm:$0xff] }
 0x990   : > { %9248 = vmatmul.mubr.f32.vlgmr.msra.gmra.mxu1 %v17075_v4  ;;  %13176 = vmatpush3.msra.mxu0 %v19155_v48 }
 0x991   : > { %13177 = vmatprep.subr.mxu0 %v19156_v43  ;;  %9371 = vmatprep.subr.mxu1 %v19157_v34 }
 0x992   : > { %13178 = vmatpush3.msra.mxu0 %v19158_v23  ;;  %9377 = vmatpush1.msra.mxu1 %v19159_v3 }
 0x993   : > { %13179 = vmatprep.subr.mxu0 %v19160_v30  ;;  %9383 = vmatprep.subr.mxu1 %v19161_v44 }
 0x994   : > { %13180 = vmatpush3.msra.mxu0 %v19162_v19  ;;  %9389 = vmatpush1.msra.mxu1 %v19163_v59 }
 0x995   : > { %13181 = vmatprep.subr.mxu0 %v19164_v15  ;;  %9422 = vmatprep.mubr.f32.mxu1 %v19165_v29 }
 0x996   : > { %13182 = vmatpush3.msra.mxu0 %v19166_v39  ;;  %9540 = vmatprep.subr.mxu1 %v19167_v5  ;;  %v7528_v39 = vld [vmem:[%s705_s25] sm:$0x1] }
 0x997   : > { %9144 = vmatmul.mubr.f32.vlgmr.msra.gmra.mxu0 %v17075_v4  ;;  %9287 = vmatprep.subr.mxu0 %v19167_v5 }
 0x998   : > { %9289 = vmatpush1.msra.mxu0 %v19168_v28  ;;  %9326 = vmatprep.mubr.f32.mxu0 %v19165_v29 }
 0x999   : > { %9291 = vmatprep.subr.mxu0 %v19169_v46 }
 0x99a   : > { %9293 = vmatpush1.msra.mxu0 %v19170_v62 }
 0x99b   : > { %9460 = vmatprep.subr.mxu0 %v19171_v8 }
 0x9a7   : > { %v12868_v41 = vpop.f32.mrf.mxu1 }
 0x9a9   : > { %v12869_v17 = vpop.f32.mrf.mxu1 }
 0x9aa   : > { %v12870_v14 = vadd.f32 %v12869_v17, %v12868_v41 }
 0x9af   : > { %v12833_v58 = vpop.f32.mrf.mxu0 }
 0x9b1   : > { %v12834_v60 = vpop.f32.mrf.mxu0 }
 0x9b2   : > { %v12835_v38 = vadd.f32 %v12834_v60, %v12833_v58 }
 0x9b4   : > { %v7638_v33 = vadd.f32 1e-05, %v12835_v38 }
 0x9b6   : > { %v7870_v18 = vadd.f32 %v12870_v14, %v7638_v33  ;;  %v19173_v33 = vld [vmem:[#allocation277_spill] sm:$0xff]  ;;  %v19175_v14 = vld [vmem:[#allocation280_spill] sm:$0xff] }
 0x9c8   : > { %v12938_v12 = vpop.f32.mrf.mxu1 }
 0x9ca   : > { %v12939_v9 = vpop.f32.mrf.mxu1 }
 0x9cb   : > { %v12940_v1 = vadd.f32 %v12939_v9, %v12938_v12  ;;  %v19177_v9 = vld [vmem:[#allocation282_spill] sm:$0xff] }
 0x9d0   : > { %v12903_v57 = vpop.f32.mrf.mxu0 }
 0x9d2   : > { %v12904_v4 = vpop.f32.mrf.mxu0 }
 0x9d3   : > { %v12905_v45 = vadd.f32 %v12904_v4, %v12903_v57 }
 0x9d5   : > { %v8008_v16 = vadd.f32 %v12905_v45, %v7870_v18  ;;  %v19176_v45 = vld [vmem:[#allocation302_spill] sm:$0xff]  ;;  %v19178_v18 = vld [vmem:[#allocation303_spill] sm:$0xff] }
 0x9d7   : > { %v8116_v26 = vadd.f32 %v12940_v1, %v8008_v16  ;;  %v19180_v16 = vld [vmem:[#allocation304_spill] sm:$0xff]  ;;  %v19182_v1 = vld [vmem:[#allocation289_spill] sm:$0xff] }
 0x9ea   : > { %v13008_v24 = vpop.f32.mrf.mxu1 }
 0x9ec   : > { %v13009_v54 = vpop.f32.mrf.mxu1 }
 0x9ed   : > { %v13010_v51 = vadd.f32 %v13009_v54, %v13008_v24  ;;  %v19179_v24 = vld [vmem:[#allocation279_spill] sm:$0xff] }
 0x9ee   : > { %v19183_v54 = vld [vmem:[#allocation283_spill] sm:$0xff] }
 0x9f2   : > { %v12973_v20 = vpop.f32.mrf.mxu0 }
 0x9f4   : > { %v12974_v37 = vpop.f32.mrf.mxu0 }
 0x9f5   : > { %v12975_v25 = vadd.f32 %v12974_v37, %v12973_v20  ;;  %v19174_v20 = vld [vmem:[#allocation301_spill] sm:$0xff]  ;;  %v10240_v37 = vld [vmem:[%s586_s8] sm:$0x1]  ;;  %s11833_s8 = sshll.u32 %s13880_s7, 1 }
 0x9f6   : > { %s679_s11 = scalar_lea.vmem [#allocation8], %s11833_s8 }
 0x9f7   : > { %v8284_v11 = vadd.f32 %v12975_v25, %v8116_v26  ;;  %v10242_v25 = vsel %vm1778_vm1, %v10240_v37, 0  ;;  %v19184_v26 = vld [vmem:[#allocation290_spill] sm:$0xff]  ;;  %s11629_s9 = sshll.u32 %s679_s11, 4  ;;  %s11630_s9 = int_to_ptr.vmem [resolvable:$true] %s11629_s9 }
 0x9f8   : > { %s13566_s12 = scalar_lea.vmem %s11630_s9, 32  ;;  %p13573_p2 = scmp.lt.s32.totalorder %s11630_s9, %s13571_s22 }
 0x9f9   : > { %v8388_v53 = vadd.f32 %v13010_v51, %v8284_v11  ;;  %v17306_v11 = vand.u32 4294901760, %v10242_v25  ;;  %p13567_p7 = scmp.ne.s32.totalorder %s11630_s9, %s13566_s12  ;;  %p13574_p9 = scmp.lt.s32.totalorder %s13572_s16, %s13566_s12 }
 0x9fb   : > { %v17316_v51 = vsub.f32 %v10242_v25, %v17306_v11  ;;  %p13575_p11 = por %p13574_p9, %p13573_p2 }
 0xa0c   : > { %v13078_v0 = vpop.f32.mrf.mxu1 }
 0xa0e   : > { %v13079_v52 = vpop.f32.mrf.mxu1 }
 0xa0f   : > { %v13080_v63 = vadd.f32 %v13079_v52, %v13078_v0  ;;  %v19185_v0 = vld [vmem:[#allocation284_spill] sm:$0xff]  ;;  %v17326_v52 = vand.u32 4294901760, %v17316_v51 }
 0xa14   : > { %v13043_v13 = vpop.f32.mrf.mxu0 }
 0xa16   : > { %v13044_v22 = vpop.f32.mrf.mxu0 }
 0xa17   : > { %v13045_v2 = vadd.f32 %v13044_v22, %v13043_v13  ;;  %v19181_v13 = vld [vmem:[#allocation281_spill] sm:$0xff]  ;;  %v19186_v22 = vld [vmem:[#allocation291_spill] sm:$0xff] }
 0xa19   : > { %v8500_v55 = vadd.f32 %v13045_v2, %v8388_v53  ;;  %v19188_v2 = vld [vmem:[#allocation292_spill] sm:$0xff]  ;;  %v19189_v53 = vld [vmem:[#allocation294_spill] sm:$0xff] }
 0xa1b   : > { %v8732_v61 = vadd.f32 %v13080_v63, %v8500_v55  ;;  %v19192_v55 = vld [vmem:[#allocation296_spill] sm:$0xff]  ;;  %v10316_v63 = vsub.f32 %v17316_v51, %v17326_v52 }
 0xa2e   : > { %v13148_v47 = vpop.f32.mrf.mxu1 }
 0xa30   : > { %v13149_v6 = vpop.f32.mrf.mxu1 }
 0xa31   : > { %v13150_v32 = vadd.f32 %v13149_v6, %v13148_v47  ;;  %v19190_v47 = vld [vmem:[#allocation295_spill] sm:$0xff] }
 0xa32   : > { %v19194_v6 = vld [vmem:[#allocation299_spill] sm:$0xff] }
 0xa36   : > { %v13113_v40 = vpop.f32.mrf.mxu0 }
 0xa38   : > { %v13114_v31 = vpop.f32.mrf.mxu0 }
 0xa39   : > { %v13115_v50 = vadd.f32 %v13114_v31, %v13113_v40  ;;  %v19187_v40 = vld [vmem:[#allocation293_spill] sm:$0xff] }
 0xa3a   : > { %v19191_v31 = vld [vmem:[#allocation297_spill] sm:$0xff] }
 0xa3b   : > { %v8870_v7 = vadd.f32 %v13115_v50, %v8732_v61  ;;  %v19193_v50 = vld [vmem:[#allocation298_spill] sm:$0xff]  ;;  %v13454_v61 = vld [vmem:[%s14090_s17 + $0xb8] sm:$0xff]  }
 0xa3d   : > { %v8978_v43 = vadd.f32 %v13150_v32, %v8870_v7  ;;  %v13455_v7 = vld [vmem:[%s14090_s17 + $0x58] sm:$0xff]  }
 0xa3e   : > { %v13457_v32 = vld [vmem:[%s14090_s17 + $0x18] sm:$0xff]  }
 0xa50   : > { %v13218_v10 = vpop.f32.mrf.mxu1 }
 0xa52   : > { %v13219_v49 = vpop.f32.mrf.mxu1 }
 0xa53   : > { %v13220_v30 = vadd.f32 %v13219_v49, %v13218_v10  ;;  %v13453_v10 = vld [vmem:[%s14090_s17 + $0x20] sm:$0xff]   ;;  %v13458_v49 = vld [vmem:[%s14090_s17 + $0xb0] sm:$0xff]  }
 0xa57   : > { %v13183_v35 = vpop.f32.mrf.mxu0 }
 0xa59   : > { %v13184_v48 = vpop.f32.mrf.mxu0 }
 0xa5a   : > { %v13185_v23 = vadd.f32 %v13184_v48, %v13183_v35  ;;  %v13456_v35 = vld [vmem:[%s14090_s17 + $0xf0] sm:$0xff]  }
 0xa5b   : > { %v13459_v48 = vld [vmem:[%s14090_s17 + $0x50] sm:$0xff]  }
 0xa5c   : > { %v9146_v19 = vadd.f32 %v13185_v23, %v8978_v43  ;;  %v13460_v43 = vld [vmem:[%s14090_s17 + $0xe8] sm:$0xff]   ;;  %v13461_v23 = vld [vmem:[%s14090_s17 + $0x10] sm:$0xff]  }
 0xa5e   : > { %v9250_v15 = vadd.f32 %v13220_v30, %v9146_v19  ;;  %v13462_v30 = vld [vmem:[%s14090_s17 + $0xa8] sm:$0xff]  }
 0xa5f   : > { %v13463_v19 = vld [vmem:[%s14090_s17 + $0x48] sm:$0xff]  }
 0xa60   : > { %13479 = vrsqrt.f32 %v9250_v15  ;;  %v13464_v15 = vld [vmem:[%s14090_s17 + $0xe0] sm:$0xff]  }
 0xa6d   : > { %v13480_v58 = vpop.eup %13479 }
 0xa6e   : > { %v9254_v41 = vmul.f32 %v13480_v58, %v7528_v39  ;;  %v13465_v39 = vld [vmem:[%s14090_s17 + $0x8] sm:$0xff]   ;;  %v13466_v58 = vld [vmem:[%s14090_s17 + $0xa0] sm:$0xff]  }
 0xa70   : > { %v9256_v60 = vsel %vm1778_vm1, %v9254_v41, 0  ;;  %v13467_v41 = vld [vmem:[%s14090_s17 + $0x40] sm:$0xff]  }
 0xa71   : > { %v17265_v57 = vand.u32 4294901760, %v9256_v60 }
 0xa73   : > { %9424 = vmatmul.mubr.f32.vlgmr.msra.gmra.mxu1 %v17265_v57  ;;  %v17269_v38 = vsub.f32 %v9256_v60, %v17265_v57  ;;  %v13468_v60 = vld [vmem:[%s14090_s17 + $0xd8] sm:$0xff]  }
 0xa74   : > { %9542 = vmatpush1.msra.mxu1 %v19168_v28  ;;  %9579 = vmatprep.mubr.f32.mxu1 %v19165_v29 }
 0xa75   : > { %9544 = vmatprep.subr.mxu1 %v19169_v46  ;;  %v9329_v17 = vand.u32 4294901760, %v17269_v38 }
 0xa76   : > { %9546 = vmatpush1.msra.mxu1 %v19170_v62 }
 0xa77   : > { %9583 = vmatmul.mubr.f32.vlgmr.msra.gmra.mxu1 %v9329_v17  ;;  %9702 = vmatprep.subr.mxu1 %v19167_v5  ;;  %v9330_v12 = vsub.f32 %v17269_v38, %v9329_v17 }
 0xa78   : > { %9704 = vmatpush1.msra.mxu1 %v19168_v28  ;;  %9741 = vmatprep.mubr.f32.mxu1 %v19165_v29 }
 0xa79   : > { %9706 = vmatprep.subr.mxu1 %v19169_v46  ;;  %v9331_v4 = vand.u32 4294901760, %v9330_v12  ;;  %v13472_v12 = vld [vmem:[%s14090_s17 + $0x90] sm:$0xff]  }
 0xa7a   : > { %9708 = vmatpush1.msra.mxu1 %v19170_v62 }
 0xa7b   : > { %9332 = vmatmul.mubr.f32.vlgmr.msra.gmra.mxu0 %v9331_v4  ;;  %9743 = vmatmul.mubr.f32.vlgmr.msra.gmra.mxu1 %v17265_v57 }
 0xa7c   : > { %9463 = vmatpush1.msra.mxu0 %v19173_v33  ;;  %9862 = vmatprep.subr.mxu1 %v19174_v20 }
 0xa7d   : > { %9466 = vmatprep.subr.mxu0 %v19175_v14  ;;  %9868 = vmatpush1.msra.mxu1 %v19176_v45 }
 0xa7e   : > { %9469 = vmatpush1.msra.mxu0 %v19177_v9  ;;  %9874 = vmatprep.subr.mxu1 %v19178_v18 }
 0xa7f   : > { %9502 = vmatprep.mubr.f32.mxu0 %v19165_v29  ;;  %9620 = vmatprep.subr.mxu0 %v19179_v24 }
 0xa80   : > { %9880 = vmatpush1.msra.mxu1 %v19180_v16  ;;  %9913 = vmatprep.mubr.f32.mxu1 %v19165_v29 }
 0xa81   : > { %9505 = vmatmul.mubr.f32.vlgmr.msra.gmra.mxu0 %v17269_v38  ;;  %9915 = vmatmul.mubr.f32.vlgmr.msra.gmra.mxu1 %v17265_v57 }
 0xa82   : > { %9624 = vmatpush1.msra.mxu0 %v19181_v13  ;;  %10031 = vmatprep.subr.mxu1 %v19182_v1 }
 0xa83   : > { %9628 = vmatprep.subr.mxu0 %v19183_v54  ;;  %10033 = vmatpush1.msra.mxu1 %v19184_v26 }
 0xa84   : > { %9632 = vmatpush1.msra.mxu0 %v19185_v0  ;;  %10035 = vmatprep.subr.mxu1 %v19186_v22 }
 0xa85   : > { %9665 = vmatprep.mubr.f32.mxu0 %v19165_v29  ;;  %9778 = vmatprep.subr.mxu0 %v19182_v1 }
 0xa86   : > { %10037 = vmatpush1.msra.mxu1 %v19187_v40  ;;  %10070 = vmatprep.mubr.f32.mxu1 %v19165_v29 }
 0xa87   : > { %9667 = vmatmul.mubr.f32.vlgmr.msra.gmra.mxu0 %v17265_v57  ;;  %10074 = vmatmul.mubr.f32.vlgmr.msra.gmra.mxu1 %v9329_v17  ;;  %v13471_v17 = vld [vmem:[%s14090_s17 + $0xd0] sm:$0xff]  }
 0xa88   : > { %9780 = vmatpush1.msra.mxu0 %v19184_v26  ;;  %10193 = vmatprep.subr.mxu1 %v19182_v1 }
 0xa89   : > { %9782 = vmatprep.subr.mxu0 %v19186_v22  ;;  %10195 = vmatpush1.msra.mxu1 %v19184_v26 }
 0xa8a   : > { %9784 = vmatpush1.msra.mxu0 %v19187_v40  ;;  %10197 = vmatprep.subr.mxu1 %v19186_v22 }
 0xa8b   : > { %9817 = vmatprep.mubr.f32.mxu0 %v19165_v29  ;;  %9951 = vmatprep.subr.mxu0 %v19188_v2 }
 0xa8c   : > { %10199 = vmatpush1.msra.mxu1 %v19187_v40  ;;  %10232 = vmatprep.mubr.f32.mxu1 %v19165_v29 }
 0xa8d   : > { %9823 = vmatmul.mubr.f32.vlgmr.msra.gmra.mxu0 %v9331_v4  ;;  %10234 = vmatmul.mubr.f32.vlgmr.msra.gmra.mxu1 %v17265_v57  ;;  %v13473_v4 = vld [vmem:[%s14090_s17 + $0xc8] sm:$0xff]  }
 0xa8e   : > { %9954 = vmatpush1.msra.mxu0 %v19189_v53  ;;  %9993 = vmatprep.mubr.f32.mxu0 %v19165_v29 }
 0xa8f   : > { %9957 = vmatprep.subr.mxu0 %v19190_v47  ;;  %10357 = vmatprep.subr.mxu1 %v19157_v34  ;;  %v19195_v34 = vld [vmem:[#allocation300_spill] sm:$0xff] }
 0xa90   : > { %9960 = vmatpush1.msra.mxu0 %v19191_v31  ;;  %10363 = vmatpush1.msra.mxu1 %v19159_v3  ;;  %v10317_v3 = vand.u32 4294901760, %v10316_v63 }
 0xa91   : > { %10111 = vmatprep.subr.mxu0 %v19192_v55  ;;  %9996 = vmatmul.mubr.f32.vlgmr.msra.gmra.mxu0 %v17269_v38  ;;  %v13470_v38 = vld [vmem:[%s14090_s17 + $0x98] sm:$0xff]  }
 0xa92   : > { %10115 = vmatpush1.msra.mxu0 %v19193_v50  ;;  %10156 = vmatprep.mubr.f32.mxu0 %v19165_v29 }
 0xa93   : > { %10119 = vmatprep.subr.mxu0 %v19194_v6  ;;  %10369 = vmatprep.subr.mxu1 %v19161_v44  ;;  %v13445_v44 = vld [vmem:[%s14090_s17 + $0x78] sm:$0xff]  }
 0xa94   : > { %10123 = vmatpush1.msra.mxu0 %v19195_v34  ;;  %10375 = vmatpush1.msra.mxu1 %v19163_v59  ;;  %v13446_v59 = vld [vmem:[%s14090_s17 + $0x38] sm:$0xff]  }
 0xa95   : > { %10273 = vmatprep.subr.mxu0 %v19167_v5  ;;  %10158 = vmatmul.mubr.f32.vlgmr.msra.gmra.mxu0 %v17265_v57  ;;  %v13469_v57 = vld [vmem:[%s14090_s17] sm:$0xff]  }
 0xa96   : > { %10275 = vmatpush1.msra.mxu0 %v19168_v28  ;;  %10312 = vmatprep.mubr.f32.mxu0 %v19165_v29 }
 0xa97   : > { %10277 = vmatprep.subr.mxu0 %v19169_v46  ;;  %10408 = vmatprep.mubr.f32.mxu1 %v19165_v29 }
 0xa98   : > { %10279 = vmatpush1.msra.mxu0 %v19170_v62  ;;  %10410 = vmatmul.mubr.f32.vlgmr.msra.gmra.mxu1 %v17306_v11 }
 0xa99   : > { %10446 = vmatprep.subr.mxu0 %v19171_v8  ;;  %10318 = vmatmul.mubr.f32.vlgmr.msra.gmra.mxu0 %v10317_v3  ;;  %v13452_v8 = vld [vmem:[%s14090_s17 + $0xf8] sm:$0xff]  }
 0xa9a   : > { %10449 = vmatpush1.msra.mxu0 %v19173_v33  ;;  %10526 = vmatprep.subr.mxu1 %v19167_v5  ;;  %v13474_v33 = vld [vmem:[%s14090_s17 + $0x88] sm:$0xff]  }
 0xa9b   : > { %10452 = vmatprep.subr.mxu0 %v19175_v14  ;;  %10528 = vmatpush1.msra.mxu1 %v19168_v28  ;;  %v13476_v14 = vld [vmem:[%s14090_s17 + $0x80] sm:$0xff]  }
 0xa9c   : > { %10455 = vmatpush1.msra.mxu0 %v19177_v9  ;;  %10530 = vmatprep.subr.mxu1 %v19169_v46 }
 0xa9d   : > { %10488 = vmatprep.mubr.f32.mxu0 %v19165_v29  ;;  %10532 = vmatpush1.msra.mxu1 %v19170_v62 }
 0xa9e   : > { %10565 = vmatprep.mubr.f32.mxu1 %v19165_v29  ;;  %10606 = vmatprep.subr.mxu0 %v19179_v24 }
 0xa9f   : > { %10491 = vmatmul.mubr.f32.vlgmr.msra.gmra.mxu0 %v17316_v51  ;;  %10569 = vmatmul.mubr.f32.vlgmr.msra.gmra.mxu1 %v17326_v52 }
 0xaa0   : > { %10610 = vmatpush1.msra.mxu0 %v19181_v13  ;;  %10688 = vmatprep.subr.mxu1 %v19167_v5  ;;  %v13447_v5 = vld [vmem:[%s14090_s17 + $0x70] sm:$0xff]  }
 0xaa1   : > { %10614 = vmatprep.subr.mxu0 %v19183_v54  ;;  %10690 = vmatpush1.msra.mxu1 %v19168_v28  ;;  %v13448_v28 = vld [vmem:[%s14090_s17 + $0x30] sm:$0xff]  }
 0xaa2   : > { %10618 = vmatpush1.msra.mxu0 %v19185_v0  ;;  %10692 = vmatprep.subr.mxu1 %v19169_v46  ;;  %v13449_v46 = vld [vmem:[%s14090_s17 + $0x68] sm:$0xff]  }
 0xaa3   : > { %10651 = vmatprep.mubr.f32.mxu0 %v19165_v29  ;;  %10694 = vmatpush1.msra.mxu1 %v19170_v62  ;;  %v13450_v62 = vld [vmem:[%s14090_s17 + $0x28] sm:$0xff]  }
 0xaa4   : > { %10727 = vmatprep.mubr.f32.mxu1 %v19165_v29  ;;  %10764 = vmatprep.subr.mxu0 %v19182_v1 }
 0xaa5   : > { %10653 = vmatmul.mubr.f32.vlgmr.msra.gmra.mxu0 %v17306_v11  ;;  %10729 = vmatmul.mubr.f32.vlgmr.msra.gmra.mxu1 %v17306_v11 }
 0xaa6   : > { %10766 = vmatpush1.msra.mxu0 %v19184_v26  ;;  %10848 = vmatprep.subr.mxu1 %v19174_v20  ;;  %v13475_v20 = vld [vmem:[%s14090_s17 + $0xc0] sm:$0xff]  }
 0xaa7   : > { %10768 = vmatprep.subr.mxu0 %v19186_v22  ;;  %10854 = vmatpush1.msra.mxu1 %v19176_v45 }
 0xaa8   : > { %10770 = vmatpush1.msra.mxu0 %v19187_v40  ;;  %10860 = vmatprep.subr.mxu1 %v19178_v18 }
 0xaa9   : > { %10803 = vmatprep.mubr.f32.mxu0 %v19165_v29  ;;  %10866 = vmatpush1.msra.mxu1 %v19180_v16 }
 0xaaa   : > { %10899 = vmatprep.mubr.f32.mxu1 %v19165_v29  ;;  %10937 = vmatprep.subr.mxu0 %v19188_v2 }
 0xaab   : > { %10809 = vmatmul.mubr.f32.vlgmr.msra.gmra.mxu0 %v10317_v3  ;;  %10901 = vmatmul.mubr.f32.vlgmr.msra.gmra.mxu1 %v17306_v11 }
 0xaac   : > { %10940 = vmatpush1.msra.mxu0 %v19189_v53  ;;  %11017 = vmatprep.subr.mxu1 %v19182_v1 }
 0xaad   : > { %10943 = vmatprep.subr.mxu0 %v19190_v47  ;;  %11019 = vmatpush1.msra.mxu1 %v19184_v26 }
 0xaae   : > { %10946 = vmatpush1.msra.mxu0 %v19191_v31  ;;  %11021 = vmatprep.subr.mxu1 %v19186_v22 }
 0xaaf   : > { %10979 = vmatprep.mubr.f32.mxu0 %v19165_v29  ;;  %11023 = vmatpush1.msra.mxu1 %v19187_v40 }
 0xab0   : > { %11056 = vmatprep.mubr.f32.mxu1 %v19165_v29  ;;  %11097 = vmatprep.subr.mxu0 %v19192_v55 }
 0xab1   : > { %10982 = vmatmul.mubr.f32.vlgmr.msra.gmra.mxu0 %v17316_v51  ;;  %11060 = vmatmul.mubr.f32.vlgmr.msra.gmra.mxu1 %v17326_v52 }
 0xab2   : > { %11101 = vmatpush1.msra.mxu0 %v19193_v50  ;;  %11179 = vmatprep.subr.mxu1 %v19182_v1 }
 0xab3   : > { %11105 = vmatprep.subr.mxu0 %v19194_v6  ;;  %11181 = vmatpush1.msra.mxu1 %v19184_v26 }
 0xab4   : > { %11109 = vmatpush1.msra.mxu0 %v19195_v34  ;;  %11183 = vmatprep.subr.mxu1 %v19186_v22 }
 0xab5   : > { %11142 = vmatprep.mubr.f32.mxu0 %v19165_v29  ;;  %11185 = vmatpush1.msra.mxu1 %v19187_v40 }
 0xab6   : > { %11218 = vmatprep.mubr.f32.mxu1 %v19165_v29  ;;  %11144 = vmatmul.mubr.f32.vlgmr.msra.gmra.mxu0 %v17306_v11  ;;  %v13451_v29 = vld [vmem:[%s14090_s17 + $0x60] sm:$0xff]   ;;  %s19196_s17 = sld [smem:[#allocation17_spill]] }
 0xab7   : > { %11220 = vmatmul.mubr.f32.vlgmr.msra.gmra.mxu1 %v17306_v11  ;;  %13221 = vmatprep.subr.bf16.mxu0 %v13445_v44 }
 0xab8   : > { %13222 = vmatpush3.bf16.msra.mxu0 %v13446_v59  ;;  %13243 = vmatprep.subr.bf16.mxu1 %v13452_v8 }
 0xab9   : > { %13223 = vmatprep.subr.bf16.mxu0 %v13447_v5  ;;  %13244 = vmatpush3.bf16.msra.mxu1 %v13454_v61 }
 0xaba   : > { %13245 = vmatprep.subr.bf16.mxu1 %v13456_v35 }
 0xabc   : > { %13224 = vmatpush3.bf16.msra.mxu0 %v13448_v28  ;;  %p19199_p8 = scmp.ne.s32.totalorder %s19196_s17, 0 }
 0xabd   : > { %13225 = vmatprep.subr.bf16.mxu0 %v13449_v46  ;;  %13246 = vmatpush3.bf16.msra.mxu1 %v13458_v49 }
 0xabe   : > { %13247 = vmatprep.subr.bf16.mxu1 %v13460_v43  ;;  %p13568_p10 = pnand %p13567_p7, %p19199_p8 }
 0xac0   : > { %13226 = vmatpush3.bf16.msra.mxu0 %v13450_v62  ;;  %p13569_p0 = pneg %p13568_p10 }
 0xac1   : > { %13227 = vmatprep.subr.bf16.mxu0 %v13451_v29  ;;  %13248 = vmatpush3.bf16.msra.mxu1 %v13462_v30 }
 0xac2   : > { %13249 = vmatprep.subr.bf16.mxu1 %v13464_v15  ;;  %p13576_p12 = pnand %p13575_p11, %p13569_p0 }
 0xac4   : > { %13228 = vmatpush3.bf16.msra.mxu0 %v13453_v10 }
 0xac5   : > { %13229 = vmatprep.subr.bf16.mxu0 %v13455_v7  ;;  %13250 = vmatpush3.bf16.msra.mxu1 %v13466_v58 }
 0xac6   : > { %13251 = vmatprep.subr.bf16.mxu1 %v13468_v60 }
 0xac8   : > { %13230 = vmatpush3.bf16.msra.mxu0 %v13457_v32 }
 0xac9   : > { %13231 = vmatprep.subr.bf16.mxu0 %v13459_v48  ;;  %13252 = vmatpush3.bf16.msra.mxu1 %v13470_v38 }
 0xaca   : > { %13253 = vmatprep.subr.bf16.mxu1 %v13471_v17 }
 0xacc   : > { %13232 = vmatpush3.bf16.msra.mxu0 %v13461_v23 }
 0xacd   : > { %13233 = vmatprep.subr.bf16.mxu0 %v13463_v19  ;;  %13254 = vmatpush3.bf16.msra.mxu1 %v13472_v12 }
 0xace   : > { %13255 = vmatprep.subr.bf16.mxu1 %v13473_v4 }
 0xad0   : > { %13234 = vmatpush3.bf16.msra.mxu0 %v13465_v39 }
 0xad1   : > { %13235 = vmatprep.subr.bf16.mxu0 %v13467_v41  ;;  %13256 = vmatpush3.bf16.msra.mxu1 %v13474_v33 }
 0xad2   : > { %13257 = vmatprep.subr.bf16.mxu1 %v13475_v20 }
 0xad4   : > { %13236 = vmatpush3.bf16.msra.mxu0 %v13469_v57 }
 0xad5   : > { %13258 = vmatpush3.bf16.msra.mxu1 %v13476_v14 }
 0xb33   : > { %v9425_v45 = vpop.f32.mrf.mxu1 }
 0xb35   : > { %v9427_v9 = vpop.f32.mrf.mxu1 }
 0xb37   : > { %v9584_v18 = vpop.f32.mrf.mxu1 }
 0xb39   : > { %v9586_v24 = vpop.f32.mrf.mxu1 }
 0xb3b   : > { %v9333_v37 = vpop.f32.mrf.mxu0  ;;  %v9744_v16 = vpop.f32.mrf.mxu1 }
 0xb3c   : > { %v9426_v55 = vadd.f32 %v9425_v45, %v9333_v37 }
 0xb3d   : > { %v9335_v13 = vpop.f32.mrf.mxu0  ;;  %v9746_v1 = vpop.f32.mrf.mxu1 }
 0xb3e   : > { %v9428_v50 = vadd.f32 %v9427_v9, %v9335_v13 }
 0xb41   : > { %v9506_v25 = vpop.f32.mrf.mxu0  ;;  %v9916_v54 = vpop.f32.mrf.mxu1 }
 0xb42   : > { %v9507_v34 = vadd.f32 %v9506_v25, %v9426_v55 }
 0xb43   : > { %v9508_v26 = vpop.f32.mrf.mxu0  ;;  %v9918_v0 = vpop.f32.mrf.mxu1 }
 0xb44   : > { %v9509_v44 = vadd.f32 %v9508_v26, %v9428_v50  ;;  %v9585_v28 = vadd.f32 %v9584_v18, %v9507_v34 }
 0xb46   : > { %v9587_v29 = vadd.f32 %v9586_v24, %v9509_v44 }
 0xb47   : > { %v9668_v22 = vpop.f32.mrf.mxu0  ;;  %v10075_v40 = vpop.f32.mrf.mxu1 }
 0xb48   : > { %v9669_v61 = vadd.f32 %v9668_v22, %v9585_v28 }
 0xb49   : > { %v9670_v11 = vpop.f32.mrf.mxu0  ;;  %v10077_v2 = vpop.f32.mrf.mxu1 }
 0xb4a   : > { %v9671_v35 = vadd.f32 %v9670_v11, %v9587_v29  ;;  %v9745_v19 = vadd.f32 %v9744_v16, %v9669_v61 }
 0xb4c   : > { %v9747_v15 = vadd.f32 %v9746_v1, %v9671_v35  ;;  %v11229_v38 = vrot.slane %v9745_v19, %v18969_v27 }
 0xb4d   : > { %v9824_v51 = vpop.f32.mrf.mxu0  ;;  %v17443_v47 = vpop.f32.mrf.mxu1 }
 0xb4e   : > { %v9917_v60 = vadd.f32 %v9916_v54, %v9824_v51  ;;  %v11233_v33 = vrot.slane %v9747_v15, %v18969_v27  ;;  %v11242_v37 = vmul.f32 %v11229_v38, %v16832_v36 }
 0xb4f   : > { %v9826_v52 = vpop.f32.mrf.mxu0  ;;  %v17445_v6 = vpop.f32.mrf.mxu1 }
 0xb50   : > { %v9919_v17 = vadd.f32 %v9918_v0, %v9826_v52  ;;  %v11243_v54 = vmul.f32 %v11233_v33, %v16839_v21 }
 0xb51   : > { %v9997_v53 = vpop.f32.mrf.mxu0 }
 0xb52   : > { %v9998_v20 = vadd.f32 %v9997_v53, %v9917_v60 }
 0xb53   : > { %v9999_v31 = vpop.f32.mrf.mxu0 }
 0xb54   : > { %v10000_v9 = vadd.f32 %v9999_v31, %v9919_v17  ;;  %v10076_v1 = vadd.f32 %v10075_v40, %v9998_v20  ;;  %v13481_v20 = vld [vmem:[%s13999_s30] sm:$0x3] }
 0xb55   : > { %v10159_v63 = vpop.f32.mrf.mxu0 }
 0xb56   : > { %v10078_v26 = vadd.f32 %v10077_v2, %v10000_v9  ;;  %v10160_v52 = vadd.f32 %v10159_v63, %v10076_v1 }
 0xb57   : > { %v10161_v3 = vpop.f32.mrf.mxu0 }
 0xb58   : > { %v10411_v59 = vpop.f32.mrf.mxu1  ;;  %v10162_v55 = vadd.f32 %v10161_v3, %v10078_v26  ;;  %v10236_v21 = vadd.f32 %v17443_v47, %v10160_v52 }
 0xb59   : > { %v10319_v5 = vpop.f32.mrf.mxu0 }
 0xb5a   : > { %v10413_v62 = vpop.f32.mrf.mxu1  ;;  %v10412_v8 = vadd.f32 %v10411_v59, %v10319_v5  ;;  %v11237_v3 = vrot.slane %v10236_v21, %v18969_v27 }
 0xb5b   : > { %v10321_v46 = vpop.f32.mrf.mxu0 }
 0xb5c   : > { %v10414_v32 = vadd.f32 %v10413_v62, %v10321_v46  ;;  %v10238_v46 = vadd.f32 %v17445_v6, %v10162_v55 }
 0xb5f   : > { %v10492_v10 = vpop.f32.mrf.mxu0  ;;  %v10570_v7 = vpop.f32.mrf.mxu1 }
 0xb60   : > { %v10493_v49 = vadd.f32 %v10492_v10, %v10412_v8  ;;  %v11241_v10 = vrot.slane %v10238_v46, %v18969_v27 }
 0xb61   : > { %v10494_v48 = vpop.f32.mrf.mxu0  ;;  %v10572_v43 = vpop.f32.mrf.mxu1 }
 0xb62   : > { %v10571_v23 = vadd.f32 %v10570_v7, %v10493_v49  ;;  %v10495_v30 = vadd.f32 %v10494_v48, %v10414_v32  ;;  %v11244_v48 = vmul.f32 %v11237_v3, %v16990_v42  ;;  %v11921_v42 = vld [vmem:[%s594_s26] ss:$0 sm:$0xff] }
 0xb64   : > { %v10573_v39 = vadd.f32 %v10572_v43, %v10495_v30  ;;  %v11245_v43 = vmul.f32 %v11241_v10, %v16911_v56 }
 0xb65   : > { %v10654_v58 = vpop.f32.mrf.mxu0  ;;  %v10730_v41 = vpop.f32.mrf.mxu1 }
 0xb66   : > { %v10655_v57 = vadd.f32 %v10654_v58, %v10571_v23 }
 0xb67   : > { %v10656_v12 = vpop.f32.mrf.mxu0  ;;  %v10732_v4 = vpop.f32.mrf.mxu1 }
 0xb68   : > { %v10731_v14 = vadd.f32 %v10730_v41, %v10655_v57  ;;  %v10657_v45 = vadd.f32 %v10656_v12, %v10573_v39 }
 0xb6a   : > { %v11249_v18 = vrot.slane %v10731_v14, %v18969_v27  ;;  %v10733_v24 = vadd.f32 %v10732_v4, %v10657_v45 }
 0xb6b   : > { %v10810_v16 = vpop.f32.mrf.mxu0  ;;  %v10902_v13 = vpop.f32.mrf.mxu1 }
 0xb6c   : > { %v11253_v25 = vrot.slane %v10733_v24, %v18969_v27  ;;  %v11262_v0 = vadd.f32 %v11249_v18, %v11242_v37  ;;  %v10903_v53 = vadd.f32 %v10902_v13, %v10810_v16 }
 0xb6d   : > { %v10812_v22 = vpop.f32.mrf.mxu0  ;;  %v10904_v11 = vpop.f32.mrf.mxu1 }
 0xb6e   : > { %v11263_v51 = vadd.f32 %v11253_v25, %v11243_v54  ;;  %v11266_v50 = vpack.c.bf16 %v11262_v0, %v11262_v0  ;;  %v10905_v36 = vadd.f32 %v10904_v11, %v10812_v22 }
 0xb70   : > { %v11267_v31 = vpack.c.bf16 %v11263_v51, %v11263_v51 }
 0xb71   : > { %v10983_v34 = vpop.f32.mrf.mxu0  ;;  %v11061_v44 = vpop.f32.mrf.mxu1 }
 0xb72   : > { %v10984_v59 = vadd.f32 %v10983_v34, %v10903_v53  ;;  %11565 = vmatprep.mubr.bf16.mxu0 %v11267_v31 }
 0xb73   : > { %v10985_v40 = vpop.f32.mrf.mxu0  ;;  %v11063_v5 = vpop.f32.mrf.mxu1  ;;  %11566 = vmatmul.mubr.bf16.vlgmr.msra.gmra.mxu0 %v11266_v50 }
 0xb74   : > { %v11062_v2 = vadd.f32 %v11061_v44, %v10984_v59  ;;  %v10986_v28 = vadd.f32 %v10985_v40, %v10905_v36 }
 0xb76   : > { %v11064_v62 = vadd.f32 %v11063_v5, %v10986_v28  ;;  %v11145_v63 = vpop.f32.mrf.mxu0 }
 0xb77   : > { %v11146_v29 = vadd.f32 %v11145_v63, %v11062_v2  ;;  %v11221_v8 = vpop.f32.mrf.mxu1 }
 0xb78   : > { %v11147_v61 = vpop.f32.mrf.mxu0 }
 0xb79   : > { %v11222_v7 = vadd.f32 %v11221_v8, %v11146_v29  ;;  %v11148_v35 = vadd.f32 %v11147_v61, %v11064_v62  ;;  %v11223_v32 = vpop.f32.mrf.mxu1 }
 0xb7b   : > { %v11257_v49 = vrot.slane %v11222_v7, %v18969_v27  ;;  %v11224_v47 = vadd.f32 %v11223_v32, %v11148_v35 }
 0xb7d   : > { %v11261_v6 = vrot.slane %v11224_v47, %v18969_v27  ;;  %v11264_v23 = vadd.f32 %v11257_v49, %v11244_v48 }
 0xb7f   : > { %v11265_v30 = vadd.f32 %v11261_v6, %v11245_v43  ;;  %v11268_v15 = vpack.c.bf16 %v11264_v23, %v11264_v23 }
 0xb81   : > { %v11269_v19 = vpack.c.bf16 %v11265_v30, %v11265_v30 }
 0xb83   : > { %11605 = vmatprep.mubr.bf16.mxu1 %v11269_v19 }
 0xb84   : > { %11606 = vmatmul.mubr.bf16.vlgmr.msra.gmra.mxu1 %v11268_v15 }
 0xc33   : > { %v13237_v39 = vpop.f32.mrf.mxu0 }
 0xc35   : > { %v13238_v58 = vpop.f32.mrf.mxu0 }
 0xc36   : > { %v13239_v57 = vadd.f32 %v13238_v58, %v13237_v39 }
 0xc37   : > { %v13240_v41 = vpop.f32.mrf.mxu0 }
 0xc38   : > { %v11568_v56 = vadd.f32 %v13239_v57, %v11921_v42 }
 0xc39   : > { %v13241_v60 = vpop.f32.mrf.mxu0 }
 0xc44   : > { %v13259_v27 = vpop.f32.mrf.mxu1 }
 0xc46   : > { %v13260_v38 = vpop.f32.mrf.mxu1 }
 0xc47   : > { %v13261_v17 = vadd.f32 %v13260_v38, %v13259_v27 }
 0xc48   : > { %v13262_v12 = vpop.f32.mrf.mxu1 }
 0xc49   : > { %v11608_v4 = vadd.f32 %v13261_v17, %v11568_v56 }
 0xc4a   : > { %v13263_v33 = vpop.f32.mrf.mxu1 }
 0xc4b   : > { %v11613_v14 = vadd.f32 %v13481_v20, %v11608_v4 }
 0xc4d   : > { %11614 = vst [vmem:[%s679_s11] sm:$0x3] %v11613_v14 }
 0xc4e   : > { %13579 = shalt.err (!%p13576_p12)
}
 0xc4f   : > { %s13580_s30 = scalar_lea.hbm %s11627_s18, 32  ;;  %s13584_s8 = scalar_lea.hbm %s19198_s23, 64 }
 0xc50   : > { %p13581_p3 = scmp.ne.s32.totalorder %s11627_s18, %s13580_s30  ;;  %p13585_p5 = scmp.lt.s32.totalorder %s11627_s18, %s19198_s23 }
 0xc51   : > { %p13586_p1 = scmp.lt.s32.totalorder %s13584_s8, %s13580_s30 }
 0xc52   : > { %p13582_p4 = pnand %p13581_p3, %p19199_p8 }
 0xc53   : > { %p13587_p13 = por %p13586_p1, %p13585_p5 }
 0xc54   : > { %p13583_p6 = pneg %p13582_p4 }
 0xc56   : > { %p13588_p7 = pnand %p13587_p13, %p13583_p6 }
 0xc58   : > { %13591 = shalt.err (!%p13588_p7)
}
 0xc59   : > { %13271 = dma.vmem_to_hbm [thread:$0]  (%p19199_p8), %s11630_s9, 32, %s11627_s18, %s11616_s24  }
 0xc5a PF: > { %s19200_s11 = sld [smem:[#allocation12_spill]] }
 0xc5b   : > { %s19201_s21 = sld [smem:[#allocation18_spill]] }
 0xc5c   : > { %s19202_s29 = sld [smem:[#allocation14_spill]] }
 0xc60   : > { %s11641_s20 = sand.u32 1, %s19200_s11  }
 0xc61   : > { %p19203_p10 = scmp.ne.s32.totalorder %s19201_s21, 0  ;;  %s11642_s12 = scalar_lea.sflag [#allocation4], %s11641_s20 }
 0xc62   : > { %p19204_p0 = scmp.ge.s32.totalorder %s19202_s29, 2 }
 0xc64   : > { %p13284_p2 = pnand %p19204_p0, %p19203_p10 }
 0xc66   : > { %p13285_p9 = pneg %p13284_p2 }
 0xc68   : > { %13617 = dma.done.wait (%p13285_p9), %s11642_s12, 32  }
 0xc69   : > { %13619 = vsyncadd (%p13285_p9), %s11642_s12, 4294967264  ;;  %s19205_s21 = sld [smem:[#allocation15_spill]]  ;;  %s19208_s18 = smov %s13626_s19 }
 0xc6a   : > { %s19206_s15 = sld [smem:[#allocation13_spill]] }
 0xc6b   : > { %s19207_s20 = sld [smem:[#allocation16_spill]] }
 0xc6f   : > { %p31_p11 = scmp.ge.s32.totalorder %s19205_s21, 4  }
 0xc70   : > { %s19209_s19 = smov %s19206_s15 }
 0xc71   :  { %33 = sbr.rel (!%p31_p11) target bundleno = 15 (0xf), region = 173 }
 0xc76   :  { %11647 = vsyncpa [#allocation3], 1 }
 0xc77   :  { %11649 = vsyncpa [#allocation3 + $0x1], 1 }
 0xc78   :  { %11650 = vsyncpa [#allocation6], 1 }
 0xc79   :  { %11652 = vsyncpa [#allocation6 + $0x1], 1 }
 0xc7a   :  { %11653 = vsyncpa [#allocation4], 1 }
 0xc7b   :  { %11655 = vsyncpa [#allocation4 + $0x1], 1 }

</bundles_post_ra>
